<compile_context>
chip_gen: v6e
topology: v6e:2x2x1
jax: 0.10.0
libtpu: 0.0.40
codegen_flags: <defaults>
</compile_context>

<pallas_src>
import jax
import jax.numpy as jnp
from jax.experimental import pallas as pl
from jax.experimental.pallas import tpu as pltpu

# ----------------------------- configuration --------------------------------
B = 2          # batch
L = 8          # sequence length
H = 768        # hidden size (fixed by nn.Linear(768, 1) in the module)
F = 768        # FFN intermediate size (synthetic backbone)
VOCAB = 100
LN_EPS = 1e-12
NEG_INF = -1e9


# ---------------------- Pallas kernel: encoder + fc head ----------------------
def cross_encoder_kernel(x_ref, maskb_ref,
                         wqkv_ref, bqkv_ref,
                         wo_ref, bo_ref,
                         g1_ref, be1_ref,
                         w1_hbm_ref, b1_ref,
                         w2_hbm_ref, b2_ref,
                         g2_ref, be2_ref,
                         wfc_ref, bfc_ref,
                         o_ref,
                         w1_vmem, w2_vmem, dma_sem):
    """Fused 1-layer encoder + fc head, single invocation (no grid).

    x_ref      : (B*L, H)     f32   flattened token embeddings
    maskb_ref  : (B*L, B*L)   f32   additive block-diagonal + key-pad mask bias
    wqkv_ref   : (H, 3H)      bf16  fused Q/K/V weights (1/sqrt(H) folded into Q)
    w1/w2_hbm  : (H, F)/(F,H) bf16  FFN weights left in HBM, DMA'd manually
    wfc_ref    : (1, H)       f32   fc weight row
    o_ref      : (B, 1)       f32   per-sequence CLS logits
    """
    # Kick off FFN-weight DMAs first so they overlap the attention phase.
    cp_w1 = pltpu.make_async_copy(w1_hbm_ref, w1_vmem, dma_sem.at[0])
    cp_w2 = pltpu.make_async_copy(w2_hbm_ref, w2_vmem, dma_sem.at[1])
    cp_w1.start()
    cp_w2.start()

    x = x_ref[...]                                       # (B*L, H) f32
    x16 = x.astype(jnp.bfloat16)

    # --- fused QKV projection (bf16 operands, f32 accumulation on the MXU) ---
    qkv = jnp.dot(x16, wqkv_ref[...],
                  preferred_element_type=jnp.float32) + bqkv_ref[...]
    q16 = qkv[:, :H].astype(jnp.bfloat16)                # scale pre-folded into wq
    k16 = qkv[:, H:2 * H].astype(jnp.bfloat16)
    v16 = qkv[:, 2 * H:].astype(jnp.bfloat16)

    # --- flattened single-head self attention over one (B*L, B*L) score mat ---
    s = jnp.einsum('qd,kd->qk', q16, k16,
                   preferred_element_type=jnp.float32)   # (B*L, B*L)
    s = s + maskb_ref[...]                               # block-diag + key mask
    s = s - jnp.max(s, axis=-1, keepdims=True)
    p = jnp.exp(s)
    p = p * pl.reciprocal(jnp.sum(p, axis=-1, keepdims=True), approx=True)
    attn = jnp.dot(p.astype(jnp.bfloat16), v16,
                   preferred_element_type=jnp.float32)   # (B*L, H)

    proj = jnp.dot(attn.astype(jnp.bfloat16), wo_ref[...],
                   preferred_element_type=jnp.float32) + bo_ref[...]

    # --- residual + layernorm 1 (f32 on the VPU) ---
    h = x + proj
    mu = jnp.mean(h, axis=-1, keepdims=True)
    var = jnp.mean((h - mu) ** 2, axis=-1, keepdims=True)
    h1 = (h - mu) * jax.lax.rsqrt(var + LN_EPS) * g1_ref[...] + be1_ref[...]

    # --- feed-forward (wait on manually DMA'd weights right before use) ---
    cp_w1.wait()
    ff = jnp.dot(h1.astype(jnp.bfloat16), w1_vmem[...],
                 preferred_element_type=jnp.float32) + b1_ref[...]
    ff = jax.nn.gelu(ff, approximate=True)
    cp_w2.wait()
    ff = jnp.dot(ff.astype(jnp.bfloat16), w2_vmem[...],
                 preferred_element_type=jnp.float32) + b2_ref[...]

    # --- residual + layernorm 2 (f32) ---
    h2 = h1 + ff
    mu2 = jnp.mean(h2, axis=-1, keepdims=True)
    var2 = jnp.mean((h2 - mu2) ** 2, axis=-1, keepdims=True)
    hidden = (h2 - mu2) * jax.lax.rsqrt(var2 + LN_EPS) * g2_ref[...] + be2_ref[...]

    # --- fc head on the B CLS rows only: VPU multiply + lane reduce ---
    cls = jnp.concatenate([hidden[b * L:b * L + 1, :] for b in range(B)],
                          axis=0)                        # (B, H)
    o_ref[...] = (jnp.sum(cls * wfc_ref[...], axis=-1, keepdims=True)
                  + bfc_ref[...])                        # (B, 1)


def encoder_and_head(xf, mask_bias, p):
    """xf: (B*L, H) f32, mask_bias: (B*L, B*L) f32 -> CLS logits (B, 1)."""
    vmem = pl.BlockSpec(memory_space=pltpu.MemorySpace.VMEM)
    hbm = pl.BlockSpec(memory_space=pl.ANY)
    cost = pl.CostEstimate(flops=114_000_000,
                           transcendentals=13_000,
                           bytes_accessed=7_200_000)
    return pl.pallas_call(
        cross_encoder_kernel,
        out_shape=jax.ShapeDtypeStruct((B, 1), jnp.float32),
        in_specs=[vmem, vmem,        # x, mask_bias
                  vmem, vmem,        # wqkv, bqkv
                  vmem, vmem,        # wo, bo
                  vmem, vmem,        # g1, be1
                  hbm,  vmem,        # w1 (manual DMA), b1
                  hbm,  vmem,        # w2 (manual DMA), b2
                  vmem, vmem,        # g2, be2
                  vmem, vmem],       # wfc, bfc
        out_specs=vmem,
        scratch_shapes=[pltpu.VMEM((H, F), jnp.bfloat16),
                        pltpu.VMEM((F, H), jnp.bfloat16),
                        pltpu.SemaphoreType.DMA((2,))],
        cost_estimate=cost,
    )(xf, mask_bias,
      p["wqkv"], p["bqkv"], p["wo"], p["bo"],
      p["g1"], p["be1"],
      p["w1"], p["b1"], p["w2"], p["b2"],
      p["g2"], p["be2"],
      p["w_fc"], p["b_fc"])


# ------------------------------- wrapper -------------------------------------
@jax.jit
def cross_model_forward(ids, masks, kparams):
    """Equivalent of Cross_Model.forward(ids, masks) -> logits (B, 1)."""
    # Glue: embedding lookup + block-diagonal mask-bias construction (plain JAX).
    x = jnp.take(kparams["emb"], ids, axis=0).astype(jnp.float32)    # (B, L, H)
    xf = x.reshape(B * L, H)
    batch_of = jnp.arange(B * L, dtype=jnp.int32) // L               # (B*L,)
    same_batch = batch_of[:, None] == batch_of[None, :]              # (B*L, B*L)
    key_ok = masks.reshape(B * L) > 0
    allowed = jnp.logical_and(same_batch, key_ok[None, :])
    mask_bias = jnp.where(allowed, 0.0, NEG_INF).astype(jnp.float32)
    return encoder_and_head(xf, mask_bias, kparams)                  # (B, 1)


# ------------------------------ param prep ------------------------------------
def init_params(key):
    """Raw f32 parameters in the same layout the PyTorch module implies."""
    ks = jax.random.split(key, 16)
    n = lambda k, shape, s=0.02: (s * jax.random.normal(k, shape)).astype(jnp.float32)
    return {
        "emb": n(ks[0], (VOCAB, H), 1.0),
        "wq": n(ks[1], (H, H)), "bq": n(ks[2], (1, H)),
        "wk": n(ks[3], (H, H)), "bk": n(ks[4], (1, H)),
        "wv": n(ks[5], (H, H)), "bv": n(ks[6], (1, H)),
        "wo": n(ks[7], (H, H)), "bo": n(ks[8], (1, H)),
        "g1": jnp.ones((1, H), jnp.float32), "be1": n(ks[9], (1, H)),
        "w1": n(ks[10], (H, F)), "b1": n(ks[11], (1, F)),
        "w2": n(ks[12], (F, H)), "b2": n(ks[13], (1, H)),
        "g2": jnp.ones((1, H), jnp.float32), "be2": n(ks[14], (1, H)),
        # fc = nn.Linear(768, 1): weight stored transposed as (768, 1)
        "w_fc": n(ks[15], (H, 1)), "b_fc": jnp.full((1, 1), 0.01, jnp.float32),
    }


def prepare_kernel_params(raw):
    """Fuse QKV, fold 1/sqrt(H) into the Q slice, cast big weights to bf16."""
    scale = 1.0 / jnp.sqrt(jnp.float32(H))
    bf16 = lambda w: w.astype(jnp.bfloat16)
    wqkv = jnp.concatenate([raw["wq"] * scale, raw["wk"], raw["wv"]], axis=1)
    bqkv = jnp.concatenate([raw["bq"] * scale, raw["bk"], raw["bv"]], axis=1)
    return {
        "emb": raw["emb"],
        "wqkv": bf16(wqkv), "bqkv": bqkv,
        "wo": bf16(raw["wo"]), "bo": raw["bo"],
        "g1": raw["g1"], "be1": raw["be1"],
        "w1": bf16(raw["w1"]), "b1": raw["b1"],
        "w2": bf16(raw["w2"]), "b2": raw["b2"],
        "g2": raw["g2"], "be2": raw["be2"],
        # fc weight as a (1, H) row for the VPU multiply + lane-reduce head
        "w_fc": raw["w_fc"].T, "b_fc": raw["b_fc"],
    }


# --------------------------- pure-JAX reference -------------------------------
def reference_forward(ids, masks, raw):
    # Same bf16-quantized weights as the kernel (f32 math everywhere else).
    deq = lambda name: raw[name].astype(jnp.bfloat16).astype(jnp.float32)
    wq, wk, wv, wo = deq("wq"), deq("wk"), deq("wv"), deq("wo")
    w1, w2 = deq("w1"), deq("w2")

    x = jnp.take(raw["emb"], ids, axis=0).astype(jnp.float32)
    mask_bias = (1.0 - masks.astype(jnp.float32))[:, None, :] * NEG_INF

    def one(xb, mb):
        q = xb @ wq + raw["bq"]
        k = xb @ wk + raw["bk"]
        v = xb @ wv + raw["bv"]
        s = (q @ k.T) / jnp.sqrt(jnp.float32(H)) + mb
        s = s - jnp.max(s, axis=-1, keepdims=True)
        p = jnp.exp(s)
        p = p / jnp.sum(p, axis=-1, keepdims=True)
        a = (p @ v) @ wo + raw["bo"]
        h = xb + a
        mu = jnp.mean(h, -1, keepdims=True)
        var = jnp.mean((h - mu) ** 2, -1, keepdims=True)
        h1 = (h - mu) * jax.lax.rsqrt(var + LN_EPS) * raw["g1"] + raw["be1"]
        ff = jax.nn.gelu(h1 @ w1 + raw["b1"], approximate=True)
        ff = ff @ w2 + raw["b2"]
        h2 = h1 + ff
        mu2 = jnp.mean(h2, -1, keepdims=True)
        var2 = jnp.mean((h2 - mu2) ** 2, -1, keepdims=True)
        return (h2 - mu2) * jax.lax.rsqrt(var2 + LN_EPS) * raw["g2"] + raw["be2"]

    hidden = jnp.stack([one(x[b], mask_bias[b]) for b in range(B)])
    cls = hidden[:, 0, :]
    return cls @ raw["w_fc"] + raw["b_fc"]


# --------------------------------- main ---------------------------------------
if __name__ == "__main__":
    key = jax.random.PRNGKey(0)
    k_ids, k_params = jax.random.split(key)

    ids = jax.random.randint(k_ids, (B, L), 0, VOCAB, dtype=jnp.int32)
    masks = jnp.array([[1, 1, 1, 1, 1, 1, 0, 0],
                       [1, 1, 1, 1, 0, 0, 0, 0]], dtype=jnp.int32)

    raw_params = init_params(k_params)
    kparams = prepare_kernel_params(raw_params)

    logits = cross_model_forward(ids, masks, kparams)
    jax.block_until_ready(logits)

    ref = reference_forward(ids, masks, raw_params)
    assert logits.shape == (B, 1)
    assert bool(jnp.all(jnp.isfinite(logits)))
    assert bool(jnp.allclose(logits, ref, rtol=2e-2, atol=2e-2)), (logits, ref)

    print("KERNEL_OK")
</pallas_src>

<mosaic_0001>
module attributes {stable_mosaic.version = 11 : i64} {
  func.func @cross_encoder_kernel(%arg0: memref<16x768xf32, #tpu.memory_space<vmem>>, %arg1: memref<16x16xf32, #tpu.memory_space<vmem>>, %arg2: memref<768x2304xbf16, #tpu.memory_space<vmem>>, %arg3: memref<1x2304xf32, #tpu.memory_space<vmem>>, %arg4: memref<768x768xbf16, #tpu.memory_space<vmem>>, %arg5: memref<1x768xf32, #tpu.memory_space<vmem>>, %arg6: memref<1x768xf32, #tpu.memory_space<vmem>>, %arg7: memref<1x768xf32, #tpu.memory_space<vmem>>, %arg8: memref<768x768xbf16, #tpu.memory_space<any>>, %arg9: memref<1x768xf32, #tpu.memory_space<vmem>>, %arg10: memref<768x768xbf16, #tpu.memory_space<any>>, %arg11: memref<1x768xf32, #tpu.memory_space<vmem>>, %arg12: memref<1x768xf32, #tpu.memory_space<vmem>>, %arg13: memref<1x768xf32, #tpu.memory_space<vmem>>, %arg14: memref<1x768xf32, #tpu.memory_space<vmem>>, %arg15: memref<1x1xf32, #tpu.memory_space<vmem>>, %arg16: memref<2x1xf32, #tpu.memory_space<vmem>>, %arg17: memref<768x768xbf16, #tpu.memory_space<vmem>>, %arg18: memref<768x768xbf16, #tpu.memory_space<vmem>>, %arg19: memref<2x!tpu.dma_semaphore, #tpu.memory_space<semaphore_mem>>) attributes {dimension_semantics = [], scalar_prefetch = 0 : i64, scratch_operands = 3 : i64, tpu.core_type = #tpu.core_type<tc>} {
    %c0_i32 = arith.constant 0 : i32
    %0 = tpu.memref_slice %arg19[%c0_i32] : memref<2x!tpu.dma_semaphore, #tpu.memory_space<semaphore_mem>> -> memref<1x!tpu.dma_semaphore, #tpu.memory_space<semaphore_mem>>
    %1 = tpu.memref_squeeze %0 : memref<1x!tpu.dma_semaphore, #tpu.memory_space<semaphore_mem>> -> memref<!tpu.dma_semaphore, #tpu.memory_space<semaphore_mem>>
    tpu.enqueue_dma source(%arg8 : memref<768x768xbf16, #tpu.memory_space<any>>) target(%arg17 : memref<768x768xbf16, #tpu.memory_space<vmem>>) target_semaphore(%1 : memref<!tpu.dma_semaphore, #tpu.memory_space<semaphore_mem>>)
    %c1_i32 = arith.constant 1 : i32
    %2 = tpu.memref_slice %arg19[%c1_i32] : memref<2x!tpu.dma_semaphore, #tpu.memory_space<semaphore_mem>> -> memref<1x!tpu.dma_semaphore, #tpu.memory_space<semaphore_mem>>
    %3 = tpu.memref_squeeze %2 : memref<1x!tpu.dma_semaphore, #tpu.memory_space<semaphore_mem>> -> memref<!tpu.dma_semaphore, #tpu.memory_space<semaphore_mem>>
    tpu.enqueue_dma source(%arg10 : memref<768x768xbf16, #tpu.memory_space<any>>) target(%arg18 : memref<768x768xbf16, #tpu.memory_space<vmem>>) target_semaphore(%3 : memref<!tpu.dma_semaphore, #tpu.memory_space<semaphore_mem>>)
    %c0 = arith.constant 0 : index
    %c0_0 = arith.constant 0 : index
    %4 = vector.load %arg0[%c0, %c0_0] : memref<16x768xf32, #tpu.memory_space<vmem>>, vector<16x768xf32>
    %5 = arith.truncf %4 : vector<16x768xf32> to vector<16x768xbf16>
    %c0_1 = arith.constant 0 : index
    %c0_2 = arith.constant 0 : index
    %6 = vector.load %arg2[%c0_1, %c0_2] : memref<768x2304xbf16, #tpu.memory_space<vmem>>, vector<768x2304xbf16>
    %cst = arith.constant dense<0.000000e+00> : vector<16x2304xf32>
    %7 = tpu.matmul %5, %6, %cst {dimension_numbers = #tpu.dot_dimension_numbers<[1], [0], [0], [1], [0, 0, 1, 1], [], []>} : vector<16x768xbf16>, vector<768x2304xbf16>, vector<16x2304xf32> -> vector<16x2304xf32>
    %c0_3 = arith.constant 0 : index
    %c0_4 = arith.constant 0 : index
    %8 = vector.load %arg3[%c0_3, %c0_4] : memref<1x2304xf32, #tpu.memory_space<vmem>>, vector<1x2304xf32>
    %9 = vector.broadcast %8 : vector<1x2304xf32> to vector<16x2304xf32>
    %10 = arith.addf %7, %9 : vector<16x2304xf32>
    %11 = vector.extract_strided_slice %10 {offsets = [0, 0], sizes = [16, 768], strides = [1, 1]} : vector<16x2304xf32> to vector<16x768xf32>
    %12 = arith.truncf %11 : vector<16x768xf32> to vector<16x768xbf16>
    %13 = vector.extract_strided_slice %10 {offsets = [0, 768], sizes = [16, 768], strides = [1, 1]} : vector<16x2304xf32> to vector<16x768xf32>
    %14 = arith.truncf %13 : vector<16x768xf32> to vector<16x768xbf16>
    %15 = vector.extract_strided_slice %10 {offsets = [0, 1536], sizes = [16, 768], strides = [1, 1]} : vector<16x2304xf32> to vector<16x768xf32>
    %16 = arith.truncf %15 : vector<16x768xf32> to vector<16x768xbf16>
    "tpu.trace_start"() <{level = 10 : i32, message = "qd,kd->qk"}> : () -> ()
    %cst_5 = arith.constant dense<0.000000e+00> : vector<16x16xf32>
    %17 = tpu.matmul %12, %14, %cst_5 {dimension_numbers = #tpu.dot_dimension_numbers<[1], [1], [0], [0], [0, 0, 1, 0], [], []>} : vector<16x768xbf16>, vector<16x768xbf16>, vector<16x16xf32> -> vector<16x16xf32>
    "tpu.trace_stop"() : () -> ()
    %c0_6 = arith.constant 0 : index
    %c0_7 = arith.constant 0 : index
    %18 = vector.load %arg1[%c0_6, %c0_7] : memref<16x16xf32, #tpu.memory_space<vmem>>, vector<16x16xf32>
    %19 = arith.addf %17, %18 : vector<16x16xf32>
    %cst_8 = arith.constant dense<0xFF800000> : vector<16xf32>
    %20 = vector.multi_reduction <maximumf>, %19, %cst_8 [1] : vector<16x16xf32> to vector<16xf32>
    %21 = vector.shape_cast %20 : vector<16xf32> to vector<16x1xf32>
    %22 = vector.broadcast %21 : vector<16x1xf32> to vector<16x16xf32>
    %23 = arith.subf %19, %22 : vector<16x16xf32>
    %24 = math.exp %23 : vector<16x16xf32>
    %cst_9 = arith.constant dense<0.000000e+00> : vector<16xf32>
    %25 = vector.multi_reduction <add>, %24, %cst_9 [1] : vector<16x16xf32> to vector<16xf32>
    %26 = vector.shape_cast %25 : vector<16xf32> to vector<16x1xf32>
    %27 = tpu.reciprocal %26 {approx = true} : vector<16x1xf32> -> vector<16x1xf32>
    %28 = vector.broadcast %27 : vector<16x1xf32> to vector<16x16xf32>
    %29 = arith.mulf %24, %28 : vector<16x16xf32>
    %30 = arith.truncf %29 : vector<16x16xf32> to vector<16x16xbf16>
    %cst_10 = arith.constant dense<0.000000e+00> : vector<16x768xf32>
    %31 = tpu.matmul %30, %16, %cst_10 {dimension_numbers = #tpu.dot_dimension_numbers<[1], [0], [0], [1], [0, 0, 1, 1], [], []>} : vector<16x16xbf16>, vector<16x768xbf16>, vector<16x768xf32> -> vector<16x768xf32>
    %32 = arith.truncf %31 : vector<16x768xf32> to vector<16x768xbf16>
    %c0_11 = arith.constant 0 : index
    %c0_12 = arith.constant 0 : index
    %33 = vector.load %arg4[%c0_11, %c0_12] : memref<768x768xbf16, #tpu.memory_space<vmem>>, vector<768x768xbf16>
    %cst_13 = arith.constant dense<0.000000e+00> : vector<16x768xf32>
    %34 = tpu.matmul %32, %33, %cst_13 {dimension_numbers = #tpu.dot_dimension_numbers<[1], [0], [0], [1], [0, 0, 1, 1], [], []>} : vector<16x768xbf16>, vector<768x768xbf16>, vector<16x768xf32> -> vector<16x768xf32>
    %c0_14 = arith.constant 0 : index
    %c0_15 = arith.constant 0 : index
    %35 = vector.load %arg5[%c0_14, %c0_15] : memref<1x768xf32, #tpu.memory_space<vmem>>, vector<1x768xf32>
    %36 = vector.broadcast %35 : vector<1x768xf32> to vector<16x768xf32>
    %37 = arith.addf %34, %36 : vector<16x768xf32>
    %38 = arith.addf %4, %37 : vector<16x768xf32>
    %cst_16 = arith.constant dense<0.000000e+00> : vector<16xf32>
    %39 = vector.multi_reduction <add>, %38, %cst_16 [1] : vector<16x768xf32> to vector<16xf32>
    %40 = vector.shape_cast %39 : vector<16xf32> to vector<16x1xf32>
    %cst_17 = arith.constant 7.680000e+02 : f32
    %41 = vector.broadcast %cst_17 : f32 to vector<16x1xf32>
    %42 = arith.divf %40, %41 : vector<16x1xf32>
    %43 = vector.broadcast %42 : vector<16x1xf32> to vector<16x768xf32>
    %44 = arith.subf %38, %43 : vector<16x768xf32>
    %45 = arith.mulf %44, %44 : vector<16x768xf32>
    %cst_18 = arith.constant dense<0.000000e+00> : vector<16xf32>
    %46 = vector.multi_reduction <add>, %45, %cst_18 [1] : vector<16x768xf32> to vector<16xf32>
    %47 = vector.shape_cast %46 : vector<16xf32> to vector<16x1xf32>
    %cst_19 = arith.constant 7.680000e+02 : f32
    %48 = vector.broadcast %cst_19 : f32 to vector<16x1xf32>
    %49 = arith.divf %47, %48 : vector<16x1xf32>
    %50 = vector.broadcast %42 : vector<16x1xf32> to vector<16x768xf32>
    %51 = arith.subf %38, %50 : vector<16x768xf32>
    %cst_20 = arith.constant 9.99999996E-13 : f32
    %52 = vector.broadcast %cst_20 : f32 to vector<16x1xf32>
    %53 = arith.addf %49, %52 : vector<16x1xf32>
    %54 = math.rsqrt %53 : vector<16x1xf32>
    %55 = vector.broadcast %54 : vector<16x1xf32> to vector<16x768xf32>
    %56 = arith.mulf %51, %55 : vector<16x768xf32>
    %c0_21 = arith.constant 0 : index
    %c0_22 = arith.constant 0 : index
    %57 = vector.load %arg6[%c0_21, %c0_22] : memref<1x768xf32, #tpu.memory_space<vmem>>, vector<1x768xf32>
    %58 = vector.broadcast %57 : vector<1x768xf32> to vector<16x768xf32>
    %59 = arith.mulf %56, %58 : vector<16x768xf32>
    %c0_23 = arith.constant 0 : index
    %c0_24 = arith.constant 0 : index
    %60 = vector.load %arg7[%c0_23, %c0_24] : memref<1x768xf32, #tpu.memory_space<vmem>>, vector<1x768xf32>
    %61 = vector.broadcast %60 : vector<1x768xf32> to vector<16x768xf32>
    %62 = arith.addf %59, %61 : vector<16x768xf32>
    %c0_i32_25 = arith.constant 0 : i32
    %63 = tpu.memref_slice %arg19[%c0_i32_25] : memref<2x!tpu.dma_semaphore, #tpu.memory_space<semaphore_mem>> -> memref<1x!tpu.dma_semaphore, #tpu.memory_space<semaphore_mem>>
    %64 = tpu.memref_squeeze %63 : memref<1x!tpu.dma_semaphore, #tpu.memory_space<semaphore_mem>> -> memref<!tpu.dma_semaphore, #tpu.memory_space<semaphore_mem>>
    tpu.wait_dma2 semaphore(%64 : memref<!tpu.dma_semaphore, #tpu.memory_space<semaphore_mem>>) src(%arg8 : memref<768x768xbf16, #tpu.memory_space<any>>) dst(%arg17 : memref<768x768xbf16, #tpu.memory_space<vmem>>)
    %65 = arith.truncf %62 : vector<16x768xf32> to vector<16x768xbf16>
    %c0_26 = arith.constant 0 : index
    %c0_27 = arith.constant 0 : index
    %66 = vector.load %arg17[%c0_26, %c0_27] : memref<768x768xbf16, #tpu.memory_space<vmem>>, vector<768x768xbf16>
    %cst_28 = arith.constant dense<0.000000e+00> : vector<16x768xf32>
    %67 = tpu.matmul %65, %66, %cst_28 {dimension_numbers = #tpu.dot_dimension_numbers<[1], [0], [0], [1], [0, 0, 1, 1], [], []>} : vector<16x768xbf16>, vector<768x768xbf16>, vector<16x768xf32> -> vector<16x768xf32>
    %c0_29 = arith.constant 0 : index
    %c0_30 = arith.constant 0 : index
    %68 = vector.load %arg9[%c0_29, %c0_30] : memref<1x768xf32, #tpu.memory_space<vmem>>, vector<1x768xf32>
    %69 = vector.broadcast %68 : vector<1x768xf32> to vector<16x768xf32>
    %70 = arith.addf %67, %69 : vector<16x768xf32>
    %71 = arith.mulf %70, %70 : vector<16x768xf32>
    %72 = arith.mulf %70, %71 : vector<16x768xf32>
    %cst_31 = arith.constant 4.471500e-02 : f32
    %73 = vector.broadcast %cst_31 : f32 to vector<16x768xf32>
    %74 = arith.mulf %73, %72 : vector<16x768xf32>
    %75 = arith.addf %70, %74 : vector<16x768xf32>
    %cst_32 = arith.constant 0.797884583 : f32
    %76 = vector.broadcast %cst_32 : f32 to vector<16x768xf32>
    %77 = arith.mulf %76, %75 : vector<16x768xf32>
    %78 = math.tanh %77 : vector<16x768xf32>
    %cst_33 = arith.constant 1.000000e+00 : f32
    %79 = vector.broadcast %cst_33 : f32 to vector<16x768xf32>
    %80 = arith.addf %79, %78 : vector<16x768xf32>
    %cst_34 = arith.constant 5.000000e-01 : f32
    %81 = vector.broadcast %cst_34 : f32 to vector<16x768xf32>
    %82 = arith.mulf %81, %80 : vector<16x768xf32>
    %83 = arith.mulf %70, %82 : vector<16x768xf32>
    %c1_i32_35 = arith.constant 1 : i32
    %84 = tpu.memref_slice %arg19[%c1_i32_35] : memref<2x!tpu.dma_semaphore, #tpu.memory_space<semaphore_mem>> -> memref<1x!tpu.dma_semaphore, #tpu.memory_space<semaphore_mem>>
    %85 = tpu.memref_squeeze %84 : memref<1x!tpu.dma_semaphore, #tpu.memory_space<semaphore_mem>> -> memref<!tpu.dma_semaphore, #tpu.memory_space<semaphore_mem>>
    tpu.wait_dma2 semaphore(%85 : memref<!tpu.dma_semaphore, #tpu.memory_space<semaphore_mem>>) src(%arg10 : memref<768x768xbf16, #tpu.memory_space<any>>) dst(%arg18 : memref<768x768xbf16, #tpu.memory_space<vmem>>)
    %86 = arith.truncf %83 : vector<16x768xf32> to vector<16x768xbf16>
    %c0_36 = arith.constant 0 : index
    %c0_37 = arith.constant 0 : index
    %87 = vector.load %arg18[%c0_36, %c0_37] : memref<768x768xbf16, #tpu.memory_space<vmem>>, vector<768x768xbf16>
    %cst_38 = arith.constant dense<0.000000e+00> : vector<16x768xf32>
    %88 = tpu.matmul %86, %87, %cst_38 {dimension_numbers = #tpu.dot_dimension_numbers<[1], [0], [0], [1], [0, 0, 1, 1], [], []>} : vector<16x768xbf16>, vector<768x768xbf16>, vector<16x768xf32> -> vector<16x768xf32>
    %c0_39 = arith.constant 0 : index
    %c0_40 = arith.constant 0 : index
    %89 = vector.load %arg11[%c0_39, %c0_40] : memref<1x768xf32, #tpu.memory_space<vmem>>, vector<1x768xf32>
    %90 = vector.broadcast %89 : vector<1x768xf32> to vector<16x768xf32>
    %91 = arith.addf %88, %90 : vector<16x768xf32>
    %92 = arith.addf %62, %91 : vector<16x768xf32>
    %cst_41 = arith.constant dense<0.000000e+00> : vector<16xf32>
    %93 = vector.multi_reduction <add>, %92, %cst_41 [1] : vector<16x768xf32> to vector<16xf32>
    %94 = vector.shape_cast %93 : vector<16xf32> to vector<16x1xf32>
    %cst_42 = arith.constant 7.680000e+02 : f32
    %95 = vector.broadcast %cst_42 : f32 to vector<16x1xf32>
    %96 = arith.divf %94, %95 : vector<16x1xf32>
    %97 = vector.broadcast %96 : vector<16x1xf32> to vector<16x768xf32>
    %98 = arith.subf %92, %97 : vector<16x768xf32>
    %99 = arith.mulf %98, %98 : vector<16x768xf32>
    %cst_43 = arith.constant dense<0.000000e+00> : vector<16xf32>
    %100 = vector.multi_reduction <add>, %99, %cst_43 [1] : vector<16x768xf32> to vector<16xf32>
    %101 = vector.shape_cast %100 : vector<16xf32> to vector<16x1xf32>
    %cst_44 = arith.constant 7.680000e+02 : f32
    %102 = vector.broadcast %cst_44 : f32 to vector<16x1xf32>
    %103 = arith.divf %101, %102 : vector<16x1xf32>
    %104 = vector.broadcast %96 : vector<16x1xf32> to vector<16x768xf32>
    %105 = arith.subf %92, %104 : vector<16x768xf32>
    %cst_45 = arith.constant 9.99999996E-13 : f32
    %106 = vector.broadcast %cst_45 : f32 to vector<16x1xf32>
    %107 = arith.addf %103, %106 : vector<16x1xf32>
    %108 = math.rsqrt %107 : vector<16x1xf32>
    %109 = vector.broadcast %108 : vector<16x1xf32> to vector<16x768xf32>
    %110 = arith.mulf %105, %109 : vector<16x768xf32>
    %c0_46 = arith.constant 0 : index
    %c0_47 = arith.constant 0 : index
    %111 = vector.load %arg12[%c0_46, %c0_47] : memref<1x768xf32, #tpu.memory_space<vmem>>, vector<1x768xf32>
    %112 = vector.broadcast %111 : vector<1x768xf32> to vector<16x768xf32>
    %113 = arith.mulf %110, %112 : vector<16x768xf32>
    %c0_48 = arith.constant 0 : index
    %c0_49 = arith.constant 0 : index
    %114 = vector.load %arg13[%c0_48, %c0_49] : memref<1x768xf32, #tpu.memory_space<vmem>>, vector<1x768xf32>
    %115 = vector.broadcast %114 : vector<1x768xf32> to vector<16x768xf32>
    %116 = arith.addf %113, %115 : vector<16x768xf32>
    %117 = vector.extract_strided_slice %116 {offsets = [0, 0], sizes = [1, 768], strides = [1, 1]} : vector<16x768xf32> to vector<1x768xf32>
    %118 = vector.extract_strided_slice %116 {offsets = [8, 0], sizes = [1, 768], strides = [1, 1]} : vector<16x768xf32> to vector<1x768xf32>
    %119 = tpu.concatenate %117, %118 in 0 : vector<1x768xf32>, vector<1x768xf32> -> vector<2x768xf32>
    %c0_50 = arith.constant 0 : index
    %c0_51 = arith.constant 0 : index
    %120 = vector.load %arg14[%c0_50, %c0_51] : memref<1x768xf32, #tpu.memory_space<vmem>>, vector<1x768xf32>
    %121 = vector.broadcast %120 : vector<1x768xf32> to vector<2x768xf32>
    %122 = arith.mulf %119, %121 : vector<2x768xf32>
    %cst_52 = arith.constant dense<0.000000e+00> : vector<2xf32>
    %123 = vector.multi_reduction <add>, %122, %cst_52 [1] : vector<2x768xf32> to vector<2xf32>
    %124 = vector.shape_cast %123 : vector<2xf32> to vector<2x1xf32>
    %c0_53 = arith.constant 0 : index
    %c0_54 = arith.constant 0 : index
    %125 = vector.load %arg15[%c0_53, %c0_54] : memref<1x1xf32, #tpu.memory_space<vmem>>, vector<1x1xf32>
    %126 = vector.broadcast %125 : vector<1x1xf32> to vector<2x1xf32>
    %127 = arith.addf %124, %126 : vector<2x1xf32>
    %c0_55 = arith.constant 0 : index
    %c0_56 = arith.constant 0 : index
    %128 = vector.load %arg16[%c0_55, %c0_56] : memref<2x1xf32, #tpu.memory_space<vmem>>, vector<2x1xf32>
    tpu.vector_store %arg16[%c0_55, %c0_56], %127 {strides = array<i32>} : memref<2x1xf32, #tpu.memory_space<vmem>>, vector<2x1xf32>,
    return
  }
}

</mosaic_0001>

<bundles_post_ra>
// kernel: cross_model_forward.1
= control target key start
LH: loop header
LB: loop body
LE: loop exit
PB: predicated region body
PF: predicated region fallthrough
CT: control target
= control target key end

     0   :  { %s19611_s0 = inlined_call_operand.vmem [shape: f32[16,768], index: 0, kind: input, shape index: {}]   ;;  %s19612_s1 = inlined_call_operand.vmem [shape: f32[16,16], index: 1, kind: input, shape index: {}]   ;;  %s19613_s2 = inlined_call_operand.hbm [shape: bf16[768,2304], index: 2, kind: input, shape index: {}]   ;;  %s19614_s3 = inlined_call_operand.hbm [shape: f32[1,2304], index: 3, kind: input, shape index: {}]   ;;  %s19615_s4 = inlined_call_operand.hbm [shape: bf16[768,768], index: 4, kind: input, shape index: {}]   ;;  %s19616_s5 = inlined_call_operand.hbm [shape: f32[1,768], index: 5, kind: input, shape index: {}]   ;;  %s19617_s6 = inlined_call_operand.hbm [shape: f32[1,768], index: 6, kind: input, shape index: {}]   ;;  %s19618_s7 = inlined_call_operand.hbm [shape: f32[1,768], index: 7, kind: input, shape index: {}]   ;;  %s19619_s8 = inlined_call_operand.hbm [shape: bf16[768,768], index: 8, kind: input, shape index: {}]   ;;  %s19620_s9 = inlined_call_operand.hbm [shape: f32[1,768], index: 9, kind: input, shape index: {}]   ;;  %s19621_s10 = inlined_call_operand.hbm [shape: bf16[768,768], index: 10, kind: input, shape index: {}]   ;;  %s19622_s11 = inlined_call_operand.hbm [shape: f32[1,768], index: 11, kind: input, shape index: {}]   ;;  %s19623_s12 = inlined_call_operand.hbm [shape: f32[1,768], index: 12, kind: input, shape index: {}]   ;;  %s19624_s13 = inlined_call_operand.hbm [shape: f32[1,768], index: 13, kind: input, shape index: {}]   ;;  %s19625_s14 = inlined_call_operand.hbm [shape: f32[1,768], index: 14, kind: input, shape index: {}]   ;;  %s19626_s15 = inlined_call_operand.<no memory space> [shape: f32[1,1], index: 15, kind: input, shape index: {}]   ;;  %s19627_s16 = inlined_call_operand.vmem [shape: f32[2,1], index: 16, kind: output, shape index: {}]  }
   0x1   :  { %19641 = sst [smem:[#allocation54_spill]] %s19611_s0  ;;  %v21_v0 = vstv %s19626_s15 }
   0x2   :  { %22 = vst [vmem:[#allocation5] sm:$0x1] %v21_v0 }
   0x3   :  { %23 = vsyncpa [#allocation7], 0 }
   0x4   :  { %24 = vsyncpa [#allocation9], 0 }
   0x5   :  { %25 = vsyncpa [#allocation12], 0 }
   0x6   :  { %26 = vsyncpa [#allocation15], 0 }
   0x7   :  { %27 = vsyncpa [#allocation18], 0 }
   0x8   :  { %28 = vsyncpa [#allocation21], 0  ;;  %s18666_s23 = smov [#allocation8]   ;;  %s18667_s25 = smov [#allocation11]  }
   0x9   :  { %s51_s24 = sshll.u32 %s18666_s23, 4  ;;  %s73_s26 = sshll.u32 %s18667_s25, 4  ;;  %s52_s24 = int_to_ptr.vmem [resolvable:$true] %s51_s24  ;;  %s74_s26 = int_to_ptr.vmem [resolvable:$true] %s73_s26 }
   0xa   :  { %s18398_s27 = scalar_lea.vmem %s52_s24, 288  ;;  %p18403_p1 = scmp.lt.s32.totalorder %s52_s24, %s52_s24 }
   0xb   :  { %p18399_p0 = scmp.ne.s32.totalorder %s52_s24, %s18398_s27  ;;  %p18404_p2 = scmp.lt.s32.totalorder %s18398_s27, %s18398_s27 }
   0xd   :  { %p18405_p3 = por %p18404_p2, %p18403_p1 }
   0xf   :  { %p18406_p4 = pnand %p18405_p3, %p18399_p0 }
  0x11   :  { %18409 = shalt.err (!%p18406_p4)
}
  0x12   :  { %54 = dma.hbm_to_vmem [thread:$0]  %s19614_s3, 288, %s52_s24, [#allocation9]  }
  0x13   :  { %s18418_s29 = scalar_lea.vmem %s74_s26, 96  ;;  %p18423_p6 = scmp.lt.s32.totalorder %s74_s26, %s74_s26 }
  0x14   :  { %p18419_p5 = scmp.ne.s32.totalorder %s74_s26, %s18418_s29  ;;  %p18424_p7 = scmp.lt.s32.totalorder %s18418_s29, %s18418_s29 }
  0x16   :  { %p18425_p8 = por %p18424_p7, %p18423_p6 }
  0x18   :  { %p18426_p9 = pnand %p18425_p8, %p18419_p5 }
  0x1a   :  { %18429 = shalt.err (!%p18426_p9)
}
  0x1b   :  { %76 = dma.hbm_to_vmem [thread:$0]  %s19616_s5, 96, %s74_s26, [#allocation12]  }
  0x1c   :  { %s18668_s17 = smov [#allocation14]   ;;  %s18669_s19 = smov [#allocation17]  }
  0x1d   :  { %s93_s18 = sshll.u32 %s18668_s17, 4  ;;  %s113_s20 = sshll.u32 %s18669_s19, 4  ;;  %s94_s18 = int_to_ptr.vmem [resolvable:$true] %s93_s18  ;;  %s114_s20 = int_to_ptr.vmem [resolvable:$true] %s113_s20 }
  0x1e   :  { %s18438_s21 = scalar_lea.vmem %s94_s18, 96  ;;  %p18443_p11 = scmp.lt.s32.totalorder %s94_s18, %s94_s18 }
  0x1f   :  { %p18439_p10 = scmp.ne.s32.totalorder %s94_s18, %s18438_s21  ;;  %p18444_p12 = scmp.lt.s32.totalorder %s18438_s21, %s18438_s21 }
  0x21   :  { %p18445_p13 = por %p18444_p12, %p18443_p11 }
  0x23   :  { %p18446_p0 = pnand %p18445_p13, %p18439_p10 }
  0x25   :  { %18449 = shalt.err (!%p18446_p0)
}
  0x26   :  { %96 = dma.hbm_to_vmem [thread:$0]  %s19618_s7, 96, %s94_s18, [#allocation15]  }
  0x27   :  { %s18458_s23 = scalar_lea.vmem %s114_s20, 96  ;;  %p18463_p2 = scmp.lt.s32.totalorder %s114_s20, %s114_s20 }
  0x28   :  { %p18459_p1 = scmp.ne.s32.totalorder %s114_s20, %s18458_s23  ;;  %p18464_p3 = scmp.lt.s32.totalorder %s18458_s23, %s18458_s23 }
  0x2a   :  { %p18465_p4 = por %p18464_p3, %p18463_p2 }
  0x2c   :  { %p18466_p5 = pnand %p18465_p4, %p18459_p1 }
  0x2e   :  { %18469 = shalt.err (!%p18466_p5)
}
  0x2f   :  { %116 = dma.hbm_to_vmem [thread:$0]  %s19622_s11, 96, %s114_s20, [#allocation18]  }
  0x30   :  { %s18670_s25 = smov [#allocation20]   ;;  %s18671_s27 = smov [#allocation6]  }
  0x31   :  { %s133_s26 = sshll.u32 %s18670_s25, 4  ;;  %s38_s15 = sshll.u32 %s18671_s27, 4  ;;  %s134_s26 = int_to_ptr.vmem [resolvable:$true] %s133_s26  ;;  %s39_s15 = int_to_ptr.vmem [resolvable:$true] %s38_s15 }
  0x32   :  { %s18478_s28 = scalar_lea.vmem %s134_s26, 96  ;;  %p18483_p7 = scmp.lt.s32.totalorder %s134_s26, %s134_s26 }
  0x33   :  { %p18479_p6 = scmp.ne.s32.totalorder %s134_s26, %s18478_s28  ;;  %p18484_p8 = scmp.lt.s32.totalorder %s18478_s28, %s18478_s28 }
  0x35   :  { %p18485_p9 = por %p18484_p8, %p18483_p7 }
  0x37   :  { %p18486_p10 = pnand %p18485_p9, %p18479_p6 }
  0x39   :  { %18489 = shalt.err (!%p18486_p10)
}
  0x3a   :  { %136 = dma.hbm_to_vmem [thread:$0]  %s19624_s13, 96, %s134_s26, [#allocation21]  }
  0x3b   :  { %s18498_s30 = scalar_lea.vmem %s39_s15, 110592  ;;  %p18503_p12 = scmp.lt.s32.totalorder %s39_s15, %s39_s15 }
  0x3c   :  { %p18499_p11 = scmp.ne.s32.totalorder %s39_s15, %s18498_s30  ;;  %p18504_p13 = scmp.lt.s32.totalorder %s18498_s30, %s18498_s30 }
  0x3e   :  { %p18505_p0 = por %p18504_p13, %p18503_p12 }
  0x40   :  { %p18506_p1 = pnand %p18505_p0, %p18499_p11 }
  0x42   :  { %18509 = shalt.err (!%p18506_p1)
}
  0x43   :  { %s18672_s11 = smov 1152   ;;  %s18673_s0 = smov 72  }
  0x44   :  { %44 = dma.hbm_to_vmem [thread:$0]  %s19613_s2, 110592, %s39_s15, [#allocation7], %s18672_s11, %s18672_s11, %s18673_s0  }
  0x45   :  { %s18674_s19 = smov [#allocation10]  }
  0x46   :  { %s60_s20 = sshll.u32 %s18674_s19, 4  ;;  %s61_s20 = int_to_ptr.vmem [resolvable:$true] %s60_s20 }
  0x47   :  { %s18518_s21 = scalar_lea.vmem %s61_s20, 36864  ;;  %p18523_p3 = scmp.lt.s32.totalorder %s61_s20, %s61_s20 }
  0x48   :  { %p18519_p2 = scmp.ne.s32.totalorder %s61_s20, %s18518_s21  ;;  %p18524_p4 = scmp.lt.s32.totalorder %s18518_s21, %s18518_s21 }
  0x4a   :  { %p18525_p5 = por %p18524_p4, %p18523_p3 }
  0x4c   :  { %p18526_p6 = pnand %p18525_p5, %p18519_p2 }
  0x4e   :  { %18529 = shalt.err (!%p18526_p6)
}
  0x4f   :  { %s18675_s13 = smov 384   ;;  %s18676_s3 = smov 24  }
  0x50   :  { %66 = dma.hbm_to_vmem [thread:$0]  %s19615_s4, 36864, %s61_s20, [#allocation9], %s18675_s13, %s18675_s13, %s18676_s3  }
  0x51   :  { %s18677_s5 = smov [#allocation13]   ;;  %s18678_s2 = smov [#allocation16]  }
  0x52   :  { %s83_s24 = sshll.u32 %s18677_s5, 4  ;;  %s103_s25 = sshll.u32 %s18678_s2, 4  ;;  %s84_s24 = int_to_ptr.vmem [resolvable:$true] %s83_s24  ;;  %s104_s25 = int_to_ptr.vmem [resolvable:$true] %s103_s25 }
  0x53   :  { %s18538_s26 = scalar_lea.vmem %s84_s24, 96  ;;  %p18543_p8 = scmp.lt.s32.totalorder %s84_s24, %s84_s24 }
  0x54   :  { %p18539_p7 = scmp.ne.s32.totalorder %s84_s24, %s18538_s26  ;;  %p18544_p9 = scmp.lt.s32.totalorder %s18538_s26, %s18538_s26 }
  0x56   :  { %p18545_p10 = por %p18544_p9, %p18543_p8 }
  0x58   :  { %p18546_p11 = pnand %p18545_p10, %p18539_p7 }
  0x5a   :  { %18549 = shalt.err (!%p18546_p11)
}
  0x5b   :  { %86 = dma.hbm_to_vmem [thread:$0]  %s19617_s6, 96, %s84_s24, [#allocation12]  }
  0x5c   :  { %s18558_s28 = scalar_lea.vmem %s104_s25, 96  ;;  %p18563_p13 = scmp.lt.s32.totalorder %s104_s25, %s104_s25 }
  0x5d   :  { %p18559_p12 = scmp.ne.s32.totalorder %s104_s25, %s18558_s28  ;;  %p18564_p0 = scmp.lt.s32.totalorder %s18558_s28, %s18558_s28 }
  0x5f   :  { %p18565_p1 = por %p18564_p0, %p18563_p13 }
  0x61   :  { %p18566_p2 = pnand %p18565_p1, %p18559_p12 }
  0x63   :  { %18569 = shalt.err (!%p18566_p2)
}
  0x64   :  { %106 = dma.hbm_to_vmem [thread:$0]  %s19620_s9, 96, %s104_s25, [#allocation15]  }
  0x65   :  { %s18679_s29 = smov [#allocation19]   ;;  %s18680_s11 = smov [#allocation22]  }
  0x66   :  { %s123_s30 = sshll.u32 %s18679_s29, 4  ;;  %s143_s0 = sshll.u32 %s18680_s11, 4  ;;  %s124_s30 = int_to_ptr.vmem [resolvable:$true] %s123_s30  ;;  %s144_s0 = int_to_ptr.vmem [resolvable:$true] %s143_s0 }
  0x67   :  { %s18578_s17 = scalar_lea.vmem %s124_s30, 96  ;;  %p18583_p4 = scmp.lt.s32.totalorder %s124_s30, %s124_s30 }
  0x68   :  { %p18579_p3 = scmp.ne.s32.totalorder %s124_s30, %s18578_s17  ;;  %p18584_p5 = scmp.lt.s32.totalorder %s18578_s17, %s18578_s17 }
  0x6a   :  { %p18585_p6 = por %p18584_p5, %p18583_p4 }
  0x6c   :  { %p18586_p7 = pnand %p18585_p6, %p18579_p3 }
  0x6e   :  { %18589 = shalt.err (!%p18586_p7)
}
  0x6f   :  { %126 = dma.hbm_to_vmem [thread:$0]  %s19623_s12, 96, %s124_s30, [#allocation18]  }
  0x70   :  { %s18598_s19 = scalar_lea.vmem %s144_s0, 96  ;;  %p18603_p9 = scmp.lt.s32.totalorder %s144_s0, %s144_s0 }
  0x71   :  { %p18599_p8 = scmp.ne.s32.totalorder %s144_s0, %s18598_s19  ;;  %p18604_p10 = scmp.lt.s32.totalorder %s18598_s19, %s18598_s19 }
  0x73   :  { %p18605_p11 = por %p18604_p10, %p18603_p9 }
  0x75   :  { %p18606_p12 = pnand %p18605_p11, %p18599_p8 }
  0x77   :  { %18609 = shalt.err (!%p18606_p12)
}
  0x78   :  { %146 = dma.hbm_to_vmem [thread:$0]  %s19625_s14, 96, %s144_s0, [#allocation21]  }
  0x79   :  { %18650 = dma.done.wait [#allocation7], 110592  }
  0x7a   :  { %18651 = vsyncadd [#allocation7], 4294856704 }
  0x7b   :  { %18652 = dma.done.wait [#allocation9], 37152  }
  0x7c   :  { %18653 = vsyncadd [#allocation9], 4294930144 }
  0x7d   :  { %18654 = dma.done.wait [#allocation12], 192  }
  0x7e   :  { %18655 = vsyncadd [#allocation12], 4294967104 }
  0x7f   :  { %18656 = dma.done.wait [#allocation15], 192  }
  0x80   :  { %18657 = vsyncadd [#allocation15], 4294967104 }
  0x81   :  { %18658 = dma.done.wait [#allocation18], 192  }
  0x82   :  { %18659 = vsyncadd [#allocation18], 4294967104 }
  0x83   :  { %18660 = dma.done.wait [#allocation21], 192  }
  0x84   :  { %18661 = vsyncadd [#allocation21], 4294967104  ;;  %v15744_v1 = vld [vmem:[#allocation6 + $0x3f4] ss:$72 sps:$4 sm:$0xff]   ;;  %v15746_v2 = vld [vmem:[#allocation6 + $0x3f0] ss:$72 sps:$4 sm:$0xff]  }
  0x85   :  { %5504 = vmatprep.subr.bf16.mxu0 %v15744_v1  ;;  %v15747_v3 = vld [vmem:[#allocation6 + $0xcf4] ss:$72 sps:$4 sm:$0xff]   ;;  %v15749_v4 = vld [vmem:[#allocation6 + $0xcf0] ss:$72 sps:$4 sm:$0xff]   ;;  %v15750_v5 = vld [vmem:[#allocation6 + $0x364] ss:$72 sps:$4 sm:$0xff]  }
  0x86   :  { %5505 = vmatpush1.bf16.msra.mxu0 %v15746_v2  ;;  %v15752_v6 = vld [vmem:[#allocation6 + $0x360] ss:$72 sps:$4 sm:$0xff]   ;;  %5547 = vmatprep.subr.bf16.mxu1 %v15747_v3  ;;  %v15753_v7 = vld [vmem:[#allocation6 + $0xc64] ss:$72 sps:$4 sm:$0xff]   ;;  %v15756_v9 = vld [vmem:[#allocation6 + $0x2d4] ss:$72 sps:$4 sm:$0xff]  }
  0x87   :  { %5548 = vmatpush1.bf16.msra.mxu1 %v15749_v4  ;;  %5506 = vmatprep.subr.bf16.mxu0 %v15750_v5  ;;  %v15755_v8 = vld [vmem:[#allocation6 + $0xc60] ss:$72 sps:$4 sm:$0xff]   ;;  %v15758_v10 = vld [vmem:[#allocation6 + $0x2d0] ss:$72 sps:$4 sm:$0xff]   ;;  %v15759_v11 = vld [vmem:[#allocation6 + $0xbd4] ss:$72 sps:$4 sm:$0xff]  }
  0x88   :  { %5549 = vmatprep.subr.bf16.mxu1 %v15753_v7  ;;  %v15762_v12 = vld [vmem:[#allocation6 + $0x244] ss:$72 sps:$4 sm:$0xff]   ;;  %v15761_v13 = vld [vmem:[#allocation6 + $0xbd0] ss:$72 sps:$4 sm:$0xff]   ;;  %v15764_v15 = vld [vmem:[#allocation6 + $0x240] ss:$72 sps:$4 sm:$0xff]  }
  0x89   :  { %v15765_v14 = vld [vmem:[#allocation6 + $0xb44] ss:$72 sps:$4 sm:$0xff]   ;;  %v15768_v16 = vld [vmem:[#allocation6 + $0x1b4] ss:$72 sps:$4 sm:$0xff]   ;;  %v15767_v17 = vld [vmem:[#allocation6 + $0xb40] ss:$72 sps:$4 sm:$0xff]  }
  0x8a   :  { %5507 = vmatpush1.bf16.msra.mxu0 %v15752_v6  ;;  %v15771_v18 = vld [vmem:[#allocation6 + $0xab4] ss:$72 sps:$4 sm:$0xff]   ;;  %v15770_v19 = vld [vmem:[#allocation6 + $0x1b0] ss:$72 sps:$4 sm:$0xff]   ;;  %v15774_v20 = vld [vmem:[#allocation6 + $0x124] ss:$72 sps:$4 sm:$0xff]  }
  0x8b   :  { %5508 = vmatprep.subr.bf16.mxu0 %v15756_v9  ;;  %5550 = vmatpush1.bf16.msra.mxu1 %v15755_v8  ;;  %v15773_v21 = vld [vmem:[#allocation6 + $0xab0] ss:$72 sps:$4 sm:$0xff]   ;;  %v15777_v22 = vld [vmem:[#allocation6 + $0xa24] ss:$72 sps:$4 sm:$0xff]   ;;  %v15776_v23 = vld [vmem:[#allocation6 + $0x120] ss:$72 sps:$4 sm:$0xff]  }
  0x8c   :  { %5551 = vmatprep.subr.bf16.mxu1 %v15759_v11  ;;  %v15780_v24 = vld [vmem:[#allocation6 + $0x94] ss:$72 sps:$4 sm:$0xff]   ;;  %v15779_v25 = vld [vmem:[#allocation6 + $0xa20] ss:$72 sps:$4 sm:$0xff]   ;;  %v15782_v27 = vld [vmem:[#allocation6 + $0x90] ss:$72 sps:$4 sm:$0xff]  }
  0x8d   :  { %v15783_v26 = vld [vmem:[#allocation6 + $0x994] ss:$72 sps:$4 sm:$0xff]   ;;  %v15786_v28 = vld [vmem:[#allocation6 + $0x4] ss:$72 sps:$4 sm:$0xff]   ;;  %v15785_v29 = vld [vmem:[#allocation6 + $0x990] ss:$72 sps:$4 sm:$0xff]  }
  0x8e   :  { %5509 = vmatpush1.bf16.msra.mxu0 %v15758_v10  ;;  %v15789_v30 = vld [vmem:[#allocation6 + $0x904] ss:$72 sps:$4 sm:$0xff]   ;;  %v15788_v31 = vld [vmem:[#allocation6] ss:$72 sps:$4 sm:$0xff]   ;;  %v15792_v32 = vld [vmem:[#allocation6 + $0x874] ss:$72 sps:$4 sm:$0xff]  }
  0x8f   :  { %5510 = vmatprep.subr.bf16.mxu0 %v15762_v12  ;;  %5552 = vmatpush1.bf16.msra.mxu1 %v15761_v13  ;;  %v15791_v33 = vld [vmem:[#allocation6 + $0x900] ss:$72 sps:$4 sm:$0xff]   ;;  %v15795_v34 = vld [vmem:[#allocation6 + $0x1174] ss:$72 sps:$4 sm:$0xff]   ;;  %v15794_v35 = vld [vmem:[#allocation6 + $0x870] ss:$72 sps:$4 sm:$0xff]  }
  0x90   :  { %5553 = vmatprep.subr.bf16.mxu1 %v15765_v14  ;;  %v15798_v36 = vld [vmem:[#allocation6 + $0x7e4] ss:$72 sps:$4 sm:$0xff]   ;;  %v15797_v37 = vld [vmem:[#allocation6 + $0x1170] ss:$72 sps:$4 sm:$0xff]   ;;  %v15800_v39 = vld [vmem:[#allocation6 + $0x7e0] ss:$72 sps:$4 sm:$0xff]  }
  0x91   :  { %v15801_v38 = vld [vmem:[#allocation6 + $0x10e4] ss:$72 sps:$4 sm:$0xff]   ;;  %v15804_v40 = vld [vmem:[#allocation6 + $0x754] ss:$72 sps:$4 sm:$0xff]   ;;  %v15803_v41 = vld [vmem:[#allocation6 + $0x10e0] ss:$72 sps:$4 sm:$0xff]  }
  0x92   :  { %5511 = vmatpush1.bf16.msra.mxu0 %v15764_v15  ;;  %v15807_v42 = vld [vmem:[#allocation6 + $0x1054] ss:$72 sps:$4 sm:$0xff]   ;;  %v15806_v43 = vld [vmem:[#allocation6 + $0x750] ss:$72 sps:$4 sm:$0xff]   ;;  %v15810_v44 = vld [vmem:[#allocation6 + $0x6c4] ss:$72 sps:$4 sm:$0xff]  }
  0x93   :  { %5512 = vmatprep.subr.bf16.mxu0 %v15768_v16  ;;  %5554 = vmatpush1.bf16.msra.mxu1 %v15767_v17  ;;  %v15809_v45 = vld [vmem:[#allocation6 + $0x1050] ss:$72 sps:$4 sm:$0xff]   ;;  %v15813_v46 = vld [vmem:[#allocation6 + $0xfc4] ss:$72 sps:$4 sm:$0xff]   ;;  %s19642_s21 = sld [smem:[#allocation54_spill]]  ;;  %vm6808_vm0 = vcmask 130048  }
  0x94   :  { %5555 = vmatprep.subr.bf16.mxu1 %v15771_v18  ;;  %v15812_v49 = vld [vmem:[#allocation6 + $0x6c0] ss:$72 sps:$4 sm:$0xff]   ;;  %v15816_v51 = vld [vmem:[#allocation6 + $0x634] ss:$72 sps:$4 sm:$0xff]   ;;  %v15818_v57 = vld [vmem:[#allocation6 + $0x630] ss:$72 sps:$4 sm:$0xff]  }
  0x95   :  { %v15815_v52 = vld [vmem:[#allocation6 + $0xfc0] ss:$72 sps:$4 sm:$0xff]   ;;  %v15819_v55 = vld [vmem:[#allocation6 + $0xf34] ss:$72 sps:$4 sm:$0xff]   ;;  %v15822_v58 = vld [vmem:[#allocation6 + $0x5a4] ss:$72 sps:$4 sm:$0xff]  }
  0x96   :  { %5513 = vmatpush1.bf16.msra.mxu0 %v15770_v19  ;;  %v15821_v59 = vld [vmem:[#allocation6 + $0xf30] ss:$72 sps:$4 sm:$0xff]   ;;  %v15825_v60 = vld [vmem:[#allocation6 + $0xea4] ss:$72 sps:$4 sm:$0xff]   ;;  %v15824_v61 = vld [vmem:[#allocation6 + $0x5a0] ss:$72 sps:$4 sm:$0xff]  }
  0x97   :  { %5514 = vmatprep.subr.bf16.mxu0 %v15774_v20  ;;  %5556 = vmatpush1.bf16.msra.mxu1 %v15773_v21  ;;  %v15828_v62 = vld [vmem:[#allocation6 + $0x514] ss:$72 sps:$4 sm:$0xff]   ;;  %v15827_v63 = vld [vmem:[#allocation6 + $0xea0] ss:$72 sps:$4 sm:$0xff]   ;;  %v15830_v1 = vld [vmem:[#allocation6 + $0x510] ss:$72 sps:$4 sm:$0xff]  }
  0x98   :  { %5557 = vmatprep.subr.bf16.mxu1 %v15777_v22  ;;  %v15831_v0 = vld [vmem:[#allocation6 + $0xe14] ss:$72 sps:$4 sm:$0xff]   ;;  %v15833_v2 = vld [vmem:[#allocation6 + $0xe10] ss:$72 sps:$4 sm:$0xff]   ;;  %v15834_v3 = vld [vmem:[#allocation6 + $0x484] ss:$72 sps:$4 sm:$0xff]  }
  0x99   :  { %v207_v47 = vld [vmem:[%s19642_s21 + $0x8] sm:$0xff]  ;;  %v213_v48 = vld [vmem:[%s19642_s21 + $0x38] sm:$0xff]  ;;  %v206_v6 = vld [vmem:[%s19642_s21] sm:$0xff]  ;;  %s18683_s12 = smov [#allocation3]  }
  0x9a   :  { %5515 = vmatpush1.bf16.msra.mxu0 %v15776_v23  ;;  %v18811_v50 = vpack.c.bf16 %v213_v48, %v207_v47  ;;  %v209_v53 = vld [vmem:[%s19642_s21 + $0x18] sm:$0xff]  ;;  %v215_v54 = vld [vmem:[%s19642_s21 + $0x48] sm:$0xff]  ;;  %v212_v8 = vld [vmem:[%s19642_s21 + $0x30] sm:$0xff]  ;;  %s202_s14 = sshll.u32 %s18683_s12, 4  ;;  %s203_s14 = int_to_ptr.vmem [resolvable:$true] %s202_s14 }
  0x9b   :  { %5516 = vmatprep.subr.bf16.mxu0 %v15780_v24  ;;  %5558 = vmatpush1.bf16.msra.mxu1 %v15779_v25  ;;  %v18820_v56 = vpack.c.bf16 %v215_v54, %v209_v53  ;;  %v15836_v4 = vld [vmem:[#allocation6 + $0x480] ss:$72 sps:$4 sm:$0xff]   ;;  %v15837_v5 = vld [vmem:[#allocation6 + $0xd84] ss:$72 sps:$4 sm:$0xff]   ;;  %v15842_v9 = vld [vmem:[#allocation6 + $0x15f4] ss:$72 sps:$4 sm:$0xff]   ;;  %v18835_v12 = vpack.c.bf16 %v212_v8, %v206_v6 }
  0x9c   :  { %5559 = vmatprep.subr.bf16.mxu1 %v15783_v26  ;;  %5536 = vmatprep.mubr.bf16.mxu0 %v18811_v50  ;;  %v15839_v7 = vld [vmem:[#allocation6 + $0xd80] ss:$72 sps:$4 sm:$0xff]   ;;  %v208_v10 = vld [vmem:[%s19642_s21 + $0x10] sm:$0xff]  ;;  %v15845_v13 = vld [vmem:[#allocation6 + $0x3fc] ss:$72 sps:$4 sm:$0xff]  }
  0x9d   :  { %5579 = vmatprep.mubr.bf16.mxu1 %v18820_v56  ;;  %v214_v11 = vld [vmem:[%s19642_s21 + $0x40] sm:$0xff]  ;;  %v15840_v14 = vld [vmem:[#allocation6 + $0x15f0] ss:$72 sps:$4 sm:$0xff]   ;;  %v15851_v18 = vld [vmem:[#allocation6 + $0x36c] ss:$72 sps:$4 sm:$0xff]  }
  0x9e   :  { %5517 = vmatpush1.bf16.msra.mxu0 %v15782_v27  ;;  %v18837_v15 = vpack.c.bf16 %v214_v11, %v208_v10  ;;  %v15848_v16 = vld [vmem:[#allocation6 + $0x1564] ss:$72 sps:$4 sm:$0xff]   ;;  %v15843_v17 = vld [vmem:[#allocation6 + $0x3f8] ss:$72 sps:$4 sm:$0xff]   ;;  %v15854_v20 = vld [vmem:[#allocation6 + $0x14d4] ss:$72 sps:$4 sm:$0xff]  }
  0x9f   :  { %5518 = vmatprep.subr.bf16.mxu0 %v15786_v28  ;;  %5560 = vmatpush1.bf16.msra.mxu1 %v15785_v29  ;;  %v15846_v19 = vld [vmem:[#allocation6 + $0x1560] ss:$72 sps:$4 sm:$0xff]   ;;  %v15857_v22 = vld [vmem:[#allocation6 + $0x2dc] ss:$72 sps:$4 sm:$0xff]   ;;  %v15852_v23 = vld [vmem:[#allocation6 + $0x14d0] ss:$72 sps:$4 sm:$0xff]  }
  0xa0   :  { %5561 = vmatprep.subr.bf16.mxu1 %v15789_v30  ;;  %v15849_v21 = vld [vmem:[#allocation6 + $0x368] ss:$72 sps:$4 sm:$0xff]   ;;  %v15860_v24 = vld [vmem:[#allocation6 + $0x1444] ss:$72 sps:$4 sm:$0xff]   ;;  %v15855_v25 = vld [vmem:[#allocation6 + $0x2d8] ss:$72 sps:$4 sm:$0xff]  }
  0xa1   :  { %v15863_v26 = vld [vmem:[#allocation6 + $0x24c] ss:$72 sps:$4 sm:$0xff]   ;;  %v15858_v27 = vld [vmem:[#allocation6 + $0x1440] ss:$72 sps:$4 sm:$0xff]   ;;  %v15869_v30 = vld [vmem:[#allocation6 + $0x1bc] ss:$72 sps:$4 sm:$0xff]  }
  0xa2   :  { %5519 = vmatpush1.bf16.msra.mxu0 %v15788_v31  ;;  %v15866_v28 = vld [vmem:[#allocation6 + $0x13b4] ss:$72 sps:$4 sm:$0xff]   ;;  %v15861_v29 = vld [vmem:[#allocation6 + $0x248] ss:$72 sps:$4 sm:$0xff]   ;;  %v15891_v53 = vld [vmem:[#allocation6 + $0x878] ss:$72 sps:$4 sm:$0xff]  }
  0xa3   :  { %5520 = vmatprep.subr.bf16.mxu0 %v15792_v32  ;;  %5562 = vmatpush1.bf16.msra.mxu1 %v15791_v33  ;;  %v15864_v31 = vld [vmem:[#allocation6 + $0x13b0] ss:$72 sps:$4 sm:$0xff]   ;;  %v15872_v32 = vld [vmem:[#allocation6 + $0x1324] ss:$72 sps:$4 sm:$0xff]   ;;  %v15890_v47 = vld [vmem:[#allocation6 + $0x1a74] ss:$72 sps:$4 sm:$0xff]  }
  0xa4   :  { %5563 = vmatprep.subr.bf16.mxu1 %v15795_v34  ;;  %v15867_v33 = vld [vmem:[#allocation6 + $0x1b8] ss:$72 sps:$4 sm:$0xff]   ;;  %v15875_v34 = vld [vmem:[#allocation6 + $0x12c] ss:$72 sps:$4 sm:$0xff]   ;;  %v15885_v48 = vld [vmem:[#allocation6 + $0x8] ss:$72 sps:$4 sm:$0xff]  }
  0xa5   :  { %v15899_v54 = vld [vmem:[#allocation6 + $0x7ec] ss:$72 sps:$4 sm:$0xff]   ;;  %v15915_v6 = vld [vmem:[#allocation6 + $0x638] ss:$72 sps:$4 sm:$0xff]   ;;  %v15921_v10 = vld [vmem:[#allocation6 + $0x5a8] ss:$72 sps:$4 sm:$0xff]  }
  0xa6   :  { %5521 = vmatpush2.bf16.msra.mxu0 %v15794_v35  ;;  %v15870_v35 = vld [vmem:[#allocation6 + $0x1320] ss:$72 sps:$4 sm:$0xff]   ;;  %v15929_v11 = vld [vmem:[#allocation6 + $0x51c] ss:$72 sps:$4 sm:$0xff]  }
  0xa7   :  { %5522 = vmatprep.subr.bf16.mxu0 %v15798_v36  ;;  %5564 = vmatpush2.bf16.msra.mxu1 %v15797_v37  ;;  %v15878_v36 = vld [vmem:[#allocation6 + $0x1294] ss:$72 sps:$4 sm:$0xff]   ;;  %v15873_v37 = vld [vmem:[#allocation6 + $0x128] ss:$72 sps:$4 sm:$0xff]  }
  0xa8   :  { %5565 = vmatprep.subr.bf16.mxu1 %v15801_v38  ;;  %v15881_v38 = vld [vmem:[#allocation6 + $0x9c] ss:$72 sps:$4 sm:$0xff]   ;;  %v15918_v8 = vld [vmem:[#allocation6 + $0x17a0] ss:$72 sps:$4 sm:$0xff]  }
  0xaa   :  { %5523 = vmatpush2.bf16.msra.mxu0 %v15800_v39  ;;  %v15876_v39 = vld [vmem:[#allocation6 + $0x1290] ss:$72 sps:$4 sm:$0xff]  }
  0xab   :  { %5524 = vmatprep.subr.bf16.mxu0 %v15804_v40  ;;  %5566 = vmatpush2.bf16.msra.mxu1 %v15803_v41  ;;  %v15884_v40 = vld [vmem:[#allocation6 + $0x1204] ss:$72 sps:$4 sm:$0xff]  }
  0xac   :  { %5567 = vmatprep.subr.bf16.mxu1 %v15807_v42  ;;  %v211_v41 = vld [vmem:[%s19642_s21 + $0x28] sm:$0xff]  ;;  %v217_v42 = vld [vmem:[%s19642_s21 + $0x58] sm:$0xff] }
  0xae   :  { %5525 = vmatpush2.bf16.msra.mxu0 %v15806_v43  ;;  %v15879_v43 = vld [vmem:[#allocation6 + $0x98] ss:$72 sps:$4 sm:$0xff]  }
  0xaf   :  { %5526 = vmatprep.subr.bf16.mxu0 %v15810_v44  ;;  %5568 = vmatpush2.bf16.msra.mxu1 %v15809_v45  ;;  %v18848_v44 = vpack.c.bf16 %v217_v42, %v211_v41  ;;  %v15887_v45 = vld [vmem:[#allocation6 + $0xc] ss:$72 sps:$4 sm:$0xff]   ;;  %v15960_v41 = vld [vmem:[#allocation6 + $0xab8] ss:$72 sps:$4 sm:$0xff]  }
  0xb0   :  { %5569 = vmatprep.subr.bf16.mxu1 %v15813_v46  ;;  %v15882_v46 = vld [vmem:[#allocation6 + $0x1200] ss:$72 sps:$4 sm:$0xff]   ;;  %v15968_v42 = vld [vmem:[#allocation6 + $0xa2c] ss:$72 sps:$4 sm:$0xff]  }
  0xb2   :  { %5527 = vmatpush2.bf16.msra.mxu0 %v15812_v49  ;;  %v15893_v49 = vld [vmem:[#allocation6 + $0x87c] ss:$72 sps:$4 sm:$0xff]  }
  0xb3   :  { %5528 = vmatprep.subr.bf16.mxu0 %v15816_v51  ;;  %5570 = vmatpush2.bf16.msra.mxu1 %v15815_v52  ;;  %v15888_v51 = vld [vmem:[#allocation6 + $0x1a70] ss:$72 sps:$4 sm:$0xff]   ;;  %v15896_v52 = vld [vmem:[#allocation6 + $0x19e4] ss:$72 sps:$4 sm:$0xff]  }
  0xb4   :  { %5571 = vmatprep.subr.bf16.mxu1 %v15819_v55  ;;  %v15894_v55 = vld [vmem:[#allocation6 + $0x19e0] ss:$72 sps:$4 sm:$0xff]  }
  0xb6   :  { %5529 = vmatpush2.bf16.msra.mxu0 %v15818_v57  ;;  %v15902_v57 = vld [vmem:[#allocation6 + $0x1954] ss:$72 sps:$4 sm:$0xff]  }
  0xb7   :  { %5530 = vmatprep.subr.bf16.mxu0 %v15822_v58  ;;  %5572 = vmatpush2.bf16.msra.mxu1 %v15821_v59  ;;  %v15897_v58 = vld [vmem:[#allocation6 + $0x7e8] ss:$72 sps:$4 sm:$0xff]   ;;  %v15905_v59 = vld [vmem:[#allocation6 + $0x75c] ss:$72 sps:$4 sm:$0xff]  }
  0xb8   :  { %5573 = vmatprep.subr.bf16.mxu1 %v15825_v60  ;;  %v15900_v60 = vld [vmem:[#allocation6 + $0x1950] ss:$72 sps:$4 sm:$0xff]  }
  0xba   :  { %5531 = vmatpush2.bf16.msra.mxu0 %v15824_v61  ;;  %v15908_v61 = vld [vmem:[#allocation6 + $0x18c4] ss:$72 sps:$4 sm:$0xff]  }
  0xbb   :  { %5532 = vmatprep.subr.bf16.mxu0 %v15828_v62  ;;  %5574 = vmatpush2.bf16.msra.mxu1 %v15827_v63  ;;  %v15903_v62 = vld [vmem:[#allocation6 + $0x758] ss:$72 sps:$4 sm:$0xff]   ;;  %v15911_v63 = vld [vmem:[#allocation6 + $0x6cc] ss:$72 sps:$4 sm:$0xff]  }
  0xbc   :  { %5575 = vmatprep.subr.bf16.mxu1 %v15831_v0  ;;  %v15906_v0 = vld [vmem:[#allocation6 + $0x18c0] ss:$72 sps:$4 sm:$0xff]  }
  0xbe   :  { %5533 = vmatpush2.bf16.msra.mxu0 %v15830_v1  ;;  %v15914_v1 = vld [vmem:[#allocation6 + $0x1834] ss:$72 sps:$4 sm:$0xff]  }
  0xbf   :  { %5534 = vmatprep.subr.bf16.mxu0 %v15834_v3  ;;  %5576 = vmatpush2.bf16.msra.mxu1 %v15833_v2  ;;  %v15909_v2 = vld [vmem:[#allocation6 + $0x6c8] ss:$72 sps:$4 sm:$0xff]   ;;  %v15917_v3 = vld [vmem:[#allocation6 + $0x63c] ss:$72 sps:$4 sm:$0xff]  }
  0xc0   :  { %5577 = vmatprep.subr.bf16.mxu1 %v15837_v5  ;;  %v15920_v5 = vld [vmem:[#allocation6 + $0x17a4] ss:$72 sps:$4 sm:$0xff]  }
  0xc2   :  { %5535 = vmatpush2.bf16.msra.mxu0 %v15836_v4  ;;  %v15912_v4 = vld [vmem:[#allocation6 + $0x1830] ss:$72 sps:$4 sm:$0xff]  }
  0xc3   :  { %5590 = vmatprep.subr.bf16.mxu0 %v15842_v9  ;;  %5578 = vmatpush2.bf16.msra.mxu1 %v15839_v7  ;;  %v15923_v7 = vld [vmem:[#allocation6 + $0x5ac] ss:$72 sps:$4 sm:$0xff]  }
  0xc4   :  { %5633 = vmatprep.subr.bf16.mxu1 %v15845_v13  ;;  %v15926_v9 = vld [vmem:[#allocation6 + $0x1714] ss:$72 sps:$4 sm:$0xff]   ;;  %v15924_v13 = vld [vmem:[#allocation6 + $0x1710] ss:$72 sps:$4 sm:$0xff]  }
  0xc5   :  { %5537 = vmatmul.mubr.bf16.vlgmr.msra.gmra.mxu0 %v18835_v12 }
  0xc6   :  { %5591 = vmatpush1.bf16.msra.mxu0 %v15840_v14  ;;  %5580 = vmatmul.mubr.bf16.vlgmr.msra.gmra.mxu1 %v18837_v15  ;;  %v15932_v14 = vld [vmem:[#allocation6 + $0x1684] ss:$72 sps:$4 sm:$0xff]  }
  0xc7   :  { %5592 = vmatprep.subr.bf16.mxu0 %v15848_v16  ;;  %5634 = vmatpush1.bf16.msra.mxu1 %v15843_v17  ;;  %v15927_v16 = vld [vmem:[#allocation6 + $0x518] ss:$72 sps:$4 sm:$0xff]  }
  0xc8   :  { %5665 = vmatprep.mubr.bf16.mxu1 %v18811_v50  ;;  %5635 = vmatprep.subr.bf16.mxu1 %v15851_v18  ;;  %v15930_v17 = vld [vmem:[#allocation6 + $0x1680] ss:$72 sps:$4 sm:$0xff]   ;;  %v15935_v18 = vld [vmem:[#allocation6 + $0x48c] ss:$72 sps:$4 sm:$0xff]  }
  0xc9   :  { %5622 = vmatprep.mubr.bf16.mxu0 %v18848_v44 }
  0xca   :  { %5593 = vmatpush1.bf16.msra.mxu0 %v15846_v19  ;;  %v210_v19 = vld [vmem:[%s19642_s21 + $0x20] sm:$0xff] }
  0xcb   :  { %5594 = vmatprep.subr.bf16.mxu0 %v15854_v20  ;;  %5636 = vmatpush1.bf16.msra.mxu1 %v15849_v21  ;;  %v216_v20 = vld [vmem:[%s19642_s21 + $0x50] sm:$0xff]  ;;  %v15938_v21 = vld [vmem:[#allocation6 + $0xcfc] ss:$72 sps:$4 sm:$0xff]  }
  0xcc   :  { %5637 = vmatprep.subr.bf16.mxu1 %v15857_v22  ;;  %v15933_v22 = vld [vmem:[#allocation6 + $0x488] ss:$72 sps:$4 sm:$0xff]  }
  0xce   :  { %5595 = vmatpush1.bf16.msra.mxu0 %v15852_v23  ;;  %v18857_v23 = vpack.c.bf16 %v216_v20, %v210_v19  ;;  %v16022_v19 = vld [vmem:[#allocation6 + $0xe1c] ss:$72 sps:$4 sm:$0xff]   ;;  %v16017_v20 = vld [vmem:[#allocation6 + $0x17a8] ss:$72 sps:$4 sm:$0xff]  }
  0xcf   :  { %5596 = vmatprep.subr.bf16.mxu0 %v15860_v24  ;;  %5638 = vmatpush1.bf16.msra.mxu1 %v15855_v25  ;;  %v15941_v24 = vld [vmem:[#allocation6 + $0x15fc] ss:$72 sps:$4 sm:$0xff]   ;;  %v15936_v25 = vld [vmem:[#allocation6 + $0xcf8] ss:$72 sps:$4 sm:$0xff]  }
  0xd0   :  { %5639 = vmatprep.subr.bf16.mxu1 %v15863_v26  ;;  %v15944_v26 = vld [vmem:[#allocation6 + $0xc6c] ss:$72 sps:$4 sm:$0xff]  }
  0xd2   :  { %5597 = vmatpush1.bf16.msra.mxu0 %v15858_v27  ;;  %v15939_v27 = vld [vmem:[#allocation6 + $0x15f8] ss:$72 sps:$4 sm:$0xff]  }
  0xd3   :  { %5598 = vmatprep.subr.bf16.mxu0 %v15866_v28  ;;  %5640 = vmatpush1.bf16.msra.mxu1 %v15861_v29  ;;  %v15947_v28 = vld [vmem:[#allocation6 + $0x156c] ss:$72 sps:$4 sm:$0xff]   ;;  %v15942_v29 = vld [vmem:[#allocation6 + $0xc68] ss:$72 sps:$4 sm:$0xff]  }
  0xd4   :  { %5641 = vmatprep.subr.bf16.mxu1 %v15869_v30  ;;  %v15950_v30 = vld [vmem:[#allocation6 + $0xbdc] ss:$72 sps:$4 sm:$0xff]  }
  0xd6   :  { %5599 = vmatpush1.bf16.msra.mxu0 %v15864_v31  ;;  %v15945_v31 = vld [vmem:[#allocation6 + $0x1568] ss:$72 sps:$4 sm:$0xff]  }
  0xd7   :  { %5600 = vmatprep.subr.bf16.mxu0 %v15872_v32  ;;  %5642 = vmatpush1.bf16.msra.mxu1 %v15867_v33  ;;  %v15953_v32 = vld [vmem:[#allocation6 + $0x14dc] ss:$72 sps:$4 sm:$0xff]   ;;  %v15948_v33 = vld [vmem:[#allocation6 + $0xbd8] ss:$72 sps:$4 sm:$0xff]  }
  0xd8   :  { %5643 = vmatprep.subr.bf16.mxu1 %v15875_v34  ;;  %v15956_v34 = vld [vmem:[#allocation6 + $0xb4c] ss:$72 sps:$4 sm:$0xff]  }
  0xda   :  { %5601 = vmatpush1.bf16.msra.mxu0 %v15870_v35  ;;  %v15951_v35 = vld [vmem:[#allocation6 + $0x14d8] ss:$72 sps:$4 sm:$0xff]  }
  0xdb   :  { %5602 = vmatprep.subr.bf16.mxu0 %v15878_v36  ;;  %5644 = vmatpush1.bf16.msra.mxu1 %v15873_v37  ;;  %v15959_v36 = vld [vmem:[#allocation6 + $0x144c] ss:$72 sps:$4 sm:$0xff]   ;;  %v15954_v37 = vld [vmem:[#allocation6 + $0xb48] ss:$72 sps:$4 sm:$0xff]  }
  0xdc   :  { %5645 = vmatprep.subr.bf16.mxu1 %v15881_v38  ;;  %v15962_v38 = vld [vmem:[#allocation6 + $0xabc] ss:$72 sps:$4 sm:$0xff]  }
  0xde   :  { %5603 = vmatpush1.bf16.msra.mxu0 %v15876_v39  ;;  %v15957_v39 = vld [vmem:[#allocation6 + $0x1448] ss:$72 sps:$4 sm:$0xff]  }
  0xdf   :  { %5604 = vmatprep.subr.bf16.mxu0 %v15884_v40  ;;  %5646 = vmatpush1.bf16.msra.mxu1 %v15879_v43  ;;  %v15965_v40 = vld [vmem:[#allocation6 + $0x13bc] ss:$72 sps:$4 sm:$0xff]   ;;  %v15963_v43 = vld [vmem:[#allocation6 + $0x13b8] ss:$72 sps:$4 sm:$0xff]  }
  0xe0   :  { %5647 = vmatprep.subr.bf16.mxu1 %v15887_v45  ;;  %v15971_v45 = vld [vmem:[#allocation6 + $0x132c] ss:$72 sps:$4 sm:$0xff]  }
  0xe2   :  { %5605 = vmatpush1.bf16.msra.mxu0 %v15882_v46  ;;  %v15966_v46 = vld [vmem:[#allocation6 + $0xa28] ss:$72 sps:$4 sm:$0xff]  }
  0xe3   :  { %5606 = vmatprep.subr.bf16.mxu0 %v15890_v47  ;;  %5648 = vmatpush1.bf16.msra.mxu1 %v15885_v48  ;;  %v15974_v47 = vld [vmem:[#allocation6 + $0x99c] ss:$72 sps:$4 sm:$0xff]   ;;  %v15969_v48 = vld [vmem:[#allocation6 + $0x1328] ss:$72 sps:$4 sm:$0xff]  }
  0xe4   :  { %5649 = vmatprep.subr.bf16.mxu1 %v15893_v49  ;;  %v15977_v49 = vld [vmem:[#allocation6 + $0x129c] ss:$72 sps:$4 sm:$0xff]  }
  0xe6   :  { %5607 = vmatpush2.bf16.msra.mxu0 %v15888_v51  ;;  %v15972_v51 = vld [vmem:[#allocation6 + $0x998] ss:$72 sps:$4 sm:$0xff]  }
  0xe7   :  { %5608 = vmatprep.subr.bf16.mxu0 %v15896_v52  ;;  %5650 = vmatpush2.bf16.msra.mxu1 %v15891_v53  ;;  %v15980_v52 = vld [vmem:[#allocation6 + $0x90c] ss:$72 sps:$4 sm:$0xff]   ;;  %v15975_v53 = vld [vmem:[#allocation6 + $0x1298] ss:$72 sps:$4 sm:$0xff]  }
  0xe8   :  { %5651 = vmatprep.subr.bf16.mxu1 %v15899_v54  ;;  %v15983_v54 = vld [vmem:[#allocation6 + $0x120c] ss:$72 sps:$4 sm:$0xff]  }
  0xea   :  { %5609 = vmatpush2.bf16.msra.mxu0 %v15894_v55  ;;  %v15978_v55 = vld [vmem:[#allocation6 + $0x908] ss:$72 sps:$4 sm:$0xff]  }
  0xeb   :  { %5610 = vmatprep.subr.bf16.mxu0 %v15902_v57  ;;  %5652 = vmatpush2.bf16.msra.mxu1 %v15897_v58  ;;  %v15986_v57 = vld [vmem:[#allocation6 + $0x117c] ss:$72 sps:$4 sm:$0xff]   ;;  %v15981_v58 = vld [vmem:[#allocation6 + $0x1208] ss:$72 sps:$4 sm:$0xff]  }
  0xec   :  { %5653 = vmatprep.subr.bf16.mxu1 %v15905_v59  ;;  %v15989_v59 = vld [vmem:[#allocation6 + $0x1a7c] ss:$72 sps:$4 sm:$0xff]  }
  0xee   :  { %5611 = vmatpush2.bf16.msra.mxu0 %v15900_v60  ;;  %v15984_v60 = vld [vmem:[#allocation6 + $0x1178] ss:$72 sps:$4 sm:$0xff]  }
  0xef   :  { %5612 = vmatprep.subr.bf16.mxu0 %v15908_v61  ;;  %5654 = vmatpush2.bf16.msra.mxu1 %v15903_v62  ;;  %v15992_v61 = vld [vmem:[#allocation6 + $0x10ec] ss:$72 sps:$4 sm:$0xff]   ;;  %v15987_v62 = vld [vmem:[#allocation6 + $0x1a78] ss:$72 sps:$4 sm:$0xff]  }
  0xf0   :  { %5655 = vmatprep.subr.bf16.mxu1 %v15911_v63  ;;  %v15995_v63 = vld [vmem:[#allocation6 + $0x19ec] ss:$72 sps:$4 sm:$0xff]  }
  0xf2   :  { %5613 = vmatpush2.bf16.msra.mxu0 %v15906_v0  ;;  %v15990_v0 = vld [vmem:[#allocation6 + $0x10e8] ss:$72 sps:$4 sm:$0xff]  }
  0xf3   :  { %5614 = vmatprep.subr.bf16.mxu0 %v15914_v1  ;;  %5656 = vmatpush2.bf16.msra.mxu1 %v15909_v2  ;;  %v15998_v1 = vld [vmem:[#allocation6 + $0x105c] ss:$72 sps:$4 sm:$0xff]   ;;  %v15993_v2 = vld [vmem:[#allocation6 + $0x19e8] ss:$72 sps:$4 sm:$0xff]  }
  0xf4   :  { %5657 = vmatprep.subr.bf16.mxu1 %v15917_v3  ;;  %v16001_v3 = vld [vmem:[#allocation6 + $0x195c] ss:$72 sps:$4 sm:$0xff]  }
  0xf6   :  { %5615 = vmatpush2.bf16.msra.mxu0 %v15912_v4  ;;  %v15996_v4 = vld [vmem:[#allocation6 + $0x1058] ss:$72 sps:$4 sm:$0xff]  }
  0xf7   :  { %5616 = vmatprep.subr.bf16.mxu0 %v15920_v5  ;;  %5658 = vmatpush2.bf16.msra.mxu1 %v15915_v6  ;;  %v16004_v5 = vld [vmem:[#allocation6 + $0xfcc] ss:$72 sps:$4 sm:$0xff]   ;;  %v15999_v6 = vld [vmem:[#allocation6 + $0x1958] ss:$72 sps:$4 sm:$0xff]  }
  0xf8   :  { %5659 = vmatprep.subr.bf16.mxu1 %v15923_v7  ;;  %v16007_v7 = vld [vmem:[#allocation6 + $0x18cc] ss:$72 sps:$4 sm:$0xff]  }
  0xfa   :  { %5617 = vmatpush2.bf16.msra.mxu0 %v15918_v8  ;;  %v16002_v8 = vld [vmem:[#allocation6 + $0xfc8] ss:$72 sps:$4 sm:$0xff]  }
  0xfb   :  { %5618 = vmatprep.subr.bf16.mxu0 %v15926_v9  ;;  %5660 = vmatpush2.bf16.msra.mxu1 %v15921_v10  ;;  %v16010_v9 = vld [vmem:[#allocation6 + $0xf3c] ss:$72 sps:$4 sm:$0xff]   ;;  %v16005_v10 = vld [vmem:[#allocation6 + $0x18c8] ss:$72 sps:$4 sm:$0xff]  }
  0xfc   :  { %5661 = vmatprep.subr.bf16.mxu1 %v15929_v11  ;;  %v16013_v11 = vld [vmem:[#allocation6 + $0x183c] ss:$72 sps:$4 sm:$0xff]  }
  0xfe   :  { %5619 = vmatpush2.bf16.msra.mxu0 %v15924_v13  ;;  %v16008_v13 = vld [vmem:[#allocation6 + $0xf38] ss:$72 sps:$4 sm:$0xff]  }
  0xff   :  { %5620 = vmatprep.subr.bf16.mxu0 %v15932_v14  ;;  %5662 = vmatpush2.bf16.msra.mxu1 %v15927_v16  ;;  %v16016_v14 = vld [vmem:[#allocation6 + $0xeac] ss:$72 sps:$4 sm:$0xff]   ;;  %v16011_v16 = vld [vmem:[#allocation6 + $0x1838] ss:$72 sps:$4 sm:$0xff]  }
 0x100   :  { %5663 = vmatprep.subr.bf16.mxu1 %v15935_v18  ;;  %v16014_v18 = vld [vmem:[#allocation6 + $0xea8] ss:$72 sps:$4 sm:$0xff]  }
 0x102   :  { %5621 = vmatpush2.bf16.msra.mxu0 %v15930_v17  ;;  %v16019_v17 = vld [vmem:[#allocation6 + $0x17ac] ss:$72 sps:$4 sm:$0xff]  }
 0x103   :  { %5676 = vmatprep.subr.bf16.mxu0 %v15938_v21  ;;  %5664 = vmatpush2.bf16.msra.mxu1 %v15933_v22  ;;  %v16025_v21 = vld [vmem:[#allocation6 + $0x171c] ss:$72 sps:$4 sm:$0xff]   ;;  %v16020_v22 = vld [vmem:[#allocation6 + $0xe18] ss:$72 sps:$4 sm:$0xff]  }
 0x104   :  { %5719 = vmatprep.subr.bf16.mxu1 %v15941_v24  ;;  %v16028_v24 = vld [vmem:[#allocation6 + $0xd8c] ss:$72 sps:$4 sm:$0xff]  }
 0x105   :  { %5623 = vmatmul.mubr.bf16.vlgmr.msra.gmra.mxu0 %v18857_v23 }
 0x106   :  { %5677 = vmatpush1.bf16.msra.mxu0 %v15936_v25  ;;  %5708 = vmatprep.mubr.bf16.mxu0 %v18820_v56  ;;  %v16023_v25 = vld [vmem:[#allocation6 + $0x1718] ss:$72 sps:$4 sm:$0xff]  }
 0x107   :  { %5666 = vmatmul.mubr.bf16.vlgmr.msra.gmra.mxu1 %v18835_v12  ;;  %5678 = vmatprep.subr.bf16.mxu0 %v15944_v26  ;;  %v16031_v26 = vld [vmem:[#allocation6 + $0x168c] ss:$72 sps:$4 sm:$0xff]  }
 0x108   :  { %5720 = vmatpush1.bf16.msra.mxu1 %v15939_v27  ;;  %5751 = vmatprep.mubr.bf16.mxu1 %v18848_v44  ;;  %v16026_v27 = vld [vmem:[#allocation6 + $0xd88] ss:$72 sps:$4 sm:$0xff]  }
 0x109   :  { %5721 = vmatprep.subr.bf16.mxu1 %v15947_v28  ;;  %v16034_v28 = vld [vmem:[#allocation6 + $0x404] ss:$72 sps:$4 sm:$0xff]  }
 0x10a   :  { %5679 = vmatpush1.bf16.msra.mxu0 %v15942_v29  ;;  %v16029_v29 = vld [vmem:[#allocation6 + $0x1688] ss:$72 sps:$4 sm:$0xff]  }
 0x10b   :  { %5680 = vmatprep.subr.bf16.mxu0 %v15950_v30  ;;  %v16037_v30 = vld [vmem:[#allocation6 + $0xd04] ss:$72 sps:$4 sm:$0xff]  }
 0x10c   :  { %5722 = vmatpush1.bf16.msra.mxu1 %v15945_v31  ;;  %v16032_v31 = vld [vmem:[#allocation6 + $0x400] ss:$72 sps:$4 sm:$0xff]  }
 0x10d   :  { %5723 = vmatprep.subr.bf16.mxu1 %v15953_v32  ;;  %v16040_v32 = vld [vmem:[#allocation6 + $0x374] ss:$72 sps:$4 sm:$0xff]  }
 0x10e   :  { %5681 = vmatpush1.bf16.msra.mxu0 %v15948_v33  ;;  %v16035_v33 = vld [vmem:[#allocation6 + $0xd00] ss:$72 sps:$4 sm:$0xff]  }
 0x10f   :  { %5682 = vmatprep.subr.bf16.mxu0 %v15956_v34  ;;  %v16043_v34 = vld [vmem:[#allocation6 + $0xc74] ss:$72 sps:$4 sm:$0xff]  }
 0x110   :  { %5724 = vmatpush1.bf16.msra.mxu1 %v15951_v35  ;;  %v16038_v35 = vld [vmem:[#allocation6 + $0x370] ss:$72 sps:$4 sm:$0xff]  }
 0x111   :  { %5725 = vmatprep.subr.bf16.mxu1 %v15959_v36  ;;  %v16046_v36 = vld [vmem:[#allocation6 + $0x2e4] ss:$72 sps:$4 sm:$0xff]  }
 0x112   :  { %5683 = vmatpush1.bf16.msra.mxu0 %v15954_v37  ;;  %v16041_v37 = vld [vmem:[#allocation6 + $0xc70] ss:$72 sps:$4 sm:$0xff]  }
 0x113   :  { %5684 = vmatprep.subr.bf16.mxu0 %v15962_v38  ;;  %v16049_v38 = vld [vmem:[#allocation6 + $0xbe4] ss:$72 sps:$4 sm:$0xff]  }
 0x114   :  { %5726 = vmatpush1.bf16.msra.mxu1 %v15957_v39  ;;  %v16044_v39 = vld [vmem:[#allocation6 + $0x2e0] ss:$72 sps:$4 sm:$0xff]  }
 0x115   :  { %5727 = vmatprep.subr.bf16.mxu1 %v15965_v40  ;;  %v16052_v40 = vld [vmem:[#allocation6 + $0x254] ss:$72 sps:$4 sm:$0xff]  }
 0x116   :  { %5685 = vmatpush1.bf16.msra.mxu0 %v15960_v41  ;;  %v16047_v41 = vld [vmem:[#allocation6 + $0xbe0] ss:$72 sps:$4 sm:$0xff]  }
 0x117   :  { %5686 = vmatprep.subr.bf16.mxu0 %v15968_v42  ;;  %v16055_v42 = vld [vmem:[#allocation6 + $0xb54] ss:$72 sps:$4 sm:$0xff]  }
 0x118   :  { %5728 = vmatpush1.bf16.msra.mxu1 %v15963_v43  ;;  %v16050_v43 = vld [vmem:[#allocation6 + $0x250] ss:$72 sps:$4 sm:$0xff]  }
 0x119   :  { %5729 = vmatprep.subr.bf16.mxu1 %v15971_v45  ;;  %v16058_v45 = vld [vmem:[#allocation6 + $0x1c4] ss:$72 sps:$4 sm:$0xff]  }
 0x11a   :  { %5687 = vmatpush1.bf16.msra.mxu0 %v15966_v46  ;;  %v16053_v46 = vld [vmem:[#allocation6 + $0xb50] ss:$72 sps:$4 sm:$0xff]  }
 0x11b   :  { %5688 = vmatprep.subr.bf16.mxu0 %v15974_v47  ;;  %v16061_v47 = vld [vmem:[#allocation6 + $0xac4] ss:$72 sps:$4 sm:$0xff]  }
 0x11c   :  { %5730 = vmatpush1.bf16.msra.mxu1 %v15969_v48  ;;  %v16056_v48 = vld [vmem:[#allocation6 + $0x1c0] ss:$72 sps:$4 sm:$0xff]  }
 0x11d   :  { %5731 = vmatprep.subr.bf16.mxu1 %v15977_v49  ;;  %v16064_v49 = vld [vmem:[#allocation6 + $0x134] ss:$72 sps:$4 sm:$0xff]  }
 0x11e   :  { %5689 = vmatpush1.bf16.msra.mxu0 %v15972_v51  ;;  %v16059_v51 = vld [vmem:[#allocation6 + $0xac0] ss:$72 sps:$4 sm:$0xff]  }
 0x11f   :  { %5690 = vmatprep.subr.bf16.mxu0 %v15980_v52  ;;  %v16067_v52 = vld [vmem:[#allocation6 + $0xa34] ss:$72 sps:$4 sm:$0xff]  }
 0x120   :  { %5732 = vmatpush1.bf16.msra.mxu1 %v15975_v53  ;;  %v16062_v53 = vld [vmem:[#allocation6 + $0x130] ss:$72 sps:$4 sm:$0xff]  }
 0x121   :  { %5733 = vmatprep.subr.bf16.mxu1 %v15983_v54  ;;  %v16070_v54 = vld [vmem:[#allocation6 + $0xa4] ss:$72 sps:$4 sm:$0xff]  }
 0x122   :  { %5691 = vmatpush1.bf16.msra.mxu0 %v15978_v55  ;;  %v16065_v55 = vld [vmem:[#allocation6 + $0xa30] ss:$72 sps:$4 sm:$0xff]  }
 0x123   :  { %5692 = vmatprep.subr.bf16.mxu0 %v15986_v57  ;;  %v16073_v57 = vld [vmem:[#allocation6 + $0x9a4] ss:$72 sps:$4 sm:$0xff]  }
 0x124   :  { %5734 = vmatpush1.bf16.msra.mxu1 %v15981_v58  ;;  %v16068_v58 = vld [vmem:[#allocation6 + $0xa0] ss:$72 sps:$4 sm:$0xff]  }
 0x125   :  { %5735 = vmatprep.subr.bf16.mxu1 %v15989_v59  ;;  %v16076_v59 = vld [vmem:[#allocation6 + $0x14] ss:$72 sps:$4 sm:$0xff]  }
 0x126   :  { %5693 = vmatpush2.bf16.msra.mxu0 %v15984_v60  ;;  %v16071_v60 = vld [vmem:[#allocation6 + $0x9a0] ss:$72 sps:$4 sm:$0xff]  }
 0x127   :  { %5694 = vmatprep.subr.bf16.mxu0 %v15992_v61  ;;  %v16079_v61 = vld [vmem:[#allocation6 + $0x914] ss:$72 sps:$4 sm:$0xff]  }
 0x128   :  { %5736 = vmatpush2.bf16.msra.mxu1 %v15987_v62  ;;  %v16074_v62 = vld [vmem:[#allocation6 + $0x10] ss:$72 sps:$4 sm:$0xff]  }
 0x129   :  { %5737 = vmatprep.subr.bf16.mxu1 %v15995_v63  ;;  %v16082_v63 = vld [vmem:[#allocation6 + $0x884] ss:$72 sps:$4 sm:$0xff]  }
 0x12a   :  { %5695 = vmatpush2.bf16.msra.mxu0 %v15990_v0  ;;  %v16077_v0 = vld [vmem:[#allocation6 + $0x910] ss:$72 sps:$4 sm:$0xff]  }
 0x12b   :  { %5696 = vmatprep.subr.bf16.mxu0 %v15998_v1  ;;  %v16085_v1 = vld [vmem:[#allocation6 + $0x1184] ss:$72 sps:$4 sm:$0xff]  }
 0x12c   :  { %5738 = vmatpush2.bf16.msra.mxu1 %v15993_v2  ;;  %v16080_v2 = vld [vmem:[#allocation6 + $0x880] ss:$72 sps:$4 sm:$0xff]  }
 0x12d   :  { %5739 = vmatprep.subr.bf16.mxu1 %v16001_v3  ;;  %v16088_v3 = vld [vmem:[#allocation6 + $0x7f4] ss:$72 sps:$4 sm:$0xff]  }
 0x12e   :  { %5697 = vmatpush2.bf16.msra.mxu0 %v15996_v4  ;;  %v16083_v4 = vld [vmem:[#allocation6 + $0x1180] ss:$72 sps:$4 sm:$0xff]  }
 0x12f   :  { %5698 = vmatprep.subr.bf16.mxu0 %v16004_v5  ;;  %v16091_v5 = vld [vmem:[#allocation6 + $0x10f4] ss:$72 sps:$4 sm:$0xff]  }
 0x130   :  { %5740 = vmatpush2.bf16.msra.mxu1 %v15999_v6  ;;  %v16086_v6 = vld [vmem:[#allocation6 + $0x7f0] ss:$72 sps:$4 sm:$0xff]  }
 0x131   :  { %5741 = vmatprep.subr.bf16.mxu1 %v16007_v7  ;;  %v16094_v7 = vld [vmem:[#allocation6 + $0x764] ss:$72 sps:$4 sm:$0xff]  }
 0x132   :  { %5699 = vmatpush2.bf16.msra.mxu0 %v16002_v8  ;;  %v16089_v8 = vld [vmem:[#allocation6 + $0x10f0] ss:$72 sps:$4 sm:$0xff]  }
 0x133   :  { %5700 = vmatprep.subr.bf16.mxu0 %v16010_v9  ;;  %v16097_v9 = vld [vmem:[#allocation6 + $0x1064] ss:$72 sps:$4 sm:$0xff]  }
 0x134   :  { %5742 = vmatpush2.bf16.msra.mxu1 %v16005_v10  ;;  %v16092_v10 = vld [vmem:[#allocation6 + $0x760] ss:$72 sps:$4 sm:$0xff]  }
 0x135   :  { %5743 = vmatprep.subr.bf16.mxu1 %v16013_v11  ;;  %v16100_v11 = vld [vmem:[#allocation6 + $0x6d4] ss:$72 sps:$4 sm:$0xff]  }
 0x136   :  { %5701 = vmatpush2.bf16.msra.mxu0 %v16008_v13  ;;  %v16095_v13 = vld [vmem:[#allocation6 + $0x1060] ss:$72 sps:$4 sm:$0xff]  }
 0x137   :  { %5702 = vmatprep.subr.bf16.mxu0 %v16016_v14  ;;  %v16103_v14 = vld [vmem:[#allocation6 + $0xfd4] ss:$72 sps:$4 sm:$0xff]  }
 0x138   :  { %5744 = vmatpush2.bf16.msra.mxu1 %v16011_v16  ;;  %v16098_v16 = vld [vmem:[#allocation6 + $0x6d0] ss:$72 sps:$4 sm:$0xff]  }
 0x139   :  { %5745 = vmatprep.subr.bf16.mxu1 %v16019_v17  ;;  %v16106_v17 = vld [vmem:[#allocation6 + $0x644] ss:$72 sps:$4 sm:$0xff]  }
 0x13a   :  { %5703 = vmatpush2.bf16.msra.mxu0 %v16014_v18  ;;  %v16101_v18 = vld [vmem:[#allocation6 + $0xfd0] ss:$72 sps:$4 sm:$0xff]  }
 0x13b   :  { %5704 = vmatprep.subr.bf16.mxu0 %v16022_v19  ;;  %v16109_v19 = vld [vmem:[#allocation6 + $0xf44] ss:$72 sps:$4 sm:$0xff]  }
 0x13c   :  { %5746 = vmatpush2.bf16.msra.mxu1 %v16017_v20  ;;  %v16104_v20 = vld [vmem:[#allocation6 + $0x640] ss:$72 sps:$4 sm:$0xff]  }
 0x13d   :  { %5747 = vmatprep.subr.bf16.mxu1 %v16025_v21  ;;  %v16112_v21 = vld [vmem:[#allocation6 + $0x5b4] ss:$72 sps:$4 sm:$0xff]  }
 0x13e   :  { %5705 = vmatpush2.bf16.msra.mxu0 %v16020_v22  ;;  %v16107_v22 = vld [vmem:[#allocation6 + $0xf40] ss:$72 sps:$4 sm:$0xff]  }
 0x13f   :  { %5706 = vmatprep.subr.bf16.mxu0 %v16028_v24  ;;  %v16115_v24 = vld [vmem:[#allocation6 + $0xeb4] ss:$72 sps:$4 sm:$0xff]  }
 0x140   :  { %5748 = vmatpush2.bf16.msra.mxu1 %v16023_v25  ;;  %v16110_v25 = vld [vmem:[#allocation6 + $0x5b0] ss:$72 sps:$4 sm:$0xff]  }
 0x141   :  { %5749 = vmatprep.subr.bf16.mxu1 %v16031_v26  ;;  %v1094_v26 = vlaneseq }
 0x142   :  { %5707 = vmatpush2.bf16.msra.mxu0 %v16026_v27  ;;  %v16118_v27 = vld [vmem:[#allocation6 + $0x524] ss:$72 sps:$4 sm:$0xff]  }
 0x143   :  { %5762 = vmatprep.subr.bf16.mxu0 %v16034_v28  ;;  %v16113_v28 = vld [vmem:[#allocation6 + $0xeb0] ss:$72 sps:$4 sm:$0xff]  }
 0x144   :  { %5750 = vmatpush2.bf16.msra.mxu1 %v16029_v29  ;;  %v16121_v29 = vld [vmem:[#allocation6 + $0xe24] ss:$72 sps:$4 sm:$0xff]  }
 0x145   :  { %5709 = vmatmul.mubr.bf16.vlgmr.msra.gmra.mxu0 %v18837_v15  ;;  %5805 = vmatprep.subr.bf16.mxu1 %v16037_v30  ;;  %v16116_v30 = vld [vmem:[#allocation6 + $0x520] ss:$72 sps:$4 sm:$0xff]  }
 0x146   :  { %5763 = vmatpush1.bf16.msra.mxu0 %v16032_v31  ;;  %5794 = vmatprep.mubr.bf16.mxu0 %v18811_v50  ;;  %v18867_v31 = vshrl.u32 %v1094_v26, 7  ;;  %v16170_v26 = vld [vmem:[#allocation6 + $0x1210] ss:$72 sps:$4 sm:$0xff]  }
 0x147   :  { %5752 = vmatmul.mubr.bf16.vlgmr.msra.gmra.mxu1 %v18857_v23  ;;  %5764 = vmatprep.subr.bf16.mxu0 %v16040_v32  ;;  %v16124_v32 = vld [vmem:[#allocation6 + $0x494] ss:$72 sps:$4 sm:$0xff]  }
 0x148   :  { %5806 = vmatpush1.bf16.msra.mxu1 %v16035_v33  ;;  %5837 = vmatprep.mubr.bf16.mxu1 %v18820_v56  ;;  %v16119_v33 = vld [vmem:[#allocation6 + $0xe20] ss:$72 sps:$4 sm:$0xff]  }
 0x149   :  { %5807 = vmatprep.subr.bf16.mxu1 %v16043_v34  ;;  %v16122_v34 = vld [vmem:[#allocation6 + $0x490] ss:$72 sps:$4 sm:$0xff]  }
 0x14a   :  { %5765 = vmatpush1.bf16.msra.mxu0 %v16038_v35  ;;  %v16127_v35 = vld [vmem:[#allocation6 + $0xd94] ss:$72 sps:$4 sm:$0xff]  }
 0x14b   :  { %5766 = vmatprep.subr.bf16.mxu0 %v16046_v36  ;;  %v1088_v36 = vld [vmem:[#allocation8] sm:$0xff] }
 0x14c   :  { %5808 = vmatpush1.bf16.msra.mxu1 %v16041_v37  ;;  %v18870_v37 = vsub.s32 0, %v18867_v31 }
 0x14d   :  { %5809 = vmatprep.subr.bf16.mxu1 %v16049_v38  ;;  %v16130_v38 = vld [vmem:[#allocation6 + $0x1604] ss:$72 sps:$4 sm:$0xff]  }
 0x14e   :  { %5767 = vmatpush1.bf16.msra.mxu0 %v16044_v39  ;;  %v16125_v39 = vld [vmem:[#allocation6 + $0xd90] ss:$72 sps:$4 sm:$0xff]  }
 0x14f   :  { %5768 = vmatprep.subr.bf16.mxu0 %v16052_v40  ;;  %v18873_v40 = vsub.s32 1, %v18867_v31 }
 0x150   :  { %5810 = vmatpush1.bf16.msra.mxu1 %v16047_v41  ;;  %v16133_v41 = vld [vmem:[#allocation6 + $0x40c] ss:$72 sps:$4 sm:$0xff]  }
 0x151   :  { %5811 = vmatprep.subr.bf16.mxu1 %v16055_v42  ;;  %19643 = vst [vmem:[#allocation37_spill] sm:$0xff] %v18873_v40  ;;  %v1097_v42 = vrot.slane %v1088_v36, %v18870_v37 }
 0x152   :  { %5769 = vmatpush1.bf16.msra.mxu0 %v16050_v43  ;;  %v16128_v43 = vld [vmem:[#allocation6 + $0x1600] ss:$72 sps:$4 sm:$0xff]  }
 0x153   :  { %5770 = vmatprep.subr.bf16.mxu0 %v16058_v45  ;;  %v16136_v45 = vld [vmem:[#allocation6 + $0x1574] ss:$72 sps:$4 sm:$0xff]  }
 0x154   :  { %5812 = vmatpush1.bf16.msra.mxu1 %v16053_v46  ;;  %v18877_v46 = vrot.slane %v1088_v36, %v18873_v40  ;;  %v16190_v36 = vld [vmem:[#allocation6 + $0x1964] ss:$72 sps:$4 sm:$0xff]  }
 0x155   :  { %5813 = vmatprep.subr.bf16.mxu1 %v16061_v47  ;;  %v16131_v47 = vld [vmem:[#allocation6 + $0x408] ss:$72 sps:$4 sm:$0xff]  }
 0x156   :  { %5771 = vmatpush1.bf16.msra.mxu0 %v16056_v48 }
 0x157   :  { %5772 = vmatprep.subr.bf16.mxu0 %v16064_v49  ;;  %v16139_v49 = vld [vmem:[#allocation6 + $0x37c] ss:$72 sps:$4 sm:$0xff]  }
 0x158   :  { %5814 = vmatpush1.bf16.msra.mxu1 %v16059_v51 }
 0x159   :  { %5815 = vmatprep.subr.bf16.mxu1 %v16067_v52  ;;  %v16134_v52 = vld [vmem:[#allocation6 + $0x1570] ss:$72 sps:$4 sm:$0xff]  }
 0x15a   :  { %5773 = vmatpush1.bf16.msra.mxu0 %v16062_v53 }
 0x15b   :  { %5774 = vmatprep.subr.bf16.mxu0 %v16070_v54 }
 0x15c   :  { %5816 = vmatpush1.bf16.msra.mxu1 %v16065_v55  ;;  %v16142_v55 = vld [vmem:[#allocation6 + $0x14e4] ss:$72 sps:$4 sm:$0xff]  }
 0x15d   :  { %5817 = vmatprep.subr.bf16.mxu1 %v16073_v57 }
 0x15e   :  { %5775 = vmatpush1.bf16.msra.mxu0 %v16068_v58 }
 0x15f   :  { %5776 = vmatprep.subr.bf16.mxu0 %v16076_v59  ;;  %v16137_v59 = vld [vmem:[#allocation6 + $0x378] ss:$72 sps:$4 sm:$0xff]  }
 0x160   :  { %5818 = vmatpush1.bf16.msra.mxu1 %v16071_v60 }
 0x161   :  { %5819 = vmatprep.subr.bf16.mxu1 %v16079_v61 }
 0x162   :  { %5777 = vmatpush1.bf16.msra.mxu0 %v16074_v62  ;;  %v16145_v62 = vld [vmem:[#allocation6 + $0x2ec] ss:$72 sps:$4 sm:$0xff]  }
 0x163   :  { %5778 = vmatprep.subr.bf16.mxu0 %v16082_v63 }
 0x164   :  { %5820 = vmatpush1.bf16.msra.mxu1 %v16077_v0 }
 0x165   :  { %5821 = vmatprep.subr.bf16.mxu1 %v16085_v1  ;;  %v16140_v1 = vld [vmem:[#allocation6 + $0x14e0] ss:$72 sps:$4 sm:$0xff]  }
 0x166   :  { %5779 = vmatpush2.bf16.msra.mxu0 %v16080_v2 }
 0x167   :  { %5780 = vmatprep.subr.bf16.mxu0 %v16088_v3  ;;  %v16148_v3 = vld [vmem:[#allocation6 + $0x1454] ss:$72 sps:$4 sm:$0xff]  }
 0x168   :  { %5822 = vmatpush2.bf16.msra.mxu1 %v16083_v4 }
 0x169   :  { %5823 = vmatprep.subr.bf16.mxu1 %v16091_v5  ;;  %v16143_v5 = vld [vmem:[#allocation6 + $0x2e8] ss:$72 sps:$4 sm:$0xff]  }
 0x16a   :  { %5781 = vmatpush2.bf16.msra.mxu0 %v16086_v6  ;;  %v16151_v6 = vld [vmem:[#allocation6 + $0x25c] ss:$72 sps:$4 sm:$0xff]  }
 0x16b   :  { %5782 = vmatprep.subr.bf16.mxu0 %v16094_v7  ;;  %v16146_v7 = vld [vmem:[#allocation6 + $0x1450] ss:$72 sps:$4 sm:$0xff]  }
 0x16c   :  { %5824 = vmatpush2.bf16.msra.mxu1 %v16089_v8  ;;  %v16154_v8 = vld [vmem:[#allocation6 + $0x13c4] ss:$72 sps:$4 sm:$0xff]  }
 0x16d   :  { %5825 = vmatprep.subr.bf16.mxu1 %v16097_v9  ;;  %v16149_v9 = vld [vmem:[#allocation6 + $0x258] ss:$72 sps:$4 sm:$0xff]  }
 0x16e   :  { %5783 = vmatpush2.bf16.msra.mxu0 %v16092_v10  ;;  %v16157_v10 = vld [vmem:[#allocation6 + $0x1cc] ss:$72 sps:$4 sm:$0xff]  }
 0x16f   :  { %5784 = vmatprep.subr.bf16.mxu0 %v16100_v11  ;;  %v16152_v11 = vld [vmem:[#allocation6 + $0x13c0] ss:$72 sps:$4 sm:$0xff]  }
 0x170   :  { %5826 = vmatpush2.bf16.msra.mxu1 %v16095_v13  ;;  %v16160_v13 = vld [vmem:[#allocation6 + $0x1334] ss:$72 sps:$4 sm:$0xff]  }
 0x171   :  { %5827 = vmatprep.subr.bf16.mxu1 %v16103_v14  ;;  %v16155_v14 = vld [vmem:[#allocation6 + $0x1c8] ss:$72 sps:$4 sm:$0xff]  }
 0x172   :  { %5785 = vmatpush2.bf16.msra.mxu0 %v16098_v16  ;;  %v16163_v16 = vld [vmem:[#allocation6 + $0x13c] ss:$72 sps:$4 sm:$0xff]  }
 0x173   :  { %5786 = vmatprep.subr.bf16.mxu0 %v16106_v17  ;;  %v16158_v17 = vld [vmem:[#allocation6 + $0x1330] ss:$72 sps:$4 sm:$0xff]  }
 0x174   :  { %5828 = vmatpush2.bf16.msra.mxu1 %v16101_v18  ;;  %v16166_v18 = vld [vmem:[#allocation6 + $0x12a4] ss:$72 sps:$4 sm:$0xff]  }
 0x175   :  { %5829 = vmatprep.subr.bf16.mxu1 %v16109_v19  ;;  %v16161_v19 = vld [vmem:[#allocation6 + $0x138] ss:$72 sps:$4 sm:$0xff]  }
 0x176   :  { %5787 = vmatpush2.bf16.msra.mxu0 %v16104_v20  ;;  %v16169_v20 = vld [vmem:[#allocation6 + $0xac] ss:$72 sps:$4 sm:$0xff]  }
 0x177   :  { %5788 = vmatprep.subr.bf16.mxu0 %v16112_v21  ;;  %v16164_v21 = vld [vmem:[#allocation6 + $0x12a0] ss:$72 sps:$4 sm:$0xff]  }
 0x178   :  { %5830 = vmatpush2.bf16.msra.mxu1 %v16107_v22  ;;  %v16172_v22 = vld [vmem:[#allocation6 + $0x1214] ss:$72 sps:$4 sm:$0xff]  }
 0x179   :  { %5831 = vmatprep.subr.bf16.mxu1 %v16115_v24  ;;  %v16167_v24 = vld [vmem:[#allocation6 + $0xa8] ss:$72 sps:$4 sm:$0xff]  }
 0x17a   :  { %5789 = vmatpush2.bf16.msra.mxu0 %v16110_v25  ;;  %v16175_v25 = vld [vmem:[#allocation6 + $0x1c] ss:$72 sps:$4 sm:$0xff]  }
 0x17b   :  { %5790 = vmatprep.subr.bf16.mxu0 %v16118_v27  ;;  %v16178_v27 = vld [vmem:[#allocation6 + $0x1a84] ss:$72 sps:$4 sm:$0xff]  }
 0x17c   :  { %5832 = vmatpush2.bf16.msra.mxu1 %v16113_v28  ;;  %v16173_v28 = vld [vmem:[#allocation6 + $0x18] ss:$72 sps:$4 sm:$0xff]  }
 0x17d   :  { %5833 = vmatprep.subr.bf16.mxu1 %v16121_v29  ;;  %v16181_v29 = vld [vmem:[#allocation6 + $0x88c] ss:$72 sps:$4 sm:$0xff]  }
 0x17e   :  { %5791 = vmatpush2.bf16.msra.mxu0 %v16116_v30  ;;  %v16176_v30 = vld [vmem:[#allocation6 + $0x1a80] ss:$72 sps:$4 sm:$0xff]  }
 0x17f   :  { %5792 = vmatprep.subr.bf16.mxu0 %v16124_v32  ;;  %v16184_v32 = vld [vmem:[#allocation6 + $0x19f4] ss:$72 sps:$4 sm:$0xff]  }
 0x180   :  { %5834 = vmatpush2.bf16.msra.mxu1 %v16119_v33  ;;  %v16179_v33 = vld [vmem:[#allocation6 + $0x888] ss:$72 sps:$4 sm:$0xff]  }
 0x181   :  { %5835 = vmatprep.subr.bf16.mxu1 %v16127_v35  ;;  %v16182_v35 = vld [vmem:[#allocation6 + $0x19f0] ss:$72 sps:$4 sm:$0xff]  }
 0x182   :  { %5793 = vmatpush2.bf16.msra.mxu0 %v16122_v34  ;;  %v16187_v34 = vld [vmem:[#allocation6 + $0x7fc] ss:$72 sps:$4 sm:$0xff]  }
 0x183   :  { %5848 = vmatprep.subr.bf16.mxu0 %v16130_v38  ;;  %v16185_v38 = vld [vmem:[#allocation6 + $0x7f8] ss:$72 sps:$4 sm:$0xff]  }
 0x184   :  { %5836 = vmatpush2.bf16.msra.mxu1 %v16125_v39  ;;  %v16193_v39 = vld [vmem:[#allocation6 + $0x76c] ss:$72 sps:$4 sm:$0xff]  }
 0x185   :  { %v5538_v48 = vpop.f32.mrf.mxu0  ;;  %5795 = vmatmul.mubr.bf16.vlgmr.msra.gmra.mxu0 %v18835_v12  ;;  %5891 = vmatprep.subr.bf16.mxu1 %v16133_v41  ;;  %v16188_v41 = vld [vmem:[#allocation6 + $0x1960] ss:$72 sps:$4 sm:$0xff]  }
 0x186   :  { %v5539_v51 = vadd.f32 %v5538_v48, %v1097_v42  ;;  %5849 = vmatpush1.bf16.msra.mxu0 %v16128_v43  ;;  %5880 = vmatprep.mubr.bf16.mxu0 %v18848_v44  ;;  %v5581_v54 = vpop.f32.mrf.mxu1  ;;  %v16191_v43 = vld [vmem:[#allocation6 + $0x768] ss:$72 sps:$4 sm:$0xff]   ;;  %v16202_v48 = vld [vmem:[#allocation6 + $0x1844] ss:$72 sps:$4 sm:$0xff]  }
 0x187   :  { %v5540_v53 = vpop.f32.mrf.mxu0  ;;  %5838 = vmatmul.mubr.bf16.vlgmr.msra.gmra.mxu1 %v18837_v15  ;;  %5850 = vmatprep.subr.bf16.mxu0 %v16136_v45  ;;  %v16199_v45 = vld [vmem:[#allocation6 + $0x6dc] ss:$72 sps:$4 sm:$0xff]  }
 0x188   :  { %v5541_v57 = vadd.f32 %v5540_v53, %v18877_v46  ;;  %v18883_v58 = vadd.f32 %v5581_v54, %v5539_v51  ;;  %5892 = vmatpush1.bf16.msra.mxu1 %v16131_v47  ;;  %5923 = vmatprep.mubr.bf16.mxu1 %v18811_v50  ;;  %v5583_v61 = vpop.f32.mrf.mxu1  ;;  %v16194_v47 = vld [vmem:[#allocation6 + $0x18d0] ss:$72 sps:$4 sm:$0xff]   ;;  %v16205_v51 = vld [vmem:[#allocation6 + $0x64c] ss:$72 sps:$4 sm:$0xff]  }
 0x189   :  { %v5542_v60 = vpop.f32.mrf.mxu0  ;;  %5893 = vmatprep.subr.bf16.mxu1 %v16139_v49  ;;  %v16197_v49 = vld [vmem:[#allocation6 + $0x6d8] ss:$72 sps:$4 sm:$0xff]   ;;  %v16208_v53 = vld [vmem:[#allocation6 + $0x17b4] ss:$72 sps:$4 sm:$0xff]   ;;  %v16203_v54 = vld [vmem:[#allocation6 + $0x648] ss:$72 sps:$4 sm:$0xff]  }
 0x18a   :  { %v5543_v63 = vadd.f32 %v5542_v60, %v1097_v42  ;;  %v18886_v0 = vadd.f32 %v5583_v61, %v5541_v57  ;;  %5851 = vmatpush1.bf16.msra.mxu0 %v16134_v52  ;;  %v5585_v2 = vpop.f32.mrf.mxu1  ;;  %v16196_v42 = vld [vmem:[#allocation6 + $0x18d4] ss:$72 sps:$4 sm:$0xff]   ;;  %v16200_v52 = vld [vmem:[#allocation6 + $0x1840] ss:$72 sps:$4 sm:$0xff]   ;;  %v16206_v57 = vld [vmem:[#allocation6 + $0x17b0] ss:$72 sps:$4 sm:$0xff]  }
 0x18b   :  { %5852 = vmatprep.subr.bf16.mxu0 %v16142_v55  ;;  %v16211_v55 = vld [vmem:[#allocation6 + $0x5bc] ss:$72 sps:$4 sm:$0xff]   ;;  %v16209_v60 = vld [vmem:[#allocation6 + $0x5b8] ss:$72 sps:$4 sm:$0xff]   ;;  %v16217_v61 = vld [vmem:[#allocation6 + $0x52c] ss:$72 sps:$4 sm:$0xff]  }
 0x18c   :  { %v18888_v4 = vadd.f32 %v5585_v2, %v5543_v63  ;;  %5894 = vmatpush1.bf16.msra.mxu1 %v16137_v59  ;;  %v16214_v59 = vld [vmem:[#allocation6 + $0x1724] ss:$72 sps:$4 sm:$0xff]   ;;  %v16220_v63 = vld [vmem:[#allocation6 + $0x1694] ss:$72 sps:$4 sm:$0xff]  }
 0x18d   :  { %5895 = vmatprep.subr.bf16.mxu1 %v16145_v62  ;;  %v16212_v62 = vld [vmem:[#allocation6 + $0x1720] ss:$72 sps:$4 sm:$0xff]   ;;  %v16223_v2 = vld [vmem:[#allocation6 + $0x49c] ss:$72 sps:$4 sm:$0xff]  }
 0x18e   :  { %5853 = vmatpush1.bf16.msra.mxu0 %v16140_v1  ;;  %v16215_v1 = vld [vmem:[#allocation6 + $0x528] ss:$72 sps:$4 sm:$0xff]  }
 0x18f   :  { %5854 = vmatprep.subr.bf16.mxu0 %v16148_v3  ;;  %v16218_v3 = vld [vmem:[#allocation6 + $0x1690] ss:$72 sps:$4 sm:$0xff]  }
 0x190   :  { %5896 = vmatpush1.bf16.msra.mxu1 %v16143_v5  ;;  %v16226_v5 = vld [vmem:[#allocation6 + $0xd0c] ss:$72 sps:$4 sm:$0xff]  }
 0x191   :  { %5897 = vmatprep.subr.bf16.mxu1 %v16151_v6  ;;  %v16221_v6 = vld [vmem:[#allocation6 + $0x498] ss:$72 sps:$4 sm:$0xff]  }
 0x192   :  { %5855 = vmatpush1.bf16.msra.mxu0 %v16146_v7  ;;  %v16229_v7 = vld [vmem:[#allocation6 + $0x160c] ss:$72 sps:$4 sm:$0xff]  }
 0x193   :  { %5856 = vmatprep.subr.bf16.mxu0 %v16154_v8  ;;  %v16224_v8 = vld [vmem:[#allocation6 + $0xd08] ss:$72 sps:$4 sm:$0xff]  }
 0x194   :  { %5898 = vmatpush1.bf16.msra.mxu1 %v16149_v9  ;;  %v5544_v9 = vpop.f32.mrf.mxu0 }
 0x195   :  { %5899 = vmatprep.subr.bf16.mxu1 %v16157_v10  ;;  %v16232_v10 = vld [vmem:[#allocation6 + $0xc7c] ss:$72 sps:$4 sm:$0xff]  }
 0x196   :  { %5857 = vmatpush1.bf16.msra.mxu0 %v16152_v11  ;;  %v16227_v11 = vld [vmem:[#allocation6 + $0x1608] ss:$72 sps:$4 sm:$0xff]  }
 0x197   :  { %5858 = vmatprep.subr.bf16.mxu0 %v16160_v13 }
 0x198   :  { %5900 = vmatpush1.bf16.msra.mxu1 %v16155_v14  ;;  %v16235_v14 = vld [vmem:[#allocation6 + $0x157c] ss:$72 sps:$4 sm:$0xff]  }
 0x199   :  { %5901 = vmatprep.subr.bf16.mxu1 %v16163_v16  ;;  %v5545_v16 = vadd.f32 %v5544_v9, %v18877_v46  ;;  %v16287_v9 = vld [vmem:[#allocation6 + $0x1968] ss:$72 sps:$4 sm:$0xff]  }
 0x19a   :  { %5859 = vmatpush1.bf16.msra.mxu0 %v16158_v17 }
 0x19b   :  { %5860 = vmatprep.subr.bf16.mxu0 %v16166_v18  ;;  %v16230_v18 = vld [vmem:[#allocation6 + $0xc78] ss:$72 sps:$4 sm:$0xff]  }
 0x19c   :  { %5902 = vmatpush1.bf16.msra.mxu1 %v16161_v19  ;;  %v5587_v19 = vpop.f32.mrf.mxu1 }
 0x19d   :  { %5903 = vmatprep.subr.bf16.mxu1 %v16169_v20 }
 0x19e   :  { %5861 = vmatpush1.bf16.msra.mxu0 %v16164_v21  ;;  %v16238_v21 = vld [vmem:[#allocation6 + $0xbec] ss:$72 sps:$4 sm:$0xff]  }
 0x19f   :  { %5862 = vmatprep.subr.bf16.mxu0 %v16172_v22 }
 0x1a0   :  { %5904 = vmatpush1.bf16.msra.mxu1 %v16167_v24  ;;  %v16233_v24 = vld [vmem:[#allocation6 + $0x1578] ss:$72 sps:$4 sm:$0xff]  }
 0x1a1   :  { %5905 = vmatprep.subr.bf16.mxu1 %v16175_v25  ;;  %v5588_v25 = vadd.f32 %v5587_v19, %v5545_v16  ;;  %v16301_v16 = vld [vmem:[#allocation6 + $0x184c] ss:$72 sps:$4 sm:$0xff]   ;;  %v16304_v19 = vld [vmem:[#allocation6 + $0xebc] ss:$72 sps:$4 sm:$0xff]  }
 0x1a2   :  { %5863 = vmatpush1.bf16.msra.mxu0 %v16170_v26 }
 0x1a3   :  { %5864 = vmatprep.subr.bf16.mxu0 %v16178_v27  ;;  %v16236_v27 = vld [vmem:[#allocation6 + $0xbe8] ss:$72 sps:$4 sm:$0xff]  }
 0x1a4   :  { %5906 = vmatpush1.bf16.msra.mxu1 %v16173_v28 }
 0x1a5   :  { %5907 = vmatprep.subr.bf16.mxu1 %v16181_v29  ;;  %v16244_v29 = vld [vmem:[#allocation6 + $0xb5c] ss:$72 sps:$4 sm:$0xff]  }
 0x1a6   :  { %5865 = vmatpush2.bf16.msra.mxu0 %v16176_v30 }
 0x1a7   :  { %5866 = vmatprep.subr.bf16.mxu0 %v16184_v32  ;;  %v16239_v32 = vld [vmem:[#allocation6 + $0x14e8] ss:$72 sps:$4 sm:$0xff]  }
 0x1a8   :  { %5908 = vmatpush2.bf16.msra.mxu1 %v16179_v33  ;;  %v16247_v33 = vld [vmem:[#allocation6 + $0x145c] ss:$72 sps:$4 sm:$0xff]  }
 0x1a9   :  { %5909 = vmatprep.subr.bf16.mxu1 %v16187_v34 }
 0x1aa   :  { %5867 = vmatpush2.bf16.msra.mxu0 %v16182_v35  ;;  %v16250_v35 = vld [vmem:[#allocation6 + $0xacc] ss:$72 sps:$4 sm:$0xff]  }
 0x1ab   :  { %5868 = vmatprep.subr.bf16.mxu0 %v16190_v36  ;;  %v16245_v36 = vld [vmem:[#allocation6 + $0x1458] ss:$72 sps:$4 sm:$0xff]  }
 0x1ac   :  { %5910 = vmatpush2.bf16.msra.mxu1 %v16185_v38  ;;  %v16253_v38 = vld [vmem:[#allocation6 + $0x13cc] ss:$72 sps:$4 sm:$0xff]  }
 0x1ad   :  { %5911 = vmatprep.subr.bf16.mxu1 %v16193_v39  ;;  %v16248_v39 = vld [vmem:[#allocation6 + $0xac8] ss:$72 sps:$4 sm:$0xff]  }
 0x1ae   :  { %5869 = vmatpush2.bf16.msra.mxu0 %v16188_v41  ;;  %v16256_v41 = vld [vmem:[#allocation6 + $0xa3c] ss:$72 sps:$4 sm:$0xff]  }
 0x1af   :  { %5870 = vmatprep.subr.bf16.mxu0 %v16196_v42  ;;  %v16251_v42 = vld [vmem:[#allocation6 + $0x13c8] ss:$72 sps:$4 sm:$0xff]  }
 0x1b0   :  { %5912 = vmatpush2.bf16.msra.mxu1 %v16191_v43  ;;  %v16259_v43 = vld [vmem:[#allocation6 + $0x133c] ss:$72 sps:$4 sm:$0xff]  }
 0x1b1   :  { %5913 = vmatprep.subr.bf16.mxu1 %v16199_v45  ;;  %v16254_v45 = vld [vmem:[#allocation6 + $0xa38] ss:$72 sps:$4 sm:$0xff]  }
 0x1b2   :  { %5871 = vmatpush2.bf16.msra.mxu0 %v16194_v47  ;;  %v16262_v47 = vld [vmem:[#allocation6 + $0x9ac] ss:$72 sps:$4 sm:$0xff]  }
 0x1b3   :  { %5872 = vmatprep.subr.bf16.mxu0 %v16202_v48  ;;  %v16257_v48 = vld [vmem:[#allocation6 + $0x1338] ss:$72 sps:$4 sm:$0xff]  }
 0x1b4   :  { %5914 = vmatpush2.bf16.msra.mxu1 %v16197_v49  ;;  %v16265_v49 = vld [vmem:[#allocation6 + $0x12ac] ss:$72 sps:$4 sm:$0xff]  }
 0x1b5   :  { %5915 = vmatprep.subr.bf16.mxu1 %v16205_v51  ;;  %v16260_v51 = vld [vmem:[#allocation6 + $0x9a8] ss:$72 sps:$4 sm:$0xff]  }
 0x1b6   :  { %5873 = vmatpush2.bf16.msra.mxu0 %v16200_v52  ;;  %v16268_v52 = vld [vmem:[#allocation6 + $0x91c] ss:$72 sps:$4 sm:$0xff]  }
 0x1b7   :  { %5874 = vmatprep.subr.bf16.mxu0 %v16208_v53  ;;  %v16263_v53 = vld [vmem:[#allocation6 + $0x12a8] ss:$72 sps:$4 sm:$0xff]  }
 0x1b8   :  { %5916 = vmatpush2.bf16.msra.mxu1 %v16203_v54  ;;  %v16271_v54 = vld [vmem:[#allocation6 + $0x121c] ss:$72 sps:$4 sm:$0xff]  }
 0x1b9   :  { %5917 = vmatprep.subr.bf16.mxu1 %v16211_v55  ;;  %v16266_v55 = vld [vmem:[#allocation6 + $0x918] ss:$72 sps:$4 sm:$0xff]  }
 0x1ba   :  { %5875 = vmatpush2.bf16.msra.mxu0 %v16206_v57  ;;  %v16274_v57 = vld [vmem:[#allocation6 + $0x118c] ss:$72 sps:$4 sm:$0xff]  }
 0x1bb   :  { %5876 = vmatprep.subr.bf16.mxu0 %v16214_v59  ;;  %v16269_v59 = vld [vmem:[#allocation6 + $0x1218] ss:$72 sps:$4 sm:$0xff]  }
 0x1bc   :  { %5918 = vmatpush2.bf16.msra.mxu1 %v16209_v60  ;;  %v16277_v60 = vld [vmem:[#allocation6 + $0x1a8c] ss:$72 sps:$4 sm:$0xff]  }
 0x1bd   :  { %5919 = vmatprep.subr.bf16.mxu1 %v16217_v61  ;;  %v16272_v61 = vld [vmem:[#allocation6 + $0x1188] ss:$72 sps:$4 sm:$0xff]  }
 0x1be   :  { %5877 = vmatpush2.bf16.msra.mxu0 %v16212_v62  ;;  %v16280_v62 = vld [vmem:[#allocation6 + $0x10fc] ss:$72 sps:$4 sm:$0xff]  }
 0x1bf   :  { %5878 = vmatprep.subr.bf16.mxu0 %v16220_v63  ;;  %v16275_v63 = vld [vmem:[#allocation6 + $0x1a88] ss:$72 sps:$4 sm:$0xff]  }
 0x1c0   :  { %5920 = vmatpush2.bf16.msra.mxu1 %v16215_v1  ;;  %v16283_v1 = vld [vmem:[#allocation6 + $0x19fc] ss:$72 sps:$4 sm:$0xff]  }
 0x1c1   :  { %5921 = vmatprep.subr.bf16.mxu1 %v16223_v2  ;;  %v16278_v2 = vld [vmem:[#allocation6 + $0x10f8] ss:$72 sps:$4 sm:$0xff]  }
 0x1c2   :  { %5879 = vmatpush2.bf16.msra.mxu0 %v16218_v3  ;;  %v16286_v3 = vld [vmem:[#allocation6 + $0x106c] ss:$72 sps:$4 sm:$0xff]  }
 0x1c3   :  { %5934 = vmatprep.subr.bf16.mxu0 %v16226_v5  ;;  %v16281_v5 = vld [vmem:[#allocation6 + $0x19f8] ss:$72 sps:$4 sm:$0xff]  }
 0x1c4   :  { %5922 = vmatpush2.bf16.msra.mxu1 %v16221_v6  ;;  %v16289_v6 = vld [vmem:[#allocation6 + $0x196c] ss:$72 sps:$4 sm:$0xff]  }
 0x1c5   :  { %v5624_v13 = vpop.f32.mrf.mxu0  ;;  %5881 = vmatmul.mubr.bf16.vlgmr.msra.gmra.mxu0 %v18857_v23  ;;  %5977 = vmatprep.subr.bf16.mxu1 %v16229_v7  ;;  %v16284_v7 = vld [vmem:[#allocation6 + $0x1068] ss:$72 sps:$4 sm:$0xff]  }
 0x1c6   :  { %v18893_v17 = vadd.f32 %v5624_v13, %v18883_v58  ;;  %5935 = vmatpush1.bf16.msra.mxu0 %v16224_v8  ;;  %5966 = vmatprep.mubr.bf16.mxu0 %v18820_v56  ;;  %v16241_v58 = vld [vmem:[#allocation6 + $0x14ec] ss:$72 sps:$4 sm:$0xff]   ;;  %v16292_v8 = vld [vmem:[#allocation6 + $0xfdc] ss:$72 sps:$4 sm:$0xff]  }
 0x1c7   :  { %v5626_v20 = vpop.f32.mrf.mxu0  ;;  %5924 = vmatmul.mubr.bf16.vlgmr.msra.gmra.mxu1 %v18835_v12  ;;  %5936 = vmatprep.subr.bf16.mxu0 %v16232_v10  ;;  %v16295_v10 = vld [vmem:[#allocation6 + $0x18dc] ss:$72 sps:$4 sm:$0xff]   ;;  %v16298_v13 = vld [vmem:[#allocation6 + $0xf4c] ss:$72 sps:$4 sm:$0xff]  }
 0x1c8   :  { %19644 = vst [vmem:[#allocation38_spill] sm:$0xff] %v18893_v17  ;;  %v18898_v22 = vadd.f32 %v5626_v20, %v18886_v0  ;;  %5978 = vmatpush1.bf16.msra.mxu1 %v16227_v11  ;;  %6009 = vmatprep.mubr.bf16.mxu1 %v18848_v44  ;;  %v16290_v11 = vld [vmem:[#allocation6 + $0xfd8] ss:$72 sps:$4 sm:$0xff]   ;;  %v16299_v20 = vld [vmem:[#allocation6 + $0x1848] ss:$72 sps:$4 sm:$0xff]  }
 0x1c9   :  { %v5628_v46 = vpop.f32.mrf.mxu0  ;;  %5979 = vmatprep.subr.bf16.mxu1 %v16235_v14  ;;  %v16293_v14 = vld [vmem:[#allocation6 + $0x18d8] ss:$72 sps:$4 sm:$0xff]  }
 0x1ca   :  { %v18902_v26 = vadd.f32 %v5628_v46, %v18888_v4  ;;  %5937 = vmatpush1.bf16.msra.mxu0 %v16230_v18  ;;  %v16242_v4 = vld [vmem:[#allocation6 + $0xb58] ss:$72 sps:$4 sm:$0xff]   ;;  %v16296_v18 = vld [vmem:[#allocation6 + $0xf48] ss:$72 sps:$4 sm:$0xff]   ;;  %v16310_v46 = vld [vmem:[#allocation6 + $0xe2c] ss:$72 sps:$4 sm:$0xff]  }
 0x1cb   :  { %v5630_v28 = vpop.f32.mrf.mxu0  ;;  %5938 = vmatprep.subr.bf16.mxu0 %v16238_v21  ;;  %v16307_v21 = vld [vmem:[#allocation6 + $0x17bc] ss:$72 sps:$4 sm:$0xff]   ;;  %v17022_v0 = vld [vmem:[#allocation6 + $0x1990] ss:$72 sps:$4 sm:$0xff]  }
 0x1cc   :  { %19645 = vst [vmem:[#allocation39_spill] sm:$0xff] %v18902_v26  ;;  %v18906_v30 = vadd.f32 %v5630_v28, %v5588_v25  ;;  %5980 = vmatpush1.bf16.msra.mxu1 %v16233_v24  ;;  %v16302_v24 = vld [vmem:[#allocation6 + $0xeb8] ss:$72 sps:$4 sm:$0xff]   ;;  %v16308_v28 = vld [vmem:[#allocation6 + $0xe28] ss:$72 sps:$4 sm:$0xff]  }
 0x1cd   :  { %5981 = vmatprep.subr.bf16.mxu1 %v16241_v58  ;;  %v5667_v58 = vpop.f32.mrf.mxu1  ;;  %v16305_v25 = vld [vmem:[#allocation6 + $0x17b8] ss:$72 sps:$4 sm:$0xff]  }
 0x1ce   :  { %5939 = vmatpush1.bf16.msra.mxu0 %v16236_v27  ;;  %v16313_v27 = vld [vmem:[#allocation6 + $0x172c] ss:$72 sps:$4 sm:$0xff]  }
 0x1cf   :  { %5940 = vmatprep.subr.bf16.mxu0 %v16244_v29  ;;  %v18911_v29 = vsub.s32 2, %v18867_v31 }
 0x1d0   :  { %5982 = vmatpush1.bf16.msra.mxu1 %v16239_v32  ;;  %v5669_v32 = vpop.f32.mrf.mxu1 }
 0x1d1   :  { %5983 = vmatprep.subr.bf16.mxu1 %v16247_v33  ;;  %v16316_v33 = vld [vmem:[#allocation6 + $0xd9c] ss:$72 sps:$4 sm:$0xff]  }
 0x1d2   :  { %5941 = vmatpush1.bf16.msra.mxu0 %v16242_v4  ;;  %v16311_v4 = vld [vmem:[#allocation6 + $0x1728] ss:$72 sps:$4 sm:$0xff]  }
 0x1d3   :  { %5942 = vmatprep.subr.bf16.mxu0 %v16250_v35  ;;  %v18914_v35 = vsub.s32 3, %v18867_v31 }
 0x1d4   :  { %5984 = vmatpush1.bf16.msra.mxu1 %v16245_v36  ;;  %v16319_v36 = vld [vmem:[#allocation6 + $0x169c] ss:$72 sps:$4 sm:$0xff]  }
 0x1d5   :  { %5985 = vmatprep.subr.bf16.mxu1 %v16253_v38  ;;  %19646 = vst [vmem:[#allocation40_spill] sm:$0xff] %v18914_v35  ;;  %v18916_v38 = vld [vmem:[#allocation8] sm:$0xff] }
 0x1d6   :  { %5943 = vmatpush1.bf16.msra.mxu0 %v16248_v39  ;;  %v1105_v39 = vrot.slane %v18916_v38, %v18911_v29 }
 0x1d7   :  { %5944 = vmatprep.subr.bf16.mxu0 %v16256_v41  ;;  %v16314_v41 = vld [vmem:[#allocation6 + $0xd98] ss:$72 sps:$4 sm:$0xff]  }
 0x1d8   :  { %5986 = vmatpush1.bf16.msra.mxu1 %v16251_v42  ;;  %v5671_v42 = vpop.f32.mrf.mxu1 }
 0x1d9   :  { %5987 = vmatprep.subr.bf16.mxu1 %v16259_v43  ;;  %v16322_v43 = vld [vmem:[#allocation6 + $0x414] ss:$72 sps:$4 sm:$0xff]  }
 0x1da   :  { %5945 = vmatpush1.bf16.msra.mxu0 %v16254_v45  ;;  %v18922_v45 = vrot.slane %v18916_v38, %v18914_v35 }
 0x1db   :  { %5946 = vmatprep.subr.bf16.mxu0 %v16262_v47  ;;  %v16317_v47 = vld [vmem:[#allocation6 + $0x1698] ss:$72 sps:$4 sm:$0xff]  }
 0x1dc   :  { %5988 = vmatpush1.bf16.msra.mxu1 %v16257_v48  ;;  %v16325_v48 = vld [vmem:[#allocation6 + $0xd14] ss:$72 sps:$4 sm:$0xff]  }
 0x1dd   :  { %5989 = vmatprep.subr.bf16.mxu1 %v16265_v49  ;;  %v5668_v49 = vadd.f32 %v5667_v58, %v1105_v39  ;;  %v16349_v58 = vld [vmem:[#allocation6 + $0xad4] ss:$72 sps:$4 sm:$0xff]  }
 0x1de   :  { %5947 = vmatpush1.bf16.msra.mxu0 %v16260_v51  ;;  %v16320_v51 = vld [vmem:[#allocation6 + $0x410] ss:$72 sps:$4 sm:$0xff]  }
 0x1df   :  { %5948 = vmatprep.subr.bf16.mxu0 %v16268_v52  ;;  %v18924_v52 = vpop.f32.mrf.mxu1 }
 0x1e0   :  { %5990 = vmatpush1.bf16.msra.mxu1 %v16263_v53  ;;  %v16328_v53 = vld [vmem:[#allocation6 + $0x384] ss:$72 sps:$4 sm:$0xff]  }
 0x1e1   :  { %5991 = vmatprep.subr.bf16.mxu1 %v16271_v54  ;;  %v5670_v54 = vadd.f32 %v5669_v32, %v18922_v45  ;;  %v16355_v32 = vld [vmem:[#allocation6 + $0xa44] ss:$72 sps:$4 sm:$0xff]  }
 0x1e2   :  { %5949 = vmatpush1.bf16.msra.mxu0 %v16266_v55  ;;  %v16323_v55 = vld [vmem:[#allocation6 + $0xd10] ss:$72 sps:$4 sm:$0xff]  }
 0x1e3   :  { %5950 = vmatprep.subr.bf16.mxu0 %v16274_v57 }
 0x1e4   :  { %5992 = vmatpush1.bf16.msra.mxu1 %v16269_v59  ;;  %v16331_v59 = vld [vmem:[#allocation6 + $0xc84] ss:$72 sps:$4 sm:$0xff]  }
 0x1e5   :  { %5993 = vmatprep.subr.bf16.mxu1 %v16277_v60  ;;  %v5672_v60 = vadd.f32 %v5671_v42, %v1105_v39  ;;  %v16361_v39 = vld [vmem:[#allocation6 + $0x9b4] ss:$72 sps:$4 sm:$0xff]   ;;  %v16364_v42 = vld [vmem:[#allocation6 + $0x24] ss:$72 sps:$4 sm:$0xff]  }
 0x1e6   :  { %5951 = vmatpush2.bf16.msra.mxu0 %v16272_v61 }
 0x1e7   :  { %5952 = vmatprep.subr.bf16.mxu0 %v16280_v62  ;;  %v16326_v62 = vld [vmem:[#allocation6 + $0x380] ss:$72 sps:$4 sm:$0xff]  }
 0x1e8   :  { %5994 = vmatpush2.bf16.msra.mxu1 %v16275_v63 }
 0x1e9   :  { %5995 = vmatprep.subr.bf16.mxu1 %v16283_v1 }
 0x1ea   :  { %5953 = vmatpush2.bf16.msra.mxu0 %v16278_v2  ;;  %v16334_v2 = vld [vmem:[#allocation6 + $0x2f4] ss:$72 sps:$4 sm:$0xff]  }
 0x1eb   :  { %5954 = vmatprep.subr.bf16.mxu0 %v16286_v3 }
 0x1ec   :  { %5996 = vmatpush2.bf16.msra.mxu1 %v16281_v5 }
 0x1ed   :  { %5997 = vmatprep.subr.bf16.mxu1 %v16289_v6  ;;  %v16329_v6 = vld [vmem:[#allocation6 + $0xc80] ss:$72 sps:$4 sm:$0xff]  }
 0x1ee   :  { %5955 = vmatpush2.bf16.msra.mxu0 %v16284_v7 }
 0x1ef   :  { %5956 = vmatprep.subr.bf16.mxu0 %v16292_v8 }
 0x1f0   :  { %5998 = vmatpush2.bf16.msra.mxu1 %v16287_v9  ;;  %v16337_v9 = vld [vmem:[#allocation6 + $0xbf4] ss:$72 sps:$4 sm:$0xff]  }
 0x1f1   :  { %5999 = vmatprep.subr.bf16.mxu1 %v16295_v10 }
 0x1f2   :  { %5957 = vmatpush2.bf16.msra.mxu0 %v16290_v11  ;;  %v16332_v11 = vld [vmem:[#allocation6 + $0x2f0] ss:$72 sps:$4 sm:$0xff]  }
 0x1f3   :  { %5958 = vmatprep.subr.bf16.mxu0 %v16298_v13 }
 0x1f4   :  { %6000 = vmatpush2.bf16.msra.mxu1 %v16293_v14  ;;  %v16340_v14 = vld [vmem:[#allocation6 + $0x264] ss:$72 sps:$4 sm:$0xff]  }
 0x1f5   :  { %6001 = vmatprep.subr.bf16.mxu1 %v16301_v16 }
 0x1f6   :  { %5959 = vmatpush2.bf16.msra.mxu0 %v16296_v18  ;;  %v16335_v18 = vld [vmem:[#allocation6 + $0xbf0] ss:$72 sps:$4 sm:$0xff]  }
 0x1f7   :  { %5960 = vmatprep.subr.bf16.mxu0 %v16304_v19  ;;  %v16343_v19 = vld [vmem:[#allocation6 + $0xb64] ss:$72 sps:$4 sm:$0xff]  }
 0x1f8   :  { %6002 = vmatpush2.bf16.msra.mxu1 %v16299_v20 }
 0x1f9   :  { %6003 = vmatprep.subr.bf16.mxu1 %v16307_v21  ;;  %v16338_v21 = vld [vmem:[#allocation6 + $0x260] ss:$72 sps:$4 sm:$0xff]  }
 0x1fa   :  { %5961 = vmatpush2.bf16.msra.mxu0 %v16302_v24  ;;  %v16346_v24 = vld [vmem:[#allocation6 + $0x1d4] ss:$72 sps:$4 sm:$0xff]  }
 0x1fb   :  { %5962 = vmatprep.subr.bf16.mxu0 %v16310_v46  ;;  %v16341_v46 = vld [vmem:[#allocation6 + $0xb60] ss:$72 sps:$4 sm:$0xff]  }
 0x1fc   :  { %6004 = vmatpush2.bf16.msra.mxu1 %v16305_v25  ;;  %v16344_v25 = vld [vmem:[#allocation6 + $0x1d0] ss:$72 sps:$4 sm:$0xff]  }
 0x1fd   :  { %6005 = vmatprep.subr.bf16.mxu1 %v16313_v27  ;;  %v16352_v27 = vld [vmem:[#allocation6 + $0x144] ss:$72 sps:$4 sm:$0xff]  }
 0x1fe   :  { %5963 = vmatpush2.bf16.msra.mxu0 %v16308_v28  ;;  %v16347_v28 = vld [vmem:[#allocation6 + $0xad0] ss:$72 sps:$4 sm:$0xff]  }
 0x1ff   :  { %5964 = vmatprep.subr.bf16.mxu0 %v16316_v33  ;;  %v16350_v33 = vld [vmem:[#allocation6 + $0x140] ss:$72 sps:$4 sm:$0xff]  }
 0x200   :  { %6006 = vmatpush2.bf16.msra.mxu1 %v16311_v4  ;;  %v16358_v4 = vld [vmem:[#allocation6 + $0xb4] ss:$72 sps:$4 sm:$0xff]  }
 0x201   :  { %6007 = vmatprep.subr.bf16.mxu1 %v16319_v36  ;;  %v16353_v36 = vld [vmem:[#allocation6 + $0xa40] ss:$72 sps:$4 sm:$0xff]  }
 0x202   :  { %5965 = vmatpush2.bf16.msra.mxu0 %v16314_v41  ;;  %v16356_v41 = vld [vmem:[#allocation6 + $0xb0] ss:$72 sps:$4 sm:$0xff]  }
 0x203   :  { %6020 = vmatprep.subr.bf16.mxu0 %v16322_v43  ;;  %v16359_v43 = vld [vmem:[#allocation6 + $0x9b0] ss:$72 sps:$4 sm:$0xff]  }
 0x204   :  { %6008 = vmatpush2.bf16.msra.mxu1 %v16317_v47  ;;  %v16367_v47 = vld [vmem:[#allocation6 + $0x924] ss:$72 sps:$4 sm:$0xff]  }
 0x205   :  { %v5710_v57 = vpop.f32.mrf.mxu0  ;;  %5967 = vmatmul.mubr.bf16.vlgmr.msra.gmra.mxu0 %v18837_v15  ;;  %6063 = vmatprep.subr.bf16.mxu1 %v16325_v48  ;;  %v16362_v48 = vld [vmem:[#allocation6 + $0x20] ss:$72 sps:$4 sm:$0xff]  }
 0x206   :  { %v5711_v61 = vadd.f32 %v5710_v57, %v5668_v49  ;;  %6021 = vmatpush1.bf16.msra.mxu0 %v16320_v51  ;;  %6052 = vmatprep.mubr.bf16.mxu0 %v18811_v50  ;;  %v16370_v49 = vld [vmem:[#allocation6 + $0x894] ss:$72 sps:$4 sm:$0xff]   ;;  %v16365_v51 = vld [vmem:[#allocation6 + $0x920] ss:$72 sps:$4 sm:$0xff]   ;;  %v16371_v57 = vld [vmem:[#allocation6 + $0x1190] ss:$72 sps:$4 sm:$0xff]  }
 0x207   :  { %v5712_v63 = vpop.f32.mrf.mxu0  ;;  %v5753_v1 = vpop.f32.mrf.mxu1  ;;  %6010 = vmatmul.mubr.bf16.vlgmr.msra.gmra.mxu1 %v18857_v23  ;;  %6022 = vmatprep.subr.bf16.mxu0 %v16328_v53  ;;  %v16373_v53 = vld [vmem:[#allocation6 + $0x1194] ss:$72 sps:$4 sm:$0xff]  }
 0x208   :  { %v18930_v3 = vadd.f32 %v5712_v63, %v5670_v54  ;;  %v18932_v5 = vadd.f32 %v5753_v1, %v5711_v61  ;;  %6064 = vmatpush1.bf16.msra.mxu1 %v16323_v55  ;;  %6095 = vmatprep.mubr.bf16.mxu1 %v18820_v56  ;;  %v16368_v54 = vld [vmem:[#allocation6 + $0x890] ss:$72 sps:$4 sm:$0xff]   ;;  %v16376_v55 = vld [vmem:[#allocation6 + $0x804] ss:$72 sps:$4 sm:$0xff]   ;;  %v16382_v61 = vld [vmem:[#allocation6 + $0x774] ss:$72 sps:$4 sm:$0xff]  }
 0x209   :  { %v5714_v7 = vpop.f32.mrf.mxu0  ;;  %v18935_v8 = vpop.f32.mrf.mxu1  ;;  %6065 = vmatprep.subr.bf16.mxu1 %v16331_v59  ;;  %v16379_v59 = vld [vmem:[#allocation6 + $0x1104] ss:$72 sps:$4 sm:$0xff]   ;;  %v16385_v63 = vld [vmem:[#allocation6 + $0x1074] ss:$72 sps:$4 sm:$0xff]   ;;  %v16380_v1 = vld [vmem:[#allocation6 + $0x770] ss:$72 sps:$4 sm:$0xff]  }
 0x20a   :  { %19647 = vst [vmem:[#allocation41_spill] sm:$0xff] %v18932_v5  ;;  %v5715_v10 = vadd.f32 %v5714_v7, %v5672_v60  ;;  %6023 = vmatpush1.bf16.msra.mxu0 %v16326_v62  ;;  %v16374_v60 = vld [vmem:[#allocation6 + $0x800] ss:$72 sps:$4 sm:$0xff]   ;;  %v16391_v7 = vld [vmem:[#allocation6 + $0xfe4] ss:$72 sps:$4 sm:$0xff]  }
 0x20b   :  { %v5757_v13 = vpop.f32.mrf.mxu1  ;;  %6024 = vmatprep.subr.bf16.mxu0 %v16334_v2  ;;  %v16377_v62 = vld [vmem:[#allocation6 + $0x1100] ss:$72 sps:$4 sm:$0xff]   ;;  %v16388_v2 = vld [vmem:[#allocation6 + $0x6e4] ss:$72 sps:$4 sm:$0xff]  }
 0x20c   :  { %v18937_v16 = vadd.f32 %v5757_v13, %v5715_v10  ;;  %6066 = vmatpush1.bf16.msra.mxu1 %v16329_v6  ;;  %v16383_v6 = vld [vmem:[#allocation6 + $0x1070] ss:$72 sps:$4 sm:$0xff]   ;;  %v16394_v10 = vld [vmem:[#allocation6 + $0x654] ss:$72 sps:$4 sm:$0xff]  }
 0x20d   :  { %6067 = vmatprep.subr.bf16.mxu1 %v16337_v9  ;;  %v16386_v9 = vld [vmem:[#allocation6 + $0x6e0] ss:$72 sps:$4 sm:$0xff]   ;;  %v16397_v13 = vld [vmem:[#allocation6 + $0xf54] ss:$72 sps:$4 sm:$0xff]  }
 0x20e   :  { %19648 = vst [vmem:[#allocation42_spill] sm:$0xff] %v18937_v16  ;;  %6025 = vmatpush1.bf16.msra.mxu0 %v16332_v11  ;;  %v16389_v11 = vld [vmem:[#allocation6 + $0xfe0] ss:$72 sps:$4 sm:$0xff]   ;;  %v19636_v16 = vsub.s32 6, %v18867_v31 }
 0x20f   :  { %6026 = vmatprep.subr.bf16.mxu0 %v16340_v14  ;;  %v16392_v14 = vld [vmem:[#allocation6 + $0x650] ss:$72 sps:$4 sm:$0xff]  }
 0x210   :  { %6068 = vmatpush1.bf16.msra.mxu1 %v16335_v18  ;;  %v16400_v18 = vld [vmem:[#allocation6 + $0x5c4] ss:$72 sps:$4 sm:$0xff]  }
 0x211   :  { %6069 = vmatprep.subr.bf16.mxu1 %v16343_v19  ;;  %v16395_v19 = vld [vmem:[#allocation6 + $0xf50] ss:$72 sps:$4 sm:$0xff]  }
 0x212   :  { %6027 = vmatpush1.bf16.msra.mxu0 %v16338_v21  ;;  %v16403_v21 = vld [vmem:[#allocation6 + $0xec4] ss:$72 sps:$4 sm:$0xff]  }
 0x213   :  { %6028 = vmatprep.subr.bf16.mxu0 %v16346_v24  ;;  %v16398_v24 = vld [vmem:[#allocation6 + $0x5c0] ss:$72 sps:$4 sm:$0xff]  }
 0x214   :  { %6070 = vmatpush1.bf16.msra.mxu1 %v16341_v46  ;;  %v16406_v46 = vld [vmem:[#allocation6 + $0x534] ss:$72 sps:$4 sm:$0xff]  }
 0x215   :  { %6071 = vmatprep.subr.bf16.mxu1 %v16349_v58  ;;  %v16401_v58 = vld [vmem:[#allocation6 + $0xec0] ss:$72 sps:$4 sm:$0xff]  }
 0x216   :  { %6029 = vmatpush1.bf16.msra.mxu0 %v16344_v25  ;;  %v16409_v25 = vld [vmem:[#allocation6 + $0xe34] ss:$72 sps:$4 sm:$0xff]  }
 0x217   :  { %6030 = vmatprep.subr.bf16.mxu0 %v16352_v27  ;;  %v16404_v27 = vld [vmem:[#allocation6 + $0x530] ss:$72 sps:$4 sm:$0xff]  }
 0x218   :  { %6072 = vmatpush1.bf16.msra.mxu1 %v16347_v28  ;;  %v16412_v28 = vld [vmem:[#allocation6 + $0x4a4] ss:$72 sps:$4 sm:$0xff]  }
 0x219   :  { %6073 = vmatprep.subr.bf16.mxu1 %v16355_v32  ;;  %v16407_v32 = vld [vmem:[#allocation6 + $0xe30] ss:$72 sps:$4 sm:$0xff]  }
 0x21a   :  { %6031 = vmatpush1.bf16.msra.mxu0 %v16350_v33  ;;  %v16415_v33 = vld [vmem:[#allocation6 + $0xda4] ss:$72 sps:$4 sm:$0xff]  }
 0x21b   :  { %6032 = vmatprep.subr.bf16.mxu0 %v16358_v4  ;;  %v16410_v4 = vld [vmem:[#allocation6 + $0x4a0] ss:$72 sps:$4 sm:$0xff]  }
 0x21c   :  { %6074 = vmatpush1.bf16.msra.mxu1 %v16353_v36  ;;  %v18942_v36 = vsub.s32 4, %v18867_v31 }
 0x21d   :  { %6075 = vmatprep.subr.bf16.mxu1 %v16361_v39  ;;  %v16418_v39 = vld [vmem:[#allocation6 + $0x1614] ss:$72 sps:$4 sm:$0xff]  }
 0x21e   :  { %6033 = vmatpush1.bf16.msra.mxu0 %v16356_v41  ;;  %v16413_v41 = vld [vmem:[#allocation6 + $0xda0] ss:$72 sps:$4 sm:$0xff]  }
 0x21f   :  { %6034 = vmatprep.subr.bf16.mxu0 %v16364_v42  ;;  %v16421_v42 = vld [vmem:[#allocation6 + $0x41c] ss:$72 sps:$4 sm:$0xff]  }
 0x220   :  { %6076 = vmatpush1.bf16.msra.mxu1 %v16359_v43  ;;  %v18946_v43 = vrot.slane %v18916_v38, %v18942_v36 }
 0x221   :  { %6077 = vmatprep.subr.bf16.mxu1 %v16367_v47  ;;  %v16416_v47 = vld [vmem:[#allocation6 + $0x1610] ss:$72 sps:$4 sm:$0xff]  }
 0x222   :  { %6035 = vmatpush1.bf16.msra.mxu0 %v16362_v48  ;;  %v18948_v48 = vpop.f32.mrf.mxu0 }
 0x223   :  { %6036 = vmatprep.subr.bf16.mxu0 %v16370_v49  ;;  %v16424_v49 = vld [vmem:[#allocation6 + $0x1584] ss:$72 sps:$4 sm:$0xff]  }
 0x224   :  { %6078 = vmatpush1.bf16.msra.mxu1 %v16365_v51  ;;  %v16419_v51 = vld [vmem:[#allocation6 + $0x418] ss:$72 sps:$4 sm:$0xff]  }
 0x225   :  { %6079 = vmatprep.subr.bf16.mxu1 %v16373_v53  ;;  %v18950_v53 = vpop.f32.mrf.mxu1 }
 0x226   :  { %6037 = vmatpush2.bf16.msra.mxu0 %v16368_v54 }
 0x227   :  { %6038 = vmatprep.subr.bf16.mxu0 %v16376_v55  ;;  %v16427_v55 = vld [vmem:[#allocation6 + $0x38c] ss:$72 sps:$4 sm:$0xff]  }
 0x228   :  { %6080 = vmatpush2.bf16.msra.mxu1 %v16371_v57 }
 0x229   :  { %6081 = vmatprep.subr.bf16.mxu1 %v16379_v59  ;;  %v16422_v59 = vld [vmem:[#allocation6 + $0x1580] ss:$72 sps:$4 sm:$0xff]  }
 0x22a   :  { %6039 = vmatpush2.bf16.msra.mxu0 %v16374_v60  ;;  %v16430_v60 = vld [vmem:[#allocation6 + $0x14f4] ss:$72 sps:$4 sm:$0xff]  }
 0x22b   :  { %6040 = vmatprep.subr.bf16.mxu0 %v16382_v61 }
 0x22c   :  { %6082 = vmatpush2.bf16.msra.mxu1 %v16377_v62  ;;  %v16425_v62 = vld [vmem:[#allocation6 + $0x388] ss:$72 sps:$4 sm:$0xff]  }
 0x22d   :  { %6083 = vmatprep.subr.bf16.mxu1 %v16385_v63  ;;  %v16433_v63 = vld [vmem:[#allocation6 + $0x2fc] ss:$72 sps:$4 sm:$0xff]  }
 0x22e   :  { %6041 = vmatpush2.bf16.msra.mxu0 %v16380_v1  ;;  %v16428_v1 = vld [vmem:[#allocation6 + $0x14f0] ss:$72 sps:$4 sm:$0xff]  }
 0x22f   :  { %6042 = vmatprep.subr.bf16.mxu0 %v16388_v2  ;;  %v16436_v2 = vld [vmem:[#allocation6 + $0x1464] ss:$72 sps:$4 sm:$0xff]  }
 0x230   :  { %6084 = vmatpush2.bf16.msra.mxu1 %v16383_v6  ;;  %v16431_v6 = vld [vmem:[#allocation6 + $0x2f8] ss:$72 sps:$4 sm:$0xff]  }
 0x231   :  { %6085 = vmatprep.subr.bf16.mxu1 %v16391_v7  ;;  %v16439_v7 = vld [vmem:[#allocation6 + $0x26c] ss:$72 sps:$4 sm:$0xff]  }
 0x232   :  { %6043 = vmatpush2.bf16.msra.mxu0 %v16386_v9  ;;  %v16434_v9 = vld [vmem:[#allocation6 + $0x1460] ss:$72 sps:$4 sm:$0xff]  }
 0x233   :  { %6044 = vmatprep.subr.bf16.mxu0 %v16394_v10  ;;  %v16442_v10 = vld [vmem:[#allocation6 + $0x13d4] ss:$72 sps:$4 sm:$0xff]  }
 0x234   :  { %6086 = vmatpush2.bf16.msra.mxu1 %v16389_v11  ;;  %v16437_v11 = vld [vmem:[#allocation6 + $0x268] ss:$72 sps:$4 sm:$0xff]  }
 0x235   :  { %6087 = vmatprep.subr.bf16.mxu1 %v16397_v13  ;;  %v16445_v13 = vld [vmem:[#allocation6 + $0x1dc] ss:$72 sps:$4 sm:$0xff]  }
 0x236   :  { %6045 = vmatpush2.bf16.msra.mxu0 %v16392_v14  ;;  %v16440_v14 = vld [vmem:[#allocation6 + $0x13d0] ss:$72 sps:$4 sm:$0xff]  }
 0x237   :  { %6046 = vmatprep.subr.bf16.mxu0 %v16400_v18  ;;  %v16448_v18 = vld [vmem:[#allocation6 + $0x1344] ss:$72 sps:$4 sm:$0xff]  }
 0x238   :  { %6088 = vmatpush2.bf16.msra.mxu1 %v16395_v19  ;;  %v16443_v19 = vld [vmem:[#allocation6 + $0x1d8] ss:$72 sps:$4 sm:$0xff]  }
 0x239   :  { %6089 = vmatprep.subr.bf16.mxu1 %v16403_v21  ;;  %v16451_v21 = vld [vmem:[#allocation6 + $0x14c] ss:$72 sps:$4 sm:$0xff]  }
 0x23a   :  { %6047 = vmatpush2.bf16.msra.mxu0 %v16398_v24  ;;  %v16446_v24 = vld [vmem:[#allocation6 + $0x1340] ss:$72 sps:$4 sm:$0xff]  }
 0x23b   :  { %6048 = vmatprep.subr.bf16.mxu0 %v16406_v46  ;;  %v16454_v46 = vld [vmem:[#allocation6 + $0x12b4] ss:$72 sps:$4 sm:$0xff]  }
 0x23c   :  { %6090 = vmatpush2.bf16.msra.mxu1 %v16401_v58  ;;  %v16449_v58 = vld [vmem:[#allocation6 + $0x148] ss:$72 sps:$4 sm:$0xff]  }
 0x23d   :  { %6091 = vmatprep.subr.bf16.mxu1 %v16409_v25  ;;  %v16457_v25 = vld [vmem:[#allocation6 + $0xbc] ss:$72 sps:$4 sm:$0xff]  }
 0x23e   :  { %6049 = vmatpush2.bf16.msra.mxu0 %v16404_v27  ;;  %v16452_v27 = vld [vmem:[#allocation6 + $0x12b0] ss:$72 sps:$4 sm:$0xff]  }
 0x23f   :  { %6050 = vmatprep.subr.bf16.mxu0 %v16412_v28  ;;  %v16460_v28 = vld [vmem:[#allocation6 + $0x1224] ss:$72 sps:$4 sm:$0xff]  }
 0x240   :  { %6092 = vmatpush2.bf16.msra.mxu1 %v16407_v32  ;;  %v16455_v32 = vld [vmem:[#allocation6 + $0xb8] ss:$72 sps:$4 sm:$0xff]  }
 0x241   :  { %6093 = vmatprep.subr.bf16.mxu1 %v16415_v33  ;;  %v16463_v33 = vld [vmem:[#allocation6 + $0x2c] ss:$72 sps:$4 sm:$0xff]  }
 0x242   :  { %6051 = vmatpush2.bf16.msra.mxu0 %v16410_v4  ;;  %v16458_v4 = vld [vmem:[#allocation6 + $0x1220] ss:$72 sps:$4 sm:$0xff]  }
 0x243   :  { %6106 = vmatprep.subr.bf16.mxu0 %v16418_v39  ;;  %v16466_v39 = vld [vmem:[#allocation6 + $0x1a94] ss:$72 sps:$4 sm:$0xff]  }
 0x244   :  { %6094 = vmatpush2.bf16.msra.mxu1 %v16413_v41  ;;  %v16461_v41 = vld [vmem:[#allocation6 + $0x28] ss:$72 sps:$4 sm:$0xff]  }
 0x245   :  { %v5796_v54 = vpop.f32.mrf.mxu0  ;;  %6053 = vmatmul.mubr.bf16.vlgmr.msra.gmra.mxu0 %v18835_v12  ;;  %6149 = vmatprep.subr.bf16.mxu1 %v16421_v42  ;;  %v16469_v42 = vld [vmem:[#allocation6 + $0x89c] ss:$72 sps:$4 sm:$0xff]  }
 0x246   :  { %v5797_v57 = vadd.f32 %v5796_v54, %v18946_v43  ;;  %6107 = vmatpush1.bf16.msra.mxu0 %v16416_v47  ;;  %6138 = vmatprep.mubr.bf16.mxu0 %v18848_v44  ;;  %v16464_v47 = vld [vmem:[#allocation6 + $0x1a90] ss:$72 sps:$4 sm:$0xff]   ;;  %v16475_v54 = vld [vmem:[#allocation6 + $0x80c] ss:$72 sps:$4 sm:$0xff]  }
 0x247   :  { %v5839_v38 = vpop.f32.mrf.mxu1  ;;  %6096 = vmatmul.mubr.bf16.vlgmr.msra.gmra.mxu1 %v18837_v15  ;;  %6108 = vmatprep.subr.bf16.mxu0 %v16424_v49  ;;  %v16472_v49 = vld [vmem:[#allocation6 + $0x1a04] ss:$72 sps:$4 sm:$0xff]  }
 0x248   :  { %v18956_v61 = vadd.f32 %v5839_v38, %v5797_v57  ;;  %6150 = vmatpush1.bf16.msra.mxu1 %v16419_v51  ;;  %6181 = vmatprep.mubr.bf16.mxu1 %v18811_v50  ;;  %v16467_v51 = vld [vmem:[#allocation6 + $0x898] ss:$72 sps:$4 sm:$0xff]   ;;  %v16478_v57 = vld [vmem:[#allocation6 + $0x1974] ss:$72 sps:$4 sm:$0xff]  }
 0x249   :  { %6151 = vmatprep.subr.bf16.mxu1 %v16427_v55  ;;  %v16470_v55 = vld [vmem:[#allocation6 + $0x1a00] ss:$72 sps:$4 sm:$0xff]   ;;  %v16481_v38 = vld [vmem:[#allocation6 + $0x77c] ss:$72 sps:$4 sm:$0xff]  }
 0x24a   :  { %6109 = vmatpush1.bf16.msra.mxu0 %v16422_v59  ;;  %v16473_v59 = vld [vmem:[#allocation6 + $0x808] ss:$72 sps:$4 sm:$0xff]  }
 0x24b   :  { %6110 = vmatprep.subr.bf16.mxu0 %v16430_v60  ;;  %v16476_v60 = vld [vmem:[#allocation6 + $0x1970] ss:$72 sps:$4 sm:$0xff]  }
 0x24c   :  { %6152 = vmatpush1.bf16.msra.mxu1 %v16425_v62  ;;  %v16484_v62 = vld [vmem:[#allocation6 + $0x18e4] ss:$72 sps:$4 sm:$0xff]  }
 0x24d   :  { %6153 = vmatprep.subr.bf16.mxu1 %v16433_v63  ;;  %v16479_v63 = vld [vmem:[#allocation6 + $0x778] ss:$72 sps:$4 sm:$0xff]  }
 0x24e   :  { %6111 = vmatpush1.bf16.msra.mxu0 %v16428_v1  ;;  %v16487_v1 = vld [vmem:[#allocation6 + $0x6ec] ss:$72 sps:$4 sm:$0xff]  }
 0x24f   :  { %6112 = vmatprep.subr.bf16.mxu0 %v16436_v2  ;;  %v16482_v2 = vld [vmem:[#allocation6 + $0x18e0] ss:$72 sps:$4 sm:$0xff]  }
 0x250   :  { %6154 = vmatpush1.bf16.msra.mxu1 %v16431_v6  ;;  %v16490_v6 = vld [vmem:[#allocation6 + $0x1854] ss:$72 sps:$4 sm:$0xff]  }
 0x251   :  { %6155 = vmatprep.subr.bf16.mxu1 %v16439_v7  ;;  %v16485_v7 = vld [vmem:[#allocation6 + $0x6e8] ss:$72 sps:$4 sm:$0xff]  }
 0x252   :  { %6113 = vmatpush1.bf16.msra.mxu0 %v16434_v9  ;;  %v16493_v9 = vld [vmem:[#allocation6 + $0x65c] ss:$72 sps:$4 sm:$0xff]  }
 0x253   :  { %6114 = vmatprep.subr.bf16.mxu0 %v16442_v10  ;;  %v16488_v10 = vld [vmem:[#allocation6 + $0x1850] ss:$72 sps:$4 sm:$0xff]  }
 0x254   :  { %6156 = vmatpush1.bf16.msra.mxu1 %v16437_v11  ;;  %v16496_v11 = vld [vmem:[#allocation6 + $0x17c4] ss:$72 sps:$4 sm:$0xff]  }
 0x255   :  { %6157 = vmatprep.subr.bf16.mxu1 %v16445_v13  ;;  %v16491_v13 = vld [vmem:[#allocation6 + $0x658] ss:$72 sps:$4 sm:$0xff]  }
 0x256   :  { %6115 = vmatpush1.bf16.msra.mxu0 %v16440_v14  ;;  %v16499_v14 = vld [vmem:[#allocation6 + $0x5cc] ss:$72 sps:$4 sm:$0xff]  }
 0x257   :  { %6116 = vmatprep.subr.bf16.mxu0 %v16448_v18  ;;  %v16494_v18 = vld [vmem:[#allocation6 + $0x17c0] ss:$72 sps:$4 sm:$0xff]  }
 0x258   :  { %6158 = vmatpush1.bf16.msra.mxu1 %v16443_v19  ;;  %v16502_v19 = vld [vmem:[#allocation6 + $0x1734] ss:$72 sps:$4 sm:$0xff]  }
 0x259   :  { %6159 = vmatprep.subr.bf16.mxu1 %v16451_v21  ;;  %v16497_v21 = vld [vmem:[#allocation6 + $0x5c8] ss:$72 sps:$4 sm:$0xff]  }
 0x25a   :  { %6117 = vmatpush1.bf16.msra.mxu0 %v16446_v24  ;;  %v16505_v24 = vld [vmem:[#allocation6 + $0x53c] ss:$72 sps:$4 sm:$0xff]  }
 0x25b   :  { %6118 = vmatprep.subr.bf16.mxu0 %v16454_v46  ;;  %v16500_v46 = vld [vmem:[#allocation6 + $0x1730] ss:$72 sps:$4 sm:$0xff]  }
 0x25c   :  { %6160 = vmatpush1.bf16.msra.mxu1 %v16449_v58  ;;  %v18959_v58 = vpop.f32.mrf.mxu0 }
 0x25d   :  { %6161 = vmatprep.subr.bf16.mxu1 %v16457_v25  ;;  %v16508_v25 = vld [vmem:[#allocation6 + $0x16a4] ss:$72 sps:$4 sm:$0xff]  }
 0x25e   :  { %6119 = vmatpush1.bf16.msra.mxu0 %v16452_v27  ;;  %v16503_v27 = vld [vmem:[#allocation6 + $0x538] ss:$72 sps:$4 sm:$0xff]  }
 0x25f   :  { %6120 = vmatprep.subr.bf16.mxu0 %v16460_v28  ;;  %v16511_v28 = vld [vmem:[#allocation6 + $0x4ac] ss:$72 sps:$4 sm:$0xff]  }
 0x260   :  { %6162 = vmatpush1.bf16.msra.mxu1 %v16455_v32  ;;  %v16506_v32 = vld [vmem:[#allocation6 + $0x16a0] ss:$72 sps:$4 sm:$0xff]  }
 0x261   :  { %6163 = vmatprep.subr.bf16.mxu1 %v16463_v33  ;;  %v5800_v33 = vpop.f32.mrf.mxu0 }
 0x262   :  { %6121 = vmatpush1.bf16.msra.mxu0 %v16458_v4  ;;  %v16514_v4 = vld [vmem:[#allocation6 + $0xd1c] ss:$72 sps:$4 sm:$0xff]  }
 0x263   :  { %6122 = vmatprep.subr.bf16.mxu0 %v16466_v39  ;;  %v16509_v39 = vld [vmem:[#allocation6 + $0x4a8] ss:$72 sps:$4 sm:$0xff]  }
 0x264   :  { %6164 = vmatpush1.bf16.msra.mxu1 %v16461_v41  ;;  %v18961_v41 = vpop.f32.mrf.mxu1 }
 0x265   :  { %6165 = vmatprep.subr.bf16.mxu1 %v16469_v42  ;;  %19649 = vst [vmem:[#allocation43_spill] sm:$0xff] %v18961_v41  ;;  %v16517_v42 = vld [vmem:[#allocation6 + $0x161c] ss:$72 sps:$4 sm:$0xff]  }
 0x266   :  { %6123 = vmatpush2.bf16.msra.mxu0 %v16464_v47  ;;  %v16512_v47 = vld [vmem:[#allocation6 + $0xd18] ss:$72 sps:$4 sm:$0xff]  }
 0x267   :  { %6124 = vmatprep.subr.bf16.mxu0 %v16472_v49  ;;  %v18963_v49 = vpop.f32.mrf.mxu0 }
 0x268   :  { %6166 = vmatpush2.bf16.msra.mxu1 %v16467_v51  ;;  %v16520_v51 = vld [vmem:[#allocation6 + $0xc8c] ss:$72 sps:$4 sm:$0xff]  }
 0x269   :  { %6167 = vmatprep.subr.bf16.mxu1 %v16475_v54  ;;  %v5801_v54 = vadd.f32 %v5800_v33, %v18946_v43  ;;  %v16526_v43 = vld [vmem:[#allocation6 + $0xbfc] ss:$72 sps:$4 sm:$0xff]  }
 0x26a   :  { %6125 = vmatpush2.bf16.msra.mxu0 %v16470_v55  ;;  %v16515_v55 = vld [vmem:[#allocation6 + $0x1618] ss:$72 sps:$4 sm:$0xff]   ;;  %v16550_v33 = vld [vmem:[#allocation6 + $0x9bc] ss:$72 sps:$4 sm:$0xff]  }
 0x26b   :  { %6126 = vmatprep.subr.bf16.mxu0 %v16478_v57  ;;  %v5843_v57 = vpop.f32.mrf.mxu1 }
 0x26c   :  { %6168 = vmatpush2.bf16.msra.mxu1 %v16473_v59 }
 0x26d   :  { %6169 = vmatprep.subr.bf16.mxu1 %v16481_v38  ;;  %v16523_v38 = vld [vmem:[#allocation6 + $0x158c] ss:$72 sps:$4 sm:$0xff]  }
 0x26e   :  { %6127 = vmatpush2.bf16.msra.mxu0 %v16476_v60 }
 0x26f   :  { %6128 = vmatprep.subr.bf16.mxu0 %v16484_v62  ;;  %v16518_v62 = vld [vmem:[#allocation6 + $0xc88] ss:$72 sps:$4 sm:$0xff]  }
 0x270   :  { %6170 = vmatpush2.bf16.msra.mxu1 %v16479_v63 }
 0x271   :  { %6171 = vmatprep.subr.bf16.mxu1 %v16487_v1  ;;  %v5844_v1 = vadd.f32 %v5843_v57, %v5801_v54  ;;  %v16559_v54 = vld [vmem:[#allocation6 + $0x122c] ss:$72 sps:$4 sm:$0xff]   ;;  %v16562_v57 = vld [vmem:[#allocation6 + $0x119c] ss:$72 sps:$4 sm:$0xff]  }
 0x272   :  { %6129 = vmatpush2.bf16.msra.mxu0 %v16482_v2  ;;  %v16521_v2 = vld [vmem:[#allocation6 + $0x1588] ss:$72 sps:$4 sm:$0xff]  }
 0x273   :  { %6130 = vmatprep.subr.bf16.mxu0 %v16490_v6 }
 0x274   :  { %6172 = vmatpush2.bf16.msra.mxu1 %v16485_v7  ;;  %v16529_v7 = vld [vmem:[#allocation6 + $0x14fc] ss:$72 sps:$4 sm:$0xff]  }
 0x275   :  { %6173 = vmatprep.subr.bf16.mxu1 %v16493_v9  ;;  %v16524_v9 = vld [vmem:[#allocation6 + $0xbf8] ss:$72 sps:$4 sm:$0xff]  }
 0x276   :  { %6131 = vmatpush2.bf16.msra.mxu0 %v16488_v10  ;;  %v16532_v10 = vld [vmem:[#allocation6 + $0xb6c] ss:$72 sps:$4 sm:$0xff]  }
 0x277   :  { %6132 = vmatprep.subr.bf16.mxu0 %v16496_v11 }
 0x278   :  { %6174 = vmatpush2.bf16.msra.mxu1 %v16491_v13  ;;  %v16527_v13 = vld [vmem:[#allocation6 + $0x14f8] ss:$72 sps:$4 sm:$0xff]  }
 0x279   :  { %6175 = vmatprep.subr.bf16.mxu1 %v16499_v14  ;;  %v16535_v14 = vld [vmem:[#allocation6 + $0x146c] ss:$72 sps:$4 sm:$0xff]  }
 0x27a   :  { %6133 = vmatpush2.bf16.msra.mxu0 %v16494_v18  ;;  %v16530_v18 = vld [vmem:[#allocation6 + $0xb68] ss:$72 sps:$4 sm:$0xff]  }
 0x27b   :  { %6134 = vmatprep.subr.bf16.mxu0 %v16502_v19  ;;  %v16538_v19 = vld [vmem:[#allocation6 + $0xadc] ss:$72 sps:$4 sm:$0xff]  }
 0x27c   :  { %6176 = vmatpush2.bf16.msra.mxu1 %v16497_v21  ;;  %v16533_v21 = vld [vmem:[#allocation6 + $0x1468] ss:$72 sps:$4 sm:$0xff]  }
 0x27d   :  { %6177 = vmatprep.subr.bf16.mxu1 %v16505_v24  ;;  %v16541_v24 = vld [vmem:[#allocation6 + $0x13dc] ss:$72 sps:$4 sm:$0xff]  }
 0x27e   :  { %6135 = vmatpush2.bf16.msra.mxu0 %v16500_v46  ;;  %v16536_v46 = vld [vmem:[#allocation6 + $0xad8] ss:$72 sps:$4 sm:$0xff]  }
 0x27f   :  { %6136 = vmatprep.subr.bf16.mxu0 %v16508_v25  ;;  %v16544_v25 = vld [vmem:[#allocation6 + $0xa4c] ss:$72 sps:$4 sm:$0xff]  }
 0x280   :  { %6178 = vmatpush2.bf16.msra.mxu1 %v16503_v27  ;;  %v16539_v27 = vld [vmem:[#allocation6 + $0x13d8] ss:$72 sps:$4 sm:$0xff]  }
 0x281   :  { %6179 = vmatprep.subr.bf16.mxu1 %v16511_v28  ;;  %v16547_v28 = vld [vmem:[#allocation6 + $0x134c] ss:$72 sps:$4 sm:$0xff]  }
 0x282   :  { %6137 = vmatpush2.bf16.msra.mxu0 %v16506_v32  ;;  %v16542_v32 = vld [vmem:[#allocation6 + $0xa48] ss:$72 sps:$4 sm:$0xff]  }
 0x283   :  { %6192 = vmatprep.subr.bf16.mxu0 %v16514_v4  ;;  %v16545_v4 = vld [vmem:[#allocation6 + $0x1348] ss:$72 sps:$4 sm:$0xff]  }
 0x284   :  { %6180 = vmatpush2.bf16.msra.mxu1 %v16509_v39  ;;  %v16553_v39 = vld [vmem:[#allocation6 + $0x12bc] ss:$72 sps:$4 sm:$0xff]  }
 0x285   :  { %v5882_v59 = vpop.f32.mrf.mxu0  ;;  %6139 = vmatmul.mubr.bf16.vlgmr.msra.gmra.mxu0 %v18857_v23  ;;  %6235 = vmatprep.subr.bf16.mxu1 %v16517_v42  ;;  %v16548_v42 = vld [vmem:[#allocation6 + $0x9b8] ss:$72 sps:$4 sm:$0xff]  }
 0x286   :  { %v18968_v60 = vadd.f32 %v5882_v59, %v18956_v61  ;;  %6193 = vmatpush1.bf16.msra.mxu0 %v16512_v47  ;;  %6224 = vmatprep.mubr.bf16.mxu0 %v18820_v56  ;;  %v16556_v47 = vld [vmem:[#allocation6 + $0x92c] ss:$72 sps:$4 sm:$0xff]   ;;  %v16557_v59 = vld [vmem:[#allocation6 + $0x1228] ss:$72 sps:$4 sm:$0xff]  }
 0x287   :  { %v18971_v63 = vpop.f32.mrf.mxu0  ;;  %6182 = vmatmul.mubr.bf16.vlgmr.msra.gmra.mxu1 %v18835_v12  ;;  %6194 = vmatprep.subr.bf16.mxu0 %v16520_v51  ;;  %v16551_v51 = vld [vmem:[#allocation6 + $0x12b8] ss:$72 sps:$4 sm:$0xff]  }
 0x288   :  { %19650 = vst [vmem:[#allocation44_spill] sm:$0xff] %v18968_v60  ;;  %19651 = vst [vmem:[#allocation45_spill] sm:$0xff] %v18971_v63  ;;  %6236 = vmatpush1.bf16.msra.mxu1 %v16515_v55  ;;  %6267 = vmatprep.mubr.bf16.mxu1 %v18848_v44  ;;  %v16554_v55 = vld [vmem:[#allocation6 + $0x928] ss:$72 sps:$4 sm:$0xff]  }
 0x289   :  { %v5886_v6 = vpop.f32.mrf.mxu0  ;;  %6237 = vmatprep.subr.bf16.mxu1 %v16523_v38  ;;  %v16565_v38 = vld [vmem:[#allocation6 + $0x1a9c] ss:$72 sps:$4 sm:$0xff]   ;;  %v17025_v60 = vld [vmem:[#allocation6 + $0x1900] ss:$72 sps:$4 sm:$0xff]  }
 0x28a   :  { %v18975_v61 = vadd.f32 %v5886_v6, %v5844_v1  ;;  %6195 = vmatpush1.bf16.msra.mxu0 %v16518_v62  ;;  %v16560_v62 = vld [vmem:[#allocation6 + $0x1198] ss:$72 sps:$4 sm:$0xff]   ;;  %v16566_v6 = vld [vmem:[#allocation6 + $0x1108] ss:$72 sps:$4 sm:$0xff]  }
 0x28b   :  { %6196 = vmatprep.subr.bf16.mxu0 %v16526_v43  ;;  %v16568_v43 = vld [vmem:[#allocation6 + $0x110c] ss:$72 sps:$4 sm:$0xff]   ;;  %v16563_v1 = vld [vmem:[#allocation6 + $0x1a98] ss:$72 sps:$4 sm:$0xff]  }
 0x28c   :  { %19652 = vst [vmem:[#allocation46_spill] sm:$0xff] %v18975_v61  ;;  %6238 = vmatpush1.bf16.msra.mxu1 %v16521_v2  ;;  %v16571_v2 = vld [vmem:[#allocation6 + $0x1a0c] ss:$72 sps:$4 sm:$0xff]  }
 0x28d   :  { %6239 = vmatprep.subr.bf16.mxu1 %v16529_v7  ;;  %v16574_v7 = vld [vmem:[#allocation6 + $0x107c] ss:$72 sps:$4 sm:$0xff]  }
 0x28e   :  { %6197 = vmatpush1.bf16.msra.mxu0 %v16524_v9  ;;  %v16569_v9 = vld [vmem:[#allocation6 + $0x1a08] ss:$72 sps:$4 sm:$0xff]   ;;  %v17030_v61 = vld [vmem:[#allocation6 + $0x1874] ss:$72 sps:$4 sm:$0xff]  }
 0x28f   :  { %6198 = vmatprep.subr.bf16.mxu0 %v16532_v10  ;;  %v16577_v10 = vld [vmem:[#allocation6 + $0x197c] ss:$72 sps:$4 sm:$0xff]  }
 0x290   :  { %6240 = vmatpush1.bf16.msra.mxu1 %v16527_v13  ;;  %v16572_v13 = vld [vmem:[#allocation6 + $0x1078] ss:$72 sps:$4 sm:$0xff]  }
 0x291   :  { %6241 = vmatprep.subr.bf16.mxu1 %v16535_v14  ;;  %v16580_v14 = vld [vmem:[#allocation6 + $0xfec] ss:$72 sps:$4 sm:$0xff]  }
 0x292   :  { %6199 = vmatpush1.bf16.msra.mxu0 %v16530_v18  ;;  %v16575_v18 = vld [vmem:[#allocation6 + $0x1978] ss:$72 sps:$4 sm:$0xff]  }
 0x293   :  { %6200 = vmatprep.subr.bf16.mxu0 %v16538_v19  ;;  %v16583_v19 = vld [vmem:[#allocation6 + $0x18ec] ss:$72 sps:$4 sm:$0xff]  }
 0x294   :  { %6242 = vmatpush1.bf16.msra.mxu1 %v16533_v21  ;;  %v16578_v21 = vld [vmem:[#allocation6 + $0xfe8] ss:$72 sps:$4 sm:$0xff]  }
 0x295   :  { %6243 = vmatprep.subr.bf16.mxu1 %v16541_v24  ;;  %v16586_v24 = vld [vmem:[#allocation6 + $0xf5c] ss:$72 sps:$4 sm:$0xff]  }
 0x296   :  { %6201 = vmatpush1.bf16.msra.mxu0 %v16536_v46  ;;  %v16581_v46 = vld [vmem:[#allocation6 + $0x18e8] ss:$72 sps:$4 sm:$0xff]  }
 0x297   :  { %6202 = vmatprep.subr.bf16.mxu0 %v16544_v25  ;;  %v16589_v25 = vld [vmem:[#allocation6 + $0x185c] ss:$72 sps:$4 sm:$0xff]  }
 0x298   :  { %6244 = vmatpush1.bf16.msra.mxu1 %v16539_v27  ;;  %v16584_v27 = vld [vmem:[#allocation6 + $0xf58] ss:$72 sps:$4 sm:$0xff]  }
 0x299   :  { %6245 = vmatprep.subr.bf16.mxu1 %v16547_v28  ;;  %v16592_v28 = vld [vmem:[#allocation6 + $0xecc] ss:$72 sps:$4 sm:$0xff]  }
 0x29a   :  { %6203 = vmatpush1.bf16.msra.mxu0 %v16542_v32  ;;  %v16587_v32 = vld [vmem:[#allocation6 + $0x1858] ss:$72 sps:$4 sm:$0xff]  }
 0x29b   :  { %6204 = vmatprep.subr.bf16.mxu0 %v16550_v33  ;;  %v16595_v33 = vld [vmem:[#allocation6 + $0x17cc] ss:$72 sps:$4 sm:$0xff]  }
 0x29c   :  { %6246 = vmatpush1.bf16.msra.mxu1 %v16545_v4  ;;  %v16590_v4 = vld [vmem:[#allocation6 + $0xec8] ss:$72 sps:$4 sm:$0xff]  }
 0x29d   :  { %6247 = vmatprep.subr.bf16.mxu1 %v16553_v39  ;;  %v16598_v39 = vld [vmem:[#allocation6 + $0xe3c] ss:$72 sps:$4 sm:$0xff]  }
 0x29e   :  { %6205 = vmatpush1.bf16.msra.mxu0 %v16548_v42  ;;  %v16593_v42 = vld [vmem:[#allocation6 + $0x17c8] ss:$72 sps:$4 sm:$0xff]  }
 0x29f   :  { %6206 = vmatprep.subr.bf16.mxu0 %v16556_v47  ;;  %v16601_v47 = vld [vmem:[#allocation6 + $0x173c] ss:$72 sps:$4 sm:$0xff]  }
 0x2a0   :  { %6248 = vmatpush1.bf16.msra.mxu1 %v16551_v51  ;;  %v16596_v51 = vld [vmem:[#allocation6 + $0xe38] ss:$72 sps:$4 sm:$0xff]  }
 0x2a1   :  { %6249 = vmatprep.subr.bf16.mxu1 %v16559_v54  ;;  %v16604_v54 = vld [vmem:[#allocation6 + $0xdac] ss:$72 sps:$4 sm:$0xff]  }
 0x2a2   :  { %6207 = vmatpush1.bf16.msra.mxu0 %v16554_v55  ;;  %v16599_v55 = vld [vmem:[#allocation6 + $0x1738] ss:$72 sps:$4 sm:$0xff]  }
 0x2a3   :  { %6208 = vmatprep.subr.bf16.mxu0 %v16562_v57  ;;  %v16607_v57 = vld [vmem:[#allocation6 + $0x16ac] ss:$72 sps:$4 sm:$0xff]  }
 0x2a4   :  { %6250 = vmatpush1.bf16.msra.mxu1 %v16557_v59  ;;  %v16602_v59 = vld [vmem:[#allocation6 + $0xda8] ss:$72 sps:$4 sm:$0xff]  }
 0x2a5   :  { %6251 = vmatprep.subr.bf16.mxu1 %v16565_v38  ;;  %v16610_v38 = vld [vmem:[#allocation6 + $0x424] ss:$72 sps:$4 sm:$0xff]  }
 0x2a6   :  { %6209 = vmatpush2.bf16.msra.mxu0 %v16560_v62  ;;  %v16605_v62 = vld [vmem:[#allocation6 + $0x16a8] ss:$72 sps:$4 sm:$0xff]  }
 0x2a7   :  { %6210 = vmatprep.subr.bf16.mxu0 %v16568_v43  ;;  %v16613_v43 = vld [vmem:[#allocation6 + $0xd24] ss:$72 sps:$4 sm:$0xff]  }
 0x2a8   :  { %6252 = vmatpush2.bf16.msra.mxu1 %v16563_v1  ;;  %v16608_v1 = vld [vmem:[#allocation6 + $0x420] ss:$72 sps:$4 sm:$0xff]  }
 0x2a9   :  { %6253 = vmatprep.subr.bf16.mxu1 %v16571_v2  ;;  %v16616_v2 = vld [vmem:[#allocation6 + $0x394] ss:$72 sps:$4 sm:$0xff]  }
 0x2aa   :  { %6211 = vmatpush2.bf16.msra.mxu0 %v16566_v6  ;;  %v16611_v6 = vld [vmem:[#allocation6 + $0xd20] ss:$72 sps:$4 sm:$0xff]  }
 0x2ab   :  { %6212 = vmatprep.subr.bf16.mxu0 %v16574_v7  ;;  %v16619_v7 = vld [vmem:[#allocation6 + $0xc94] ss:$72 sps:$4 sm:$0xff]  }
 0x2ac   :  { %6254 = vmatpush2.bf16.msra.mxu1 %v16569_v9  ;;  %v16614_v9 = vld [vmem:[#allocation6 + $0x390] ss:$72 sps:$4 sm:$0xff]  }
 0x2ad   :  { %6255 = vmatprep.subr.bf16.mxu1 %v16577_v10  ;;  %v16622_v10 = vld [vmem:[#allocation6 + $0x304] ss:$72 sps:$4 sm:$0xff]  }
 0x2ae   :  { %6213 = vmatpush2.bf16.msra.mxu0 %v16572_v13  ;;  %v16617_v13 = vld [vmem:[#allocation6 + $0xc90] ss:$72 sps:$4 sm:$0xff]  }
 0x2af   :  { %6214 = vmatprep.subr.bf16.mxu0 %v16580_v14  ;;  %v16625_v14 = vld [vmem:[#allocation6 + $0xc04] ss:$72 sps:$4 sm:$0xff]  }
 0x2b0   :  { %6256 = vmatpush2.bf16.msra.mxu1 %v16575_v18  ;;  %v16620_v18 = vld [vmem:[#allocation6 + $0x300] ss:$72 sps:$4 sm:$0xff]  }
 0x2b1   :  { %6257 = vmatprep.subr.bf16.mxu1 %v16583_v19  ;;  %v16628_v19 = vld [vmem:[#allocation6 + $0x274] ss:$72 sps:$4 sm:$0xff]  }
 0x2b2   :  { %6215 = vmatpush2.bf16.msra.mxu0 %v16578_v21  ;;  %v16623_v21 = vld [vmem:[#allocation6 + $0xc00] ss:$72 sps:$4 sm:$0xff]  }
 0x2b3   :  { %6216 = vmatprep.subr.bf16.mxu0 %v16586_v24  ;;  %v16631_v24 = vld [vmem:[#allocation6 + $0xb74] ss:$72 sps:$4 sm:$0xff]  }
 0x2b4   :  { %6258 = vmatpush2.bf16.msra.mxu1 %v16581_v46  ;;  %v16626_v46 = vld [vmem:[#allocation6 + $0x270] ss:$72 sps:$4 sm:$0xff]  }
 0x2b5   :  { %6259 = vmatprep.subr.bf16.mxu1 %v16589_v25  ;;  %v16634_v25 = vld [vmem:[#allocation6 + $0x1e4] ss:$72 sps:$4 sm:$0xff]  }
 0x2b6   :  { %6217 = vmatpush2.bf16.msra.mxu0 %v16584_v27  ;;  %v16629_v27 = vld [vmem:[#allocation6 + $0xb70] ss:$72 sps:$4 sm:$0xff]  }
 0x2b7   :  { %6218 = vmatprep.subr.bf16.mxu0 %v16592_v28  ;;  %v16637_v28 = vld [vmem:[#allocation6 + $0xae4] ss:$72 sps:$4 sm:$0xff]  }
 0x2b8   :  { %6260 = vmatpush2.bf16.msra.mxu1 %v16587_v32  ;;  %v16632_v32 = vld [vmem:[#allocation6 + $0x1e0] ss:$72 sps:$4 sm:$0xff]  }
 0x2b9   :  { %6261 = vmatprep.subr.bf16.mxu1 %v16595_v33  ;;  %v16640_v33 = vld [vmem:[#allocation6 + $0x154] ss:$72 sps:$4 sm:$0xff]  }
 0x2ba   :  { %6219 = vmatpush2.bf16.msra.mxu0 %v16590_v4  ;;  %v16635_v4 = vld [vmem:[#allocation6 + $0xae0] ss:$72 sps:$4 sm:$0xff]  }
 0x2bb   :  { %6220 = vmatprep.subr.bf16.mxu0 %v16598_v39  ;;  %v16643_v39 = vld [vmem:[#allocation6 + $0xa54] ss:$72 sps:$4 sm:$0xff]  }
 0x2bc   :  { %6262 = vmatpush2.bf16.msra.mxu1 %v16593_v42  ;;  %v16638_v42 = vld [vmem:[#allocation6 + $0x150] ss:$72 sps:$4 sm:$0xff]  }
 0x2bd   :  { %6263 = vmatprep.subr.bf16.mxu1 %v16601_v47  ;;  %v16646_v47 = vld [vmem:[#allocation6 + $0xc4] ss:$72 sps:$4 sm:$0xff]  }
 0x2be   :  { %6221 = vmatpush2.bf16.msra.mxu0 %v16596_v51  ;;  %v16641_v51 = vld [vmem:[#allocation6 + $0xa50] ss:$72 sps:$4 sm:$0xff]  }
 0x2bf   :  { %6222 = vmatprep.subr.bf16.mxu0 %v16604_v54  ;;  %v16649_v54 = vld [vmem:[#allocation6 + $0x9c4] ss:$72 sps:$4 sm:$0xff]  }
 0x2c0   :  { %6264 = vmatpush2.bf16.msra.mxu1 %v16599_v55  ;;  %v16644_v55 = vld [vmem:[#allocation6 + $0xc0] ss:$72 sps:$4 sm:$0xff]  }
 0x2c1   :  { %6265 = vmatprep.subr.bf16.mxu1 %v16607_v57  ;;  %v16652_v57 = vld [vmem:[#allocation6 + $0x34] ss:$72 sps:$4 sm:$0xff]  }
 0x2c2   :  { %6223 = vmatpush2.bf16.msra.mxu0 %v16602_v59  ;;  %v16647_v59 = vld [vmem:[#allocation6 + $0x9c0] ss:$72 sps:$4 sm:$0xff]  }
 0x2c3   :  { %6278 = vmatprep.subr.bf16.mxu0 %v16610_v38  ;;  %v16655_v38 = vld [vmem:[#allocation6 + $0x934] ss:$72 sps:$4 sm:$0xff]  }
 0x2c4   :  { %6266 = vmatpush2.bf16.msra.mxu1 %v16605_v62  ;;  %v16650_v62 = vld [vmem:[#allocation6 + $0x30] ss:$72 sps:$4 sm:$0xff]  }
 0x2c5   :  { %6225 = vmatmul.mubr.bf16.vlgmr.msra.gmra.mxu0 %v18837_v15  ;;  %6321 = vmatprep.subr.bf16.mxu1 %v16613_v43  ;;  %v16658_v43 = vld [vmem:[#allocation6 + $0x8a4] ss:$72 sps:$4 sm:$0xff]  }
 0x2c6   :  { %6279 = vmatpush1.bf16.msra.mxu0 %v16608_v1  ;;  %6310 = vmatprep.mubr.bf16.mxu0 %v18811_v50  ;;  %v16653_v1 = vld [vmem:[#allocation6 + $0x930] ss:$72 sps:$4 sm:$0xff]  }
 0x2c7   :  { %6268 = vmatmul.mubr.bf16.vlgmr.msra.gmra.mxu1 %v18857_v23  ;;  %6280 = vmatprep.subr.bf16.mxu0 %v16616_v2  ;;  %v16661_v2 = vld [vmem:[#allocation6 + $0x11a4] ss:$72 sps:$4 sm:$0xff]  }
 0x2c8   :  { %6322 = vmatpush1.bf16.msra.mxu1 %v16611_v6  ;;  %6353 = vmatprep.mubr.bf16.mxu1 %v18820_v56  ;;  %v16656_v6 = vld [vmem:[#allocation6 + $0x8a0] ss:$72 sps:$4 sm:$0xff]  }
 0x2c9   :  { %6323 = vmatprep.subr.bf16.mxu1 %v16619_v7  ;;  %v16664_v7 = vld [vmem:[#allocation6 + $0x814] ss:$72 sps:$4 sm:$0xff]  }
 0x2ca   :  { %6281 = vmatpush1.bf16.msra.mxu0 %v16614_v9  ;;  %v16659_v9 = vld [vmem:[#allocation6 + $0x11a0] ss:$72 sps:$4 sm:$0xff]  }
 0x2cb   :  { %6282 = vmatprep.subr.bf16.mxu0 %v16622_v10  ;;  %v16667_v10 = vld [vmem:[#allocation6 + $0x1114] ss:$72 sps:$4 sm:$0xff]  }
 0x2cc   :  { %6324 = vmatpush1.bf16.msra.mxu1 %v16617_v13  ;;  %v16662_v13 = vld [vmem:[#allocation6 + $0x810] ss:$72 sps:$4 sm:$0xff]  }
 0x2cd   :  { %6325 = vmatprep.subr.bf16.mxu1 %v16625_v14  ;;  %v16670_v14 = vld [vmem:[#allocation6 + $0x784] ss:$72 sps:$4 sm:$0xff]  }
 0x2ce   :  { %6283 = vmatpush1.bf16.msra.mxu0 %v16620_v18  ;;  %v16665_v18 = vld [vmem:[#allocation6 + $0x1110] ss:$72 sps:$4 sm:$0xff]  }
 0x2cf   :  { %6284 = vmatprep.subr.bf16.mxu0 %v16628_v19  ;;  %v16673_v19 = vld [vmem:[#allocation6 + $0x1084] ss:$72 sps:$4 sm:$0xff]  }
 0x2d0   :  { %6326 = vmatpush1.bf16.msra.mxu1 %v16623_v21  ;;  %v16668_v21 = vld [vmem:[#allocation6 + $0x780] ss:$72 sps:$4 sm:$0xff]  }
 0x2d1   :  { %6327 = vmatprep.subr.bf16.mxu1 %v16631_v24  ;;  %v16676_v24 = vld [vmem:[#allocation6 + $0x6f4] ss:$72 sps:$4 sm:$0xff]  }
 0x2d2   :  { %6285 = vmatpush1.bf16.msra.mxu0 %v16626_v46  ;;  %v16671_v46 = vld [vmem:[#allocation6 + $0x1080] ss:$72 sps:$4 sm:$0xff]  }
 0x2d3   :  { %6286 = vmatprep.subr.bf16.mxu0 %v16634_v25  ;;  %v16679_v25 = vld [vmem:[#allocation6 + $0xff4] ss:$72 sps:$4 sm:$0xff]  }
 0x2d4   :  { %6328 = vmatpush1.bf16.msra.mxu1 %v16629_v27  ;;  %v16674_v27 = vld [vmem:[#allocation6 + $0x6f0] ss:$72 sps:$4 sm:$0xff]  }
 0x2d5   :  { %6329 = vmatprep.subr.bf16.mxu1 %v16637_v28  ;;  %v16682_v28 = vld [vmem:[#allocation6 + $0x664] ss:$72 sps:$4 sm:$0xff]  }
 0x2d6   :  { %6287 = vmatpush1.bf16.msra.mxu0 %v16632_v32  ;;  %v16677_v32 = vld [vmem:[#allocation6 + $0xff0] ss:$72 sps:$4 sm:$0xff]  }
 0x2d7   :  { %6288 = vmatprep.subr.bf16.mxu0 %v16640_v33  ;;  %v16685_v33 = vld [vmem:[#allocation6 + $0xf64] ss:$72 sps:$4 sm:$0xff]  }
 0x2d8   :  { %6330 = vmatpush1.bf16.msra.mxu1 %v16635_v4  ;;  %v16680_v4 = vld [vmem:[#allocation6 + $0x660] ss:$72 sps:$4 sm:$0xff]  }
 0x2d9   :  { %6331 = vmatprep.subr.bf16.mxu1 %v16643_v39  ;;  %v16688_v39 = vld [vmem:[#allocation6 + $0x5d4] ss:$72 sps:$4 sm:$0xff]  }
 0x2da   :  { %6289 = vmatpush1.bf16.msra.mxu0 %v16638_v42  ;;  %v16683_v42 = vld [vmem:[#allocation6 + $0xf60] ss:$72 sps:$4 sm:$0xff]  }
 0x2db   :  { %6290 = vmatprep.subr.bf16.mxu0 %v16646_v47  ;;  %v16691_v47 = vld [vmem:[#allocation6 + $0xed4] ss:$72 sps:$4 sm:$0xff]  }
 0x2dc   :  { %6332 = vmatpush1.bf16.msra.mxu1 %v16641_v51  ;;  %v16686_v51 = vld [vmem:[#allocation6 + $0x5d0] ss:$72 sps:$4 sm:$0xff]  }
 0x2dd   :  { %6333 = vmatprep.subr.bf16.mxu1 %v16649_v54  ;;  %v16694_v54 = vld [vmem:[#allocation6 + $0x544] ss:$72 sps:$4 sm:$0xff]  }
 0x2de   :  { %6291 = vmatpush1.bf16.msra.mxu0 %v16644_v55  ;;  %v16689_v55 = vld [vmem:[#allocation6 + $0xed0] ss:$72 sps:$4 sm:$0xff]  }
 0x2df   :  { %6292 = vmatprep.subr.bf16.mxu0 %v16652_v57  ;;  %v16697_v57 = vld [vmem:[#allocation6 + $0xe44] ss:$72 sps:$4 sm:$0xff]  }
 0x2e0   :  { %6334 = vmatpush1.bf16.msra.mxu1 %v16647_v59  ;;  %v16692_v59 = vld [vmem:[#allocation6 + $0x540] ss:$72 sps:$4 sm:$0xff]  }
 0x2e1   :  { %6335 = vmatprep.subr.bf16.mxu1 %v16655_v38  ;;  %v16700_v38 = vld [vmem:[#allocation6 + $0x4b4] ss:$72 sps:$4 sm:$0xff]  }
 0x2e2   :  { %6293 = vmatpush1.bf16.msra.mxu0 %v16650_v62  ;;  %v16695_v62 = vld [vmem:[#allocation6 + $0xe40] ss:$72 sps:$4 sm:$0xff]  }
 0x2e3   :  { %6294 = vmatprep.subr.bf16.mxu0 %v16658_v43  ;;  %v16703_v43 = vld [vmem:[#allocation6 + $0xdb4] ss:$72 sps:$4 sm:$0xff]  }
 0x2e4   :  { %6336 = vmatpush1.bf16.msra.mxu1 %v16653_v1  ;;  %v16698_v1 = vld [vmem:[#allocation6 + $0x4b0] ss:$72 sps:$4 sm:$0xff]  }
 0x2e5   :  { %6337 = vmatprep.subr.bf16.mxu1 %v16661_v2  ;;  %v16706_v2 = vld [vmem:[#allocation6 + $0x1624] ss:$72 sps:$4 sm:$0xff]  }
 0x2e6   :  { %6295 = vmatpush2.bf16.msra.mxu0 %v16656_v6  ;;  %v16701_v6 = vld [vmem:[#allocation6 + $0xdb0] ss:$72 sps:$4 sm:$0xff]  }
 0x2e7   :  { %6296 = vmatprep.subr.bf16.mxu0 %v16664_v7  ;;  %v16709_v7 = vld [vmem:[#allocation6 + $0x42c] ss:$72 sps:$4 sm:$0xff]  }
 0x2e8   :  { %6338 = vmatpush2.bf16.msra.mxu1 %v16659_v9  ;;  %v16704_v9 = vld [vmem:[#allocation6 + $0x1620] ss:$72 sps:$4 sm:$0xff]  }
 0x2e9   :  { %6339 = vmatprep.subr.bf16.mxu1 %v16667_v10  ;;  %v16712_v10 = vld [vmem:[#allocation6 + $0x1594] ss:$72 sps:$4 sm:$0xff]  }
 0x2ea   :  { %6297 = vmatpush2.bf16.msra.mxu0 %v16662_v13  ;;  %v16707_v13 = vld [vmem:[#allocation6 + $0x428] ss:$72 sps:$4 sm:$0xff]  }
 0x2eb   :  { %6298 = vmatprep.subr.bf16.mxu0 %v16670_v14  ;;  %v16715_v14 = vld [vmem:[#allocation6 + $0x39c] ss:$72 sps:$4 sm:$0xff]  }
 0x2ec   :  { %6340 = vmatpush2.bf16.msra.mxu1 %v16665_v18  ;;  %v16710_v18 = vld [vmem:[#allocation6 + $0x1590] ss:$72 sps:$4 sm:$0xff]  }
 0x2ed   :  { %6341 = vmatprep.subr.bf16.mxu1 %v16673_v19  ;;  %v16718_v19 = vld [vmem:[#allocation6 + $0x1504] ss:$72 sps:$4 sm:$0xff]  }
 0x2ee   :  { %6299 = vmatpush2.bf16.msra.mxu0 %v16668_v21  ;;  %v16713_v21 = vld [vmem:[#allocation6 + $0x398] ss:$72 sps:$4 sm:$0xff]  }
 0x2ef   :  { %6300 = vmatprep.subr.bf16.mxu0 %v16676_v24  ;;  %v16721_v24 = vld [vmem:[#allocation6 + $0x30c] ss:$72 sps:$4 sm:$0xff]  }
 0x2f0   :  { %6342 = vmatpush2.bf16.msra.mxu1 %v16671_v46  ;;  %v16716_v46 = vld [vmem:[#allocation6 + $0x1500] ss:$72 sps:$4 sm:$0xff]  }
 0x2f1   :  { %6343 = vmatprep.subr.bf16.mxu1 %v16679_v25  ;;  %v16724_v25 = vld [vmem:[#allocation6 + $0x1474] ss:$72 sps:$4 sm:$0xff]  }
 0x2f2   :  { %6301 = vmatpush2.bf16.msra.mxu0 %v16674_v27  ;;  %v16719_v27 = vld [vmem:[#allocation6 + $0x308] ss:$72 sps:$4 sm:$0xff]  }
 0x2f3   :  { %6302 = vmatprep.subr.bf16.mxu0 %v16682_v28  ;;  %v16727_v28 = vld [vmem:[#allocation6 + $0x27c] ss:$72 sps:$4 sm:$0xff]  }
 0x2f4   :  { %6344 = vmatpush2.bf16.msra.mxu1 %v16677_v32  ;;  %v16722_v32 = vld [vmem:[#allocation6 + $0x1470] ss:$72 sps:$4 sm:$0xff]  }
 0x2f5   :  { %6345 = vmatprep.subr.bf16.mxu1 %v16685_v33  ;;  %v16730_v33 = vld [vmem:[#allocation6 + $0x13e4] ss:$72 sps:$4 sm:$0xff]  }
 0x2f6   :  { %6303 = vmatpush2.bf16.msra.mxu0 %v16680_v4  ;;  %v16725_v4 = vld [vmem:[#allocation6 + $0x278] ss:$72 sps:$4 sm:$0xff]  }
 0x2f7   :  { %6304 = vmatprep.subr.bf16.mxu0 %v16688_v39  ;;  %v16733_v39 = vld [vmem:[#allocation6 + $0x1ec] ss:$72 sps:$4 sm:$0xff]  }
 0x2f8   :  { %6346 = vmatpush2.bf16.msra.mxu1 %v16683_v42  ;;  %v16728_v42 = vld [vmem:[#allocation6 + $0x13e0] ss:$72 sps:$4 sm:$0xff]  }
 0x2f9   :  { %6347 = vmatprep.subr.bf16.mxu1 %v16691_v47  ;;  %v16736_v47 = vld [vmem:[#allocation6 + $0x1354] ss:$72 sps:$4 sm:$0xff]  }
 0x2fa   :  { %6305 = vmatpush2.bf16.msra.mxu0 %v16686_v51  ;;  %v16731_v51 = vld [vmem:[#allocation6 + $0x1e8] ss:$72 sps:$4 sm:$0xff]  }
 0x2fb   :  { %6306 = vmatprep.subr.bf16.mxu0 %v16694_v54  ;;  %v16739_v54 = vld [vmem:[#allocation6 + $0x15c] ss:$72 sps:$4 sm:$0xff]  }
 0x2fc   :  { %6348 = vmatpush2.bf16.msra.mxu1 %v16689_v55  ;;  %v16734_v55 = vld [vmem:[#allocation6 + $0x1350] ss:$72 sps:$4 sm:$0xff]  }
 0x2fd   :  { %6349 = vmatprep.subr.bf16.mxu1 %v16697_v57  ;;  %v16742_v57 = vld [vmem:[#allocation6 + $0x12c4] ss:$72 sps:$4 sm:$0xff]  }
 0x2fe   :  { %6307 = vmatpush2.bf16.msra.mxu0 %v16692_v59  ;;  %v16737_v59 = vld [vmem:[#allocation6 + $0x158] ss:$72 sps:$4 sm:$0xff]  }
 0x2ff   :  { %6308 = vmatprep.subr.bf16.mxu0 %v16700_v38  ;;  %v16745_v38 = vld [vmem:[#allocation6 + $0xcc] ss:$72 sps:$4 sm:$0xff]  }
 0x300   :  { %6350 = vmatpush2.bf16.msra.mxu1 %v16695_v62  ;;  %v16740_v62 = vld [vmem:[#allocation6 + $0x12c0] ss:$72 sps:$4 sm:$0xff]  }
 0x301   :  { %6351 = vmatprep.subr.bf16.mxu1 %v16703_v43  ;;  %v16748_v43 = vld [vmem:[#allocation6 + $0x1234] ss:$72 sps:$4 sm:$0xff]  }
 0x302   :  { %6309 = vmatpush2.bf16.msra.mxu0 %v16698_v1  ;;  %v16743_v1 = vld [vmem:[#allocation6 + $0xc8] ss:$72 sps:$4 sm:$0xff]  }
 0x303   :  { %6364 = vmatprep.subr.bf16.mxu0 %v16706_v2  ;;  %v16751_v2 = vld [vmem:[#allocation6 + $0x3c] ss:$72 sps:$4 sm:$0xff]  }
 0x304   :  { %6352 = vmatpush2.bf16.msra.mxu1 %v16701_v6  ;;  %v16746_v6 = vld [vmem:[#allocation6 + $0x1230] ss:$72 sps:$4 sm:$0xff]  }
 0x305   :  { %6311 = vmatmul.mubr.bf16.vlgmr.msra.gmra.mxu0 %v18835_v12  ;;  %6407 = vmatprep.subr.bf16.mxu1 %v16709_v7  ;;  %v16754_v7 = vld [vmem:[#allocation6 + $0x1aa4] ss:$72 sps:$4 sm:$0xff]  }
 0x306   :  { %6365 = vmatpush1.bf16.msra.mxu0 %v16704_v9  ;;  %6396 = vmatprep.mubr.bf16.mxu0 %v18848_v44  ;;  %v16749_v9 = vld [vmem:[#allocation6 + $0x38] ss:$72 sps:$4 sm:$0xff]  }
 0x307   :  { %6354 = vmatmul.mubr.bf16.vlgmr.msra.gmra.mxu1 %v18837_v15  ;;  %6366 = vmatprep.subr.bf16.mxu0 %v16712_v10  ;;  %v16757_v10 = vld [vmem:[#allocation6 + $0x8ac] ss:$72 sps:$4 sm:$0xff]  }
 0x308   :  { %6408 = vmatpush1.bf16.msra.mxu1 %v16707_v13  ;;  %6439 = vmatprep.mubr.bf16.mxu1 %v18811_v50  ;;  %v16752_v13 = vld [vmem:[#allocation6 + $0x1aa0] ss:$72 sps:$4 sm:$0xff]  }
 0x309   :  { %6409 = vmatprep.subr.bf16.mxu1 %v16715_v14  ;;  %v16760_v14 = vld [vmem:[#allocation6 + $0x1a14] ss:$72 sps:$4 sm:$0xff]  }
 0x30a   :  { %6367 = vmatpush1.bf16.msra.mxu0 %v16710_v18  ;;  %v16755_v18 = vld [vmem:[#allocation6 + $0x8a8] ss:$72 sps:$4 sm:$0xff]  }
 0x30b   :  { %6368 = vmatprep.subr.bf16.mxu0 %v16718_v19  ;;  %v16763_v19 = vld [vmem:[#allocation6 + $0x81c] ss:$72 sps:$4 sm:$0xff]  }
 0x30c   :  { %6410 = vmatpush1.bf16.msra.mxu1 %v16713_v21  ;;  %v16758_v21 = vld [vmem:[#allocation6 + $0x1a10] ss:$72 sps:$4 sm:$0xff]  }
 0x30d   :  { %6411 = vmatprep.subr.bf16.mxu1 %v16721_v24  ;;  %v16766_v24 = vld [vmem:[#allocation6 + $0x1984] ss:$72 sps:$4 sm:$0xff]  }
 0x30e   :  { %6369 = vmatpush1.bf16.msra.mxu0 %v16716_v46  ;;  %v16761_v46 = vld [vmem:[#allocation6 + $0x818] ss:$72 sps:$4 sm:$0xff]  }
 0x30f   :  { %6370 = vmatprep.subr.bf16.mxu0 %v16724_v25  ;;  %v16769_v25 = vld [vmem:[#allocation6 + $0x78c] ss:$72 sps:$4 sm:$0xff]  }
 0x310   :  { %6412 = vmatpush1.bf16.msra.mxu1 %v16719_v27  ;;  %v16764_v27 = vld [vmem:[#allocation6 + $0x1980] ss:$72 sps:$4 sm:$0xff]  }
 0x311   :  { %6413 = vmatprep.subr.bf16.mxu1 %v16727_v28  ;;  %v16772_v28 = vld [vmem:[#allocation6 + $0x18f4] ss:$72 sps:$4 sm:$0xff]  }
 0x312   :  { %6371 = vmatpush1.bf16.msra.mxu0 %v16722_v32  ;;  %v16767_v32 = vld [vmem:[#allocation6 + $0x788] ss:$72 sps:$4 sm:$0xff]  }
 0x313   :  { %6372 = vmatprep.subr.bf16.mxu0 %v16730_v33  ;;  %v16775_v33 = vld [vmem:[#allocation6 + $0x6fc] ss:$72 sps:$4 sm:$0xff]  }
 0x314   :  { %6414 = vmatpush1.bf16.msra.mxu1 %v16725_v4  ;;  %v16770_v4 = vld [vmem:[#allocation6 + $0x18f0] ss:$72 sps:$4 sm:$0xff]  }
 0x315   :  { %6415 = vmatprep.subr.bf16.mxu1 %v16733_v39  ;;  %v16778_v39 = vld [vmem:[#allocation6 + $0x1864] ss:$72 sps:$4 sm:$0xff]  }
 0x316   :  { %6373 = vmatpush1.bf16.msra.mxu0 %v16728_v42  ;;  %v16773_v42 = vld [vmem:[#allocation6 + $0x6f8] ss:$72 sps:$4 sm:$0xff]  }
 0x317   :  { %6374 = vmatprep.subr.bf16.mxu0 %v16736_v47  ;;  %v16781_v47 = vld [vmem:[#allocation6 + $0x66c] ss:$72 sps:$4 sm:$0xff]  }
 0x318   :  { %6416 = vmatpush1.bf16.msra.mxu1 %v16731_v51  ;;  %v16776_v51 = vld [vmem:[#allocation6 + $0x1860] ss:$72 sps:$4 sm:$0xff]  }
 0x319   :  { %6417 = vmatprep.subr.bf16.mxu1 %v16739_v54  ;;  %v16784_v54 = vld [vmem:[#allocation6 + $0x17d4] ss:$72 sps:$4 sm:$0xff]  }
 0x31a   :  { %6375 = vmatpush1.bf16.msra.mxu0 %v16734_v55  ;;  %v16779_v55 = vld [vmem:[#allocation6 + $0x668] ss:$72 sps:$4 sm:$0xff]  }
 0x31b   :  { %6376 = vmatprep.subr.bf16.mxu0 %v16742_v57  ;;  %v16787_v57 = vld [vmem:[#allocation6 + $0x5dc] ss:$72 sps:$4 sm:$0xff]  }
 0x31c   :  { %6418 = vmatpush1.bf16.msra.mxu1 %v16737_v59  ;;  %v16782_v59 = vld [vmem:[#allocation6 + $0x17d0] ss:$72 sps:$4 sm:$0xff]  }
 0x31d   :  { %6419 = vmatprep.subr.bf16.mxu1 %v16745_v38  ;;  %v16790_v38 = vld [vmem:[#allocation6 + $0x1744] ss:$72 sps:$4 sm:$0xff]  }
 0x31e   :  { %6377 = vmatpush1.bf16.msra.mxu0 %v16740_v62  ;;  %v16785_v62 = vld [vmem:[#allocation6 + $0x5d8] ss:$72 sps:$4 sm:$0xff]  }
 0x31f   :  { %6378 = vmatprep.subr.bf16.mxu0 %v16748_v43  ;;  %v16793_v43 = vld [vmem:[#allocation6 + $0x54c] ss:$72 sps:$4 sm:$0xff]  }
 0x320   :  { %6420 = vmatpush1.bf16.msra.mxu1 %v16743_v1  ;;  %v16788_v1 = vld [vmem:[#allocation6 + $0x1740] ss:$72 sps:$4 sm:$0xff]  }
 0x321   :  { %6421 = vmatprep.subr.bf16.mxu1 %v16751_v2  ;;  %v16796_v2 = vld [vmem:[#allocation6 + $0x16b4] ss:$72 sps:$4 sm:$0xff]  }
 0x322   :  { %6379 = vmatpush1.bf16.msra.mxu0 %v16746_v6  ;;  %v16791_v6 = vld [vmem:[#allocation6 + $0x548] ss:$72 sps:$4 sm:$0xff]  }
 0x323   :  { %6380 = vmatprep.subr.bf16.mxu0 %v16754_v7  ;;  %v16799_v7 = vld [vmem:[#allocation6 + $0x4bc] ss:$72 sps:$4 sm:$0xff]  }
 0x324   :  { %6422 = vmatpush1.bf16.msra.mxu1 %v16749_v9  ;;  %v16794_v9 = vld [vmem:[#allocation6 + $0x16b0] ss:$72 sps:$4 sm:$0xff]  }
 0x325   :  { %6423 = vmatprep.subr.bf16.mxu1 %v16757_v10  ;;  %v16802_v10 = vld [vmem:[#allocation6 + $0xd2c] ss:$72 sps:$4 sm:$0xff]  }
 0x326   :  { %6381 = vmatpush2.bf16.msra.mxu0 %v16752_v13  ;;  %v16797_v13 = vld [vmem:[#allocation6 + $0x4b8] ss:$72 sps:$4 sm:$0xff]  }
 0x327   :  { %6382 = vmatprep.subr.bf16.mxu0 %v16760_v14  ;;  %v16805_v14 = vld [vmem:[#allocation6 + $0x162c] ss:$72 sps:$4 sm:$0xff]  }
 0x328   :  { %6424 = vmatpush2.bf16.msra.mxu1 %v16755_v18  ;;  %v16800_v18 = vld [vmem:[#allocation6 + $0xd28] ss:$72 sps:$4 sm:$0xff]  }
 0x329   :  { %6425 = vmatprep.subr.bf16.mxu1 %v16763_v19  ;;  %v16808_v19 = vld [vmem:[#allocation6 + $0xc9c] ss:$72 sps:$4 sm:$0xff]  }
 0x32a   :  { %6383 = vmatpush2.bf16.msra.mxu0 %v16758_v21  ;;  %v16803_v21 = vld [vmem:[#allocation6 + $0x1628] ss:$72 sps:$4 sm:$0xff]  }
 0x32b   :  { %6384 = vmatprep.subr.bf16.mxu0 %v16766_v24  ;;  %v16811_v24 = vld [vmem:[#allocation6 + $0x159c] ss:$72 sps:$4 sm:$0xff]  }
 0x32c   :  { %6426 = vmatpush2.bf16.msra.mxu1 %v16761_v46  ;;  %v16806_v46 = vld [vmem:[#allocation6 + $0xc98] ss:$72 sps:$4 sm:$0xff]  }
 0x32d   :  { %6427 = vmatprep.subr.bf16.mxu1 %v16769_v25  ;;  %v16814_v25 = vld [vmem:[#allocation6 + $0xc0c] ss:$72 sps:$4 sm:$0xff]  }
 0x32e   :  { %6385 = vmatpush2.bf16.msra.mxu0 %v16764_v27  ;;  %v16809_v27 = vld [vmem:[#allocation6 + $0x1598] ss:$72 sps:$4 sm:$0xff]  }
 0x32f   :  { %6386 = vmatprep.subr.bf16.mxu0 %v16772_v28  ;;  %v16817_v28 = vld [vmem:[#allocation6 + $0x150c] ss:$72 sps:$4 sm:$0xff]  }
 0x330   :  { %6428 = vmatpush2.bf16.msra.mxu1 %v16767_v32  ;;  %v16812_v32 = vld [vmem:[#allocation6 + $0xc08] ss:$72 sps:$4 sm:$0xff]  }
 0x331   :  { %6429 = vmatprep.subr.bf16.mxu1 %v16775_v33  ;;  %v16820_v33 = vld [vmem:[#allocation6 + $0xb7c] ss:$72 sps:$4 sm:$0xff]  }
 0x332   :  { %6387 = vmatpush2.bf16.msra.mxu0 %v16770_v4  ;;  %v16815_v4 = vld [vmem:[#allocation6 + $0x1508] ss:$72 sps:$4 sm:$0xff]  }
 0x333   :  { %6388 = vmatprep.subr.bf16.mxu0 %v16778_v39  ;;  %v16823_v39 = vld [vmem:[#allocation6 + $0x147c] ss:$72 sps:$4 sm:$0xff]  }
 0x334   :  { %6430 = vmatpush2.bf16.msra.mxu1 %v16773_v42  ;;  %v16818_v42 = vld [vmem:[#allocation6 + $0xb78] ss:$72 sps:$4 sm:$0xff]  }
 0x335   :  { %6431 = vmatprep.subr.bf16.mxu1 %v16781_v47  ;;  %v16826_v47 = vld [vmem:[#allocation6 + $0xaec] ss:$72 sps:$4 sm:$0xff]  }
 0x336   :  { %6389 = vmatpush2.bf16.msra.mxu0 %v16776_v51  ;;  %v16821_v51 = vld [vmem:[#allocation6 + $0x1478] ss:$72 sps:$4 sm:$0xff]  }
 0x337   :  { %6390 = vmatprep.subr.bf16.mxu0 %v16784_v54  ;;  %v16829_v54 = vld [vmem:[#allocation6 + $0x13ec] ss:$72 sps:$4 sm:$0xff]  }
 0x338   :  { %6432 = vmatpush2.bf16.msra.mxu1 %v16779_v55  ;;  %v16824_v55 = vld [vmem:[#allocation6 + $0xae8] ss:$72 sps:$4 sm:$0xff]  }
 0x339   :  { %6433 = vmatprep.subr.bf16.mxu1 %v16787_v57  ;;  %v16832_v57 = vld [vmem:[#allocation6 + $0xa5c] ss:$72 sps:$4 sm:$0xff]  }
 0x33a   :  { %6391 = vmatpush2.bf16.msra.mxu0 %v16782_v59  ;;  %v16827_v59 = vld [vmem:[#allocation6 + $0x13e8] ss:$72 sps:$4 sm:$0xff]  }
 0x33b   :  { %6392 = vmatprep.subr.bf16.mxu0 %v16790_v38  ;;  %v16835_v38 = vld [vmem:[#allocation6 + $0x135c] ss:$72 sps:$4 sm:$0xff]  }
 0x33c   :  { %6434 = vmatpush2.bf16.msra.mxu1 %v16785_v62  ;;  %v16830_v62 = vld [vmem:[#allocation6 + $0xa58] ss:$72 sps:$4 sm:$0xff]  }
 0x33d   :  { %6435 = vmatprep.subr.bf16.mxu1 %v16793_v43  ;;  %v16838_v43 = vld [vmem:[#allocation6 + $0x9cc] ss:$72 sps:$4 sm:$0xff]  }
 0x33e   :  { %6393 = vmatpush2.bf16.msra.mxu0 %v16788_v1  ;;  %v16833_v1 = vld [vmem:[#allocation6 + $0x1358] ss:$72 sps:$4 sm:$0xff]  }
 0x33f   :  { %6394 = vmatprep.subr.bf16.mxu0 %v16796_v2  ;;  %v16841_v2 = vld [vmem:[#allocation6 + $0x12cc] ss:$72 sps:$4 sm:$0xff]  }
 0x340   :  { %6436 = vmatpush2.bf16.msra.mxu1 %v16791_v6  ;;  %v16836_v6 = vld [vmem:[#allocation6 + $0x9c8] ss:$72 sps:$4 sm:$0xff]  }
 0x341   :  { %6437 = vmatprep.subr.bf16.mxu1 %v16799_v7  ;;  %v16844_v7 = vld [vmem:[#allocation6 + $0x93c] ss:$72 sps:$4 sm:$0xff]  }
 0x342   :  { %6395 = vmatpush2.bf16.msra.mxu0 %v16794_v9  ;;  %v16839_v9 = vld [vmem:[#allocation6 + $0x12c8] ss:$72 sps:$4 sm:$0xff]  }
 0x343   :  { %6450 = vmatprep.subr.bf16.mxu0 %v16802_v10  ;;  %v16847_v10 = vld [vmem:[#allocation6 + $0x123c] ss:$72 sps:$4 sm:$0xff]  }
 0x344   :  { %6438 = vmatpush2.bf16.msra.mxu1 %v16797_v13  ;;  %v16842_v13 = vld [vmem:[#allocation6 + $0x938] ss:$72 sps:$4 sm:$0xff]  }
 0x345   :  { %6397 = vmatmul.mubr.bf16.vlgmr.msra.gmra.mxu0 %v18857_v23  ;;  %6493 = vmatprep.subr.bf16.mxu1 %v16805_v14  ;;  %v16850_v14 = vld [vmem:[#allocation6 + $0x11ac] ss:$72 sps:$4 sm:$0xff]  }
 0x346   :  { %6451 = vmatpush1.bf16.msra.mxu0 %v16800_v18  ;;  %6482 = vmatprep.mubr.bf16.mxu0 %v18820_v56  ;;  %v16845_v18 = vld [vmem:[#allocation6 + $0x1238] ss:$72 sps:$4 sm:$0xff]  }
 0x347   :  { %6440 = vmatmul.mubr.bf16.vlgmr.msra.gmra.mxu1 %v18835_v12  ;;  %6452 = vmatprep.subr.bf16.mxu0 %v16808_v19  ;;  %v16853_v19 = vld [vmem:[#allocation6 + $0x1aac] ss:$72 sps:$4 sm:$0xff]  }
 0x348   :  { %6494 = vmatpush1.bf16.msra.mxu1 %v16803_v21  ;;  %6525 = vmatprep.mubr.bf16.mxu1 %v18848_v44  ;;  %v16848_v21 = vld [vmem:[#allocation6 + $0x11a8] ss:$72 sps:$4 sm:$0xff]  }
 0x349   :  { %6495 = vmatprep.subr.bf16.mxu1 %v16811_v24  ;;  %v16856_v24 = vld [vmem:[#allocation6 + $0x111c] ss:$72 sps:$4 sm:$0xff]  }
 0x34a   :  { %6453 = vmatpush1.bf16.msra.mxu0 %v16806_v46  ;;  %v16851_v46 = vld [vmem:[#allocation6 + $0x1aa8] ss:$72 sps:$4 sm:$0xff]  }
 0x34b   :  { %6454 = vmatprep.subr.bf16.mxu0 %v16814_v25  ;;  %v16859_v25 = vld [vmem:[#allocation6 + $0x1a1c] ss:$72 sps:$4 sm:$0xff]  }
 0x34c   :  { %6496 = vmatpush1.bf16.msra.mxu1 %v16809_v27  ;;  %v16854_v27 = vld [vmem:[#allocation6 + $0x1118] ss:$72 sps:$4 sm:$0xff]  }
 0x34d   :  { %6497 = vmatprep.subr.bf16.mxu1 %v16817_v28  ;;  %v16862_v28 = vld [vmem:[#allocation6 + $0x108c] ss:$72 sps:$4 sm:$0xff]  }
 0x34e   :  { %6455 = vmatpush1.bf16.msra.mxu0 %v16812_v32  ;;  %v16857_v32 = vld [vmem:[#allocation6 + $0x1a18] ss:$72 sps:$4 sm:$0xff]  }
 0x34f   :  { %6456 = vmatprep.subr.bf16.mxu0 %v16820_v33  ;;  %v16865_v33 = vld [vmem:[#allocation6 + $0x198c] ss:$72 sps:$4 sm:$0xff]  }
 0x350   :  { %6498 = vmatpush1.bf16.msra.mxu1 %v16815_v4  ;;  %v16860_v4 = vld [vmem:[#allocation6 + $0x1088] ss:$72 sps:$4 sm:$0xff]  }
 0x351   :  { %6499 = vmatprep.subr.bf16.mxu1 %v16823_v39  ;;  %v16868_v39 = vld [vmem:[#allocation6 + $0xffc] ss:$72 sps:$4 sm:$0xff]  }
 0x352   :  { %6457 = vmatpush1.bf16.msra.mxu0 %v16818_v42  ;;  %v16863_v42 = vld [vmem:[#allocation6 + $0x1988] ss:$72 sps:$4 sm:$0xff]  }
 0x353   :  { %6458 = vmatprep.subr.bf16.mxu0 %v16826_v47  ;;  %v16871_v47 = vld [vmem:[#allocation6 + $0x18fc] ss:$72 sps:$4 sm:$0xff]  }
 0x354   :  { %6500 = vmatpush1.bf16.msra.mxu1 %v16821_v51  ;;  %v16866_v51 = vld [vmem:[#allocation6 + $0xff8] ss:$72 sps:$4 sm:$0xff]  }
 0x355   :  { %6501 = vmatprep.subr.bf16.mxu1 %v16829_v54  ;;  %v16874_v54 = vld [vmem:[#allocation6 + $0xf6c] ss:$72 sps:$4 sm:$0xff]  }
 0x356   :  { %6459 = vmatpush1.bf16.msra.mxu0 %v16824_v55  ;;  %v16869_v55 = vld [vmem:[#allocation6 + $0x18f8] ss:$72 sps:$4 sm:$0xff]  }
 0x357   :  { %6460 = vmatprep.subr.bf16.mxu0 %v16832_v57  ;;  %v16877_v57 = vld [vmem:[#allocation6 + $0x186c] ss:$72 sps:$4 sm:$0xff]  }
 0x358   :  { %6502 = vmatpush1.bf16.msra.mxu1 %v16827_v59  ;;  %v16872_v59 = vld [vmem:[#allocation6 + $0xf68] ss:$72 sps:$4 sm:$0xff]  }
 0x359   :  { %6503 = vmatprep.subr.bf16.mxu1 %v16835_v38  ;;  %v16880_v38 = vld [vmem:[#allocation6 + $0xedc] ss:$72 sps:$4 sm:$0xff]  }
 0x35a   :  { %6461 = vmatpush1.bf16.msra.mxu0 %v16830_v62  ;;  %v16875_v62 = vld [vmem:[#allocation6 + $0x1868] ss:$72 sps:$4 sm:$0xff]  }
 0x35b   :  { %6462 = vmatprep.subr.bf16.mxu0 %v16838_v43  ;;  %v16883_v43 = vld [vmem:[#allocation6 + $0x17dc] ss:$72 sps:$4 sm:$0xff]  }
 0x35c   :  { %6504 = vmatpush1.bf16.msra.mxu1 %v16833_v1  ;;  %v16878_v1 = vld [vmem:[#allocation6 + $0xed8] ss:$72 sps:$4 sm:$0xff]  }
 0x35d   :  { %6505 = vmatprep.subr.bf16.mxu1 %v16841_v2  ;;  %v16886_v2 = vld [vmem:[#allocation6 + $0xe4c] ss:$72 sps:$4 sm:$0xff]  }
 0x35e   :  { %6463 = vmatpush1.bf16.msra.mxu0 %v16836_v6  ;;  %v16881_v6 = vld [vmem:[#allocation6 + $0x17d8] ss:$72 sps:$4 sm:$0xff]  }
 0x35f   :  { %6464 = vmatprep.subr.bf16.mxu0 %v16844_v7  ;;  %v16889_v7 = vld [vmem:[#allocation6 + $0x174c] ss:$72 sps:$4 sm:$0xff]  }
 0x360   :  { %6506 = vmatpush1.bf16.msra.mxu1 %v16839_v9  ;;  %v16884_v9 = vld [vmem:[#allocation6 + $0xe48] ss:$72 sps:$4 sm:$0xff]  }
 0x361   :  { %6507 = vmatprep.subr.bf16.mxu1 %v16847_v10  ;;  %v16892_v10 = vld [vmem:[#allocation6 + $0xdbc] ss:$72 sps:$4 sm:$0xff]  }
 0x362   :  { %6465 = vmatpush1.bf16.msra.mxu0 %v16842_v13  ;;  %v16887_v13 = vld [vmem:[#allocation6 + $0x1748] ss:$72 sps:$4 sm:$0xff]  }
 0x363   :  { %6466 = vmatprep.subr.bf16.mxu0 %v16850_v14  ;;  %v16895_v14 = vld [vmem:[#allocation6 + $0x16bc] ss:$72 sps:$4 sm:$0xff]  }
 0x364   :  { %6508 = vmatpush1.bf16.msra.mxu1 %v16845_v18  ;;  %v16890_v18 = vld [vmem:[#allocation6 + $0xdb8] ss:$72 sps:$4 sm:$0xff]  }
 0x365   :  { %6509 = vmatprep.subr.bf16.mxu1 %v16853_v19  ;;  %v16898_v19 = vld [vmem:[#allocation6 + $0x434] ss:$72 sps:$4 sm:$0xff]  }
 0x366   :  { %6467 = vmatpush2.bf16.msra.mxu0 %v16848_v21  ;;  %v16893_v21 = vld [vmem:[#allocation6 + $0x16b8] ss:$72 sps:$4 sm:$0xff]  }
 0x367   :  { %6468 = vmatprep.subr.bf16.mxu0 %v16856_v24  ;;  %v16901_v24 = vld [vmem:[#allocation6 + $0xd34] ss:$72 sps:$4 sm:$0xff]  }
 0x368   :  { %6510 = vmatpush2.bf16.msra.mxu1 %v16851_v46  ;;  %v16896_v46 = vld [vmem:[#allocation6 + $0x430] ss:$72 sps:$4 sm:$0xff]  }
 0x369   :  { %6511 = vmatprep.subr.bf16.mxu1 %v16859_v25  ;;  %v16904_v25 = vld [vmem:[#allocation6 + $0x3a4] ss:$72 sps:$4 sm:$0xff]  }
 0x36a   :  { %6469 = vmatpush2.bf16.msra.mxu0 %v16854_v27  ;;  %v16899_v27 = vld [vmem:[#allocation6 + $0xd30] ss:$72 sps:$4 sm:$0xff]  }
 0x36b   :  { %6470 = vmatprep.subr.bf16.mxu0 %v16862_v28  ;;  %v16907_v28 = vld [vmem:[#allocation6 + $0xca4] ss:$72 sps:$4 sm:$0xff]  }
 0x36c   :  { %6512 = vmatpush2.bf16.msra.mxu1 %v16857_v32  ;;  %v16902_v32 = vld [vmem:[#allocation6 + $0x3a0] ss:$72 sps:$4 sm:$0xff]  }
 0x36d   :  { %6513 = vmatprep.subr.bf16.mxu1 %v16865_v33  ;;  %v16910_v33 = vld [vmem:[#allocation6 + $0x314] ss:$72 sps:$4 sm:$0xff]  }
 0x36e   :  { %6471 = vmatpush2.bf16.msra.mxu0 %v16860_v4  ;;  %v16905_v4 = vld [vmem:[#allocation6 + $0xca0] ss:$72 sps:$4 sm:$0xff]  }
 0x36f   :  { %6472 = vmatprep.subr.bf16.mxu0 %v16868_v39  ;;  %v16913_v39 = vld [vmem:[#allocation6 + $0xc14] ss:$72 sps:$4 sm:$0xff]  }
 0x370   :  { %6514 = vmatpush2.bf16.msra.mxu1 %v16863_v42  ;;  %v16908_v42 = vld [vmem:[#allocation6 + $0x310] ss:$72 sps:$4 sm:$0xff]  }
 0x371   :  { %6515 = vmatprep.subr.bf16.mxu1 %v16871_v47  ;;  %v16916_v47 = vld [vmem:[#allocation6 + $0x284] ss:$72 sps:$4 sm:$0xff]  }
 0x372   :  { %6473 = vmatpush2.bf16.msra.mxu0 %v16866_v51  ;;  %v16911_v51 = vld [vmem:[#allocation6 + $0xc10] ss:$72 sps:$4 sm:$0xff]  }
 0x373   :  { %6474 = vmatprep.subr.bf16.mxu0 %v16874_v54  ;;  %v16919_v54 = vld [vmem:[#allocation6 + $0xb84] ss:$72 sps:$4 sm:$0xff]  }
 0x374   :  { %6516 = vmatpush2.bf16.msra.mxu1 %v16869_v55  ;;  %v16922_v55 = vld [vmem:[#allocation6 + $0x1f4] ss:$72 sps:$4 sm:$0xff]  }
 0x375   :  { %6517 = vmatprep.subr.bf16.mxu1 %v16877_v57  ;;  %v16917_v57 = vld [vmem:[#allocation6 + $0xb80] ss:$72 sps:$4 sm:$0xff]  }
 0x376   :  { %6475 = vmatpush2.bf16.msra.mxu0 %v16872_v59  ;;  %v16925_v59 = vld [vmem:[#allocation6 + $0xaf4] ss:$72 sps:$4 sm:$0xff]  }
 0x377   :  { %6476 = vmatprep.subr.bf16.mxu0 %v16880_v38  ;;  %v16928_v38 = vld [vmem:[#allocation6 + $0x164] ss:$72 sps:$4 sm:$0xff]  }
 0x378   :  { %6518 = vmatpush2.bf16.msra.mxu1 %v16875_v62  ;;  %v16923_v62 = vld [vmem:[#allocation6 + $0xaf0] ss:$72 sps:$4 sm:$0xff]  }
 0x379   :  { %6519 = vmatprep.subr.bf16.mxu1 %v16883_v43  ;;  %v16931_v43 = vld [vmem:[#allocation6 + $0xa64] ss:$72 sps:$4 sm:$0xff]  }
 0x37a   :  { %6477 = vmatpush2.bf16.msra.mxu0 %v16878_v1  ;;  %v16926_v1 = vld [vmem:[#allocation6 + $0x160] ss:$72 sps:$4 sm:$0xff]  }
 0x37b   :  { %6478 = vmatprep.subr.bf16.mxu0 %v16886_v2  ;;  %v16934_v2 = vld [vmem:[#allocation6 + $0xd4] ss:$72 sps:$4 sm:$0xff]  }
 0x37c   :  { %6520 = vmatpush2.bf16.msra.mxu1 %v16881_v6  ;;  %v16929_v6 = vld [vmem:[#allocation6 + $0xa60] ss:$72 sps:$4 sm:$0xff]  }
 0x37d   :  { %6521 = vmatprep.subr.bf16.mxu1 %v16889_v7  ;;  %v16937_v7 = vld [vmem:[#allocation6 + $0x9d4] ss:$72 sps:$4 sm:$0xff]  }
 0x37e   :  { %6479 = vmatpush2.bf16.msra.mxu0 %v16884_v9  ;;  %v16932_v9 = vld [vmem:[#allocation6 + $0xd0] ss:$72 sps:$4 sm:$0xff]  }
 0x37f   :  { %6480 = vmatprep.subr.bf16.mxu0 %v16892_v10  ;;  %v16940_v10 = vld [vmem:[#allocation6 + $0x44] ss:$72 sps:$4 sm:$0xff]  }
 0x380   :  { %6522 = vmatpush2.bf16.msra.mxu1 %v16887_v13  ;;  %v16935_v13 = vld [vmem:[#allocation6 + $0x9d0] ss:$72 sps:$4 sm:$0xff]  }
 0x381   :  { %6523 = vmatprep.subr.bf16.mxu1 %v16895_v14  ;;  %v16943_v14 = vld [vmem:[#allocation6 + $0x944] ss:$72 sps:$4 sm:$0xff]  }
 0x382   :  { %6481 = vmatpush2.bf16.msra.mxu0 %v16890_v18  ;;  %v16938_v18 = vld [vmem:[#allocation6 + $0x40] ss:$72 sps:$4 sm:$0xff]  }
 0x383   :  { %6536 = vmatprep.subr.bf16.mxu0 %v16898_v19  ;;  %v16946_v19 = vld [vmem:[#allocation6 + $0x8b4] ss:$72 sps:$4 sm:$0xff]  }
 0x384   :  { %6524 = vmatpush2.bf16.msra.mxu1 %v16893_v21  ;;  %v16941_v21 = vld [vmem:[#allocation6 + $0x940] ss:$72 sps:$4 sm:$0xff]  }
 0x385   :  { %6483 = vmatmul.mubr.bf16.vlgmr.msra.gmra.mxu0 %v18837_v15  ;;  %6579 = vmatprep.subr.bf16.mxu1 %v16901_v24  ;;  %v16949_v24 = vld [vmem:[#allocation6 + $0x11b4] ss:$72 sps:$4 sm:$0xff]  }
 0x386   :  { %6537 = vmatpush1.bf16.msra.mxu0 %v16896_v46  ;;  %6568 = vmatprep.mubr.bf16.mxu0 %v18811_v50  ;;  %v16914_v50 = vld [vmem:[#allocation6 + $0x280] ss:$72 sps:$4 sm:$0xff]   ;;  %v16944_v46 = vld [vmem:[#allocation6 + $0x8b0] ss:$72 sps:$4 sm:$0xff]  }
 0x387   :  { %6526 = vmatmul.mubr.bf16.vlgmr.msra.gmra.mxu1 %v18857_v23  ;;  %6538 = vmatprep.subr.bf16.mxu0 %v16904_v25  ;;  %v16952_v25 = vld [vmem:[#allocation6 + $0x824] ss:$72 sps:$4 sm:$0xff]  }
 0x388   :  { %6580 = vmatpush1.bf16.msra.mxu1 %v16899_v27  ;;  %6611 = vmatprep.mubr.bf16.mxu1 %v18820_v56  ;;  %v16920_v56 = vld [vmem:[#allocation6 + $0x1f0] ss:$72 sps:$4 sm:$0xff]  }
 0x389   :  { %6581 = vmatprep.subr.bf16.mxu1 %v16907_v28  ;;  %v16947_v27 = vld [vmem:[#allocation6 + $0x11b0] ss:$72 sps:$4 sm:$0xff]   ;;  %v16955_v28 = vld [vmem:[#allocation6 + $0x1124] ss:$72 sps:$4 sm:$0xff]  }
 0x38a   :  { %6539 = vmatpush1.bf16.msra.mxu0 %v16902_v32  ;;  %v16950_v32 = vld [vmem:[#allocation6 + $0x820] ss:$72 sps:$4 sm:$0xff]  }
 0x38b   :  { %6540 = vmatprep.subr.bf16.mxu0 %v16910_v33  ;;  %v16958_v33 = vld [vmem:[#allocation6 + $0x794] ss:$72 sps:$4 sm:$0xff]  }
 0x38c   :  { %6582 = vmatpush1.bf16.msra.mxu1 %v16905_v4  ;;  %v16953_v4 = vld [vmem:[#allocation6 + $0x1120] ss:$72 sps:$4 sm:$0xff]  }
 0x38d   :  { %6583 = vmatprep.subr.bf16.mxu1 %v16913_v39  ;;  %v16961_v39 = vld [vmem:[#allocation6 + $0x1094] ss:$72 sps:$4 sm:$0xff]  }
 0x38e   :  { %6541 = vmatpush1.bf16.msra.mxu0 %v16908_v42  ;;  %v16956_v42 = vld [vmem:[#allocation6 + $0x790] ss:$72 sps:$4 sm:$0xff]  }
 0x38f   :  { %6542 = vmatprep.subr.bf16.mxu0 %v16916_v47  ;;  %v16964_v47 = vld [vmem:[#allocation6 + $0x704] ss:$72 sps:$4 sm:$0xff]  }
 0x390   :  { %6584 = vmatpush1.bf16.msra.mxu1 %v16911_v51  ;;  %v16959_v51 = vld [vmem:[#allocation6 + $0x1090] ss:$72 sps:$4 sm:$0xff]  }
 0x391   :  { %6585 = vmatprep.subr.bf16.mxu1 %v16919_v54  ;;  %v16967_v54 = vld [vmem:[#allocation6 + $0x1004] ss:$72 sps:$4 sm:$0xff]  }
 0x392   :  { %6543 = vmatpush1.bf16.msra.mxu0 %v16914_v50  ;;  %v16962_v50 = vld [vmem:[#allocation6 + $0x700] ss:$72 sps:$4 sm:$0xff]  }
 0x393   :  { %6544 = vmatprep.subr.bf16.mxu0 %v16922_v55  ;;  %v18995_v55 = vpop.f32.mrf.mxu1 }
 0x394   :  { %6586 = vmatpush1.bf16.msra.mxu1 %v16917_v57  ;;  %19653 = vst [vmem:[#allocation47_spill] sm:$0xff] %v18995_v55  ;;  %v16970_v57 = vld [vmem:[#allocation6 + $0x674] ss:$72 sps:$4 sm:$0xff]  }
 0x395   :  { %6587 = vmatprep.subr.bf16.mxu1 %v16925_v59  ;;  %v16965_v59 = vld [vmem:[#allocation6 + $0x1000] ss:$72 sps:$4 sm:$0xff]  }
 0x396   :  { %6545 = vmatpush1.bf16.msra.mxu0 %v16920_v56  ;;  %v18997_v56 = vpop.f32.mrf.mxu1 }
 0x397   :  { %6546 = vmatprep.subr.bf16.mxu0 %v16928_v38  ;;  %v16973_v38 = vld [vmem:[#allocation6 + $0xf74] ss:$72 sps:$4 sm:$0xff]  }
 0x398   :  { %6588 = vmatpush1.bf16.msra.mxu1 %v16923_v62  ;;  %v16968_v62 = vld [vmem:[#allocation6 + $0x670] ss:$72 sps:$4 sm:$0xff]  }
 0x399   :  { %6589 = vmatprep.subr.bf16.mxu1 %v16931_v43  ;;  %v16976_v43 = vld [vmem:[#allocation6 + $0x5e4] ss:$72 sps:$4 sm:$0xff]  }
 0x39a   :  { %6547 = vmatpush1.bf16.msra.mxu0 %v16926_v1  ;;  %v16971_v1 = vld [vmem:[#allocation6 + $0xf70] ss:$72 sps:$4 sm:$0xff]  }
 0x39b   :  { %6548 = vmatprep.subr.bf16.mxu0 %v16934_v2  ;;  %v18999_v2 = vpop.f32.mrf.mxu1 }
 0x39c   :  { %6590 = vmatpush1.bf16.msra.mxu1 %v16929_v6  ;;  %v16979_v6 = vld [vmem:[#allocation6 + $0xee4] ss:$72 sps:$4 sm:$0xff]  }
 0x39d   :  { %6591 = vmatprep.subr.bf16.mxu1 %v16937_v7  ;;  %v16974_v7 = vld [vmem:[#allocation6 + $0x5e0] ss:$72 sps:$4 sm:$0xff]  }
 0x39e   :  { %6549 = vmatpush1.bf16.msra.mxu0 %v16932_v9  ;;  %v16982_v9 = vld [vmem:[#allocation6 + $0x554] ss:$72 sps:$4 sm:$0xff]  }
 0x39f   :  { %6550 = vmatprep.subr.bf16.mxu0 %v16940_v10  ;;  %v16977_v10 = vld [vmem:[#allocation6 + $0xee0] ss:$72 sps:$4 sm:$0xff]  }
 0x3a0   :  { %6592 = vmatpush1.bf16.msra.mxu1 %v16935_v13  ;;  %v19001_v13 = vpop.f32.mrf.mxu1 }
 0x3a1   :  { %6593 = vmatprep.subr.bf16.mxu1 %v16943_v14  ;;  %v16985_v14 = vld [vmem:[#allocation6 + $0xe54] ss:$72 sps:$4 sm:$0xff]  }
 0x3a2   :  { %6551 = vmatpush1.bf16.msra.mxu0 %v16938_v18  ;;  %v16980_v18 = vld [vmem:[#allocation6 + $0x550] ss:$72 sps:$4 sm:$0xff]  }
 0x3a3   :  { %6552 = vmatprep.subr.bf16.mxu0 %v16946_v19  ;;  %v16988_v19 = vld [vmem:[#allocation6 + $0x4c4] ss:$72 sps:$4 sm:$0xff]  }
 0x3a4   :  { %6594 = vmatpush1.bf16.msra.mxu1 %v16941_v21  ;;  %v16983_v21 = vld [vmem:[#allocation6 + $0xe50] ss:$72 sps:$4 sm:$0xff]  }
 0x3a5   :  { %6595 = vmatprep.subr.bf16.mxu1 %v16949_v24  ;;  %v19003_v24 = vpop.f32.mrf.mxu0 }
 0x3a6   :  { %6553 = vmatpush2.bf16.msra.mxu0 %v16944_v46  ;;  %19654 = vst [vmem:[#allocation48_spill] sm:$0xff] %v19003_v24  ;;  %v19005_v46 = vpop.f32.mrf.mxu1 }
 0x3a7   :  { %6554 = vmatprep.subr.bf16.mxu0 %v16952_v25  ;;  %v16991_v25 = vld [vmem:[#allocation6 + $0xdc4] ss:$72 sps:$4 sm:$0xff]  }
 0x3a8   :  { %6596 = vmatpush2.bf16.msra.mxu1 %v16947_v27  ;;  %v16986_v27 = vld [vmem:[#allocation6 + $0x4c0] ss:$72 sps:$4 sm:$0xff]  }
 0x3a9   :  { %6597 = vmatprep.subr.bf16.mxu1 %v16955_v28  ;;  %v19007_v28 = vpop.f32.mrf.mxu0 }
 0x3aa   :  { %6555 = vmatpush2.bf16.msra.mxu0 %v16950_v32  ;;  %v16994_v32 = vld [vmem:[#allocation6 + $0x1634] ss:$72 sps:$4 sm:$0xff]  }
 0x3ab   :  { %6556 = vmatprep.subr.bf16.mxu0 %v16958_v33  ;;  %v16989_v33 = vld [vmem:[#allocation6 + $0xdc0] ss:$72 sps:$4 sm:$0xff]  }
 0x3ac   :  { %6598 = vmatpush2.bf16.msra.mxu1 %v16953_v4  ;;  %v19009_v4 = vpop.f32.mrf.mxu1 }
 0x3ad   :  { %6599 = vmatprep.subr.bf16.mxu1 %v16961_v39  ;;  %v16992_v39 = vld [vmem:[#allocation6 + $0x1630] ss:$72 sps:$4 sm:$0xff]  }
 0x3ae   :  { %6557 = vmatpush2.bf16.msra.mxu0 %v16956_v42  ;;  %v19011_v42 = vpop.f32.mrf.mxu0 }
 0x3af   :  { %6558 = vmatprep.subr.bf16.mxu0 %v16964_v47  ;;  %v16997_v47 = vld [vmem:[#allocation6 + $0x15a4] ss:$72 sps:$4 sm:$0xff]  }
 0x3b0   :  { %6600 = vmatpush2.bf16.msra.mxu1 %v16959_v51  ;;  %v19013_v51 = vpop.f32.mrf.mxu1 }
 0x3b1   :  { %6601 = vmatprep.subr.bf16.mxu1 %v16967_v54  ;;  %v16995_v54 = vld [vmem:[#allocation6 + $0x15a0] ss:$72 sps:$4 sm:$0xff]  }
 0x3b2   :  { %6559 = vmatpush2.bf16.msra.mxu0 %v16962_v50  ;;  %v19017_v50 = vpop.f32.mrf.mxu0 }
 0x3b3   :  { %6560 = vmatprep.subr.bf16.mxu0 %v16970_v57  ;;  %v17000_v57 = vld [vmem:[#allocation6 + $0x1514] ss:$72 sps:$4 sm:$0xff]  }
 0x3b4   :  { %6602 = vmatpush2.bf16.msra.mxu1 %v16965_v59  ;;  %v19020_v59 = vpop.f32.mrf.mxu1 }
 0x3b5   :  { %6603 = vmatprep.subr.bf16.mxu1 %v16973_v38  ;;  %v16998_v38 = vld [vmem:[#allocation6 + $0x1510] ss:$72 sps:$4 sm:$0xff]  }
 0x3b6   :  { %6561 = vmatpush2.bf16.msra.mxu0 %v16968_v62  ;;  %v19022_v62 = vpop.f32.mrf.mxu0 }
 0x3b7   :  { %6562 = vmatprep.subr.bf16.mxu0 %v16976_v43  ;;  %v17003_v43 = vld [vmem:[#allocation6 + $0x1484] ss:$72 sps:$4 sm:$0xff]  }
 0x3b8   :  { %6604 = vmatpush2.bf16.msra.mxu1 %v16971_v1  ;;  %v19024_v1 = vpop.f32.mrf.mxu1 }
 0x3b9   :  { %6605 = vmatprep.subr.bf16.mxu1 %v16979_v6 }
 0x3ba   :  { %6563 = vmatpush2.bf16.msra.mxu0 %v16974_v7  ;;  %v19028_v6 = vpop.f32.mrf.mxu1 }
 0x3bb   :  { %6564 = vmatprep.subr.bf16.mxu0 %v16982_v9  ;;  %v17004_v9 = vld [vmem:[#allocation6 + $0x13f0] ss:$72 sps:$4 sm:$0xff]  }
 0x3bc   :  { %6606 = vmatpush2.bf16.msra.mxu1 %v16977_v10  ;;  %v19032_v10 = vpop.f32.mrf.mxu1 }
 0x3bd   :  { %6607 = vmatprep.subr.bf16.mxu1 %v16985_v14  ;;  %v17009_v14 = vld [vmem:[#allocation6 + $0x1364] ss:$72 sps:$4 sm:$0xff]  }
 0x3be   :  { %6565 = vmatpush2.bf16.msra.mxu0 %v16980_v18 }
 0x3bf   :  { %6566 = vmatprep.subr.bf16.mxu0 %v16988_v19  ;;  %v17007_v19 = vld [vmem:[#allocation6 + $0x1360] ss:$72 sps:$4 sm:$0xff]  }
 0x3c0   :  { %6608 = vmatpush2.bf16.msra.mxu1 %v16983_v21  ;;  %v19036_v21 = vpop.f32.mrf.mxu1 }
 0x3c1   :  { %6609 = vmatprep.subr.bf16.mxu1 %v16991_v25  ;;  %v17012_v25 = vld [vmem:[#allocation6 + $0x12d4] ss:$72 sps:$4 sm:$0xff]  }
 0x3c2   :  { %6567 = vmatpush2.bf16.msra.mxu0 %v16986_v27 }
 0x3c3   :  { %6622 = vmatprep.subr.bf16.mxu0 %v16994_v32  ;;  %v17010_v32 = vld [vmem:[#allocation6 + $0x12d0] ss:$72 sps:$4 sm:$0xff]  }
 0x3c4   :  { %6610 = vmatpush2.bf16.msra.mxu1 %v16989_v33  ;;  %v19040_v33 = vpop.f32.mrf.mxu1 }
 0x3c5   :  { %6569 = vmatmul.mubr.bf16.vlgmr.msra.gmra.mxu0 %v18835_v12  ;;  %v19026_v12 = vpop.f32.mrf.mxu0 }
 0x3c6   :  { %6623 = vmatpush1.bf16.msra.mxu0 %v16992_v39  ;;  %6654 = vmatprep.mubr.bf16.mxu0 %v18848_v44  ;;  %v17001_v44 = vld [vmem:[#allocation6 + $0x1480] ss:$72 sps:$4 sm:$0xff]  }
 0x3c7   :  { %6612 = vmatmul.mubr.bf16.vlgmr.msra.gmra.mxu1 %v18837_v15  ;;  %6624 = vmatprep.subr.bf16.mxu0 %v16997_v47  ;;  %v17006_v15 = vld [vmem:[#allocation6 + $0x13f4] ss:$72 sps:$4 sm:$0xff]   ;;  %v19030_v7 = vpop.f32.mrf.mxu0  ;;  %v17015_v47 = vld [vmem:[#allocation6 + $0x1244] ss:$72 sps:$4 sm:$0xff]  }
 0x3c9   :  { %v19034_v18 = vpop.f32.mrf.mxu0 }
 0x3ca   :  { %6625 = vmatpush1.bf16.msra.mxu0 %v16995_v54  ;;  %v19044_v54 = vpop.f32.mrf.mxu1 }
 0x3cb   :  { %6626 = vmatprep.subr.bf16.mxu0 %v17000_v57  ;;  %v19038_v27 = vpop.f32.mrf.mxu0  ;;  %v17013_v57 = vld [vmem:[#allocation6 + $0x1240] ss:$72 sps:$4 sm:$0xff]  }
 0x3cd   :  { %v19042_v39 = vpop.f32.mrf.mxu0 }
 0x3ce   :  { %6627 = vmatpush1.bf16.msra.mxu0 %v16998_v38 }
 0x3cf   :  { %6628 = vmatprep.subr.bf16.mxu0 %v17003_v43  ;;  %v19046_v38 = vpop.f32.mrf.mxu0  ;;  %v17018_v43 = vld [vmem:[#allocation6 + $0x1ab4] ss:$72 sps:$4 sm:$0xff]  }
 0x3d2   :  { %6629 = vmatpush1.bf16.msra.mxu0 %v17001_v44  ;;  %v19048_v44 = vpop.f32.mrf.mxu1 }
 0x3d3   :  { %6630 = vmatprep.subr.bf16.mxu0 %v17006_v15  ;;  %v17016_v15 = vld [vmem:[#allocation6 + $0x1ab0] ss:$72 sps:$4 sm:$0xff]  }
 0x3d6   :  { %6631 = vmatpush1.bf16.msra.mxu0 %v17004_v9  ;;  %v19050_v9 = vpop.f32.mrf.mxu0 }
 0x3d7   :  { %6632 = vmatprep.subr.bf16.mxu0 %v17009_v14  ;;  %v17021_v14 = vld [vmem:[#allocation6 + $0x1a24] ss:$72 sps:$4 sm:$0xff]  }
 0x3d8   :  { %v19054_v11 = vpop.f32.mrf.mxu0 }
 0x3da   :  { %6633 = vmatpush1.bf16.msra.mxu0 %v17007_v19  ;;  %v19052_v19 = vpop.f32.mrf.mxu1 }
 0x3db   :  { %6634 = vmatprep.subr.bf16.mxu0 %v17012_v25  ;;  %v17019_v25 = vld [vmem:[#allocation6 + $0x1a20] ss:$72 sps:$4 sm:$0xff]  }
 0x3dc   :  { %v19056_v20 = vpop.f32.mrf.mxu1 }
 0x3de   :  { %6635 = vmatpush1.bf16.msra.mxu0 %v17010_v32  ;;  %v17024_v32 = vld [vmem:[#allocation6 + $0x1994] ss:$72 sps:$4 sm:$0xff]  }
 0x3df   :  { %6636 = vmatprep.subr.bf16.mxu0 %v17015_v47  ;;  %v19058_v47 = vpop.f32.mrf.mxu0 }
 0x3e0   :  { %19655 = vst [vmem:[#allocation49_spill] sm:$0xff] %v19058_v47  ;;  %v19081_v47 = vld [vmem:[#allocation8 + $0x8] sm:$0xff] }
 0x3e1   :  { %v19060_v34 = vpop.f32.mrf.mxu0 }
 0x3e2   :  { %6637 = vmatpush1.bf16.msra.mxu0 %v17013_v57  ;;  %v17027_v57 = vld [vmem:[#allocation6 + $0x1904] ss:$72 sps:$4 sm:$0xff]  }
 0x3e3   :  { %6638 = vmatprep.subr.bf16.mxu0 %v17018_v43  ;;  %v19062_v43 = vpop.f32.mrf.mxu1 }
 0x3e4   :  { %19656 = vst [vmem:[#allocation50_spill] sm:$0xff] %v19062_v43 }
 0x3e5   :  { %v19067_v5 = vpop.f32.mrf.mxu1 }
 0x3e6   :  { %6639 = vmatpush2.bf16.msra.mxu0 %v17016_v15  ;;  %v19634_v15 = vsub.s32 7, %v18867_v31 }
 0x3e7   :  { %6640 = vmatprep.subr.bf16.mxu0 %v17021_v14  ;;  %v19065_v14 = vpop.f32.mrf.mxu0  ;;  %v19076_v24 = vpop.f32.mrf.mxu1 }
 0x3e8   :  { %19657 = vst [vmem:[#allocation51_spill] sm:$0xff] %v19065_v14  ;;  %19658 = vst [vmem:[#allocation52_spill] sm:$0xff] %v19076_v24  ;;  %v1133_v24 = vrot.slane %v19081_v47, %v18873_v40 }
 0x3e9   :  { %v19090_v26 = vpop.f32.mrf.mxu1 }
 0x3ea   :  { %6641 = vmatpush2.bf16.msra.mxu0 %v17019_v25  ;;  %v17028_v25 = vld [vmem:[#allocation6 + $0x1870] ss:$72 sps:$4 sm:$0xff]  }
 0x3eb   :  { %6642 = vmatprep.subr.bf16.mxu0 %v17024_v32  ;;  %v19070_v32 = vld [vmem:[#allocation8] sm:$0xff] }
 0x3ec   :  { %v1125_v43 = vrot.slane %v19070_v32, %v19634_v15  ;;  %v1121_v41 = vrot.slane %v19070_v32, %v19636_v16 }
 0x3ee   :  { %6643 = vmatpush2.bf16.msra.mxu0 %v17022_v0  ;;  %v17033_v0 = vld [vmem:[#allocation6 + $0x17e4] ss:$72 sps:$4 sm:$0xff]   ;;  %v5932_v63 = vadd.f32 %v19005_v46, %v1125_v43  ;;  %v5928_v55 = vadd.f32 %v18999_v2, %v1125_v43  ;;  %v5930_v15 = vadd.f32 %v19001_v13, %v1121_v41  ;;  %v5926_v16 = vadd.f32 %v18997_v56, %v1121_v41 }
 0x3ef   :  { %6644 = vmatprep.subr.bf16.mxu0 %v17027_v57  ;;  %v6232_v57 = vpop.f32.mrf.mxu0  ;;  %v6061_v2 = vadd.f32 %v19038_v27, %v1133_v24  ;;  %v17039_v13 = vld [vmem:[#allocation6 + $0x16c4] ss:$72 sps:$4 sm:$0xff]   ;;  %v6057_v41 = vadd.f32 %v19030_v7, %v1133_v24 }
 0x3f0   :  { %v5975_v46 = vadd.f32 %v19022_v62, %v5932_v63  ;;  %v5971_v14 = vadd.f32 %v19011_v42, %v5928_v55  ;;  %v5674_v63 = vadd.f32 %v18924_v52, %v18922_v45  ;;  %v5973_v62 = vadd.f32 %v19017_v50, %v5930_v15  ;;  %v17037_v55 = vld [vmem:[#allocation6 + $0x16c0] ss:$72 sps:$4 sm:$0xff]  }
 0x3f1   :  { %v19084_v17 = vpop.f32.mrf.mxu0  ;;  %v5969_v56 = vadd.f32 %v19007_v28, %v5926_v16  ;;  %v6104_v27 = vadd.f32 %v19040_v33, %v6061_v2  ;;  %v19109_v52 = vsub.s32 5, %v18867_v31  ;;  %v1129_v16 = vrot.slane %v19081_v47, %v18870_v37 }
 0x3f2   :  { %6645 = vmatpush2.bf16.msra.mxu0 %v17025_v60  ;;  %v17031_v60 = vld [vmem:[#allocation6 + $0x17e0] ss:$72 sps:$4 sm:$0xff]   ;;  %v6018_v40 = vadd.f32 %v19024_v1, %v5975_v46  ;;  %v6014_v42 = vadd.f32 %v19013_v51, %v5971_v14  ;;  %v5717_v45 = vadd.f32 %v18948_v48, %v5674_v63  ;;  %v6016_v24 = vadd.f32 %v19020_v59, %v5973_v62 }
 0x3f3   :  { %6646 = vmatprep.subr.bf16.mxu0 %v17030_v61  ;;  %v17036_v61 = vld [vmem:[#allocation6 + $0x1754] ss:$72 sps:$4 sm:$0xff]   ;;  %v6314_v43 = vpop.f32.mrf.mxu0  ;;  %v6100_v51 = vadd.f32 %v19032_v10, %v6057_v41  ;;  %v6147_v50 = vadd.f32 %v19054_v11, %v6104_v27  ;;  %v6012_v7 = vadd.f32 %v19009_v4, %v5969_v56  ;;  %v6059_v33 = vadd.f32 %v19034_v18, %v1129_v16 }
 0x3f4   :  { %v6672_v28 = vpack.c.bf16 %v6018_v40, %v6014_v42  ;;  %v1149_v48 = vrot.slane %v19081_v47, %v19109_v52  ;;  %v1145_v40 = vrot.slane %v19081_v47, %v18942_v36  ;;  %v6055_v4 = vadd.f32 %v19026_v12, %v1129_v16 }
 0x3f5   :  { %v6143_v59 = vadd.f32 %v19046_v38, %v6100_v51  ;;  %v6671_v11 = vpack.c.bf16 %v6016_v24, %v6012_v7  ;;  %v1137_v46 = vrot.slane %v19081_v47, %v18911_v29  ;;  %v5756_v12 = vadd.f32 %v18935_v8, %v18930_v3 }
 0x3f6   :  { %6647 = vmatpush2.bf16.msra.mxu0 %v17028_v25  ;;  %v17034_v25 = vld [vmem:[#allocation6 + $0x1750] ss:$72 sps:$4 sm:$0xff]   ;;  %v1117_v62 = vrot.slane %v19070_v32, %v19109_v52  ;;  %v6313_v41 = vadd.f32 %v19084_v17, %v1145_v40 }
 0x3f7   :  { %6648 = vmatprep.subr.bf16.mxu0 %v17033_v0  ;;  %v19095_v0 = vpop.f32.mrf.mxu1  ;;  %v6674_v18 = vpack.c.bf16 %v6147_v50, %v6143_v59  ;;  %v6184_v17 = vadd.f32 %v19044_v54, %v1137_v46  ;;  %v19668_v59 = vld [vmem:[#allocation43_spill] sm:$0xff] }
 0x3f8   :  { %19659 = vst [vmem:[#allocation53_spill] sm:$0xff] %v19095_v0 }
 0x3f9   :  { %v6357_v0 = vpop.f32.mrf.mxu1 }
 0x3fa   :  { %6649 = vmatpush2.bf16.msra.mxu0 %v17031_v60  ;;  %v1141_v60 = vrot.slane %v19081_v47, %v18914_v35 }
 0x3fb   :  { %6650 = vmatprep.subr.bf16.mxu0 %v17036_v61  ;;  %v6316_v61 = vpop.f32.mrf.mxu0  ;;  %v6359_v14 = vpop.f32.mrf.mxu1 }
 0x3fc   :  { %v6190_v1 = vadd.f32 %v19056_v20, %v1141_v60  ;;  %v6186_v15 = vadd.f32 %v19048_v44, %v1141_v60  ;;  %v5760_v20 = vadd.f32 %v18950_v53, %v5717_v45  ;;  %v6317_v2 = vadd.f32 %v6316_v61, %v1145_v40  ;;  %v19669_v40 = vld [vmem:[#allocation48_spill] sm:$0xff] }
 0x3fd   :  { %v6318_v10 = vpop.f32.mrf.mxu0  ;;  %v6102_v44 = vadd.f32 %v19036_v21, %v6059_v33  ;;  %v19660_v53 = vpack.c.bf16 %v18906_v30, %v18898_v22  ;;  %v6098_v21 = vadd.f32 %v19028_v6, %v6055_v4  ;;  %v6188_v22 = vadd.f32 %v19052_v19, %v1137_v46 }
 0x3fe   :  { %6651 = vmatpush2.bf16.msra.mxu0 %v17034_v25  ;;  %v6233_v25 = vadd.f32 %v6232_v57, %v6190_v1  ;;  %v6319_v63 = vadd.f32 %v6318_v10, %v1149_v48  ;;  %v6229_v57 = vadd.f32 %v19060_v34, %v6186_v15  ;;  %v6668_v30 = vpack.c.bf16 %v5760_v20, %v5756_v12  ;;  %v19664_v1 = vld [vmem:[#allocation38_spill] sm:$0xff] }
 0x3ff   :  { %6652 = vmatprep.subr.bf16.mxu0 %v17039_v13  ;;  %v6315_v13 = vadd.f32 %v6314_v43, %v1149_v48  ;;  %v6145_v43 = vadd.f32 %v19050_v9, %v6102_v44  ;;  %v6360_v8 = vadd.f32 %v6359_v14, %v6317_v2  ;;  %v6141_v34 = vadd.f32 %v19042_v39, %v6098_v21  ;;  %v19661_v9 = vld [vmem:[#allocation53_spill] sm:$0xff]  ;;  %v19663_v39 = vld [vmem:[#allocation39_spill] sm:$0xff]  ;;  %v19670_v14 = vld [vmem:[#allocation52_spill] sm:$0xff] }
 0x400   :  { %v6276_v3 = vadd.f32 %v19090_v26, %v6233_v25  ;;  %v5799_v60 = vadd.f32 %v18959_v58, %v1117_v62  ;;  %v6272_v6 = vadd.f32 %v19067_v5, %v6229_v57  ;;  %v6356_v61 = vadd.f32 %v19661_v9, %v6313_v41  ;;  %v19667_v58 = vld [vmem:[#allocation49_spill] sm:$0xff] }
 0x401   :  { %v6358_v42 = vadd.f32 %v6357_v0, %v6315_v13  ;;  %v6673_v24 = vpack.c.bf16 %v6145_v43, %v6141_v34  ;;  %v19665_v54 = vpack.c.bf16 %v19663_v39, %v19664_v1  ;;  %v19666_v0 = vld [vmem:[#allocation47_spill] sm:$0xff]  ;;  %v6227_v33 = vadd.f32 %v19667_v58, %v6184_v17  ;;  %v19674_v44 = vld [vmem:[#allocation41_spill] sm:$0xff] }
 0x402   :  { %6653 = vmatpush2.bf16.msra.mxu0 %v17037_v55  ;;  %v5803_v55 = vadd.f32 %v18963_v49, %v1117_v62  ;;  %v19662_v49 = vld [vmem:[#allocation51_spill] sm:$0xff]  ;;  %v6676_v51 = vpack.c.bf16 %v6276_v3, %v6272_v6  ;;  %v5842_v15 = vadd.f32 %v19668_v59, %v5799_v60  ;;  %v19679_v41 = vsub.s32 6, %v18867_v31 }
 0x403   :  { %6699 = vmatprep.subr.bf16.mxu0 %v6672_v28  ;;  %v6231_v16 = vadd.f32 %v19662_v49, %v6188_v22  ;;  %v19680_v43 = vsub.s32 7, %v18867_v31 }
 0x404   :  { %v5846_v7 = vadd.f32 %v19666_v0, %v5803_v55  ;;  %v19681_v0 = vld [vmem:[#allocation37_spill] sm:$0xff] }
 0x405   :  { %v6398_v38 = vpop.f32.mrf.mxu0  ;;  %6655 = vmatmul.mubr.bf16.vlgmr.msra.gmra.mxu0 %v18857_v23  ;;  %v6361_v23 = vpop.f32.mrf.mxu1  ;;  %v6274_v20 = vadd.f32 %v19670_v14, %v6231_v16  ;;  %v1157_v22 = vrot.slane %v19081_v47, %v19680_v43  ;;  %v6683_v43 = vld [vmem:[%s19612_s1] sm:$0xff] }
 0x406   :  { %6700 = vmatpush1.bf16.xpose.msra.mxu0 %v6671_v11  ;;  %6717 = vmatprep.mubr.bf16.mxu0 %v19660_v53  ;;  %v6362_v27 = vadd.f32 %v6361_v23, %v6319_v63  ;;  %v6399_v50 = vadd.f32 %v6398_v38, %v6356_v61  ;;  %v5889_v10 = vadd.f32 %v19669_v40, %v5846_v7  ;;  %v19671_v11 = vld [vmem:[#allocation45_spill] sm:$0xff]  ;;  %v19673_v38 = vld [vmem:[#allocation42_spill] sm:$0xff]  ;;  %v19677_v53 = vld [vmem:[#allocation44_spill] sm:$0xff] }
 0x407   :  { %v6400_v56 = vpop.f32.mrf.mxu0  ;;  %6740 = vmatprep.subr.bf16.mxu0 %v6674_v18  ;;  %v5885_v4 = vadd.f32 %v19671_v11, %v5842_v15  ;;  %v19672_v18 = vld [vmem:[#allocation50_spill] sm:$0xff]  ;;  %v19675_v13 = vpack.c.bf16 %v19673_v38, %v19674_v44  ;;  %v6441_v62 = vpop.f32.mrf.mxu1  ;;  %v1153_v23 = vrot.slane %v19081_v47, %v19679_v41 }
 0x408   :  { %v6401_v26 = vadd.f32 %v6400_v56, %v6358_v42  ;;  %v6270_v46 = vadd.f32 %v19672_v18, %v6227_v33  ;;  %v19676_v63 = vld [vmem:[#allocation46_spill] sm:$0xff] }
 0x409   :  { %v6402_v32 = vpop.f32.mrf.mxu0  ;;  %v6670_v25 = vpack.c.bf16 %v5889_v10, %v5885_v4  ;;  %v19678_v12 = vpack.c.bf16 %v19676_v63, %v19677_v53  ;;  %v6443_v57 = vpop.f32.mrf.mxu1  ;;  %v6442_v21 = vadd.f32 %v6441_v62, %v1153_v23 }
 0x40a   :  { %v6403_v19 = vadd.f32 %v6402_v32, %v6360_v8  ;;  %v6675_v2 = vpack.c.bf16 %v6274_v20, %v6270_v46  ;;  %v6444_v3 = vadd.f32 %v6443_v57, %v1157_v22 }
 0x40b   :  { %v6404_v45 = vpop.f32.mrf.mxu0  ;;  %v6445_v56 = vpop.f32.mrf.mxu1 }
 0x40c   :  { %v6405_v28 = vadd.f32 %v6404_v45, %v6362_v27  ;;  %v6677_v48 = vpack.c.bf16 %v6403_v19, %v6399_v50  ;;  %v6446_v8 = vadd.f32 %v6445_v56, %v1153_v23  ;;  %v1090_v50 = vld [vmem:[#allocation8 + $0x10] sm:$0x3] }
 0x40d   :  { %6718 = vmatmul.mubr.bf16.vlgmr.msra.gmra.mxu0 %v19665_v54  ;;  %v1161_v54 = vrot.slane %v1090_v50, %v18870_v37  ;;  %v1165_v7 = vrot.slane %v1090_v50, %v19681_v0 }
 0x40e   :  { %v6678_v5 = vpack.c.bf16 %v6405_v28, %v6401_v26  ;;  %6741 = vmatpush1.bf16.xpose.msra.mxu0 %v6673_v24  ;;  %6758 = vmatprep.mubr.bf16.mxu0 %v6668_v30  ;;  %v6447_v30 = vpop.f32.mrf.mxu1 }
 0x40f   :  { %6781 = vmatprep.subr.bf16.mxu0 %v6676_v51  ;;  %v6448_v42 = vadd.f32 %v6447_v30, %v1157_v22 }
 0x410   :  { %6849 = vmatprep.subr.bf16.mxu1 %v6678_v5 }
 0x411   :  { %6850 = vmatpush1.bf16.msra.mxu1 %v6677_v48 }
 0x415   :  { %6759 = vmatmul.mubr.bf16.vlgmr.msra.gmra.mxu0 %v19675_v13 }
 0x416   :  { %6782 = vmatpush1.bf16.xpose.msra.mxu0 %v6675_v2  ;;  %6799 = vmatprep.mubr.bf16.mxu0 %v6670_v25 }
 0x41d   :  { %6800 = vmatmul.mubr.bf16.vlgmr.msra.gmra.mxu0 %v19678_v12 }
 0x445   :  { %v6484_v55 = vpop.f32.mrf.mxu0 }
 0x446   :  { %v6485_v32 = vadd.f32 %v6484_v55, %v6442_v21 }
 0x447   :  { %v6486_v34 = vpop.f32.mrf.mxu0  ;;  %v6527_v17 = vpop.f32.mrf.mxu1 }
 0x448   :  { %v19173_v27 = vadd.f32 %v6527_v17, %v6485_v32  ;;  %v6487_v9 = vadd.f32 %v6486_v34, %v6444_v3  ;;  %v6684_v3 = vld [vmem:[%s19612_s1 + $0x8] sm:$0xff] }
 0x449   :  { %v6488_v60 = vpop.f32.mrf.mxu0  ;;  %v6529_v6 = vpop.f32.mrf.mxu1 }
 0x44a   :  { %v6489_v61 = vadd.f32 %v6488_v60, %v6446_v8  ;;  %v6530_v49 = vadd.f32 %v6529_v6, %v6487_v9 }
 0x44b   :  { %v6490_v19 = vpop.f32.mrf.mxu0  ;;  %v6531_v45 = vpop.f32.mrf.mxu1 }
 0x44c   :  { %v6491_v24 = vadd.f32 %v6490_v19, %v6448_v42  ;;  %v19175_v31 = vadd.f32 %v6531_v45, %v6489_v61 }
 0x44d   :  { %v6533_v47 = vpop.f32.mrf.mxu1 }
 0x44e   :  { %v6679_v16 = vpack.c.bf16 %v19175_v31, %v19173_v27  ;;  %v6534_v26 = vadd.f32 %v6533_v47, %v6491_v24  ;;  %v17043_v27 = vld [vmem:[#allocation10 + $0x120] ss:$24 sps:$4 sm:$0xff]   ;;  %v17048_v31 = vld [vmem:[#allocation10 + $0xf4] ss:$24 sps:$4 sm:$0xff]  }
 0x450   :  { %v6680_v28 = vpack.c.bf16 %v6534_v26, %v6530_v49 }
 0x452   :  { %6892 = vmatprep.subr.bf16.mxu1 %v6680_v28 }
 0x485   :  { %v6570_v51 = vpop.f32.mrf.mxu0 }
 0x486   :  { %v6571_v5 = vadd.f32 %v6570_v51, %v1161_v54 }
 0x487   :  { %v6572_v39 = vpop.f32.mrf.mxu0  ;;  %v6613_v1 = vpop.f32.mrf.mxu1 }
 0x488   :  { %v6573_v48 = vadd.f32 %v6572_v39, %v1165_v7  ;;  %v6614_v40 = vadd.f32 %v6613_v1, %v6571_v5  ;;  %v17051_v5 = vld [vmem:[#allocation10 + $0x454] ss:$24 sps:$4 sm:$0xff]  }
 0x489   :  { %v6574_v58 = vpop.f32.mrf.mxu0  ;;  %v6615_v33 = vpop.f32.mrf.mxu1  ;;  %8773 = vmatprep.subr.bf16.mxu0 %v17051_v5  ;;  %v17112_v5 = vld [vmem:[#allocation10 + $0x1e0] ss:$24 sps:$4 sm:$0xff]  }
 0x48a   :  { %v6575_v10 = vadd.f32 %v6574_v58, %v1161_v54  ;;  %v6616_v20 = vadd.f32 %v6615_v33, %v6573_v48  ;;  %v18681_v58 = vmov 0   ;;  %v17049_v33 = vld [vmem:[#allocation10 + $0x450] ss:$24 sps:$4 sm:$0xff]   ;;  %v17055_v48 = vld [vmem:[#allocation10 + $0x420] ss:$24 sps:$4 sm:$0xff]  }
 0x48b   :  { %v6576_v59 = vpop.f32.mrf.mxu0  ;;  %v6617_v15 = vpop.f32.mrf.mxu1  ;;  %6867 = vmatprep.mubr.bf16.mxu1 %v18681_v58  ;;  %8774 = vmatpush1.bf16.msra.mxu0 %v17049_v33  ;;  %v17121_v33 = vld [vmem:[#allocation10 + $0x510] ss:$24 sps:$4 sm:$0xff]  }
 0x48c   :  { %v6577_v11 = vadd.f32 %v6576_v59, %v1165_v7  ;;  %v6618_v25 = vadd.f32 %v6617_v15, %v6575_v10  ;;  %v17057_v59 = vld [vmem:[#allocation10 + $0x424] ss:$24 sps:$4 sm:$0xff]   ;;  %v17061_v15 = vld [vmem:[#allocation10 + $0x3f0] ss:$24 sps:$4 sm:$0xff]   ;;  %v17067_v10 = vld [vmem:[#allocation10 + $0x3c0] ss:$24 sps:$4 sm:$0xff]  }
 0x48d   :  { %v6619_v18 = vpop.f32.mrf.mxu1  ;;  %8775 = vmatprep.subr.bf16.mxu0 %v17057_v59  ;;  %v17120_v59 = vld [vmem:[#allocation10 + $0x1b4] ss:$24 sps:$4 sm:$0xff]  }
 0x48e   :  { %v6620_v44 = vadd.f32 %v6619_v18, %v6577_v11  ;;  %v17075_v11 = vld [vmem:[#allocation10 + $0x394] ss:$24 sps:$4 sm:$0xff]   ;;  %v17079_v18 = vld [vmem:[#allocation10 + $0x360] ss:$24 sps:$4 sm:$0xff]  }
 0x48f   :  { %8776 = vmatpush1.bf16.msra.mxu0 %v17055_v48  ;;  %v17123_v48 = vld [vmem:[#allocation10 + $0x514] ss:$24 sps:$4 sm:$0xff]  }
 0x4c5   :  { %v6656_v14 = vpop.f32.mrf.mxu0 }
 0x4c6   :  { %v19181_v4 = vadd.f32 %v6656_v14, %v6614_v40  ;;  %v17063_v40 = vld [vmem:[#allocation10 + $0x3f4] ss:$24 sps:$4 sm:$0xff]   ;;  %v17069_v14 = vld [vmem:[#allocation10 + $0x3c4] ss:$24 sps:$4 sm:$0xff]  }
 0x4c7   :  { %v6658_v46 = vpop.f32.mrf.mxu0  ;;  %8777 = vmatprep.subr.bf16.mxu0 %v17063_v40  ;;  %v17118_v40 = vld [vmem:[#allocation10 + $0x1b0] ss:$24 sps:$4 sm:$0xff]  }
 0x4c8   :  { %v19183_v2 = vadd.f32 %v6658_v46, %v6616_v20  ;;  %8778 = vmatpush1.bf16.msra.mxu0 %v17061_v15  ;;  %v17073_v20 = vld [vmem:[#allocation10 + $0x390] ss:$24 sps:$4 sm:$0xff]   ;;  %v17081_v46 = vld [vmem:[#allocation10 + $0x364] ss:$24 sps:$4 sm:$0xff]  }
 0x4c9   :  { %v6660_v38 = vpop.f32.mrf.mxu0  ;;  %8779 = vmatprep.subr.bf16.mxu0 %v17069_v14  ;;  %v17129_v15 = vld [vmem:[#allocation10 + $0x4e4] ss:$24 sps:$4 sm:$0xff]  }
 0x4ca   :  { %v19185_v13 = vadd.f32 %v6660_v38, %v6618_v25  ;;  %v17085_v25 = vld [vmem:[#allocation10 + $0x330] ss:$24 sps:$4 sm:$0xff]   ;;  %v17087_v38 = vld [vmem:[#allocation10 + $0x334] ss:$24 sps:$4 sm:$0xff]   ;;  %v17126_v14 = vld [vmem:[#allocation10 + $0x184] ss:$24 sps:$4 sm:$0xff]  }
 0x4cb   :  { %v6662_v63 = vpop.f32.mrf.mxu0 }
 0x4cc   :  { %v6681_v53 = vpack.c.bf16 %v19185_v13, %v19181_v4  ;;  %v19189_v12 = vadd.f32 %v6662_v63, %v6620_v44  ;;  %8780 = vmatpush1.bf16.msra.mxu0 %v17067_v10  ;;  %v17091_v44 = vld [vmem:[#allocation10 + $0x300] ss:$24 sps:$4 sm:$0xff]   ;;  %v17093_v63 = vld [vmem:[#allocation10 + $0x304] ss:$24 sps:$4 sm:$0xff]   ;;  %v17060_v4 = vld [vmem:[#allocation10 + $0x94] ss:$24 sps:$4 sm:$0xff]  }
 0x4cd   :  { %v6719_v62 = vpop.f32.mrf.mxu0  ;;  %8781 = vmatprep.subr.bf16.mxu0 %v17075_v11  ;;  %v17058_v13 = vld [vmem:[#allocation10 + $0x90] ss:$24 sps:$4 sm:$0xff]   ;;  %v17127_v10 = vld [vmem:[#allocation10 + $0x4e0] ss:$24 sps:$4 sm:$0xff]  }
 0x4ce   :  { %v6682_v57 = vpack.c.bf16 %v19189_v12, %v19183_v2  ;;  %v6720_v55 = vadd.f32 %v6719_v62, %v6683_v43  ;;  %v17097_v62 = vld [vmem:[#allocation10 + $0x5d0] ss:$24 sps:$4 sm:$0xff]   ;;  %v17111_v43 = vld [vmem:[#allocation10 + $0x574] ss:$24 sps:$4 sm:$0xff]   ;;  %v17054_v2 = vld [vmem:[#allocation10 + $0xc4] ss:$24 sps:$4 sm:$0xff]  }
 0x4cf   :  { %v6721_v41 = vpop.f32.mrf.mxu0  ;;  %v17052_v12 = vld [vmem:[#allocation10 + $0xc0] ss:$24 sps:$4 sm:$0xff]  }
 0x4d0   :  { %8782 = vmatpush1.bf16.msra.mxu0 %v17073_v20  ;;  %v17099_v41 = vld [vmem:[#allocation10 + $0x5d4] ss:$24 sps:$4 sm:$0xff]   ;;  %v17124_v11 = vld [vmem:[#allocation10 + $0x180] ss:$24 sps:$4 sm:$0xff]  }
 0x4d1   :  { %v6722_v23 = vpop.f32.mrf.mxu0  ;;  %8783 = vmatprep.subr.bf16.mxu0 %v17081_v46  ;;  %v17132_v20 = vld [vmem:[#allocation10 + $0x4b4] ss:$24 sps:$4 sm:$0xff]  }
 0x4d2   :  { %v6723_v17 = vadd.f32 %v6722_v23, %v6684_v3  ;;  %v17103_v23 = vld [vmem:[#allocation10 + $0x5a0] ss:$24 sps:$4 sm:$0xff]   ;;  %v17135_v46 = vld [vmem:[#allocation10 + $0x754] ss:$24 sps:$4 sm:$0xff]  }
 0x4d3   :  { %v6724_v56 = vpop.f32.mrf.mxu0 }
 0x4d4   :  { %8784 = vmatpush1.bf16.msra.mxu0 %v17079_v18  ;;  %v17105_v56 = vld [vmem:[#allocation10 + $0x5a4] ss:$24 sps:$4 sm:$0xff]   ;;  %v17130_v18 = vld [vmem:[#allocation10 + $0x4b0] ss:$24 sps:$4 sm:$0xff]  }
 0x4d5   :  { %v6760_v21 = vpop.f32.mrf.mxu0  ;;  %8785 = vmatprep.subr.bf16.mxu0 %v17087_v38  ;;  %v17136_v38 = vld [vmem:[#allocation10 + $0x480] ss:$24 sps:$4 sm:$0xff]  }
 0x4d6   :  { %v6761_v32 = vadd.f32 %v6760_v21, %v6720_v55  ;;  %v17109_v21 = vld [vmem:[#allocation10 + $0x570] ss:$24 sps:$4 sm:$0xff]  }
 0x4d7   :  { %v6762_v22 = vpop.f32.mrf.mxu0 }
 0x4d8   :  { %8786 = vmatpush1.bf16.msra.mxu0 %v17085_v25  ;;  %v17115_v22 = vld [vmem:[#allocation10 + $0x540] ss:$24 sps:$4 sm:$0xff]   ;;  %v17138_v25 = vld [vmem:[#allocation10 + $0x484] ss:$24 sps:$4 sm:$0xff]  }
 0x4d9   :  { %v6763_v30 = vpop.f32.mrf.mxu0  ;;  %8787 = vmatprep.subr.bf16.mxu0 %v17093_v63 }
 0x4da   :  { %v6764_v6 = vadd.f32 %v6763_v30, %v6723_v17  ;;  %v17117_v30 = vld [vmem:[#allocation10 + $0x544] ss:$24 sps:$4 sm:$0xff]  }
 0x4db   :  { %v6765_v8 = vpop.f32.mrf.mxu0 }
 0x4dc   :  { %8788 = vmatpush1.bf16.msra.mxu0 %v17091_v44  ;;  %v17147_v44 = vld [vmem:[#allocation10 + $0x15c] ss:$24 sps:$4 sm:$0xff]  }
 0x4dd   :  { %v6801_v34 = vpop.f32.mrf.mxu0  ;;  %8789 = vmatprep.subr.bf16.mxu0 %v17099_v41 }
 0x4de   :  { %v6802_v42 = vadd.f32 %v6801_v34, %v6761_v32 }
 0x4df   :  { %v6803_v60 = vpop.f32.mrf.mxu0 }
 0x4e0   :  { %v6809_v9 = vsel %vm6808_vm0, %v6802_v42, -inf  ;;  %8790 = vmatpush2.bf16.msra.mxu0 %v17097_v62  ;;  %v17042_v60 = vld [vmem:[#allocation10 + $0x154] ss:$24 sps:$4 sm:$0xff]  }
 0x4e1   :  { %v6804_v61 = vpop.f32.mrf.mxu0  ;;  %6810 = vmax.xlane.f32.xlu0 %v6809_v9  ;;  %8791 = vmatprep.subr.bf16.mxu0 %v17105_v56  ;;  %v17045_v9 = vld [vmem:[#allocation10 + $0x124] ss:$24 sps:$4 sm:$0xff]  }
 0x4e2   :  { %v6805_v19 = vadd.f32 %v6804_v61, %v6764_v6  ;;  %v17040_v6 = vld [vmem:[#allocation10 + $0x150] ss:$24 sps:$4 sm:$0xff]   ;;  %v17072_v61 = vld [vmem:[#allocation10 + $0x34] ss:$24 sps:$4 sm:$0xff]  }
 0x4e3   :  { %v6806_v45 = vpop.f32.mrf.mxu0 }
 0x4e4   :  { %v6812_v24 = vsel %vm6808_vm0, %v6805_v19, -inf  ;;  %8792 = vmatpush2.bf16.msra.mxu0 %v17103_v23  ;;  %v17078_v45 = vld [vmem:[#allocation10 + $0x4] ss:$24 sps:$4 sm:$0xff]  }
 0x4e5   :  { %6813 = vmax.xlane.f32.xlu0 %v6812_v24  ;;  %8793 = vmatprep.subr.bf16.mxu0 %v17111_v43  ;;  %v17076_v24 = vld [vmem:[#allocation10] ss:$24 sps:$4 sm:$0xff]  }
 0x4e8   :  { %8794 = vmatpush2.bf16.msra.mxu0 %v17109_v21  ;;  %v17133_v21 = vld [vmem:[#allocation10 + $0x750] ss:$24 sps:$4 sm:$0xff]  }
 0x4e9   :  { %8795 = vmatprep.subr.bf16.mxu0 %v17117_v30  ;;  %v17141_v30 = vld [vmem:[#allocation10 + $0x724] ss:$24 sps:$4 sm:$0xff]  }
 0x4ec   :  { %8796 = vmatpush2.bf16.msra.mxu0 %v17115_v22 }
 0x4ed   :  { %8797 = vmatprep.subr.bf16.mxu0 %v17123_v48  ;;  %v17178_v48 = vld [vmem:[#allocation10 + $0x8d0] ss:$24 sps:$4 sm:$0xff]  }
 0x4f0   :  { %8798 = vmatpush2.bf16.msra.mxu0 %v17121_v33  ;;  %v17180_v33 = vld [vmem:[#allocation10 + $0x8d4] ss:$24 sps:$4 sm:$0xff]  }
 0x4f1   :  { %8799 = vmatprep.subr.bf16.mxu0 %v17129_v15  ;;  %v17186_v15 = vld [vmem:[#allocation10 + $0x8a4] ss:$24 sps:$4 sm:$0xff]  }
 0x4f4   :  { %8800 = vmatpush2.bf16.msra.mxu0 %v17127_v10  ;;  %v17184_v10 = vld [vmem:[#allocation10 + $0x8a0] ss:$24 sps:$4 sm:$0xff]  }
 0x4f5   :  { %8801 = vmatprep.subr.bf16.mxu0 %v17132_v20  ;;  %v17192_v20 = vld [vmem:[#allocation10 + $0x874] ss:$24 sps:$4 sm:$0xff]  }
 0x4f8   :  { %8802 = vmatpush2.bf16.msra.mxu0 %v17130_v18  ;;  %v17190_v18 = vld [vmem:[#allocation10 + $0x870] ss:$24 sps:$4 sm:$0xff]  }
 0x4f9   :  { %8803 = vmatprep.subr.bf16.mxu0 %v17138_v25  ;;  %v17198_v25 = vld [vmem:[#allocation10 + $0x844] ss:$24 sps:$4 sm:$0xff]  }
 0x4fc   :  { %8804 = vmatpush2.bf16.msra.mxu0 %v17136_v38  ;;  %v17201_v38 = vld [vmem:[#allocation10 + $0x2ac] ss:$24 sps:$4 sm:$0xff]  }
 0x4fd   :  { %8859 = vmatprep.subr.bf16.mxu0 %v17147_v44  ;;  %v17196_v44 = vld [vmem:[#allocation10 + $0x840] ss:$24 sps:$4 sm:$0xff]  }
 0x56a   :  { %v6811_v47 = vpop.xlane.xlu0 %6810 }
 0x56b   :  { %v6815_v49 = vsub.f32 %v6802_v42, %v6811_v47  ;;  %v17084_v47 = vld [vmem:[#allocation10 + $0x2d4] ss:$24 sps:$4 sm:$0xff]  }
 0x56d   :  { %v6817_v26 = vmul.f32 1.442695, %v6815_v49  ;;  %v17082_v49 = vld [vmem:[#allocation10 + $0x2d0] ss:$24 sps:$4 sm:$0xff]  }
 0x56e   :  { %v6814_v28 = vpop.xlane.xlu0 %6813 }
 0x56f   :  { %17472 = vpow2.f32 %v6817_v26  ;;  %v6816_v51 = vsub.f32 %v6805_v19, %v6814_v28  ;;  %v17070_v19 = vld [vmem:[#allocation10 + $0x30] ss:$24 sps:$4 sm:$0xff]   ;;  %v17090_v26 = vld [vmem:[#allocation10 + $0x2a4] ss:$24 sps:$4 sm:$0xff]   ;;  %v17088_v28 = vld [vmem:[#allocation10 + $0x2a0] ss:$24 sps:$4 sm:$0xff]  }
 0x571   :  { %v6819_v50 = vmul.f32 1.442695, %v6816_v51  ;;  %v17096_v51 = vld [vmem:[#allocation10 + $0x274] ss:$24 sps:$4 sm:$0xff]  }
 0x573   :  { %17474 = vpow2.f32 %v6819_v50  ;;  %v17094_v50 = vld [vmem:[#allocation10 + $0x270] ss:$24 sps:$4 sm:$0xff]  }
 0x57c   :  { %v17473_v39 = vpop.eup %17472 }
 0x57d   :  { %v6821_v1 = vsel %vm6808_vm0, %v17473_v39, 0.0 }
 0x57e   :  { %6822 = vadd.xlane.f32.xlu1 %v6821_v1  ;;  %v17100_v1 = vld [vmem:[#allocation10 + $0x240] ss:$24 sps:$4 sm:$0xff]  }
 0x580   :  { %v17475_v54 = vpop.eup %17474 }
 0x581   :  { %v6824_v7 = vsel %vm6808_vm0, %v17475_v54, 0.0 }
 0x582   :  { %6825 = vadd.xlane.f32.xlu1 %v6824_v7  ;;  %v17106_v7 = vld [vmem:[#allocation10 + $0x210] ss:$24 sps:$4 sm:$0xff]  }
 0x607   :  { %v6823_v55 = vpop.xlane.xlu1 %6822 }
 0x608   :  { %17476 = vrcp.f32 %v6823_v55 }
 0x60b   :  { %v6826_v3 = vpop.xlane.xlu1 %6825 }
 0x60c   :  { %17478 = vrcp.f32 %v6826_v3  ;;  %v17139_v3 = vld [vmem:[#allocation10 + $0x720] ss:$24 sps:$4 sm:$0xff]  }
 0x615   :  { %v17477_v8 = vpop.eup %17476 }
 0x616   :  { %v6829_v34 = vmul.f32 %v17477_v8, %v17473_v39  ;;  %v17102_v39 = vld [vmem:[#allocation10 + $0x244] ss:$24 sps:$4 sm:$0xff]  }
 0x619   :  { %v17479_v32 = vpop.eup %17478 }
 0x61a   :  { %v6830_v17 = vmul.f32 %v17479_v32, %v17475_v54  ;;  %v17108_v54 = vld [vmem:[#allocation10 + $0x214] ss:$24 sps:$4 sm:$0xff]  }
 0x61b   :  { %v17144_v32 = vld [vmem:[#allocation10 + $0x6f4] ss:$24 sps:$4 sm:$0xff]  }
 0x61c   :  { %v6831_v42 = vpack.c.bf16 %v6830_v17, %v6829_v34 }
 0x61e   :  { %14856 = vmatmul.mubr.msk.bf16.vlgmr.msra.gmra.mxu1 %vm6808_vm0, %v6831_v42 }
 0x61f   :  { %6893 = vmatpush1.bf16.msra.mxu1 %v6679_v16  ;;  %6910 = vmatprep.mubr.bf16.mxu1 %v18681_v58  ;;  %v17046_v16 = vld [vmem:[#allocation10 + $0xf0] ss:$24 sps:$4 sm:$0xff]  }
 0x620   :  { %6935 = vmatprep.subr.bf16.mxu1 %v6682_v57  ;;  %v17064_v57 = vld [vmem:[#allocation10 + $0x60] ss:$24 sps:$4 sm:$0xff]  }
 0x626   :  { %14857 = vmatmul.mubr.msk.bf16.vlgmr.msra.gmra.mxu1 %vm6808_vm0, %v6831_v42 }
 0x627   :  { %6936 = vmatpush1.bf16.msra.mxu1 %v6681_v53  ;;  %6953 = vmatprep.mubr.bf16.mxu1 %v18681_v58  ;;  %v17066_v53 = vld [vmem:[#allocation10 + $0x64] ss:$24 sps:$4 sm:$0xff]  }
 0x628   :  { %8730 = vmatprep.subr.bf16.mxu1 %v17042_v60  ;;  %v17114_v58 = vld [vmem:[#allocation10 + $0x1e4] ss:$24 sps:$4 sm:$0xff]   ;;  %v17145_v60 = vld [vmem:[#allocation10 + $0x158] ss:$24 sps:$4 sm:$0xff]  }
 0x62e   :  { %14858 = vmatmul.mubr.msk.bf16.vlgmr.msra.gmra.mxu1 %vm6808_vm0, %v6831_v42  ;;  %v17142_v42 = vld [vmem:[#allocation10 + $0x6f0] ss:$24 sps:$4 sm:$0xff]  }
 0x62f   :  { %8731 = vmatpush1.bf16.msra.mxu1 %v17040_v6 }
 0x630   :  { %8732 = vmatprep.subr.bf16.mxu1 %v17045_v9 }
 0x633   :  { %8733 = vmatpush1.bf16.msra.mxu1 %v17043_v27  ;;  %v17150_v27 = vld [vmem:[#allocation10 + $0x6c4] ss:$24 sps:$4 sm:$0xff]  }
 0x634   :  { %8734 = vmatprep.subr.bf16.mxu1 %v17048_v31  ;;  %v17153_v31 = vld [vmem:[#allocation10 + $0x12c] ss:$24 sps:$4 sm:$0xff]  }
 0x637   :  { %8735 = vmatpush1.bf16.msra.mxu1 %v17046_v16 }
 0x638   :  { %8736 = vmatprep.subr.bf16.mxu1 %v17054_v2  ;;  %v17148_v2 = vld [vmem:[#allocation10 + $0x6c0] ss:$24 sps:$4 sm:$0xff]  }
 0x63b   :  { %8737 = vmatpush1.bf16.msra.mxu1 %v17052_v12  ;;  %v17151_v12 = vld [vmem:[#allocation10 + $0x128] ss:$24 sps:$4 sm:$0xff]  }
 0x63c   :  { %8738 = vmatprep.subr.bf16.mxu1 %v17060_v4 }
 0x63f   :  { %8739 = vmatpush1.bf16.msra.mxu1 %v17058_v13  ;;  %v17156_v13 = vld [vmem:[#allocation10 + $0x694] ss:$24 sps:$4 sm:$0xff]  }
 0x640   :  { %8740 = vmatprep.subr.bf16.mxu1 %v17066_v53  ;;  %v17159_v53 = vld [vmem:[#allocation10 + $0xfc] ss:$24 sps:$4 sm:$0xff]  }
 0x643   :  { %8741 = vmatpush1.bf16.msra.mxu1 %v17064_v57 }
 0x644   :  { %8742 = vmatprep.subr.bf16.mxu1 %v17072_v61 }
 0x647   :  { %8743 = vmatpush1.bf16.msra.mxu1 %v17070_v19  ;;  %v17154_v19 = vld [vmem:[#allocation10 + $0x690] ss:$24 sps:$4 sm:$0xff]  }
 0x648   :  { %8744 = vmatprep.subr.bf16.mxu1 %v17078_v45  ;;  %v17157_v45 = vld [vmem:[#allocation10 + $0xf8] ss:$24 sps:$4 sm:$0xff]  }
 0x64b   :  { %8745 = vmatpush1.bf16.msra.mxu1 %v17076_v24  ;;  %v17162_v24 = vld [vmem:[#allocation10 + $0x664] ss:$24 sps:$4 sm:$0xff]  }
 0x64c   :  { %8746 = vmatprep.subr.bf16.mxu1 %v17084_v47  ;;  %v17165_v47 = vld [vmem:[#allocation10 + $0xcc] ss:$24 sps:$4 sm:$0xff]  }
 0x64f   :  { %8747 = vmatpush2.bf16.msra.mxu1 %v17082_v49  ;;  %v17160_v49 = vld [vmem:[#allocation10 + $0x660] ss:$24 sps:$4 sm:$0xff]  }
 0x650   :  { %8748 = vmatprep.subr.bf16.mxu1 %v17090_v26  ;;  %v17163_v26 = vld [vmem:[#allocation10 + $0xc8] ss:$24 sps:$4 sm:$0xff]  }
 0x653   :  { %8749 = vmatpush2.bf16.msra.mxu1 %v17088_v28  ;;  %v17168_v28 = vld [vmem:[#allocation10 + $0x634] ss:$24 sps:$4 sm:$0xff]  }
 0x654   :  { %8750 = vmatprep.subr.bf16.mxu1 %v17096_v51  ;;  %v17171_v51 = vld [vmem:[#allocation10 + $0x9c] ss:$24 sps:$4 sm:$0xff]  }
 0x657   :  { %8751 = vmatpush2.bf16.msra.mxu1 %v17094_v50  ;;  %v17166_v50 = vld [vmem:[#allocation10 + $0x630] ss:$24 sps:$4 sm:$0xff]  }
 0x658   :  { %8752 = vmatprep.subr.bf16.mxu1 %v17102_v39  ;;  %v17169_v39 = vld [vmem:[#allocation10 + $0x98] ss:$24 sps:$4 sm:$0xff]  }
 0x65b   :  { %8753 = vmatpush2.bf16.msra.mxu1 %v17100_v1  ;;  %v17174_v1 = vld [vmem:[#allocation10 + $0x604] ss:$24 sps:$4 sm:$0xff]  }
 0x65c   :  { %8754 = vmatprep.subr.bf16.mxu1 %v17108_v54  ;;  %v17177_v54 = vld [vmem:[#allocation10 + $0x6c] ss:$24 sps:$4 sm:$0xff]  }
 0x65f   :  { %8755 = vmatpush2.bf16.msra.mxu1 %v17106_v7  ;;  %v17172_v7 = vld [vmem:[#allocation10 + $0x600] ss:$24 sps:$4 sm:$0xff]  }
 0x660   :  { %8756 = vmatprep.subr.bf16.mxu1 %v17114_v58  ;;  %v17175_v58 = vld [vmem:[#allocation10 + $0x68] ss:$24 sps:$4 sm:$0xff]  }
 0x663   :  { %8757 = vmatpush2.bf16.msra.mxu1 %v17112_v5  ;;  %v17183_v5 = vld [vmem:[#allocation10 + $0x3c] ss:$24 sps:$4 sm:$0xff]  }
 0x664   :  { %8758 = vmatprep.subr.bf16.mxu1 %v17120_v59  ;;  %v17181_v59 = vld [vmem:[#allocation10 + $0x38] ss:$24 sps:$4 sm:$0xff]  }
 0x667   :  { %8759 = vmatpush2.bf16.msra.mxu1 %v17118_v40  ;;  %v17189_v40 = vld [vmem:[#allocation10 + $0xc] ss:$24 sps:$4 sm:$0xff]  }
 0x668   :  { %8760 = vmatprep.subr.bf16.mxu1 %v17126_v14  ;;  %v17187_v14 = vld [vmem:[#allocation10 + $0x8] ss:$24 sps:$4 sm:$0xff]  }
 0x66b   :  { %8761 = vmatpush2.bf16.msra.mxu1 %v17124_v11  ;;  %v17195_v11 = vld [vmem:[#allocation10 + $0x2dc] ss:$24 sps:$4 sm:$0xff]  }
 0x66c   :  { %8816 = vmatprep.subr.bf16.mxu1 %v17135_v46  ;;  %v17193_v46 = vld [vmem:[#allocation10 + $0x2d8] ss:$24 sps:$4 sm:$0xff]  }
 0x6de   :  { %v6869_v63 = vpop.f32.mrf.mxu1 }
 0x6e0   :  { %v6871_v62 = vpop.f32.mrf.mxu1 }
 0x6e2   :  { %v6873_v41 = vpop.f32.mrf.mxu1 }
 0x6e3   :  { %v19220_v43 = vpack.c.bf16 %v6873_v41, %v6869_v63  ;;  %v17199_v63 = vld [vmem:[#allocation10 + $0x2a8] ss:$24 sps:$4 sm:$0xff]   ;;  %v17207_v41 = vld [vmem:[#allocation10 + $0x27c] ss:$24 sps:$4 sm:$0xff]  }
 0x6e4   :  { %v6875_v23 = vpop.f32.mrf.mxu1 }
 0x6e5   :  { %v19218_v56 = vpack.c.bf16 %v6875_v23, %v6871_v62  ;;  %v17204_v62 = vld [vmem:[#allocation10 + $0x814] ss:$24 sps:$4 sm:$0xff]   ;;  %v17202_v23 = vld [vmem:[#allocation10 + $0x810] ss:$24 sps:$4 sm:$0xff]  }
 0x6e6   :  { %v6912_v22 = vpop.f32.mrf.mxu1 }
 0x6e7   :  { %8762 = vmatprep.mubr.bf16.mxu1 %v19218_v56 }
 0x6e8   :  { %v6914_v55 = vpop.f32.mrf.mxu1  ;;  %8763 = vmatmul.mubr.bf16.vlgmr.msra.gmra.mxu1 %v19220_v43 }
 0x6e9   :  { %8817 = vmatpush1.bf16.msra.mxu1 %v17133_v21  ;;  %v17205_v21 = vld [vmem:[#allocation10 + $0x278] ss:$24 sps:$4 sm:$0xff]  }
 0x6ea   :  { %v6916_v8 = vpop.f32.mrf.mxu1  ;;  %8818 = vmatprep.subr.bf16.mxu1 %v17141_v30  ;;  %v17213_v30 = vld [vmem:[#allocation10 + $0x24c] ss:$24 sps:$4 sm:$0xff]  }
 0x6eb   :  { %v19226_v6 = vpack.c.bf16 %v6916_v8, %v6912_v22  ;;  %v17210_v22 = vld [vmem:[#allocation10 + $0x7e4] ss:$24 sps:$4 sm:$0xff]   ;;  %v17216_v8 = vld [vmem:[#allocation10 + $0x7b4] ss:$24 sps:$4 sm:$0xff]  }
 0x6ec   :  { %v6918_v34 = vpop.f32.mrf.mxu1 }
 0x6ed   :  { %v19224_v17 = vpack.c.bf16 %v6918_v34, %v6914_v55  ;;  %8819 = vmatpush1.bf16.msra.mxu1 %v17139_v3  ;;  %v17208_v55 = vld [vmem:[#allocation10 + $0x7e0] ss:$24 sps:$4 sm:$0xff]   ;;  %v17214_v34 = vld [vmem:[#allocation10 + $0x7b0] ss:$24 sps:$4 sm:$0xff]  }
 0x6ee   :  { %v19228_v9 = vpop.f32.mrf.mxu1  ;;  %8820 = vmatprep.subr.bf16.mxu1 %v17144_v32  ;;  %v17211_v3 = vld [vmem:[#allocation10 + $0x248] ss:$24 sps:$4 sm:$0xff]   ;;  %v17219_v32 = vld [vmem:[#allocation10 + $0x21c] ss:$24 sps:$4 sm:$0xff]  }
 0x6ef   :  { %8805 = vmatprep.mubr.bf16.mxu0 %v19224_v17 }
 0x6f0   :  { %v6957_v16 = vpop.f32.mrf.mxu1  ;;  %8806 = vmatmul.mubr.bf16.vlgmr.msra.gmra.mxu0 %v19226_v6 }
 0x6f1   :  { %8821 = vmatpush1.bf16.msra.mxu1 %v17142_v42  ;;  %8860 = vmatpush1.bf16.msra.mxu0 %v17145_v60  ;;  %v17217_v42 = vld [vmem:[#allocation10 + $0x218] ss:$24 sps:$4 sm:$0xff]   ;;  %v17222_v60 = vld [vmem:[#allocation10 + $0x784] ss:$24 sps:$4 sm:$0xff]  }
 0x6f2   :  { %8891 = vmatprep.mubr.bf16.mxu0 %v19218_v56  ;;  %v19233_v4 = vpop.f32.mrf.mxu1  ;;  %8822 = vmatprep.subr.bf16.mxu1 %v17150_v27  ;;  %v17225_v27 = vld [vmem:[#allocation10 + $0x1ec] ss:$24 sps:$4 sm:$0xff]  }
 0x6f3   :  { %8861 = vmatprep.subr.bf16.mxu0 %v17153_v31  ;;  %v17220_v31 = vld [vmem:[#allocation10 + $0x780] ss:$24 sps:$4 sm:$0xff]  }
 0x6f4   :  { %v6961_v57 = vpop.f32.mrf.mxu1 }
 0x6f5   :  { %v19235_v61 = vpack.c.bf16 %v6961_v57, %v6957_v16  ;;  %8823 = vmatpush1.bf16.msra.mxu1 %v17148_v2  ;;  %8862 = vmatpush1.bf16.msra.mxu0 %v17151_v12  ;;  %v17223_v16 = vld [vmem:[#allocation10 + $0x1e8] ss:$24 sps:$4 sm:$0xff]   ;;  %v17228_v2 = vld [vmem:[#allocation10 + $0x1bc] ss:$24 sps:$4 sm:$0xff]   ;;  %v19240_v57 = vpack.c.bf16 %v19233_v4, %v19228_v9  ;;  %v17238_v9 = vld [vmem:[#allocation10 + $0x3f8] ss:$24 sps:$4 sm:$0xff]  }
 0x6f6   :  { %8824 = vmatprep.subr.bf16.mxu1 %v17156_v13  ;;  %8863 = vmatprep.subr.bf16.mxu0 %v17159_v53  ;;  %v17231_v12 = vld [vmem:[#allocation10 + $0x45c] ss:$24 sps:$4 sm:$0xff]   ;;  %v17226_v13 = vld [vmem:[#allocation10 + $0x1b8] ss:$24 sps:$4 sm:$0xff]  }
 0x6f7   :  { %8848 = vmatprep.mubr.bf16.mxu1 %v19235_v61  ;;  %v17229_v53 = vld [vmem:[#allocation10 + $0x458] ss:$24 sps:$4 sm:$0xff]  }
 0x6f8   :  { %v17241_v4 = vld [vmem:[#allocation10 + $0x758] ss:$24 sps:$4 sm:$0xff]  }
 0x6f9   :  { %8825 = vmatpush1.bf16.msra.mxu1 %v17154_v19  ;;  %8864 = vmatpush1.bf16.msra.mxu0 %v17157_v45  ;;  %v17234_v19 = vld [vmem:[#allocation10 + $0x18c] ss:$24 sps:$4 sm:$0xff]  }
 0x6fa   :  { %8826 = vmatprep.subr.bf16.mxu1 %v17162_v24  ;;  %8865 = vmatprep.subr.bf16.mxu0 %v17165_v47  ;;  %v17237_v45 = vld [vmem:[#allocation10 + $0x42c] ss:$24 sps:$4 sm:$0xff]   ;;  %v17232_v24 = vld [vmem:[#allocation10 + $0x188] ss:$24 sps:$4 sm:$0xff]  }
 0x6fb   :  { %v17235_v47 = vld [vmem:[#allocation10 + $0x428] ss:$24 sps:$4 sm:$0xff]  }
 0x6fd   :  { %8827 = vmatpush1.bf16.msra.mxu1 %v17160_v49  ;;  %8866 = vmatpush1.bf16.msra.mxu0 %v17163_v26  ;;  %v17240_v49 = vld [vmem:[#allocation10 + $0x3fc] ss:$24 sps:$4 sm:$0xff]  }
 0x6fe   :  { %8828 = vmatprep.subr.bf16.mxu1 %v17168_v28  ;;  %8867 = vmatprep.subr.bf16.mxu0 %v17171_v51  ;;  %v17243_v26 = vld [vmem:[#allocation10 + $0x75c] ss:$24 sps:$4 sm:$0xff]   ;;  %v17246_v28 = vld [vmem:[#allocation10 + $0x3cc] ss:$24 sps:$4 sm:$0xff]  }
 0x6ff   :  { %v17249_v51 = vld [vmem:[#allocation10 + $0x72c] ss:$24 sps:$4 sm:$0xff]  }
 0x701   :  { %8829 = vmatpush1.bf16.msra.mxu1 %v17166_v50  ;;  %8868 = vmatpush1.bf16.msra.mxu0 %v17169_v39  ;;  %v17244_v50 = vld [vmem:[#allocation10 + $0x3c8] ss:$24 sps:$4 sm:$0xff]  }
 0x702   :  { %8830 = vmatprep.subr.bf16.mxu1 %v17174_v1  ;;  %8869 = vmatprep.subr.bf16.mxu0 %v17177_v54  ;;  %v17247_v39 = vld [vmem:[#allocation10 + $0x728] ss:$24 sps:$4 sm:$0xff]   ;;  %v17252_v1 = vld [vmem:[#allocation10 + $0x39c] ss:$24 sps:$4 sm:$0xff]  }
 0x703   :  { %v17255_v54 = vld [vmem:[#allocation10 + $0x6fc] ss:$24 sps:$4 sm:$0xff]  }
 0x705   :  { %8831 = vmatpush1.bf16.msra.mxu1 %v17172_v7  ;;  %8870 = vmatpush1.bf16.msra.mxu0 %v17175_v58  ;;  %v17250_v7 = vld [vmem:[#allocation10 + $0x398] ss:$24 sps:$4 sm:$0xff]  }
 0x706   :  { %8832 = vmatprep.subr.bf16.mxu1 %v17180_v33  ;;  %8871 = vmatprep.subr.bf16.mxu0 %v17183_v5  ;;  %v17253_v58 = vld [vmem:[#allocation10 + $0x6f8] ss:$24 sps:$4 sm:$0xff]   ;;  %v17258_v33 = vld [vmem:[#allocation10 + $0x36c] ss:$24 sps:$4 sm:$0xff]  }
 0x707   :  { %v17261_v5 = vld [vmem:[#allocation10 + $0x6cc] ss:$24 sps:$4 sm:$0xff]  }
 0x709   :  { %8833 = vmatpush2.bf16.msra.mxu1 %v17178_v48  ;;  %8872 = vmatpush1.bf16.msra.mxu0 %v17181_v59  ;;  %v17256_v48 = vld [vmem:[#allocation10 + $0x368] ss:$24 sps:$4 sm:$0xff]  }
 0x70a   :  { %8834 = vmatprep.subr.bf16.mxu1 %v17186_v15  ;;  %8873 = vmatprep.subr.bf16.mxu0 %v17189_v40  ;;  %v17259_v59 = vld [vmem:[#allocation10 + $0x6c8] ss:$24 sps:$4 sm:$0xff]   ;;  %v17264_v15 = vld [vmem:[#allocation10 + $0x33c] ss:$24 sps:$4 sm:$0xff]  }
 0x70b   :  { %v17267_v40 = vld [vmem:[#allocation10 + $0x69c] ss:$24 sps:$4 sm:$0xff]  }
 0x70d   :  { %8835 = vmatpush2.bf16.msra.mxu1 %v17184_v10  ;;  %8874 = vmatpush1.bf16.msra.mxu0 %v17187_v14  ;;  %v17262_v10 = vld [vmem:[#allocation10 + $0x338] ss:$24 sps:$4 sm:$0xff]  }
 0x70e   :  { %8836 = vmatprep.subr.bf16.mxu1 %v17192_v20  ;;  %8875 = vmatprep.subr.bf16.mxu0 %v17195_v11  ;;  %v17265_v14 = vld [vmem:[#allocation10 + $0x698] ss:$24 sps:$4 sm:$0xff]   ;;  %v17270_v20 = vld [vmem:[#allocation10 + $0x30c] ss:$24 sps:$4 sm:$0xff]  }
 0x70f   :  { %v17273_v11 = vld [vmem:[#allocation10 + $0x66c] ss:$24 sps:$4 sm:$0xff]  }
 0x711   :  { %8837 = vmatpush2.bf16.msra.mxu1 %v17190_v18  ;;  %8876 = vmatpush2.bf16.msra.mxu0 %v17193_v46  ;;  %v17268_v18 = vld [vmem:[#allocation10 + $0x308] ss:$24 sps:$4 sm:$0xff]  }
 0x712   :  { %8838 = vmatprep.subr.bf16.mxu1 %v17198_v25  ;;  %8877 = vmatprep.subr.bf16.mxu0 %v17201_v38  ;;  %v17271_v46 = vld [vmem:[#allocation10 + $0x668] ss:$24 sps:$4 sm:$0xff]   ;;  %v17276_v25 = vld [vmem:[#allocation10 + $0x5dc] ss:$24 sps:$4 sm:$0xff]  }
 0x713   :  { %v17279_v38 = vld [vmem:[#allocation10 + $0x63c] ss:$24 sps:$4 sm:$0xff]  }
 0x715   :  { %8839 = vmatpush2.bf16.msra.mxu1 %v17196_v44  ;;  %8878 = vmatpush2.bf16.msra.mxu0 %v17199_v63  ;;  %v17274_v44 = vld [vmem:[#allocation10 + $0x5d8] ss:$24 sps:$4 sm:$0xff]  }
 0x716   :  { %8840 = vmatprep.subr.bf16.mxu1 %v17204_v62  ;;  %8879 = vmatprep.subr.bf16.mxu0 %v17207_v41  ;;  %v17277_v63 = vld [vmem:[#allocation10 + $0x638] ss:$24 sps:$4 sm:$0xff]   ;;  %v17282_v62 = vld [vmem:[#allocation10 + $0x5ac] ss:$24 sps:$4 sm:$0xff]  }
 0x717   :  { %v17285_v41 = vld [vmem:[#allocation10 + $0x60c] ss:$24 sps:$4 sm:$0xff]  }
 0x719   :  { %8841 = vmatpush2.bf16.msra.mxu1 %v17202_v23  ;;  %8880 = vmatpush2.bf16.msra.mxu0 %v17205_v21  ;;  %v17280_v23 = vld [vmem:[#allocation10 + $0x5a8] ss:$24 sps:$4 sm:$0xff]  }
 0x71a   :  { %8842 = vmatprep.subr.bf16.mxu1 %v17210_v22  ;;  %8881 = vmatprep.subr.bf16.mxu0 %v17213_v30  ;;  %v17283_v21 = vld [vmem:[#allocation10 + $0x608] ss:$24 sps:$4 sm:$0xff]   ;;  %v17288_v22 = vld [vmem:[#allocation10 + $0x57c] ss:$24 sps:$4 sm:$0xff]  }
 0x71b   :  { %v17291_v30 = vld [vmem:[#allocation10 + $0x8dc] ss:$24 sps:$4 sm:$0xff]  }
 0x71d   :  { %8843 = vmatpush2.bf16.msra.mxu1 %v17208_v55  ;;  %8882 = vmatpush2.bf16.msra.mxu0 %v17211_v3  ;;  %v17286_v55 = vld [vmem:[#allocation10 + $0x578] ss:$24 sps:$4 sm:$0xff]  }
 0x71e   :  { %8844 = vmatprep.subr.bf16.mxu1 %v17216_v8  ;;  %8883 = vmatprep.subr.bf16.mxu0 %v17219_v32  ;;  %v17289_v3 = vld [vmem:[#allocation10 + $0x8d8] ss:$24 sps:$4 sm:$0xff]   ;;  %v17294_v8 = vld [vmem:[#allocation10 + $0x54c] ss:$24 sps:$4 sm:$0xff]  }
 0x71f   :  { %v17297_v32 = vld [vmem:[#allocation10 + $0x8ac] ss:$24 sps:$4 sm:$0xff]  }
 0x721   :  { %8845 = vmatpush2.bf16.msra.mxu1 %v17214_v34  ;;  %8884 = vmatpush2.bf16.msra.mxu0 %v17217_v42  ;;  %v17292_v34 = vld [vmem:[#allocation10 + $0x548] ss:$24 sps:$4 sm:$0xff]  }
 0x722   :  { %8846 = vmatprep.subr.bf16.mxu1 %v17222_v60  ;;  %8885 = vmatprep.subr.bf16.mxu0 %v17225_v27  ;;  %v17295_v42 = vld [vmem:[#allocation10 + $0x8a8] ss:$24 sps:$4 sm:$0xff]   ;;  %v17300_v60 = vld [vmem:[#allocation10 + $0x51c] ss:$24 sps:$4 sm:$0xff]  }
 0x723   :  { %v17303_v27 = vld [vmem:[#allocation10 + $0x87c] ss:$24 sps:$4 sm:$0xff]  }
 0x725   :  { %8847 = vmatpush2.bf16.msra.mxu1 %v17220_v31  ;;  %8886 = vmatpush2.bf16.msra.mxu0 %v17223_v16  ;;  %v17298_v31 = vld [vmem:[#allocation10 + $0x518] ss:$24 sps:$4 sm:$0xff]  }
 0x726   :  { %8887 = vmatprep.subr.bf16.mxu0 %v17228_v2  ;;  %8902 = vmatprep.subr.bf16.mxu1 %v17231_v12  ;;  %v17301_v16 = vld [vmem:[#allocation10 + $0x878] ss:$24 sps:$4 sm:$0xff]   ;;  %v17306_v2 = vld [vmem:[#allocation10 + $0x4ec] ss:$24 sps:$4 sm:$0xff]  }
 0x727   :  { %v17309_v12 = vld [vmem:[#allocation10 + $0x84c] ss:$24 sps:$4 sm:$0xff]  }
 0x728   :  { %8849 = vmatmul.mubr.bf16.vlgmr.msra.gmra.mxu1 %v19240_v57 }
 0x729   :  { %8888 = vmatpush2.bf16.msra.mxu0 %v17226_v13  ;;  %8903 = vmatpush1.bf16.msra.mxu1 %v17229_v53  ;;  %v17304_v13 = vld [vmem:[#allocation10 + $0x4e8] ss:$24 sps:$4 sm:$0xff]  }
 0x72a   :  { %8934 = vmatprep.mubr.bf16.mxu1 %v19224_v17  ;;  %8889 = vmatprep.subr.bf16.mxu0 %v17234_v19  ;;  %v17307_v53 = vld [vmem:[#allocation10 + $0x848] ss:$24 sps:$4 sm:$0xff]   ;;  %v17312_v19 = vld [vmem:[#allocation10 + $0x4bc] ss:$24 sps:$4 sm:$0xff]  }
 0x72b   :  { %8904 = vmatprep.subr.bf16.mxu1 %v17237_v45  ;;  %v17315_v45 = vld [vmem:[#allocation10 + $0x81c] ss:$24 sps:$4 sm:$0xff]  }
 0x72d   :  { %8890 = vmatpush2.bf16.msra.mxu0 %v17232_v24  ;;  %8905 = vmatpush1.bf16.msra.mxu1 %v17235_v47  ;;  %v17310_v24 = vld [vmem:[#allocation10 + $0x4b8] ss:$24 sps:$4 sm:$0xff]  }
 0x72e   :  { %8906 = vmatprep.subr.bf16.mxu1 %v17240_v49  ;;  %8945 = vmatprep.subr.bf16.mxu0 %v17243_v26  ;;  %v17313_v47 = vld [vmem:[#allocation10 + $0x818] ss:$24 sps:$4 sm:$0xff]   ;;  %v17318_v49 = vld [vmem:[#allocation10 + $0x48c] ss:$24 sps:$4 sm:$0xff]  }
 0x72f   :  { %v17321_v26 = vld [vmem:[#allocation10 + $0x7ec] ss:$24 sps:$4 sm:$0xff]  }
 0x730   :  { %8892 = vmatmul.mubr.bf16.vlgmr.msra.gmra.mxu0 %v19220_v43 }
 0x731   :  { %8907 = vmatpush1.bf16.msra.mxu1 %v17238_v9  ;;  %8946 = vmatpush1.bf16.msra.mxu0 %v17241_v4  ;;  %v17316_v9 = vld [vmem:[#allocation10 + $0x488] ss:$24 sps:$4 sm:$0xff]  }
 0x732   :  { %8977 = vmatprep.mubr.bf16.mxu0 %v19235_v61  ;;  %8908 = vmatprep.subr.bf16.mxu1 %v17246_v28  ;;  %v17319_v4 = vld [vmem:[#allocation10 + $0x7e8] ss:$24 sps:$4 sm:$0xff]   ;;  %v17324_v28 = vld [vmem:[#allocation10 + $0x7bc] ss:$24 sps:$4 sm:$0xff]  }
 0x733   :  { %8947 = vmatprep.subr.bf16.mxu0 %v17249_v51  ;;  %v17327_v51 = vld [vmem:[#allocation10 + $0x164] ss:$24 sps:$4 sm:$0xff]  }
 0x735   :  { %8909 = vmatpush1.bf16.msra.mxu1 %v17244_v50  ;;  %8948 = vmatpush1.bf16.msra.mxu0 %v17247_v39  ;;  %v17322_v50 = vld [vmem:[#allocation10 + $0x7b8] ss:$24 sps:$4 sm:$0xff]  }
 0x736   :  { %8910 = vmatprep.subr.bf16.mxu1 %v17252_v1  ;;  %8949 = vmatprep.subr.bf16.mxu0 %v17255_v54  ;;  %v17325_v39 = vld [vmem:[#allocation10 + $0x160] ss:$24 sps:$4 sm:$0xff]   ;;  %v17330_v1 = vld [vmem:[#allocation10 + $0x78c] ss:$24 sps:$4 sm:$0xff]  }
 0x737   :  { %v17333_v54 = vld [vmem:[#allocation10 + $0x134] ss:$24 sps:$4 sm:$0xff]  }
 0x739   :  { %8911 = vmatpush1.bf16.msra.mxu1 %v17250_v7  ;;  %8950 = vmatpush1.bf16.msra.mxu0 %v17253_v58  ;;  %v17328_v7 = vld [vmem:[#allocation10 + $0x788] ss:$24 sps:$4 sm:$0xff]  }
 0x73a   :  { %8912 = vmatprep.subr.bf16.mxu1 %v17258_v33  ;;  %8951 = vmatprep.subr.bf16.mxu0 %v17261_v5  ;;  %v17331_v58 = vld [vmem:[#allocation10 + $0x130] ss:$24 sps:$4 sm:$0xff]   ;;  %v17336_v33 = vld [vmem:[#allocation10 + $0x104] ss:$24 sps:$4 sm:$0xff]  }
 0x73b   :  { %v17339_v5 = vld [vmem:[#allocation10 + $0x464] ss:$24 sps:$4 sm:$0xff]  }
 0x73d   :  { %8913 = vmatpush1.bf16.msra.mxu1 %v17256_v48  ;;  %8952 = vmatpush1.bf16.msra.mxu0 %v17259_v59  ;;  %v17334_v48 = vld [vmem:[#allocation10 + $0x100] ss:$24 sps:$4 sm:$0xff]  }
 0x73e   :  { %8914 = vmatprep.subr.bf16.mxu1 %v17264_v15  ;;  %8953 = vmatprep.subr.bf16.mxu0 %v17267_v40  ;;  %v17337_v59 = vld [vmem:[#allocation10 + $0x460] ss:$24 sps:$4 sm:$0xff]   ;;  %v17342_v15 = vld [vmem:[#allocation10 + $0xd4] ss:$24 sps:$4 sm:$0xff]  }
 0x73f   :  { %v17345_v40 = vld [vmem:[#allocation10 + $0x434] ss:$24 sps:$4 sm:$0xff]  }
 0x741   :  { %8915 = vmatpush1.bf16.msra.mxu1 %v17262_v10  ;;  %8954 = vmatpush1.bf16.msra.mxu0 %v17265_v14  ;;  %v17340_v10 = vld [vmem:[#allocation10 + $0xd0] ss:$24 sps:$4 sm:$0xff]  }
 0x742   :  { %8916 = vmatprep.subr.bf16.mxu1 %v17270_v20  ;;  %8955 = vmatprep.subr.bf16.mxu0 %v17273_v11  ;;  %v17343_v14 = vld [vmem:[#allocation10 + $0x430] ss:$24 sps:$4 sm:$0xff]   ;;  %v17351_v20 = vld [vmem:[#allocation10 + $0x404] ss:$24 sps:$4 sm:$0xff]   ;;  %v17346_v11 = vld [vmem:[#allocation10 + $0xa0] ss:$24 sps:$4 sm:$0xff]  }
 0x745   :  { %8917 = vmatpush1.bf16.msra.mxu1 %v17268_v18  ;;  %8956 = vmatpush1.bf16.msra.mxu0 %v17271_v46  ;;  %v17349_v18 = vld [vmem:[#allocation10 + $0x400] ss:$24 sps:$4 sm:$0xff]   ;;  %v17354_v46 = vld [vmem:[#allocation10 + $0x74] ss:$24 sps:$4 sm:$0xff]  }
 0x746   :  { %8918 = vmatprep.subr.bf16.mxu1 %v17276_v25  ;;  %8957 = vmatprep.subr.bf16.mxu0 %v17279_v38  ;;  %v17357_v25 = vld [vmem:[#allocation10 + $0x3d4] ss:$24 sps:$4 sm:$0xff]   ;;  %v17352_v38 = vld [vmem:[#allocation10 + $0x70] ss:$24 sps:$4 sm:$0xff]  }
 0x749   :  { %8919 = vmatpush2.bf16.msra.mxu1 %v17274_v44  ;;  %8958 = vmatpush1.bf16.msra.mxu0 %v17277_v63  ;;  %v17355_v44 = vld [vmem:[#allocation10 + $0x3d0] ss:$24 sps:$4 sm:$0xff]   ;;  %v17360_v63 = vld [vmem:[#allocation10 + $0x44] ss:$24 sps:$4 sm:$0xff]  }
 0x74a   :  { %8920 = vmatprep.subr.bf16.mxu1 %v17282_v62  ;;  %8959 = vmatprep.subr.bf16.mxu0 %v17285_v41  ;;  %v17358_v62 = vld [vmem:[#allocation10 + $0x40] ss:$24 sps:$4 sm:$0xff]  }
 0x74b   :  { %v17361_v41 = vld [vmem:[#allocation10 + $0x3a0] ss:$24 sps:$4 sm:$0xff]  }
 0x74d   :  { %8921 = vmatpush2.bf16.msra.mxu1 %v17280_v23  ;;  %8960 = vmatpush1.bf16.msra.mxu0 %v17283_v21  ;;  %v17366_v23 = vld [vmem:[#allocation10 + $0x14] ss:$24 sps:$4 sm:$0xff]  }
 0x74e   :  { %8922 = vmatprep.subr.bf16.mxu1 %v17288_v22  ;;  %8961 = vmatprep.subr.bf16.mxu0 %v17291_v30  ;;  %v17369_v21 = vld [vmem:[#allocation10 + $0x374] ss:$24 sps:$4 sm:$0xff]   ;;  %v17364_v22 = vld [vmem:[#allocation10 + $0x10] ss:$24 sps:$4 sm:$0xff]  }
 0x74f   :  { %v17367_v30 = vld [vmem:[#allocation10 + $0x370] ss:$24 sps:$4 sm:$0xff]  }
 0x751   :  { %8923 = vmatpush2.bf16.msra.mxu1 %v17286_v55  ;;  %8962 = vmatpush2.bf16.msra.mxu0 %v17289_v3  ;;  %v17372_v55 = vld [vmem:[#allocation10 + $0x2e4] ss:$24 sps:$4 sm:$0xff]  }
 0x752   :  { %8924 = vmatprep.subr.bf16.mxu1 %v17294_v8  ;;  %8963 = vmatprep.subr.bf16.mxu0 %v17297_v32  ;;  %v17375_v3 = vld [vmem:[#allocation10 + $0x344] ss:$24 sps:$4 sm:$0xff]   ;;  %v17370_v8 = vld [vmem:[#allocation10 + $0x2e0] ss:$24 sps:$4 sm:$0xff]  }
 0x753   :  { %v17373_v32 = vld [vmem:[#allocation10 + $0x340] ss:$24 sps:$4 sm:$0xff]  }
 0x755   :  { %8925 = vmatpush2.bf16.msra.mxu1 %v17292_v34  ;;  %8964 = vmatpush2.bf16.msra.mxu0 %v17295_v42  ;;  %v17378_v34 = vld [vmem:[#allocation10 + $0x2b4] ss:$24 sps:$4 sm:$0xff]  }
 0x756   :  { %8926 = vmatprep.subr.bf16.mxu1 %v17300_v60  ;;  %8965 = vmatprep.subr.bf16.mxu0 %v17303_v27  ;;  %v17381_v42 = vld [vmem:[#allocation10 + $0x314] ss:$24 sps:$4 sm:$0xff]   ;;  %v17376_v60 = vld [vmem:[#allocation10 + $0x2b0] ss:$24 sps:$4 sm:$0xff]  }
 0x757   :  { %v17379_v27 = vld [vmem:[#allocation10 + $0x310] ss:$24 sps:$4 sm:$0xff]  }
 0x759   :  { %8927 = vmatpush2.bf16.msra.mxu1 %v17298_v31  ;;  %8966 = vmatpush2.bf16.msra.mxu0 %v17301_v16  ;;  %v17384_v31 = vld [vmem:[#allocation10 + $0x284] ss:$24 sps:$4 sm:$0xff]  }
 0x75a   :  { %8928 = vmatprep.subr.bf16.mxu1 %v17306_v2  ;;  %8967 = vmatprep.subr.bf16.mxu0 %v17309_v12  ;;  %v17387_v16 = vld [vmem:[#allocation10 + $0x5e4] ss:$24 sps:$4 sm:$0xff]   ;;  %v17382_v2 = vld [vmem:[#allocation10 + $0x280] ss:$24 sps:$4 sm:$0xff]  }
 0x75b   :  { %v17385_v12 = vld [vmem:[#allocation10 + $0x5e0] ss:$24 sps:$4 sm:$0xff]  }
 0x75d   :  { %8929 = vmatpush2.bf16.msra.mxu1 %v17304_v13  ;;  %8968 = vmatpush2.bf16.msra.mxu0 %v17307_v53  ;;  %v17390_v13 = vld [vmem:[#allocation10 + $0x254] ss:$24 sps:$4 sm:$0xff]  }
 0x75e   :  { %8930 = vmatprep.subr.bf16.mxu1 %v17312_v19  ;;  %8969 = vmatprep.subr.bf16.mxu0 %v17315_v45  ;;  %v17393_v53 = vld [vmem:[#allocation10 + $0x5b4] ss:$24 sps:$4 sm:$0xff]   ;;  %v17388_v19 = vld [vmem:[#allocation10 + $0x250] ss:$24 sps:$4 sm:$0xff]  }
 0x75f   :  { %v17391_v45 = vld [vmem:[#allocation10 + $0x5b0] ss:$24 sps:$4 sm:$0xff]  }
 0x761   :  { %8931 = vmatpush2.bf16.msra.mxu1 %v17310_v24  ;;  %8970 = vmatpush2.bf16.msra.mxu0 %v17313_v47  ;;  %v17396_v24 = vld [vmem:[#allocation10 + $0x224] ss:$24 sps:$4 sm:$0xff]  }
 0x762   :  { %8932 = vmatprep.subr.bf16.mxu1 %v17318_v49  ;;  %8971 = vmatprep.subr.bf16.mxu0 %v17321_v26  ;;  %v17399_v47 = vld [vmem:[#allocation10 + $0x584] ss:$24 sps:$4 sm:$0xff]   ;;  %v17394_v49 = vld [vmem:[#allocation10 + $0x220] ss:$24 sps:$4 sm:$0xff]  }
 0x763   :  { %v17397_v26 = vld [vmem:[#allocation10 + $0x580] ss:$24 sps:$4 sm:$0xff]  }
 0x765   :  { %8933 = vmatpush2.bf16.msra.mxu1 %v17316_v9  ;;  %8972 = vmatpush2.bf16.msra.mxu0 %v17319_v4  ;;  %v17402_v9 = vld [vmem:[#allocation10 + $0x1f4] ss:$24 sps:$4 sm:$0xff]  }
 0x766   :  { %8973 = vmatprep.subr.bf16.mxu0 %v17324_v28  ;;  %8988 = vmatprep.subr.bf16.mxu1 %v17327_v51  ;;  %v17405_v4 = vld [vmem:[#allocation10 + $0x554] ss:$24 sps:$4 sm:$0xff]   ;;  %v17400_v28 = vld [vmem:[#allocation10 + $0x1f0] ss:$24 sps:$4 sm:$0xff]  }
 0x767   :  { %v17403_v51 = vld [vmem:[#allocation10 + $0x550] ss:$24 sps:$4 sm:$0xff]  }
 0x768   :  { %8935 = vmatmul.mubr.bf16.vlgmr.msra.gmra.mxu1 %v19226_v6 }
 0x769   :  { %8974 = vmatpush2.bf16.msra.mxu0 %v17322_v50  ;;  %8989 = vmatpush1.bf16.msra.mxu1 %v17325_v39  ;;  %v17408_v50 = vld [vmem:[#allocation10 + $0x1c4] ss:$24 sps:$4 sm:$0xff]  }
 0x76a   :  { %9020 = vmatprep.mubr.bf16.mxu1 %v19218_v56  ;;  %8975 = vmatprep.subr.bf16.mxu0 %v17330_v1  ;;  %v17348_v56 = vld [vmem:[#allocation10 + $0xa4] ss:$24 sps:$4 sm:$0xff]   ;;  %v17406_v1 = vld [vmem:[#allocation10 + $0x1c0] ss:$24 sps:$4 sm:$0xff]  }
 0x76b   :  { %8990 = vmatprep.subr.bf16.mxu1 %v17333_v54  ;;  %v17411_v39 = vld [vmem:[#allocation10 + $0x524] ss:$24 sps:$4 sm:$0xff]   ;;  %v17409_v54 = vld [vmem:[#allocation10 + $0x520] ss:$24 sps:$4 sm:$0xff]  }
 0x76d   :  { %8976 = vmatpush2.bf16.msra.mxu0 %v17328_v7  ;;  %8991 = vmatpush1.bf16.msra.mxu1 %v17331_v58  ;;  %v17414_v7 = vld [vmem:[#allocation10 + $0x194] ss:$24 sps:$4 sm:$0xff]  }
 0x76e   :  { %8992 = vmatprep.subr.bf16.mxu1 %v17336_v33  ;;  %9031 = vmatprep.subr.bf16.mxu0 %v17339_v5  ;;  %v17417_v58 = vld [vmem:[#allocation10 + $0x4f4] ss:$24 sps:$4 sm:$0xff]   ;;  %v17412_v33 = vld [vmem:[#allocation10 + $0x190] ss:$24 sps:$4 sm:$0xff]  }
 0x76f   :  { %v17415_v5 = vld [vmem:[#allocation10 + $0x4f0] ss:$24 sps:$4 sm:$0xff]  }
 0x770   :  { %8978 = vmatmul.mubr.bf16.vlgmr.msra.gmra.mxu0 %v19240_v57 }
 0x771   :  { %8993 = vmatpush1.bf16.msra.mxu1 %v17334_v48  ;;  %9032 = vmatpush1.bf16.msra.mxu0 %v17337_v59  ;;  %v17420_v48 = vld [vmem:[#allocation10 + $0x4c4] ss:$24 sps:$4 sm:$0xff]  }
 0x772   :  { %9063 = vmatprep.mubr.bf16.mxu0 %v19224_v17  ;;  %8994 = vmatprep.subr.bf16.mxu1 %v17342_v15  ;;  %v17363_v17 = vld [vmem:[#allocation10 + $0x3a4] ss:$24 sps:$4 sm:$0xff]   ;;  %v17418_v15 = vld [vmem:[#allocation10 + $0x4c0] ss:$24 sps:$4 sm:$0xff]  }
 0x773   :  { %9033 = vmatprep.subr.bf16.mxu0 %v17345_v40  ;;  %v17423_v59 = vld [vmem:[#allocation10 + $0x764] ss:$24 sps:$4 sm:$0xff]   ;;  %v17421_v40 = vld [vmem:[#allocation10 + $0x760] ss:$24 sps:$4 sm:$0xff]  }
 0x775   :  { %8995 = vmatpush1.bf16.msra.mxu1 %v17340_v10  ;;  %9034 = vmatpush1.bf16.msra.mxu0 %v17343_v14  ;;  %v17426_v10 = vld [vmem:[#allocation10 + $0x494] ss:$24 sps:$4 sm:$0xff]  }
 0x776   :  { %8996 = vmatprep.subr.bf16.mxu1 %v17348_v56  ;;  %9035 = vmatprep.subr.bf16.mxu0 %v17351_v20  ;;  %v17429_v14 = vld [vmem:[#allocation10 + $0x734] ss:$24 sps:$4 sm:$0xff]   ;;  %v17424_v56 = vld [vmem:[#allocation10 + $0x490] ss:$24 sps:$4 sm:$0xff]  }
 0x777   :  { %v17427_v20 = vld [vmem:[#allocation10 + $0x730] ss:$24 sps:$4 sm:$0xff]  }
 0x779   :  { %8997 = vmatpush1.bf16.msra.mxu1 %v17346_v11  ;;  %9036 = vmatpush1.bf16.msra.mxu0 %v17349_v18  ;;  %v17432_v11 = vld [vmem:[#allocation10 + $0x704] ss:$24 sps:$4 sm:$0xff]   ;;  %v17430_v18 = vld [vmem:[#allocation10 + $0x700] ss:$24 sps:$4 sm:$0xff]  }
 0x77a   :  { %8998 = vmatprep.subr.bf16.mxu1 %v17354_v46  ;;  %9037 = vmatprep.subr.bf16.mxu0 %v17357_v25  ;;  %v17435_v46 = vld [vmem:[#allocation10 + $0x6d4] ss:$24 sps:$4 sm:$0xff]   ;;  %v17433_v25 = vld [vmem:[#allocation10 + $0x6d0] ss:$24 sps:$4 sm:$0xff]  }
 0x77d   :  { %8999 = vmatpush1.bf16.msra.mxu1 %v17352_v38  ;;  %9038 = vmatpush1.bf16.msra.mxu0 %v17355_v44  ;;  %v17436_v38 = vld [vmem:[#allocation10 + $0x6a0] ss:$24 sps:$4 sm:$0xff]   ;;  %v17441_v44 = vld [vmem:[#allocation10 + $0x674] ss:$24 sps:$4 sm:$0xff]  }
 0x77e   :  { %9000 = vmatprep.subr.bf16.mxu1 %v17360_v63  ;;  %9039 = vmatprep.subr.bf16.mxu0 %v17363_v17  ;;  %v17444_v63 = vld [vmem:[#allocation10 + $0x644] ss:$24 sps:$4 sm:$0xff]   ;;  %v17442_v17 = vld [vmem:[#allocation10 + $0x640] ss:$24 sps:$4 sm:$0xff]  }
 0x781   :  { %9001 = vmatpush1.bf16.msra.mxu1 %v17358_v62  ;;  %9040 = vmatpush1.bf16.msra.mxu0 %v17361_v41  ;;  %v17447_v62 = vld [vmem:[#allocation10 + $0x614] ss:$24 sps:$4 sm:$0xff]   ;;  %v17445_v41 = vld [vmem:[#allocation10 + $0x610] ss:$24 sps:$4 sm:$0xff]  }
 0x782   :  { %9002 = vmatprep.subr.bf16.mxu1 %v17366_v23  ;;  %9041 = vmatprep.subr.bf16.mxu0 %v17369_v21  ;;  %v17448_v23 = vld [vmem:[#allocation10 + $0x8e0] ss:$24 sps:$4 sm:$0xff]   ;;  %v17453_v21 = vld [vmem:[#allocation10 + $0x8b4] ss:$24 sps:$4 sm:$0xff]  }
 0x785   :  { %9003 = vmatpush1.bf16.msra.mxu1 %v17364_v22  ;;  %9042 = vmatpush1.bf16.msra.mxu0 %v17367_v30  ;;  %v17451_v22 = vld [vmem:[#allocation10 + $0x8b0] ss:$24 sps:$4 sm:$0xff]   ;;  %v17456_v30 = vld [vmem:[#allocation10 + $0x884] ss:$24 sps:$4 sm:$0xff]  }
 0x786   :  { %9004 = vmatprep.subr.bf16.mxu1 %v17372_v55  ;;  %9043 = vmatprep.subr.bf16.mxu0 %v17375_v3  ;;  %v17454_v55 = vld [vmem:[#allocation10 + $0x880] ss:$24 sps:$4 sm:$0xff]   ;;  %v17459_v3 = vld [vmem:[#allocation10 + $0x854] ss:$24 sps:$4 sm:$0xff]  }
 0x789   :  { %9005 = vmatpush2.bf16.msra.mxu1 %v17370_v8  ;;  %9044 = vmatpush1.bf16.msra.mxu0 %v17373_v32  ;;  %v17457_v8 = vld [vmem:[#allocation10 + $0x850] ss:$24 sps:$4 sm:$0xff]   ;;  %v17462_v32 = vld [vmem:[#allocation10 + $0x824] ss:$24 sps:$4 sm:$0xff]  }
 0x78a   :  { %9006 = vmatprep.subr.bf16.mxu1 %v17378_v34  ;;  %9045 = vmatprep.subr.bf16.mxu0 %v17381_v42  ;;  %v17460_v34 = vld [vmem:[#allocation10 + $0x820] ss:$24 sps:$4 sm:$0xff]   ;;  %v17465_v42 = vld [vmem:[#allocation10 + $0x7f4] ss:$24 sps:$4 sm:$0xff]  }
 0x78d   :  { %9007 = vmatpush2.bf16.msra.mxu1 %v17376_v60  ;;  %9046 = vmatpush1.bf16.msra.mxu0 %v17379_v27  ;;  %v17463_v60 = vld [vmem:[#allocation10 + $0x7f0] ss:$24 sps:$4 sm:$0xff]   ;;  %v17468_v27 = vld [vmem:[#allocation10 + $0x7c4] ss:$24 sps:$4 sm:$0xff]  }
 0x78e   :  { %9008 = vmatprep.subr.bf16.mxu1 %v17384_v31  ;;  %9047 = vmatprep.subr.bf16.mxu0 %v17387_v16  ;;  %v17466_v31 = vld [vmem:[#allocation10 + $0x7c0] ss:$24 sps:$4 sm:$0xff]   ;;  %v17471_v16 = vld [vmem:[#allocation10 + $0x794] ss:$24 sps:$4 sm:$0xff]  }
 0x791   :  { %9009 = vmatpush2.bf16.msra.mxu1 %v17382_v2  ;;  %9048 = vmatpush2.bf16.msra.mxu0 %v17385_v12  ;;  %v17469_v2 = vld [vmem:[#allocation10 + $0x790] ss:$24 sps:$4 sm:$0xff]  }
 0x792   :  { %9010 = vmatprep.subr.bf16.mxu1 %v17390_v13  ;;  %9049 = vmatprep.subr.bf16.mxu0 %v17393_v53 }
 0x795   :  { %9011 = vmatpush2.bf16.msra.mxu1 %v17388_v19  ;;  %9050 = vmatpush2.bf16.msra.mxu0 %v17391_v45 }
 0x796   :  { %9012 = vmatprep.subr.bf16.mxu1 %v17396_v24  ;;  %9051 = vmatprep.subr.bf16.mxu0 %v17399_v47 }
 0x799   :  { %9013 = vmatpush2.bf16.msra.mxu1 %v17394_v49  ;;  %9052 = vmatpush2.bf16.msra.mxu0 %v17397_v26 }
 0x79a   :  { %9014 = vmatprep.subr.bf16.mxu1 %v17402_v9  ;;  %9053 = vmatprep.subr.bf16.mxu0 %v17405_v4 }
 0x79d   :  { %9015 = vmatpush2.bf16.msra.mxu1 %v17400_v28  ;;  %9054 = vmatpush2.bf16.msra.mxu0 %v17403_v51 }
 0x79e   :  { %9016 = vmatprep.subr.bf16.mxu1 %v17408_v50  ;;  %9055 = vmatprep.subr.bf16.mxu0 %v17411_v39 }
 0x7a1   :  { %9017 = vmatpush2.bf16.msra.mxu1 %v17406_v1  ;;  %9056 = vmatpush2.bf16.msra.mxu0 %v17409_v54 }
 0x7a2   :  { %9018 = vmatprep.subr.bf16.mxu1 %v17414_v7  ;;  %9057 = vmatprep.subr.bf16.mxu0 %v17417_v58 }
 0x7a5   :  { %9019 = vmatpush2.bf16.msra.mxu1 %v17412_v33  ;;  %9058 = vmatpush2.bf16.msra.mxu0 %v17415_v5 }
 0x7a6   :  { %9059 = vmatprep.subr.bf16.mxu0 %v17420_v48  ;;  %9074 = vmatprep.subr.bf16.mxu1 %v17423_v59 }
 0x7a8   :  { %9021 = vmatmul.mubr.bf16.vlgmr.msra.gmra.mxu1 %v19220_v43  ;;  %v17438_v43 = vld [vmem:[#allocation10 + $0x6a4] ss:$24 sps:$4 sm:$0xff]   ;;  %v8764_v12 = vpop.f32.mrf.mxu1 }
 0x7a9   :  { %9060 = vmatpush2.bf16.msra.mxu0 %v17418_v15  ;;  %9075 = vmatpush1.bf16.msra.mxu1 %v17421_v40 }
 0x7aa   :  { %9106 = vmatprep.mubr.bf16.mxu1 %v19235_v61  ;;  %9061 = vmatprep.subr.bf16.mxu0 %v17426_v10  ;;  %v17439_v61 = vld [vmem:[#allocation10 + $0x670] ss:$24 sps:$4 sm:$0xff]   ;;  %v8766_v13 = vpop.f32.mrf.mxu1 }
 0x7ab   :  { %9076 = vmatprep.subr.bf16.mxu1 %v17429_v14 }
 0x7ac   :  { %v8768_v19 = vpop.f32.mrf.mxu1 }
 0x7ad   :  { %9062 = vmatpush2.bf16.msra.mxu0 %v17424_v56  ;;  %9077 = vmatpush1.bf16.msra.mxu1 %v17427_v20 }
 0x7ae   :  { %9078 = vmatprep.subr.bf16.mxu1 %v17432_v11  ;;  %v8770_v24 = vpop.f32.mrf.mxu1 }
 0x7b0   :  { %9064 = vmatmul.mubr.bf16.vlgmr.msra.gmra.mxu0 %v19226_v6  ;;  %v17450_v6 = vld [vmem:[#allocation10 + $0x8e4] ss:$24 sps:$4 sm:$0xff]   ;;  %v8807_v53 = vpop.f32.mrf.mxu0 }
 0x7b1   :  { %9079 = vmatpush1.bf16.msra.mxu1 %v17430_v18 }
 0x7b2   :  { %9080 = vmatprep.subr.bf16.mxu1 %v17435_v46  ;;  %v8809_v45 = vpop.f32.mrf.mxu0 }
 0x7b4   :  { %v8811_v47 = vpop.f32.mrf.mxu0 }
 0x7b5   :  { %9081 = vmatpush1.bf16.msra.mxu1 %v17433_v25 }
 0x7b6   :  { %9082 = vmatprep.subr.bf16.mxu1 %v17438_v43  ;;  %v8813_v26 = vpop.f32.mrf.mxu0 }
 0x7b9   :  { %9083 = vmatpush1.bf16.msra.mxu1 %v17436_v38 }
 0x7ba   :  { %9084 = vmatprep.subr.bf16.mxu1 %v17441_v44 }
 0x7bd   :  { %9085 = vmatpush1.bf16.msra.mxu1 %v17439_v61 }
 0x7be   :  { %9086 = vmatprep.subr.bf16.mxu1 %v17444_v63 }
 0x7c1   :  { %9087 = vmatpush1.bf16.msra.mxu1 %v17442_v17 }
 0x7c2   :  { %9088 = vmatprep.subr.bf16.mxu1 %v17447_v62 }
 0x7c5   :  { %9089 = vmatpush1.bf16.msra.mxu1 %v17445_v41 }
 0x7c6   :  { %9090 = vmatprep.subr.bf16.mxu1 %v17450_v6 }
 0x7c9   :  { %9091 = vmatpush2.bf16.msra.mxu1 %v17448_v23 }
 0x7ca   :  { %9092 = vmatprep.subr.bf16.mxu1 %v17453_v21 }
 0x7cd   :  { %9093 = vmatpush2.bf16.msra.mxu1 %v17451_v22 }
 0x7ce   :  { %9094 = vmatprep.subr.bf16.mxu1 %v17456_v30 }
 0x7d1   :  { %9095 = vmatpush2.bf16.msra.mxu1 %v17454_v55  ;;  %v17486_v55 = vld [vmem:[%s19642_s21 + $0x8] sm:$0xff] }
 0x7d2   :  { %9096 = vmatprep.subr.bf16.mxu1 %v17459_v3 }
 0x7d5   :  { %9097 = vmatpush2.bf16.msra.mxu1 %v17457_v8 }
 0x7d6   :  { %9098 = vmatprep.subr.bf16.mxu1 %v17462_v32 }
 0x7d9   :  { %9099 = vmatpush2.bf16.msra.mxu1 %v17460_v34 }
 0x7da   :  { %9100 = vmatprep.subr.bf16.mxu1 %v17465_v42  ;;  %v17487_v42 = vld [vmem:[%s19642_s21] sm:$0xff] }
 0x7dd   :  { %9101 = vmatpush2.bf16.msra.mxu1 %v17463_v60 }
 0x7de   :  { %9102 = vmatprep.subr.bf16.mxu1 %v17468_v27 }
 0x7e1   :  { %9103 = vmatpush2.bf16.msra.mxu1 %v17466_v31 }
 0x7e2   :  { %9104 = vmatprep.subr.bf16.mxu1 %v17471_v16 }
 0x7e5   :  { %9105 = vmatpush2.bf16.msra.mxu1 %v17469_v2  ;;  %v17488_v2 = vld [vmem:[%s19642_s21 + $0x10] sm:$0xff] }
 0x7e8   :  { %9107 = vmatmul.mubr.bf16.vlgmr.msra.gmra.mxu1 %v19240_v57  ;;  %v8850_v49 = vpop.f32.mrf.mxu1  ;;  %v7258_v57 = vld [vmem:[#allocation11] sm:$0x3f] }
 0x7e9   :  { %v7267_v33 = vrot.slane %v7258_v57, %v19681_v0  ;;  %v7263_v59 = vrot.slane %v7258_v57, %v18870_v37  ;;  %v7271_v15 = vrot.slane %v7258_v57, %v18911_v29  ;;  %v7275_v18 = vrot.slane %v7258_v57, %v18914_v35 }
 0x7ea   :  { %v8852_v9 = vpop.f32.mrf.mxu1  ;;  %v7279_v31 = vrot.slane %v7258_v57, %v18942_v36 }
 0x7eb   :  { %v8767_v40 = vadd.f32 %v8766_v13, %v7267_v33  ;;  %v8765_v56 = vadd.f32 %v8764_v12, %v7263_v59  ;;  %v8771_v43 = vadd.f32 %v8770_v24, %v7267_v33  ;;  %v8769_v63 = vadd.f32 %v8768_v19, %v7263_v59 }
 0x7ec   :  { %v8854_v28 = vpop.f32.mrf.mxu1  ;;  %v7283_v24 = vrot.slane %v7258_v57, %v19109_v52 }
 0x7ed   :  { %v8810_v20 = vadd.f32 %v8809_v45, %v8767_v40  ;;  %v8808_v25 = vadd.f32 %v8807_v53, %v8765_v56  ;;  %v8814_v62 = vadd.f32 %v8813_v26, %v8771_v43  ;;  %v8812_v30 = vadd.f32 %v8811_v47, %v8769_v63 }
 0x7ee   :  { %v8856_v50 = vpop.f32.mrf.mxu1 }
 0x7ef   :  { %v8853_v38 = vadd.f32 %v8852_v9, %v8810_v20  ;;  %v8851_v17 = vadd.f32 %v8850_v49, %v8808_v25  ;;  %v8857_v8 = vadd.f32 %v8856_v50, %v8814_v62  ;;  %v8855_v27 = vadd.f32 %v8854_v28, %v8812_v30  ;;  %v17489_v49 = vld [vmem:[%s19642_s21 + $0x38] sm:$0xff] }
 0x7f0   :  { %v8893_v4 = vpop.f32.mrf.mxu0 }
 0x7f1   :  { %v8894_v11 = vadd.f32 %v8893_v4, %v7271_v15  ;;  %v19261_v3 = vadd.f32 %v17486_v55, %v8853_v38  ;;  %v19266_v60 = vadd.f32 %v17487_v42, %v8851_v17  ;;  %v19278_v26 = vadd.f32 %v17489_v49, %v8857_v8  ;;  %v17490_v4 = vld [vmem:[%s19642_s21 + $0x30] sm:$0xff]  ;;  %v17497_v42 = vld [vmem:[%s19642_s21 + $0x58] sm:$0xff] }
 0x7f2   :  { %v8895_v51 = vpop.f32.mrf.mxu0  ;;  %v9123_v28 = vadd.f32 %v17490_v4, %v8855_v27  ;;  %v17496_v55 = vld [vmem:[%s19642_s21 + $0x50] sm:$0xff] }
 0x7f3   :  { %v8896_v41 = vadd.f32 %v8895_v51, %v7275_v18  ;;  %v9129_v47 = vadd.f32 %v19261_v3, %v19266_v60 }
 0x7f4   :  { %v8897_v39 = vpop.f32.mrf.mxu0  ;;  %v9136_v59 = vadd.f32 %v19278_v26, %v9123_v28 }
 0x7f5   :  { %v8898_v6 = vadd.f32 %v8897_v39, %v7271_v15  ;;  %v17491_v39 = vld [vmem:[%s19642_s21 + $0x18] sm:$0xff] }
 0x7f6   :  { %v8899_v54 = vpop.f32.mrf.mxu0 }
 0x7f7   :  { %v8900_v16 = vadd.f32 %v8899_v54, %v7275_v18  ;;  %v17492_v54 = vld [vmem:[%s19642_s21 + $0x40] sm:$0xff] }
 0x828   :  { %v8936_v1 = vpop.f32.mrf.mxu1 }
 0x829   :  { %v8937_v44 = vadd.f32 %v8936_v1, %v8894_v11  ;;  %v17493_v11 = vld [vmem:[%s19642_s21 + $0x48] sm:$0xff] }
 0x82a   :  { %v8938_v7 = vpop.f32.mrf.mxu1 }
 0x82b   :  { %v8939_v32 = vadd.f32 %v8938_v7, %v8896_v41  ;;  %v17495_v41 = vld [vmem:[%s19642_s21 + $0x28] sm:$0xff] }
 0x82c   :  { %v8940_v5 = vpop.f32.mrf.mxu1 }
 0x82d   :  { %v8941_v34 = vadd.f32 %v8940_v5, %v8898_v6 }
 0x82e   :  { %v8942_v10 = vpop.f32.mrf.mxu1 }
 0x82f   :  { %v8943_v9 = vadd.f32 %v8942_v10, %v8900_v16 }
 0x830   :  { %v8979_v58 = vpop.f32.mrf.mxu0 }
 0x831   :  { %v8980_v23 = vadd.f32 %v8979_v58, %v8937_v44  ;;  %v17494_v44 = vld [vmem:[%s19642_s21 + $0x20] sm:$0xff]  ;;  %s18682_s21 = smov [#allocation2]  }
 0x832   :  { %v8981_v48 = vpop.f32.mrf.mxu0  ;;  %s190_s20 = sshll.u32 %s18682_s21, 4  ;;  %s191_s20 = int_to_ptr.vmem [resolvable:$true] %s190_s20 }
 0x833   :  { %v9119_v12 = vadd.f32 %v17488_v2, %v8980_v23  ;;  %v8982_v13 = vadd.f32 %v8981_v48, %v8939_v32  ;;  %s18618_s1 = scalar_lea.vmem %s191_s20, 36864  ;;  %p18623_p0 = scmp.lt.s32.totalorder %s191_s20, %s191_s20 }
 0x834   :  { %v8983_v14 = vpop.f32.mrf.mxu0  ;;  %p18619_p13 = scmp.ne.s32.totalorder %s191_s20, %s18618_s1  ;;  %p18624_p1 = scmp.lt.s32.totalorder %s18618_s1, %s18618_s1 }
 0x835   :  { %v8984_v53 = vadd.f32 %v8983_v14, %v8941_v34  ;;  %v9130_v50 = vadd.f32 %v9129_v47, %v9119_v12  ;;  %v9120_v1 = vadd.f32 %v17491_v39, %v8982_v13 }
 0x836   :  { %v8985_v61 = vpop.f32.mrf.mxu0  ;;  %p18625_p2 = por %p18624_p1, %p18623_p0 }
 0x837   :  { %v9125_v7 = vadd.f32 %v17492_v54, %v8984_v53  ;;  %v8986_v58 = vadd.f32 %v8985_v61, %v8943_v9  ;;  %v9131_v56 = vadd.f32 %v9130_v50, %v9120_v1 }
 0x838   :  { %p18626_p3 = pnand %p18625_p2, %p18619_p13 }
 0x839   :  { %v9137_v20 = vadd.f32 %v9136_v59, %v9125_v7  ;;  %v9126_v18 = vadd.f32 %v17493_v11, %v8986_v58 }
 0x83b   :  { %v9138_v30 = vadd.f32 %v9137_v20, %v9126_v18 }
 0x868   :  { %v9022_v46 = vpop.f32.mrf.mxu1 }
 0x869   :  { %v9023_v51 = vadd.f32 %v9022_v46, %v7279_v31 }
 0x86a   :  { %v9024_v21 = vpop.f32.mrf.mxu1 }
 0x86b   :  { %v9025_v5 = vadd.f32 %v9024_v21, %v7283_v24 }
 0x86c   :  { %v9026_v19 = vpop.f32.mrf.mxu1 }
 0x86d   :  { %v9027_v40 = vadd.f32 %v9026_v19, %v7279_v31 }
 0x86e   :  { %v9028_v57 = vpop.f32.mrf.mxu1 }
 0x86f   :  { %v9029_v43 = vadd.f32 %v9028_v57, %v7283_v24 }
 0x870   :  { %v9065_v22 = vpop.f32.mrf.mxu0 }
 0x871   :  { %v9066_v48 = vadd.f32 %v9065_v22, %v9023_v51 }
 0x872   :  { %v9067_v45 = vpop.f32.mrf.mxu0 }
 0x873   :  { %v9068_v10 = vadd.f32 %v9067_v45, %v9025_v5 }
 0x874   :  { %v9069_v33 = vpop.f32.mrf.mxu0 }
 0x875   :  { %v9070_v38 = vadd.f32 %v9069_v33, %v9027_v40 }
 0x876   :  { %v9071_v46 = vpop.f32.mrf.mxu0 }
 0x877   :  { %v9072_v62 = vadd.f32 %v9071_v46, %v9029_v43 }
 0x8a8   :  { %v9108_v15 = vpop.f32.mrf.mxu1 }
 0x8a9   :  { %v9109_v14 = vadd.f32 %v9108_v15, %v9066_v48 }
 0x8aa   :  { %v9110_v25 = vpop.f32.mrf.mxu1 }
 0x8ab   :  { %v9121_v61 = vadd.f32 %v17494_v44, %v9109_v14  ;;  %v9111_v63 = vadd.f32 %v9110_v25, %v9068_v10 }
 0x8ac   :  { %v9112_v17 = vpop.f32.mrf.mxu1 }
 0x8ad   :  { %v9122_v6 = vadd.f32 %v17495_v41, %v9111_v63  ;;  %v9113_v23 = vadd.f32 %v9112_v17, %v9070_v38  ;;  %v9132_v21 = vadd.f32 %v9131_v56, %v9121_v61 }
 0x8ae   :  { %v9114_v22 = vpop.f32.mrf.mxu1 }
 0x8af   :  { %v9127_v8 = vadd.f32 %v17496_v55, %v9113_v23  ;;  %v9115_v32 = vadd.f32 %v9114_v22, %v9072_v62  ;;  %v9133_v34 = vadd.f32 %v9132_v21, %v9122_v6 }
 0x8b1   :  { %v9128_v27 = vadd.f32 %v17497_v42, %v9115_v32  ;;  %9134 = vadd.xlane.f32.xlu0 %v9133_v34  ;;  %v9139_v31 = vadd.f32 %v9138_v30, %v9127_v8 }
 0x8b3   :  { %v9140_v16 = vadd.f32 %v9139_v31, %v9128_v27 }
 0x8b5   :  { %9141 = vadd.xlane.f32.xlu1 %v9140_v16 }
 0x93a   :  { %v9135_v2 = vpop.xlane.xlu0 %9134 }
 0x93b   :  { %v9144_v13 = vmul.f32 0.0013020834, %v9135_v2 }
 0x93d   :  { %v19306_v53 = vsub.f32 %v19266_v60, %v9144_v13  ;;  %v19309_v19 = vsub.f32 %v19261_v3, %v9144_v13  ;;  %v19311_v45 = vsub.f32 %v9119_v12, %v9144_v13  ;;  %v19313_v47 = vsub.f32 %v9120_v1, %v9144_v13 }
 0x93e   :  { %v9142_v24 = vpop.xlane.xlu1 %9141  ;;  %v19319_v51 = vsub.f32 %v9121_v61, %v9144_v13  ;;  %v19330_v1 = vsub.f32 %v9122_v6, %v9144_v13 }
 0x93f   :  { %v9145_v49 = vmul.f32 0.0013020834, %v9142_v24  ;;  %v9158_v9 = vmul.f32 %v19306_v53, %v19306_v53  ;;  %v9159_v4 = vmul.f32 %v19309_v19, %v19309_v19  ;;  %v9160_v60 = vmul.f32 %v19311_v45, %v19311_v45 }
 0x940   :  { %v9161_v54 = vmul.f32 %v19313_v47, %v19313_v47  ;;  %v9163_v15 = vmul.f32 %v19330_v1, %v19330_v1 }
 0x941   :  { %v9170_v50 = vadd.f32 %v9159_v4, %v9158_v9  ;;  %v19323_v3 = vsub.f32 %v9123_v28, %v9145_v49  ;;  %v19326_v12 = vsub.f32 %v19278_v26, %v9145_v49  ;;  %v19328_v39 = vsub.f32 %v9125_v7, %v9145_v49 }
 0x942   :  { %v19334_v57 = vsub.f32 %v9126_v18, %v9145_v49  ;;  %v9162_v26 = vmul.f32 %v19319_v51, %v19319_v51  ;;  %v19342_v7 = vsub.f32 %v9127_v8, %v9145_v49  ;;  %v19348_v10 = vsub.f32 %v9128_v27, %v9145_v49 }
 0x943   :  { %v9171_v58 = vadd.f32 %v9170_v50, %v9160_v60  ;;  %v9164_v33 = vmul.f32 %v19323_v3, %v19323_v3  ;;  %v9165_v28 = vmul.f32 %v19326_v12, %v19326_v12  ;;  %v9166_v48 = vmul.f32 %v19328_v39, %v19328_v39 }
 0x944   :  { %v9167_v14 = vmul.f32 %v19334_v57, %v19334_v57  ;;  %v9168_v11 = vmul.f32 %v19342_v7, %v19342_v7  ;;  %v9169_v46 = vmul.f32 %v19348_v10, %v19348_v10 }
 0x945   :  { %v9172_v5 = vadd.f32 %v9171_v58, %v9161_v54  ;;  %v9177_v59 = vadd.f32 %v9165_v28, %v9164_v33 }
 0x947   :  { %v9173_v40 = vadd.f32 %v9172_v5, %v9162_v26  ;;  %v9178_v56 = vadd.f32 %v9177_v59, %v9166_v48 }
 0x949   :  { %v9174_v20 = vadd.f32 %v9173_v40, %v9163_v15  ;;  %v9179_v18 = vadd.f32 %v9178_v56, %v9167_v14 }
 0x94b   :  { %9175 = vadd.xlane.f32.xlu0 %v9174_v20  ;;  %v9180_v25 = vadd.f32 %v9179_v18, %v9168_v11 }
 0x94d   :  { %v9181_v43 = vadd.f32 %v9180_v25, %v9169_v46 }
 0x94f   :  { %9182 = vadd.xlane.f32.xlu1 %v9181_v43 }
 0x950   :  { %18629 = shalt.err (!%p18626_p3)  }
 0x951   :  { %193 = dma.hbm_to_vmem [thread:$0]  %s19619_s8, 36864, %s191_s20, [#allocation4] }
 0x952   :  { %s18638_s22 = scalar_lea.vmem %s203_s14, 36864  ;;  %p18643_p5 = scmp.lt.s32.totalorder %s203_s14, %s203_s14 }
 0x953   :  { %p18639_p4 = scmp.ne.s32.totalorder %s203_s14, %s18638_s22  ;;  %p18644_p6 = scmp.lt.s32.totalorder %s18638_s22, %s18638_s22 }
 0x955   :  { %p18645_p7 = por %p18644_p6, %p18643_p5 }
 0x957   :  { %p18646_p8 = pnand %p18645_p7, %p18639_p4 }
 0x959   :  { %18649 = shalt.err (!%p18646_p8)  }
 0x95a   :  { %205 = dma.hbm_to_vmem [thread:$0]  %s19621_s10, 36864, %s203_s14, [#allocation4 + $0x1]  ;;  %v9202_v41 = vld [vmem:[#allocation13] sm:$0x3f]  ;;  %v9246_v6 = vld [vmem:[#allocation14] sm:$0x3f] }
 0x95b   :  { %v9207_v23 = vrot.slane %v9202_v41, %v18870_v37  ;;  %v9211_v21 = vrot.slane %v9202_v41, %v19681_v0  ;;  %v9215_v22 = vrot.slane %v9202_v41, %v18911_v29  ;;  %v9251_v30 = vrot.slane %v9246_v6, %v18870_v37 }
 0x95c   :  { %v9255_v55 = vrot.slane %v9246_v6, %v19681_v0  ;;  %v9219_v8 = vrot.slane %v9202_v41, %v18914_v35  ;;  %v9259_v34 = vrot.slane %v9246_v6, %v18911_v29  ;;  %v9263_v42 = vrot.slane %v9246_v6, %v18914_v35 }
 0x95d   :  { %v9223_v27 = vrot.slane %v9202_v41, %v18942_v36  ;;  %v9227_v31 = vrot.slane %v9202_v41, %v19109_v52  ;;  %v9267_v49 = vrot.slane %v9246_v6, %v18942_v36  ;;  %v9271_v9 = vrot.slane %v9246_v6, %v19109_v52 }
 0x9d4   :  { %v9176_v38 = vpop.xlane.xlu0 %9175 }
 0x9d5   :  { %v9184_v44 = vmul.f32 0.0013020834, %v9176_v38 }
 0x9d7   :  { %v9186_v61 = vadd.f32 1e-12, %v9184_v44 }
 0x9d8   :  { %v9183_v63 = vpop.xlane.xlu1 %9182 }
 0x9d9   :  { %17480 = vrsqrt.f32 %v9186_v61  ;;  %v9185_v17 = vmul.f32 0.0013020834, %v9183_v63 }
 0x9db   :  { %v9187_v62 = vadd.f32 1e-12, %v9185_v17 }
 0x9dd   :  { %17482 = vrsqrt.f32 %v9187_v62 }
 0x9e6   :  { %v17481_v32 = vpop.eup %17480 }
 0x9e7   :  { %v9190_v16 = vmul.f32 %v17481_v32, %v19306_v53  ;;  %v9191_v2 = vmul.f32 %v17481_v32, %v19309_v19  ;;  %v9192_v13 = vmul.f32 %v17481_v32, %v19311_v45  ;;  %v9193_v24 = vmul.f32 %v17481_v32, %v19313_v47 }
 0x9e8   :  { %v9194_v4 = vmul.f32 %v17481_v32, %v19319_v51  ;;  %v9195_v60 = vmul.f32 %v17481_v32, %v19330_v1 }
 0x9e9   :  { %v9234_v50 = vmul.f32 %v9207_v23, %v9190_v16  ;;  %v9235_v54 = vmul.f32 %v9211_v21, %v9191_v2  ;;  %v9236_v58 = vmul.f32 %v9215_v22, %v9192_v13  ;;  %v9237_v33 = vmul.f32 %v9219_v8, %v9193_v24 }
 0x9ea   :  { %v17483_v28 = vpop.eup %17482  ;;  %v9238_v53 = vmul.f32 %v9223_v27, %v9194_v4  ;;  %v9239_v26 = vmul.f32 %v9227_v31, %v9195_v60 }
 0x9eb   :  { %v19380_v19 = vadd.f32 %v9251_v30, %v9234_v50  ;;  %v19382_v45 = vadd.f32 %v9255_v55, %v9235_v54  ;;  %v19384_v47 = vadd.f32 %v9259_v34, %v9236_v58  ;;  %v19386_v5 = vadd.f32 %v9263_v42, %v9237_v33 }
 0x9ec   :  { %v19388_v48 = vadd.f32 %v9267_v49, %v9238_v53  ;;  %v19390_v51 = vadd.f32 %v9271_v9, %v9239_v26  ;;  %v9196_v1 = vmul.f32 %v17483_v28, %v19323_v3  ;;  %v9197_v59 = vmul.f32 %v17483_v28, %v19326_v12 }
 0x9ed   :  { %v9198_v15 = vmul.f32 %v17483_v28, %v19328_v39  ;;  %v9199_v40 = vmul.f32 %v17483_v28, %v19334_v57  ;;  %v9200_v14 = vmul.f32 %v17483_v28, %v19342_v7  ;;  %v9201_v56 = vmul.f32 %v17483_v28, %v19348_v10 }
 0x9ee   :  { %v9240_v20 = vmul.f32 %v9207_v23, %v9196_v1  ;;  %v9241_v11 = vmul.f32 %v9211_v21, %v9197_v59 }
 0x9ef   :  { %v9242_v18 = vmul.f32 %v9215_v22, %v9198_v15  ;;  %v9243_v46 = vmul.f32 %v9219_v8, %v9199_v40  ;;  %v9244_v25 = vmul.f32 %v9223_v27, %v9200_v14  ;;  %v9245_v43 = vmul.f32 %v9227_v31, %v9201_v56 }
 0x9f0   :  { %v19398_v38 = vadd.f32 %v9251_v30, %v9240_v20  ;;  %v19400_v44 = vadd.f32 %v9255_v55, %v9241_v11 }
 0x9f1   :  { %v19402_v3 = vadd.f32 %v9259_v34, %v9242_v18  ;;  %v19404_v12 = vadd.f32 %v9263_v42, %v9243_v46  ;;  %v19406_v39 = vadd.f32 %v9267_v49, %v9244_v25  ;;  %v19408_v57 = vadd.f32 %v9271_v9, %v9245_v43 }
 0x9f2   :  { %18662 = dma.done.wait [#allocation4], 36864 }
 0x9f3   :  { %18663 = vsyncadd [#allocation4], 4294930432  ;;  %v19412_v7 = vpack.c.bf16 %v19400_v44, %v19382_v45  ;;  %v19416_v10 = vpack.c.bf16 %v19404_v12, %v19386_v5  ;;  %v17498_v61 = vld [vmem:[#allocation2 + $0x154] ss:$24 sps:$4 sm:$0xff]   ;;  %v17500_v63 = vld [vmem:[#allocation2 + $0x150] ss:$24 sps:$4 sm:$0xff]  }
 0x9f4   :  { %11060 = vmatprep.subr.bf16.mxu0 %v17498_v61  ;;  %v17501_v17 = vld [vmem:[#allocation2 + $0x454] ss:$24 sps:$4 sm:$0xff]   ;;  %v17503_v62 = vld [vmem:[#allocation2 + $0x450] ss:$24 sps:$4 sm:$0xff]   ;;  %v17504_v41 = vld [vmem:[#allocation2 + $0x124] ss:$24 sps:$4 sm:$0xff]  }
 0x9f5   :  { %11092 = vmatprep.mubr.bf16.mxu0 %v19412_v7  ;;  %11135 = vmatprep.mubr.bf16.mxu1 %v19416_v10  ;;  %v17506_v6 = vld [vmem:[#allocation2 + $0x120] ss:$24 sps:$4 sm:$0xff]   ;;  %v17507_v23 = vld [vmem:[#allocation2 + $0x424] ss:$24 sps:$4 sm:$0xff]   ;;  %v17510_v22 = vld [vmem:[#allocation2 + $0xf4] ss:$24 sps:$4 sm:$0xff]  }
 0x9f6   :  { %11061 = vmatpush1.bf16.msra.mxu0 %v17500_v63  ;;  %11103 = vmatprep.subr.bf16.mxu1 %v17501_v17  ;;  %v17509_v21 = vld [vmem:[#allocation2 + $0x420] ss:$24 sps:$4 sm:$0xff]   ;;  %v17512_v30 = vld [vmem:[#allocation2 + $0xf0] ss:$24 sps:$4 sm:$0xff]   ;;  %v17513_v55 = vld [vmem:[#allocation2 + $0x3f4] ss:$24 sps:$4 sm:$0xff]  }
 0x9f7   :  { %11104 = vmatpush1.bf16.msra.mxu1 %v17503_v62  ;;  %11062 = vmatprep.subr.bf16.mxu0 %v17504_v41  ;;  %v17516_v8 = vld [vmem:[#allocation2 + $0xc4] ss:$24 sps:$4 sm:$0xff]   ;;  %v17515_v32 = vld [vmem:[#allocation2 + $0x3f0] ss:$24 sps:$4 sm:$0xff]   ;;  %v17518_v42 = vld [vmem:[#allocation2 + $0xc0] ss:$24 sps:$4 sm:$0xff]  }
 0x9f8   :  { %11105 = vmatprep.subr.bf16.mxu1 %v17507_v23  ;;  %v17519_v34 = vld [vmem:[#allocation2 + $0x3c4] ss:$24 sps:$4 sm:$0xff]   ;;  %v17522_v27 = vld [vmem:[#allocation2 + $0x94] ss:$24 sps:$4 sm:$0xff]   ;;  %v17521_v31 = vld [vmem:[#allocation2 + $0x3c0] ss:$24 sps:$4 sm:$0xff]  }
 0x9f9   :  { %v17525_v16 = vld [vmem:[#allocation2 + $0x394] ss:$24 sps:$4 sm:$0xff]   ;;  %v17524_v2 = vld [vmem:[#allocation2 + $0x90] ss:$24 sps:$4 sm:$0xff]   ;;  %v17528_v13 = vld [vmem:[#allocation2 + $0x64] ss:$24 sps:$4 sm:$0xff]  }
 0x9fa   :  { %11063 = vmatpush1.bf16.msra.mxu0 %v17506_v6  ;;  %v17527_v24 = vld [vmem:[#allocation2 + $0x390] ss:$24 sps:$4 sm:$0xff]   ;;  %v17531_v49 = vld [vmem:[#allocation2 + $0x364] ss:$24 sps:$4 sm:$0xff]   ;;  %v17530_v9 = vld [vmem:[#allocation2 + $0x60] ss:$24 sps:$4 sm:$0xff]  }
 0x9fb   :  { %11064 = vmatprep.subr.bf16.mxu0 %v17510_v22  ;;  %11106 = vmatpush1.bf16.msra.mxu1 %v17509_v21  ;;  %v17534_v4 = vld [vmem:[#allocation2 + $0x34] ss:$24 sps:$4 sm:$0xff]   ;;  %v17533_v60 = vld [vmem:[#allocation2 + $0x360] ss:$24 sps:$4 sm:$0xff]   ;;  %v17536_v54 = vld [vmem:[#allocation2 + $0x30] ss:$24 sps:$4 sm:$0xff]  }
 0x9fc   :  { %11107 = vmatprep.subr.bf16.mxu1 %v17513_v55  ;;  %v17537_v50 = vld [vmem:[#allocation2 + $0x334] ss:$24 sps:$4 sm:$0xff]   ;;  %v17540_v58 = vld [vmem:[#allocation2 + $0x4] ss:$24 sps:$4 sm:$0xff]   ;;  %v17539_v33 = vld [vmem:[#allocation2 + $0x330] ss:$24 sps:$4 sm:$0xff]  }
 0x9fd   :  { %v17543_v28 = vld [vmem:[#allocation2 + $0x304] ss:$24 sps:$4 sm:$0xff]   ;;  %v17542_v53 = vld [vmem:[#allocation2] ss:$24 sps:$4 sm:$0xff]   ;;  %v17546_v26 = vld [vmem:[#allocation2 + $0x2d4] ss:$24 sps:$4 sm:$0xff]  }
 0x9fe   :  { %11065 = vmatpush1.bf16.msra.mxu0 %v17512_v30  ;;  %v17545_v1 = vld [vmem:[#allocation2 + $0x300] ss:$24 sps:$4 sm:$0xff]   ;;  %v17549_v59 = vld [vmem:[#allocation2 + $0x5d4] ss:$24 sps:$4 sm:$0xff]   ;;  %v17548_v15 = vld [vmem:[#allocation2 + $0x2d0] ss:$24 sps:$4 sm:$0xff]  }
 0x9ff   :  { %11066 = vmatprep.subr.bf16.mxu0 %v17516_v8  ;;  %11108 = vmatpush1.bf16.msra.mxu1 %v17515_v32  ;;  %v17552_v40 = vld [vmem:[#allocation2 + $0x2a4] ss:$24 sps:$4 sm:$0xff]   ;;  %v17551_v14 = vld [vmem:[#allocation2 + $0x5d0] ss:$24 sps:$4 sm:$0xff]   ;;  %v17554_v20 = vld [vmem:[#allocation2 + $0x2a0] ss:$24 sps:$4 sm:$0xff]  }
 0xa00   :  { %11109 = vmatprep.subr.bf16.mxu1 %v17519_v34  ;;  %v17555_v56 = vld [vmem:[#allocation2 + $0x5a4] ss:$24 sps:$4 sm:$0xff]   ;;  %v17558_v11 = vld [vmem:[#allocation2 + $0x274] ss:$24 sps:$4 sm:$0xff]   ;;  %v17557_v18 = vld [vmem:[#allocation2 + $0x5a0] ss:$24 sps:$4 sm:$0xff]  }
 0xa01   :  { %v17561_v46 = vld [vmem:[#allocation2 + $0x574] ss:$24 sps:$4 sm:$0xff]   ;;  %v17560_v25 = vld [vmem:[#allocation2 + $0x270] ss:$24 sps:$4 sm:$0xff]   ;;  %v17564_v43 = vld [vmem:[#allocation2 + $0x244] ss:$24 sps:$4 sm:$0xff]  }
 0xa02   :  { %11067 = vmatpush1.bf16.msra.mxu0 %v17518_v42  ;;  %v17563_v61 = vld [vmem:[#allocation2 + $0x570] ss:$24 sps:$4 sm:$0xff]   ;;  %v17567_v63 = vld [vmem:[#allocation2 + $0x544] ss:$24 sps:$4 sm:$0xff]   ;;  %v17566_v17 = vld [vmem:[#allocation2 + $0x240] ss:$24 sps:$4 sm:$0xff]  }
 0xa03   :  { %11068 = vmatprep.subr.bf16.mxu0 %v17522_v27  ;;  %11110 = vmatpush1.bf16.msra.mxu1 %v17521_v31  ;;  %v17570_v62 = vld [vmem:[#allocation2 + $0x214] ss:$24 sps:$4 sm:$0xff]   ;;  %v17569_v41 = vld [vmem:[#allocation2 + $0x540] ss:$24 sps:$4 sm:$0xff]   ;;  %v17572_v23 = vld [vmem:[#allocation2 + $0x210] ss:$24 sps:$4 sm:$0xff]  }
 0xa04   :  { %11111 = vmatprep.subr.bf16.mxu1 %v17525_v16  ;;  %v17573_v6 = vld [vmem:[#allocation2 + $0x514] ss:$24 sps:$4 sm:$0xff]   ;;  %v17576_v21 = vld [vmem:[#allocation2 + $0x1e4] ss:$24 sps:$4 sm:$0xff]   ;;  %v17575_v22 = vld [vmem:[#allocation2 + $0x510] ss:$24 sps:$4 sm:$0xff]  }
 0xa05   :  { %v17579_v30 = vld [vmem:[#allocation2 + $0x4e4] ss:$24 sps:$4 sm:$0xff]   ;;  %v17578_v55 = vld [vmem:[#allocation2 + $0x1e0] ss:$24 sps:$4 sm:$0xff]   ;;  %v17582_v8 = vld [vmem:[#allocation2 + $0x1b4] ss:$24 sps:$4 sm:$0xff]  }
 0xa06   :  { %11069 = vmatpush1.bf16.msra.mxu0 %v17524_v2  ;;  %v17581_v32 = vld [vmem:[#allocation2 + $0x4e0] ss:$24 sps:$4 sm:$0xff]   ;;  %v17585_v34 = vld [vmem:[#allocation2 + $0x4b4] ss:$24 sps:$4 sm:$0xff]   ;;  %v17584_v42 = vld [vmem:[#allocation2 + $0x1b0] ss:$24 sps:$4 sm:$0xff]  }
 0xa07   :  { %11070 = vmatprep.subr.bf16.mxu0 %v17528_v13  ;;  %11112 = vmatpush1.bf16.msra.mxu1 %v17527_v24  ;;  %v17588_v27 = vld [vmem:[#allocation2 + $0x184] ss:$24 sps:$4 sm:$0xff]   ;;  %v17587_v31 = vld [vmem:[#allocation2 + $0x4b0] ss:$24 sps:$4 sm:$0xff]   ;;  %v17590_v2 = vld [vmem:[#allocation2 + $0x180] ss:$24 sps:$4 sm:$0xff]  }
 0xa08   :  { %11113 = vmatprep.subr.bf16.mxu1 %v17531_v49  ;;  %v17591_v16 = vld [vmem:[#allocation2 + $0x484] ss:$24 sps:$4 sm:$0xff]   ;;  %v17596_v13 = vld [vmem:[#allocation2 + $0x754] ss:$24 sps:$4 sm:$0xff]   ;;  %v17593_v24 = vld [vmem:[#allocation2 + $0x480] ss:$24 sps:$4 sm:$0xff]   ;;  %v19422_v49 = vpack.c.bf16 %v19398_v38, %v19380_v19 }
 0xa0a   :  { %11071 = vmatpush1.bf16.msra.mxu0 %v17530_v9  ;;  %v17599_v9 = vld [vmem:[#allocation2 + $0x15c] ss:$24 sps:$4 sm:$0xff]  }
 0xa0b   :  { %11072 = vmatprep.subr.bf16.mxu0 %v17534_v4  ;;  %11114 = vmatpush1.bf16.msra.mxu1 %v17533_v60  ;;  %v17594_v4 = vld [vmem:[#allocation2 + $0x750] ss:$24 sps:$4 sm:$0xff]   ;;  %v19426_v60 = vpack.c.bf16 %v19408_v57, %v19390_v51 }
 0xa0c   :  { %11115 = vmatprep.subr.bf16.mxu1 %v17537_v50  ;;  %v19430_v50 = vpack.c.bf16 %v19402_v3, %v19384_v47 }
 0xa0e   :  { %11073 = vmatpush1.bf16.msra.mxu0 %v17536_v54  ;;  %v17602_v54 = vld [vmem:[#allocation2 + $0x724] ss:$24 sps:$4 sm:$0xff]  }
 0xa0f   :  { %11074 = vmatprep.subr.bf16.mxu0 %v17540_v58  ;;  %11116 = vmatpush1.bf16.msra.mxu1 %v17539_v33  ;;  %v17597_v58 = vld [vmem:[#allocation2 + $0x158] ss:$24 sps:$4 sm:$0xff]   ;;  %v17605_v33 = vld [vmem:[#allocation2 + $0x12c] ss:$24 sps:$4 sm:$0xff]  }
 0xa10   :  { %11117 = vmatprep.subr.bf16.mxu1 %v17543_v28  ;;  %v17600_v28 = vld [vmem:[#allocation2 + $0x720] ss:$24 sps:$4 sm:$0xff]  }
 0xa12   :  { %11075 = vmatpush1.bf16.msra.mxu0 %v17542_v53  ;;  %v17608_v53 = vld [vmem:[#allocation2 + $0x6f4] ss:$24 sps:$4 sm:$0xff]  }
 0xa13   :  { %11076 = vmatprep.subr.bf16.mxu0 %v17546_v26  ;;  %11118 = vmatpush1.bf16.msra.mxu1 %v17545_v1  ;;  %v17603_v26 = vld [vmem:[#allocation2 + $0x128] ss:$24 sps:$4 sm:$0xff]   ;;  %v17611_v1 = vld [vmem:[#allocation2 + $0xfc] ss:$24 sps:$4 sm:$0xff]  }
 0xa14   :  { %11119 = vmatprep.subr.bf16.mxu1 %v17549_v59  ;;  %v17606_v59 = vld [vmem:[#allocation2 + $0x6f0] ss:$24 sps:$4 sm:$0xff]  }
 0xa16   :  { %11077 = vmatpush2.bf16.msra.mxu0 %v17548_v15  ;;  %v17614_v15 = vld [vmem:[#allocation2 + $0x6c4] ss:$24 sps:$4 sm:$0xff]  }
 0xa17   :  { %11078 = vmatprep.subr.bf16.mxu0 %v17552_v40  ;;  %11120 = vmatpush2.bf16.msra.mxu1 %v17551_v14  ;;  %v17609_v40 = vld [vmem:[#allocation2 + $0xf8] ss:$24 sps:$4 sm:$0xff]   ;;  %v17617_v14 = vld [vmem:[#allocation2 + $0xcc] ss:$24 sps:$4 sm:$0xff]  }
 0xa18   :  { %11121 = vmatprep.subr.bf16.mxu1 %v17555_v56  ;;  %v17612_v56 = vld [vmem:[#allocation2 + $0x6c0] ss:$24 sps:$4 sm:$0xff]  }
 0xa1a   :  { %11079 = vmatpush2.bf16.msra.mxu0 %v17554_v20  ;;  %v17620_v20 = vld [vmem:[#allocation2 + $0x694] ss:$24 sps:$4 sm:$0xff]  }
 0xa1b   :  { %11080 = vmatprep.subr.bf16.mxu0 %v17558_v11  ;;  %11122 = vmatpush2.bf16.msra.mxu1 %v17557_v18  ;;  %v17615_v11 = vld [vmem:[#allocation2 + $0xc8] ss:$24 sps:$4 sm:$0xff]   ;;  %v17623_v18 = vld [vmem:[#allocation2 + $0x9c] ss:$24 sps:$4 sm:$0xff]  }
 0xa1c   :  { %11123 = vmatprep.subr.bf16.mxu1 %v17561_v46  ;;  %v17618_v46 = vld [vmem:[#allocation2 + $0x690] ss:$24 sps:$4 sm:$0xff]  }
 0xa1e   :  { %11081 = vmatpush2.bf16.msra.mxu0 %v17560_v25  ;;  %v17626_v25 = vld [vmem:[#allocation2 + $0x664] ss:$24 sps:$4 sm:$0xff]  }
 0xa1f   :  { %11082 = vmatprep.subr.bf16.mxu0 %v17564_v43  ;;  %11124 = vmatpush2.bf16.msra.mxu1 %v17563_v61  ;;  %v17621_v43 = vld [vmem:[#allocation2 + $0x98] ss:$24 sps:$4 sm:$0xff]   ;;  %v17629_v61 = vld [vmem:[#allocation2 + $0x6c] ss:$24 sps:$4 sm:$0xff]  }
 0xa20   :  { %11125 = vmatprep.subr.bf16.mxu1 %v17567_v63  ;;  %v17624_v63 = vld [vmem:[#allocation2 + $0x660] ss:$24 sps:$4 sm:$0xff]  }
 0xa22   :  { %11083 = vmatpush2.bf16.msra.mxu0 %v17566_v17  ;;  %v17632_v17 = vld [vmem:[#allocation2 + $0x634] ss:$24 sps:$4 sm:$0xff]  }
 0xa23   :  { %11084 = vmatprep.subr.bf16.mxu0 %v17570_v62  ;;  %11126 = vmatpush2.bf16.msra.mxu1 %v17569_v41  ;;  %v17627_v62 = vld [vmem:[#allocation2 + $0x68] ss:$24 sps:$4 sm:$0xff]   ;;  %v17635_v41 = vld [vmem:[#allocation2 + $0x3c] ss:$24 sps:$4 sm:$0xff]  }
 0xa24   :  { %11127 = vmatprep.subr.bf16.mxu1 %v17573_v6  ;;  %v17630_v6 = vld [vmem:[#allocation2 + $0x630] ss:$24 sps:$4 sm:$0xff]  }
 0xa26   :  { %11085 = vmatpush2.bf16.msra.mxu0 %v17572_v23  ;;  %v17638_v23 = vld [vmem:[#allocation2 + $0x604] ss:$24 sps:$4 sm:$0xff]  }
 0xa27   :  { %11086 = vmatprep.subr.bf16.mxu0 %v17576_v21  ;;  %11128 = vmatpush2.bf16.msra.mxu1 %v17575_v22  ;;  %v17633_v21 = vld [vmem:[#allocation2 + $0x38] ss:$24 sps:$4 sm:$0xff]   ;;  %v17641_v22 = vld [vmem:[#allocation2 + $0xc] ss:$24 sps:$4 sm:$0xff]  }
 0xa28   :  { %11129 = vmatprep.subr.bf16.mxu1 %v17579_v30  ;;  %v17636_v30 = vld [vmem:[#allocation2 + $0x600] ss:$24 sps:$4 sm:$0xff]  }
 0xa2a   :  { %11087 = vmatpush2.bf16.msra.mxu0 %v17578_v55  ;;  %v17644_v55 = vld [vmem:[#allocation2 + $0x8d4] ss:$24 sps:$4 sm:$0xff]  }
 0xa2b   :  { %11088 = vmatprep.subr.bf16.mxu0 %v17582_v8  ;;  %11130 = vmatpush2.bf16.msra.mxu1 %v17581_v32  ;;  %v17639_v8 = vld [vmem:[#allocation2 + $0x8] ss:$24 sps:$4 sm:$0xff]   ;;  %v17647_v32 = vld [vmem:[#allocation2 + $0x2dc] ss:$24 sps:$4 sm:$0xff]  }
 0xa2c   :  { %11131 = vmatprep.subr.bf16.mxu1 %v17585_v34  ;;  %v17642_v34 = vld [vmem:[#allocation2 + $0x8d0] ss:$24 sps:$4 sm:$0xff]  }
 0xa2e   :  { %11089 = vmatpush2.bf16.msra.mxu0 %v17584_v42  ;;  %v17650_v42 = vld [vmem:[#allocation2 + $0x8a4] ss:$24 sps:$4 sm:$0xff]  }
 0xa2f   :  { %11090 = vmatprep.subr.bf16.mxu0 %v17588_v27  ;;  %11132 = vmatpush2.bf16.msra.mxu1 %v17587_v31  ;;  %v17645_v27 = vld [vmem:[#allocation2 + $0x2d8] ss:$24 sps:$4 sm:$0xff]   ;;  %v17653_v31 = vld [vmem:[#allocation2 + $0x2ac] ss:$24 sps:$4 sm:$0xff]  }
 0xa30   :  { %11133 = vmatprep.subr.bf16.mxu1 %v17591_v16  ;;  %v17648_v16 = vld [vmem:[#allocation2 + $0x8a0] ss:$24 sps:$4 sm:$0xff]  }
 0xa32   :  { %11091 = vmatpush2.bf16.msra.mxu0 %v17590_v2  ;;  %v17656_v2 = vld [vmem:[#allocation2 + $0x874] ss:$24 sps:$4 sm:$0xff]  }
 0xa33   :  { %11146 = vmatprep.subr.bf16.mxu0 %v17596_v13  ;;  %11134 = vmatpush2.bf16.msra.mxu1 %v17593_v24  ;;  %v17651_v13 = vld [vmem:[#allocation2 + $0x2a8] ss:$24 sps:$4 sm:$0xff]   ;;  %v17659_v24 = vld [vmem:[#allocation2 + $0x27c] ss:$24 sps:$4 sm:$0xff]  }
 0xa34   :  { %11189 = vmatprep.subr.bf16.mxu1 %v17599_v9  ;;  %v17654_v9 = vld [vmem:[#allocation2 + $0x870] ss:$24 sps:$4 sm:$0xff]  }
 0xa35   :  { %11093 = vmatmul.mubr.bf16.vlgmr.msra.gmra.mxu0 %v19422_v49 }
 0xa36   :  { %11147 = vmatpush1.bf16.msra.mxu0 %v17594_v4  ;;  %11178 = vmatprep.mubr.bf16.mxu0 %v19426_v60  ;;  %v17662_v4 = vld [vmem:[#allocation2 + $0x844] ss:$24 sps:$4 sm:$0xff]  }
 0xa37   :  { %11136 = vmatmul.mubr.bf16.vlgmr.msra.gmra.mxu1 %v19430_v50  ;;  %11148 = vmatprep.subr.bf16.mxu0 %v17602_v54  ;;  %v17657_v54 = vld [vmem:[#allocation2 + $0x278] ss:$24 sps:$4 sm:$0xff]  }
 0xa38   :  { %11190 = vmatpush1.bf16.msra.mxu1 %v17597_v58  ;;  %11221 = vmatprep.mubr.bf16.mxu1 %v19412_v7  ;;  %v17665_v58 = vld [vmem:[#allocation2 + $0x24c] ss:$24 sps:$4 sm:$0xff]  }
 0xa39   :  { %11191 = vmatprep.subr.bf16.mxu1 %v17605_v33  ;;  %v17660_v33 = vld [vmem:[#allocation2 + $0x840] ss:$24 sps:$4 sm:$0xff]  }
 0xa3a   :  { %11149 = vmatpush1.bf16.msra.mxu0 %v17600_v28  ;;  %v17668_v28 = vld [vmem:[#allocation2 + $0x814] ss:$24 sps:$4 sm:$0xff]  }
 0xa3b   :  { %11150 = vmatprep.subr.bf16.mxu0 %v17608_v53  ;;  %v17663_v53 = vld [vmem:[#allocation2 + $0x248] ss:$24 sps:$4 sm:$0xff]  }
 0xa3c   :  { %11192 = vmatpush1.bf16.msra.mxu1 %v17603_v26  ;;  %v17671_v26 = vld [vmem:[#allocation2 + $0x21c] ss:$24 sps:$4 sm:$0xff]  }
 0xa3d   :  { %11193 = vmatprep.subr.bf16.mxu1 %v17611_v1  ;;  %v17666_v1 = vld [vmem:[#allocation2 + $0x810] ss:$24 sps:$4 sm:$0xff]  }
 0xa3e   :  { %11151 = vmatpush1.bf16.msra.mxu0 %v17606_v59  ;;  %v17674_v59 = vld [vmem:[#allocation2 + $0x7e4] ss:$24 sps:$4 sm:$0xff]  }
 0xa3f   :  { %11152 = vmatprep.subr.bf16.mxu0 %v17614_v15  ;;  %v17669_v15 = vld [vmem:[#allocation2 + $0x218] ss:$24 sps:$4 sm:$0xff]  }
 0xa40   :  { %11194 = vmatpush1.bf16.msra.mxu1 %v17609_v40  ;;  %v17677_v40 = vld [vmem:[#allocation2 + $0x1ec] ss:$24 sps:$4 sm:$0xff]  }
 0xa41   :  { %11195 = vmatprep.subr.bf16.mxu1 %v17617_v14  ;;  %v17672_v14 = vld [vmem:[#allocation2 + $0x7e0] ss:$24 sps:$4 sm:$0xff]  }
 0xa42   :  { %11153 = vmatpush1.bf16.msra.mxu0 %v17612_v56  ;;  %v17680_v56 = vld [vmem:[#allocation2 + $0x7b4] ss:$24 sps:$4 sm:$0xff]  }
 0xa43   :  { %11154 = vmatprep.subr.bf16.mxu0 %v17620_v20  ;;  %v17675_v20 = vld [vmem:[#allocation2 + $0x1e8] ss:$24 sps:$4 sm:$0xff]  }
 0xa44   :  { %11196 = vmatpush1.bf16.msra.mxu1 %v17615_v11  ;;  %v17683_v11 = vld [vmem:[#allocation2 + $0x1bc] ss:$24 sps:$4 sm:$0xff]  }
 0xa45   :  { %11197 = vmatprep.subr.bf16.mxu1 %v17623_v18  ;;  %v17678_v18 = vld [vmem:[#allocation2 + $0x7b0] ss:$24 sps:$4 sm:$0xff]  }
 0xa46   :  { %11155 = vmatpush1.bf16.msra.mxu0 %v17618_v46  ;;  %v17686_v46 = vld [vmem:[#allocation2 + $0x784] ss:$24 sps:$4 sm:$0xff]  }
 0xa47   :  { %11156 = vmatprep.subr.bf16.mxu0 %v17626_v25  ;;  %v17681_v25 = vld [vmem:[#allocation2 + $0x1b8] ss:$24 sps:$4 sm:$0xff]  }
 0xa48   :  { %11198 = vmatpush1.bf16.msra.mxu1 %v17621_v43  ;;  %v17689_v43 = vld [vmem:[#allocation2 + $0x18c] ss:$24 sps:$4 sm:$0xff]  }
 0xa49   :  { %11199 = vmatprep.subr.bf16.mxu1 %v17629_v61  ;;  %v17684_v61 = vld [vmem:[#allocation2 + $0x780] ss:$24 sps:$4 sm:$0xff]  }
 0xa4a   :  { %11157 = vmatpush1.bf16.msra.mxu0 %v17624_v63  ;;  %v17692_v63 = vld [vmem:[#allocation2 + $0x45c] ss:$24 sps:$4 sm:$0xff]  }
 0xa4b   :  { %11158 = vmatprep.subr.bf16.mxu0 %v17632_v17  ;;  %v17687_v17 = vld [vmem:[#allocation2 + $0x188] ss:$24 sps:$4 sm:$0xff]  }
 0xa4c   :  { %11200 = vmatpush1.bf16.msra.mxu1 %v17627_v62  ;;  %v19438_v62 = vpack.c.bf16 %v19406_v39, %v19388_v48 }
 0xa4d   :  { %11201 = vmatprep.subr.bf16.mxu1 %v17635_v41  ;;  %v17695_v41 = vld [vmem:[#allocation2 + $0x75c] ss:$24 sps:$4 sm:$0xff]  }
 0xa4e   :  { %11159 = vmatpush1.bf16.msra.mxu0 %v17630_v6  ;;  %v17690_v6 = vld [vmem:[#allocation2 + $0x458] ss:$24 sps:$4 sm:$0xff]  }
 0xa4f   :  { %11160 = vmatprep.subr.bf16.mxu0 %v17638_v23  ;;  %v17698_v23 = vld [vmem:[#allocation2 + $0x42c] ss:$24 sps:$4 sm:$0xff]  }
 0xa50   :  { %11202 = vmatpush1.bf16.msra.mxu1 %v17633_v21  ;;  %v17693_v21 = vld [vmem:[#allocation2 + $0x758] ss:$24 sps:$4 sm:$0xff]  }
 0xa51   :  { %11203 = vmatprep.subr.bf16.mxu1 %v17641_v22  ;;  %v17701_v22 = vld [vmem:[#allocation2 + $0x72c] ss:$24 sps:$4 sm:$0xff]  }
 0xa52   :  { %11161 = vmatpush1.bf16.msra.mxu0 %v17636_v30  ;;  %v17696_v30 = vld [vmem:[#allocation2 + $0x428] ss:$24 sps:$4 sm:$0xff]  }
 0xa53   :  { %11162 = vmatprep.subr.bf16.mxu0 %v17644_v55  ;;  %v17704_v55 = vld [vmem:[#allocation2 + $0x3fc] ss:$24 sps:$4 sm:$0xff]  }
 0xa54   :  { %11204 = vmatpush1.bf16.msra.mxu1 %v17639_v8  ;;  %v17699_v8 = vld [vmem:[#allocation2 + $0x728] ss:$24 sps:$4 sm:$0xff]  }
 0xa55   :  { %11205 = vmatprep.subr.bf16.mxu1 %v17647_v32  ;;  %v17707_v32 = vld [vmem:[#allocation2 + $0x6fc] ss:$24 sps:$4 sm:$0xff]  }
 0xa56   :  { %11163 = vmatpush2.bf16.msra.mxu0 %v17642_v34  ;;  %v17702_v34 = vld [vmem:[#allocation2 + $0x3f8] ss:$24 sps:$4 sm:$0xff]  }
 0xa57   :  { %11164 = vmatprep.subr.bf16.mxu0 %v17650_v42  ;;  %v17710_v42 = vld [vmem:[#allocation2 + $0x3cc] ss:$24 sps:$4 sm:$0xff]  }
 0xa58   :  { %11206 = vmatpush2.bf16.msra.mxu1 %v17645_v27  ;;  %v17705_v27 = vld [vmem:[#allocation2 + $0x6f8] ss:$24 sps:$4 sm:$0xff]  }
 0xa59   :  { %11207 = vmatprep.subr.bf16.mxu1 %v17653_v31  ;;  %v17713_v31 = vld [vmem:[#allocation2 + $0x6cc] ss:$24 sps:$4 sm:$0xff]  }
 0xa5a   :  { %11165 = vmatpush2.bf16.msra.mxu0 %v17648_v16  ;;  %v17708_v16 = vld [vmem:[#allocation2 + $0x3c8] ss:$24 sps:$4 sm:$0xff]  }
 0xa5b   :  { %11166 = vmatprep.subr.bf16.mxu0 %v17656_v2  ;;  %v17716_v2 = vld [vmem:[#allocation2 + $0x39c] ss:$24 sps:$4 sm:$0xff]  }
 0xa5c   :  { %11208 = vmatpush2.bf16.msra.mxu1 %v17651_v13  ;;  %v17711_v13 = vld [vmem:[#allocation2 + $0x6c8] ss:$24 sps:$4 sm:$0xff]  }
 0xa5d   :  { %11209 = vmatprep.subr.bf16.mxu1 %v17659_v24  ;;  %v17719_v24 = vld [vmem:[#allocation2 + $0x69c] ss:$24 sps:$4 sm:$0xff]  }
 0xa5e   :  { %11167 = vmatpush2.bf16.msra.mxu0 %v17654_v9  ;;  %v17714_v9 = vld [vmem:[#allocation2 + $0x398] ss:$24 sps:$4 sm:$0xff]  }
 0xa5f   :  { %11168 = vmatprep.subr.bf16.mxu0 %v17662_v4  ;;  %v17722_v4 = vld [vmem:[#allocation2 + $0x36c] ss:$24 sps:$4 sm:$0xff]  }
 0xa60   :  { %11210 = vmatpush2.bf16.msra.mxu1 %v17657_v54  ;;  %v17717_v54 = vld [vmem:[#allocation2 + $0x698] ss:$24 sps:$4 sm:$0xff]  }
 0xa61   :  { %11211 = vmatprep.subr.bf16.mxu1 %v17665_v58  ;;  %v17725_v58 = vld [vmem:[#allocation2 + $0x66c] ss:$24 sps:$4 sm:$0xff]  }
 0xa62   :  { %11169 = vmatpush2.bf16.msra.mxu0 %v17660_v33  ;;  %v17720_v33 = vld [vmem:[#allocation2 + $0x368] ss:$24 sps:$4 sm:$0xff]  }
 0xa63   :  { %11170 = vmatprep.subr.bf16.mxu0 %v17668_v28  ;;  %v17728_v28 = vld [vmem:[#allocation2 + $0x33c] ss:$24 sps:$4 sm:$0xff]  }
 0xa64   :  { %11212 = vmatpush2.bf16.msra.mxu1 %v17663_v53  ;;  %v17723_v53 = vld [vmem:[#allocation2 + $0x668] ss:$24 sps:$4 sm:$0xff]  }
 0xa65   :  { %11213 = vmatprep.subr.bf16.mxu1 %v17671_v26  ;;  %v17731_v26 = vld [vmem:[#allocation2 + $0x63c] ss:$24 sps:$4 sm:$0xff]  }
 0xa66   :  { %11171 = vmatpush2.bf16.msra.mxu0 %v17666_v1  ;;  %v17726_v1 = vld [vmem:[#allocation2 + $0x338] ss:$24 sps:$4 sm:$0xff]  }
 0xa67   :  { %11172 = vmatprep.subr.bf16.mxu0 %v17674_v59  ;;  %v17734_v59 = vld [vmem:[#allocation2 + $0x30c] ss:$24 sps:$4 sm:$0xff]  }
 0xa68   :  { %11214 = vmatpush2.bf16.msra.mxu1 %v17669_v15  ;;  %v17729_v15 = vld [vmem:[#allocation2 + $0x638] ss:$24 sps:$4 sm:$0xff]  }
 0xa69   :  { %11215 = vmatprep.subr.bf16.mxu1 %v17677_v40  ;;  %v17737_v40 = vld [vmem:[#allocation2 + $0x60c] ss:$24 sps:$4 sm:$0xff]  }
 0xa6a   :  { %11173 = vmatpush2.bf16.msra.mxu0 %v17672_v14  ;;  %v17732_v14 = vld [vmem:[#allocation2 + $0x308] ss:$24 sps:$4 sm:$0xff]  }
 0xa6b   :  { %11174 = vmatprep.subr.bf16.mxu0 %v17680_v56  ;;  %v17740_v56 = vld [vmem:[#allocation2 + $0x5dc] ss:$24 sps:$4 sm:$0xff]  }
 0xa6c   :  { %11216 = vmatpush2.bf16.msra.mxu1 %v17675_v20  ;;  %v17735_v20 = vld [vmem:[#allocation2 + $0x608] ss:$24 sps:$4 sm:$0xff]  }
 0xa6d   :  { %11217 = vmatprep.subr.bf16.mxu1 %v17683_v11  ;;  %v17743_v11 = vld [vmem:[#allocation2 + $0x8dc] ss:$24 sps:$4 sm:$0xff]  }
 0xa6e   :  { %11175 = vmatpush2.bf16.msra.mxu0 %v17678_v18  ;;  %v17738_v18 = vld [vmem:[#allocation2 + $0x5d8] ss:$24 sps:$4 sm:$0xff]  }
 0xa6f   :  { %11176 = vmatprep.subr.bf16.mxu0 %v17686_v46  ;;  %v17746_v46 = vld [vmem:[#allocation2 + $0x5ac] ss:$24 sps:$4 sm:$0xff]  }
 0xa70   :  { %11218 = vmatpush2.bf16.msra.mxu1 %v17681_v25  ;;  %v17741_v25 = vld [vmem:[#allocation2 + $0x8d8] ss:$24 sps:$4 sm:$0xff]  }
 0xa71   :  { %11219 = vmatprep.subr.bf16.mxu1 %v17689_v43  ;;  %v17749_v43 = vld [vmem:[#allocation2 + $0x8ac] ss:$24 sps:$4 sm:$0xff]  }
 0xa72   :  { %11177 = vmatpush2.bf16.msra.mxu0 %v17684_v61  ;;  %v17744_v61 = vld [vmem:[#allocation2 + $0x5a8] ss:$24 sps:$4 sm:$0xff]  }
 0xa73   :  { %11232 = vmatprep.subr.bf16.mxu0 %v17692_v63  ;;  %v17752_v63 = vld [vmem:[#allocation2 + $0x57c] ss:$24 sps:$4 sm:$0xff]  }
 0xa74   :  { %11220 = vmatpush2.bf16.msra.mxu1 %v17687_v17  ;;  %v17747_v17 = vld [vmem:[#allocation2 + $0x8a8] ss:$24 sps:$4 sm:$0xff]  }
 0xa75   :  { %11179 = vmatmul.mubr.bf16.vlgmr.msra.gmra.mxu0 %v19438_v62  ;;  %11275 = vmatprep.subr.bf16.mxu1 %v17695_v41  ;;  %v17755_v41 = vld [vmem:[#allocation2 + $0x87c] ss:$24 sps:$4 sm:$0xff]  }
 0xa76   :  { %11233 = vmatpush1.bf16.msra.mxu0 %v17690_v6  ;;  %11264 = vmatprep.mubr.bf16.mxu0 %v19416_v10  ;;  %v17750_v6 = vld [vmem:[#allocation2 + $0x578] ss:$24 sps:$4 sm:$0xff]  }
 0xa77   :  { %11222 = vmatmul.mubr.bf16.vlgmr.msra.gmra.mxu1 %v19422_v49  ;;  %11234 = vmatprep.subr.bf16.mxu0 %v17698_v23  ;;  %v17758_v23 = vld [vmem:[#allocation2 + $0x54c] ss:$24 sps:$4 sm:$0xff]  }
 0xa78   :  { %11276 = vmatpush1.bf16.msra.mxu1 %v17693_v21  ;;  %11307 = vmatprep.mubr.bf16.mxu1 %v19426_v60  ;;  %v17753_v21 = vld [vmem:[#allocation2 + $0x878] ss:$24 sps:$4 sm:$0xff]  }
 0xa79   :  { %11277 = vmatprep.subr.bf16.mxu1 %v17701_v22  ;;  %v17761_v22 = vld [vmem:[#allocation2 + $0x84c] ss:$24 sps:$4 sm:$0xff]  }
 0xa7a   :  { %11235 = vmatpush1.bf16.msra.mxu0 %v17696_v30  ;;  %v17756_v30 = vld [vmem:[#allocation2 + $0x548] ss:$24 sps:$4 sm:$0xff]  }
 0xa7b   :  { %11236 = vmatprep.subr.bf16.mxu0 %v17704_v55  ;;  %v17764_v55 = vld [vmem:[#allocation2 + $0x51c] ss:$24 sps:$4 sm:$0xff]  }
 0xa7c   :  { %11278 = vmatpush1.bf16.msra.mxu1 %v17699_v8  ;;  %v17759_v8 = vld [vmem:[#allocation2 + $0x848] ss:$24 sps:$4 sm:$0xff]  }
 0xa7d   :  { %11279 = vmatprep.subr.bf16.mxu1 %v17707_v32  ;;  %v17767_v32 = vld [vmem:[#allocation2 + $0x81c] ss:$24 sps:$4 sm:$0xff]  }
 0xa7e   :  { %11237 = vmatpush1.bf16.msra.mxu0 %v17702_v34  ;;  %v17762_v34 = vld [vmem:[#allocation2 + $0x518] ss:$24 sps:$4 sm:$0xff]  }
 0xa7f   :  { %11238 = vmatprep.subr.bf16.mxu0 %v17710_v42  ;;  %v17770_v42 = vld [vmem:[#allocation2 + $0x4ec] ss:$24 sps:$4 sm:$0xff]  }
 0xa80   :  { %11280 = vmatpush1.bf16.msra.mxu1 %v17705_v27  ;;  %v17765_v27 = vld [vmem:[#allocation2 + $0x818] ss:$24 sps:$4 sm:$0xff]  }
 0xa81   :  { %11281 = vmatprep.subr.bf16.mxu1 %v17713_v31  ;;  %v17773_v31 = vld [vmem:[#allocation2 + $0x7ec] ss:$24 sps:$4 sm:$0xff]  }
 0xa82   :  { %11239 = vmatpush1.bf16.msra.mxu0 %v17708_v16  ;;  %v17768_v16 = vld [vmem:[#allocation2 + $0x4e8] ss:$24 sps:$4 sm:$0xff]  }
 0xa83   :  { %11240 = vmatprep.subr.bf16.mxu0 %v17716_v2  ;;  %v17776_v2 = vld [vmem:[#allocation2 + $0x4bc] ss:$24 sps:$4 sm:$0xff]  }
 0xa84   :  { %11282 = vmatpush1.bf16.msra.mxu1 %v17711_v13  ;;  %v17771_v13 = vld [vmem:[#allocation2 + $0x7e8] ss:$24 sps:$4 sm:$0xff]  }
 0xa85   :  { %11283 = vmatprep.subr.bf16.mxu1 %v17719_v24  ;;  %v17779_v24 = vld [vmem:[#allocation2 + $0x7bc] ss:$24 sps:$4 sm:$0xff]  }
 0xa86   :  { %11241 = vmatpush1.bf16.msra.mxu0 %v17714_v9  ;;  %v17774_v9 = vld [vmem:[#allocation2 + $0x4b8] ss:$24 sps:$4 sm:$0xff]  }
 0xa87   :  { %11242 = vmatprep.subr.bf16.mxu0 %v17722_v4  ;;  %v17782_v4 = vld [vmem:[#allocation2 + $0x48c] ss:$24 sps:$4 sm:$0xff]  }
 0xa88   :  { %11284 = vmatpush1.bf16.msra.mxu1 %v17717_v54  ;;  %v17777_v54 = vld [vmem:[#allocation2 + $0x7b8] ss:$24 sps:$4 sm:$0xff]  }
 0xa89   :  { %11285 = vmatprep.subr.bf16.mxu1 %v17725_v58  ;;  %v17785_v58 = vld [vmem:[#allocation2 + $0x78c] ss:$24 sps:$4 sm:$0xff]  }
 0xa8a   :  { %11243 = vmatpush1.bf16.msra.mxu0 %v17720_v33  ;;  %v17780_v33 = vld [vmem:[#allocation2 + $0x488] ss:$24 sps:$4 sm:$0xff]  }
 0xa8b   :  { %11244 = vmatprep.subr.bf16.mxu0 %v17728_v28  ;;  %v17788_v28 = vld [vmem:[#allocation2 + $0x164] ss:$24 sps:$4 sm:$0xff]  }
 0xa8c   :  { %11286 = vmatpush1.bf16.msra.mxu1 %v17723_v53  ;;  %v17783_v53 = vld [vmem:[#allocation2 + $0x788] ss:$24 sps:$4 sm:$0xff]  }
 0xa8d   :  { %11287 = vmatprep.subr.bf16.mxu1 %v17731_v26  ;;  %v17791_v26 = vld [vmem:[#allocation2 + $0x464] ss:$24 sps:$4 sm:$0xff]  }
 0xa8e   :  { %11245 = vmatpush1.bf16.msra.mxu0 %v17726_v1  ;;  %v17786_v1 = vld [vmem:[#allocation2 + $0x160] ss:$24 sps:$4 sm:$0xff]  }
 0xa8f   :  { %11246 = vmatprep.subr.bf16.mxu0 %v17734_v59  ;;  %v17794_v59 = vld [vmem:[#allocation2 + $0x134] ss:$24 sps:$4 sm:$0xff]  }
 0xa90   :  { %11288 = vmatpush1.bf16.msra.mxu1 %v17729_v15  ;;  %v17789_v15 = vld [vmem:[#allocation2 + $0x460] ss:$24 sps:$4 sm:$0xff]  }
 0xa91   :  { %11289 = vmatprep.subr.bf16.mxu1 %v17737_v40  ;;  %v17797_v40 = vld [vmem:[#allocation2 + $0x434] ss:$24 sps:$4 sm:$0xff]  }
 0xa92   :  { %11247 = vmatpush1.bf16.msra.mxu0 %v17732_v14  ;;  %v17792_v14 = vld [vmem:[#allocation2 + $0x130] ss:$24 sps:$4 sm:$0xff]  }
 0xa93   :  { %11248 = vmatprep.subr.bf16.mxu0 %v17740_v56  ;;  %v17800_v56 = vld [vmem:[#allocation2 + $0x104] ss:$24 sps:$4 sm:$0xff]  }
 0xa94   :  { %11290 = vmatpush1.bf16.msra.mxu1 %v17735_v20  ;;  %v17795_v20 = vld [vmem:[#allocation2 + $0x430] ss:$24 sps:$4 sm:$0xff]  }
 0xa95   :  { %11291 = vmatprep.subr.bf16.mxu1 %v17743_v11  ;;  %v17803_v11 = vld [vmem:[#allocation2 + $0x404] ss:$24 sps:$4 sm:$0xff]  }
 0xa96   :  { %11249 = vmatpush2.bf16.msra.mxu0 %v17738_v18  ;;  %v17798_v18 = vld [vmem:[#allocation2 + $0x100] ss:$24 sps:$4 sm:$0xff]  }
 0xa97   :  { %11250 = vmatprep.subr.bf16.mxu0 %v17746_v46  ;;  %v17806_v46 = vld [vmem:[#allocation2 + $0xd4] ss:$24 sps:$4 sm:$0xff]  }
 0xa98   :  { %11292 = vmatpush2.bf16.msra.mxu1 %v17741_v25  ;;  %v17801_v25 = vld [vmem:[#allocation2 + $0x400] ss:$24 sps:$4 sm:$0xff]  }
 0xa99   :  { %11293 = vmatprep.subr.bf16.mxu1 %v17749_v43  ;;  %v17809_v43 = vld [vmem:[#allocation2 + $0x3d4] ss:$24 sps:$4 sm:$0xff]  }
 0xa9a   :  { %11251 = vmatpush2.bf16.msra.mxu0 %v17744_v61  ;;  %v17812_v61 = vld [vmem:[#allocation2 + $0xa4] ss:$24 sps:$4 sm:$0xff]  }
 0xa9b   :  { %11252 = vmatprep.subr.bf16.mxu0 %v17752_v63  ;;  %v17807_v63 = vld [vmem:[#allocation2 + $0x3d0] ss:$24 sps:$4 sm:$0xff]  }
 0xa9c   :  { %11294 = vmatpush2.bf16.msra.mxu1 %v17747_v17  ;;  %v17815_v17 = vld [vmem:[#allocation2 + $0x3a4] ss:$24 sps:$4 sm:$0xff]  }
 0xa9d   :  { %11295 = vmatprep.subr.bf16.mxu1 %v17755_v41  ;;  %v17818_v41 = vld [vmem:[#allocation2 + $0x74] ss:$24 sps:$4 sm:$0xff]  }
 0xa9e   :  { %11253 = vmatpush2.bf16.msra.mxu0 %v17750_v6  ;;  %v17813_v6 = vld [vmem:[#allocation2 + $0x3a0] ss:$24 sps:$4 sm:$0xff]  }
 0xa9f   :  { %11254 = vmatprep.subr.bf16.mxu0 %v17758_v23  ;;  %v17821_v23 = vld [vmem:[#allocation2 + $0x374] ss:$24 sps:$4 sm:$0xff]  }
 0xaa0   :  { %11296 = vmatpush2.bf16.msra.mxu1 %v17753_v21  ;;  %v17816_v21 = vld [vmem:[#allocation2 + $0x70] ss:$24 sps:$4 sm:$0xff]  }
 0xaa1   :  { %11297 = vmatprep.subr.bf16.mxu1 %v17761_v22  ;;  %v17824_v22 = vld [vmem:[#allocation2 + $0x44] ss:$24 sps:$4 sm:$0xff]  }
 0xaa2   :  { %11255 = vmatpush2.bf16.msra.mxu0 %v17756_v30  ;;  %v17819_v30 = vld [vmem:[#allocation2 + $0x370] ss:$24 sps:$4 sm:$0xff]  }
 0xaa3   :  { %11256 = vmatprep.subr.bf16.mxu0 %v17764_v55  ;;  %v17827_v55 = vld [vmem:[#allocation2 + $0x344] ss:$24 sps:$4 sm:$0xff]  }
 0xaa4   :  { %11298 = vmatpush2.bf16.msra.mxu1 %v17759_v8  ;;  %v17822_v8 = vld [vmem:[#allocation2 + $0x40] ss:$24 sps:$4 sm:$0xff]  }
 0xaa5   :  { %11299 = vmatprep.subr.bf16.mxu1 %v17767_v32  ;;  %v17830_v32 = vld [vmem:[#allocation2 + $0x14] ss:$24 sps:$4 sm:$0xff]  }
 0xaa6   :  { %11257 = vmatpush2.bf16.msra.mxu0 %v17762_v34  ;;  %v17825_v34 = vld [vmem:[#allocation2 + $0x340] ss:$24 sps:$4 sm:$0xff]  }
 0xaa7   :  { %11258 = vmatprep.subr.bf16.mxu0 %v17770_v42  ;;  %v17833_v42 = vld [vmem:[#allocation2 + $0x314] ss:$24 sps:$4 sm:$0xff]  }
 0xaa8   :  { %11300 = vmatpush2.bf16.msra.mxu1 %v17765_v27  ;;  %v17828_v27 = vld [vmem:[#allocation2 + $0x10] ss:$24 sps:$4 sm:$0xff]  }
 0xaa9   :  { %11301 = vmatprep.subr.bf16.mxu1 %v17773_v31  ;;  %v17836_v31 = vld [vmem:[#allocation2 + $0x2e4] ss:$24 sps:$4 sm:$0xff]  }
 0xaaa   :  { %11259 = vmatpush2.bf16.msra.mxu0 %v17768_v16  ;;  %v17831_v16 = vld [vmem:[#allocation2 + $0x310] ss:$24 sps:$4 sm:$0xff]  }
 0xaab   :  { %11260 = vmatprep.subr.bf16.mxu0 %v17776_v2  ;;  %v17839_v2 = vld [vmem:[#allocation2 + $0x5e4] ss:$24 sps:$4 sm:$0xff]  }
 0xaac   :  { %11302 = vmatpush2.bf16.msra.mxu1 %v17771_v13  ;;  %v17834_v13 = vld [vmem:[#allocation2 + $0x2e0] ss:$24 sps:$4 sm:$0xff]  }
 0xaad   :  { %11303 = vmatprep.subr.bf16.mxu1 %v17779_v24  ;;  %v17842_v24 = vld [vmem:[#allocation2 + $0x2b4] ss:$24 sps:$4 sm:$0xff]  }
 0xaae   :  { %11261 = vmatpush2.bf16.msra.mxu0 %v17774_v9  ;;  %v17837_v9 = vld [vmem:[#allocation2 + $0x5e0] ss:$24 sps:$4 sm:$0xff]  }
 0xaaf   :  { %11262 = vmatprep.subr.bf16.mxu0 %v17782_v4  ;;  %v17845_v4 = vld [vmem:[#allocation2 + $0x5b4] ss:$24 sps:$4 sm:$0xff]  }
 0xab0   :  { %11304 = vmatpush2.bf16.msra.mxu1 %v17777_v54  ;;  %v17840_v54 = vld [vmem:[#allocation2 + $0x2b0] ss:$24 sps:$4 sm:$0xff]  }
 0xab1   :  { %11305 = vmatprep.subr.bf16.mxu1 %v17785_v58  ;;  %v17848_v58 = vld [vmem:[#allocation2 + $0x284] ss:$24 sps:$4 sm:$0xff]  }
 0xab2   :  { %11263 = vmatpush2.bf16.msra.mxu0 %v17780_v33  ;;  %v17843_v33 = vld [vmem:[#allocation2 + $0x5b0] ss:$24 sps:$4 sm:$0xff]  }
 0xab3   :  { %11318 = vmatprep.subr.bf16.mxu0 %v17788_v28  ;;  %v17851_v28 = vld [vmem:[#allocation2 + $0x584] ss:$24 sps:$4 sm:$0xff]  }
 0xab4   :  { %11306 = vmatpush2.bf16.msra.mxu1 %v17783_v53  ;;  %v17846_v53 = vld [vmem:[#allocation2 + $0x280] ss:$24 sps:$4 sm:$0xff]  }
 0xab5   :  { %11265 = vmatmul.mubr.bf16.vlgmr.msra.gmra.mxu0 %v19430_v50  ;;  %11361 = vmatprep.subr.bf16.mxu1 %v17791_v26  ;;  %v17854_v26 = vld [vmem:[#allocation2 + $0x254] ss:$24 sps:$4 sm:$0xff]  }
 0xab6   :  { %11319 = vmatpush1.bf16.msra.mxu0 %v17786_v1  ;;  %11350 = vmatprep.mubr.bf16.mxu0 %v19412_v7  ;;  %v17804_v7 = vld [vmem:[#allocation2 + $0xd0] ss:$24 sps:$4 sm:$0xff]   ;;  %v17849_v1 = vld [vmem:[#allocation2 + $0x580] ss:$24 sps:$4 sm:$0xff]  }
 0xab7   :  { %11308 = vmatmul.mubr.bf16.vlgmr.msra.gmra.mxu1 %v19438_v62  ;;  %11320 = vmatprep.subr.bf16.mxu0 %v17794_v59  ;;  %v17857_v59 = vld [vmem:[#allocation2 + $0x554] ss:$24 sps:$4 sm:$0xff]  }
 0xab8   :  { %11362 = vmatpush1.bf16.msra.mxu1 %v17789_v15  ;;  %11393 = vmatprep.mubr.bf16.mxu1 %v19416_v10  ;;  %v17810_v10 = vld [vmem:[#allocation2 + $0xa0] ss:$24 sps:$4 sm:$0xff]   ;;  %v17852_v15 = vld [vmem:[#allocation2 + $0x250] ss:$24 sps:$4 sm:$0xff]  }
 0xab9   :  { %11363 = vmatprep.subr.bf16.mxu1 %v17797_v40  ;;  %v17860_v40 = vld [vmem:[#allocation2 + $0x224] ss:$24 sps:$4 sm:$0xff]  }
 0xaba   :  { %11321 = vmatpush1.bf16.msra.mxu0 %v17792_v14  ;;  %v17855_v14 = vld [vmem:[#allocation2 + $0x550] ss:$24 sps:$4 sm:$0xff]  }
 0xabb   :  { %11322 = vmatprep.subr.bf16.mxu0 %v17800_v56  ;;  %v17863_v56 = vld [vmem:[#allocation2 + $0x524] ss:$24 sps:$4 sm:$0xff]  }
 0xabc   :  { %11364 = vmatpush1.bf16.msra.mxu1 %v17795_v20  ;;  %v17858_v20 = vld [vmem:[#allocation2 + $0x220] ss:$24 sps:$4 sm:$0xff]  }
 0xabd   :  { %11365 = vmatprep.subr.bf16.mxu1 %v17803_v11  ;;  %v17866_v11 = vld [vmem:[#allocation2 + $0x1f4] ss:$24 sps:$4 sm:$0xff]  }
 0xabe   :  { %11323 = vmatpush1.bf16.msra.mxu0 %v17798_v18  ;;  %v17861_v18 = vld [vmem:[#allocation2 + $0x520] ss:$24 sps:$4 sm:$0xff]  }
 0xabf   :  { %11324 = vmatprep.subr.bf16.mxu0 %v17806_v46  ;;  %v17869_v46 = vld [vmem:[#allocation2 + $0x4f4] ss:$24 sps:$4 sm:$0xff]  }
 0xac0   :  { %11366 = vmatpush1.bf16.msra.mxu1 %v17801_v25  ;;  %v17864_v25 = vld [vmem:[#allocation2 + $0x1f0] ss:$24 sps:$4 sm:$0xff]  }
 0xac1   :  { %11367 = vmatprep.subr.bf16.mxu1 %v17809_v43  ;;  %v17872_v43 = vld [vmem:[#allocation2 + $0x1c4] ss:$24 sps:$4 sm:$0xff]  }
 0xac2   :  { %11325 = vmatpush1.bf16.msra.mxu0 %v17804_v7  ;;  %v17867_v7 = vld [vmem:[#allocation2 + $0x4f0] ss:$24 sps:$4 sm:$0xff]  }
 0xac3   :  { %11326 = vmatprep.subr.bf16.mxu0 %v17812_v61  ;;  %v17875_v61 = vld [vmem:[#allocation2 + $0x4c4] ss:$24 sps:$4 sm:$0xff]  }
 0xac4   :  { %11368 = vmatpush1.bf16.msra.mxu1 %v17807_v63  ;;  %v17870_v63 = vld [vmem:[#allocation2 + $0x1c0] ss:$24 sps:$4 sm:$0xff]  }
 0xac5   :  { %11369 = vmatprep.subr.bf16.mxu1 %v17815_v17  ;;  %v17878_v17 = vld [vmem:[#allocation2 + $0x194] ss:$24 sps:$4 sm:$0xff]  }
 0xac6   :  { %11327 = vmatpush1.bf16.msra.mxu0 %v17810_v10  ;;  %v17873_v10 = vld [vmem:[#allocation2 + $0x4c0] ss:$24 sps:$4 sm:$0xff]  }
 0xac7   :  { %11328 = vmatprep.subr.bf16.mxu0 %v17818_v41  ;;  %v17881_v41 = vld [vmem:[#allocation2 + $0x494] ss:$24 sps:$4 sm:$0xff]  }
 0xac8   :  { %11370 = vmatpush1.bf16.msra.mxu1 %v17813_v6  ;;  %v17876_v6 = vld [vmem:[#allocation2 + $0x190] ss:$24 sps:$4 sm:$0xff]  }
 0xac9   :  { %11371 = vmatprep.subr.bf16.mxu1 %v17821_v23  ;;  %v17884_v23 = vld [vmem:[#allocation2 + $0x764] ss:$24 sps:$4 sm:$0xff]  }
 0xaca   :  { %11329 = vmatpush1.bf16.msra.mxu0 %v17816_v21  ;;  %v17879_v21 = vld [vmem:[#allocation2 + $0x490] ss:$24 sps:$4 sm:$0xff]  }
 0xacb   :  { %11330 = vmatprep.subr.bf16.mxu0 %v17824_v22  ;;  %v17882_v22 = vld [vmem:[#allocation2 + $0x760] ss:$24 sps:$4 sm:$0xff]  }
 0xacc   :  { %11372 = vmatpush1.bf16.msra.mxu1 %v17819_v30  ;;  %v17887_v30 = vld [vmem:[#allocation2 + $0x734] ss:$24 sps:$4 sm:$0xff]  }
 0xacd   :  { %11373 = vmatprep.subr.bf16.mxu1 %v17827_v55  ;;  %v17885_v55 = vld [vmem:[#allocation2 + $0x730] ss:$24 sps:$4 sm:$0xff]  }
 0xace   :  { %11331 = vmatpush1.bf16.msra.mxu0 %v17822_v8  ;;  %v17890_v8 = vld [vmem:[#allocation2 + $0x704] ss:$24 sps:$4 sm:$0xff]  }
 0xacf   :  { %11332 = vmatprep.subr.bf16.mxu0 %v17830_v32  ;;  %v17888_v32 = vld [vmem:[#allocation2 + $0x700] ss:$24 sps:$4 sm:$0xff]  }
 0xad0   :  { %11374 = vmatpush1.bf16.msra.mxu1 %v17825_v34  ;;  %v17893_v34 = vld [vmem:[#allocation2 + $0x6d4] ss:$24 sps:$4 sm:$0xff]  }
 0xad1   :  { %11375 = vmatprep.subr.bf16.mxu1 %v17833_v42  ;;  %v17891_v42 = vld [vmem:[#allocation2 + $0x6d0] ss:$24 sps:$4 sm:$0xff]  }
 0xad2   :  { %11333 = vmatpush1.bf16.msra.mxu0 %v17828_v27  ;;  %v17896_v27 = vld [vmem:[#allocation2 + $0x6a4] ss:$24 sps:$4 sm:$0xff]  }
 0xad3   :  { %11334 = vmatprep.subr.bf16.mxu0 %v17836_v31  ;;  %v17894_v31 = vld [vmem:[#allocation2 + $0x6a0] ss:$24 sps:$4 sm:$0xff]  }
 0xad4   :  { %11376 = vmatpush1.bf16.msra.mxu1 %v17831_v16  ;;  %v17897_v16 = vld [vmem:[#allocation2 + $0x670] ss:$24 sps:$4 sm:$0xff]  }
 0xad5   :  { %11377 = vmatprep.subr.bf16.mxu1 %v17839_v2  ;;  %v17905_v2 = vld [vmem:[#allocation2 + $0x614] ss:$24 sps:$4 sm:$0xff]  }
 0xad6   :  { %11335 = vmatpush2.bf16.msra.mxu0 %v17834_v13  ;;  %v17903_v13 = vld [vmem:[#allocation2 + $0x610] ss:$24 sps:$4 sm:$0xff]  }
 0xad7   :  { %11336 = vmatprep.subr.bf16.mxu0 %v17842_v24  ;;  %v17908_v24 = vld [vmem:[#allocation2 + $0x8e4] ss:$24 sps:$4 sm:$0xff]  }
 0xad8   :  { %11378 = vmatpush2.bf16.msra.mxu1 %v17837_v9  ;;  %v17906_v9 = vld [vmem:[#allocation2 + $0x8e0] ss:$24 sps:$4 sm:$0xff]  }
 0xad9   :  { %11379 = vmatprep.subr.bf16.mxu1 %v17845_v4  ;;  %v17911_v4 = vld [vmem:[#allocation2 + $0x8b4] ss:$24 sps:$4 sm:$0xff]  }
 0xada   :  { %11337 = vmatpush2.bf16.msra.mxu0 %v17840_v54  ;;  %v17909_v54 = vld [vmem:[#allocation2 + $0x8b0] ss:$24 sps:$4 sm:$0xff]  }
 0xadb   :  { %11338 = vmatprep.subr.bf16.mxu0 %v17848_v58  ;;  %v17914_v58 = vld [vmem:[#allocation2 + $0x884] ss:$24 sps:$4 sm:$0xff]  }
 0xadc   :  { %11380 = vmatpush2.bf16.msra.mxu1 %v17843_v33  ;;  %v17912_v33 = vld [vmem:[#allocation2 + $0x880] ss:$24 sps:$4 sm:$0xff]  }
 0xadd   :  { %11381 = vmatprep.subr.bf16.mxu1 %v17851_v28  ;;  %v17917_v28 = vld [vmem:[#allocation2 + $0x854] ss:$24 sps:$4 sm:$0xff]  }
 0xade   :  { %11339 = vmatpush2.bf16.msra.mxu0 %v17846_v53  ;;  %v17915_v53 = vld [vmem:[#allocation2 + $0x850] ss:$24 sps:$4 sm:$0xff]  }
 0xadf   :  { %11340 = vmatprep.subr.bf16.mxu0 %v17854_v26  ;;  %v17920_v26 = vld [vmem:[#allocation2 + $0x824] ss:$24 sps:$4 sm:$0xff]  }
 0xae0   :  { %11382 = vmatpush2.bf16.msra.mxu1 %v17849_v1  ;;  %v17918_v1 = vld [vmem:[#allocation2 + $0x820] ss:$24 sps:$4 sm:$0xff]  }
 0xae1   :  { %11383 = vmatprep.subr.bf16.mxu1 %v17857_v59  ;;  %v17923_v59 = vld [vmem:[#allocation2 + $0x7f4] ss:$24 sps:$4 sm:$0xff]  }
 0xae2   :  { %11341 = vmatpush2.bf16.msra.mxu0 %v17852_v15  ;;  %v17921_v15 = vld [vmem:[#allocation2 + $0x7f0] ss:$24 sps:$4 sm:$0xff]  }
 0xae3   :  { %11342 = vmatprep.subr.bf16.mxu0 %v17860_v40 }
 0xae4   :  { %11384 = vmatpush2.bf16.msra.mxu1 %v17855_v14  ;;  %v17926_v14 = vld [vmem:[#allocation2 + $0x7c4] ss:$24 sps:$4 sm:$0xff]  }
 0xae5   :  { %11385 = vmatprep.subr.bf16.mxu1 %v17863_v56  ;;  %v19451_v56 = vld [vmem:[#allocation16] sm:$0x3f] }
 0xae6   :  { %11343 = vmatpush2.bf16.msra.mxu0 %v17858_v20  ;;  %v17924_v20 = vld [vmem:[#allocation2 + $0x7c0] ss:$24 sps:$4 sm:$0xff]  }
 0xae7   :  { %11344 = vmatprep.subr.bf16.mxu0 %v17866_v11 }
 0xae8   :  { %11386 = vmatpush2.bf16.msra.mxu1 %v17861_v18 }
 0xae9   :  { %11387 = vmatprep.subr.bf16.mxu1 %v17869_v46  ;;  %v17929_v46 = vld [vmem:[#allocation2 + $0x794] ss:$24 sps:$4 sm:$0xff]  }
 0xaea   :  { %11345 = vmatpush2.bf16.msra.mxu0 %v17864_v25  ;;  %v9593_v25 = vrot.slane %v19451_v56, %v18870_v37 }
 0xaeb   :  { %11346 = vmatprep.subr.bf16.mxu0 %v17872_v43  ;;  %v9597_v43 = vrot.slane %v19451_v56, %v19681_v0 }
 0xaec   :  { %11388 = vmatpush2.bf16.msra.mxu1 %v17867_v7  ;;  %v17927_v7 = vld [vmem:[#allocation2 + $0x790] ss:$24 sps:$4 sm:$0xff]  }
 0xaed   :  { %11389 = vmatprep.subr.bf16.mxu1 %v17875_v61 }
 0xaee   :  { %11347 = vmatpush2.bf16.msra.mxu0 %v17870_v63 }
 0xaef   :  { %11348 = vmatprep.subr.bf16.mxu0 %v17878_v17 }
 0xaf0   :  { %11390 = vmatpush2.bf16.msra.mxu1 %v17873_v10 }
 0xaf1   :  { %11391 = vmatprep.subr.bf16.mxu1 %v17881_v41 }
 0xaf2   :  { %11349 = vmatpush2.bf16.msra.mxu0 %v17876_v6 }
 0xaf3   :  { %11404 = vmatprep.subr.bf16.mxu0 %v17884_v23 }
 0xaf4   :  { %11392 = vmatpush2.bf16.msra.mxu1 %v17879_v21 }
 0xaf5   :  { %11351 = vmatmul.mubr.bf16.vlgmr.msra.gmra.mxu0 %v19422_v49  ;;  %v17899_v49 = vld [vmem:[#allocation2 + $0x674] ss:$24 sps:$4 sm:$0xff]   ;;  %v11094_v40 = vpop.f32.mrf.mxu0 }
 0xaf6   :  { %11405 = vmatpush1.bf16.msra.mxu0 %v17882_v22  ;;  %11436 = vmatprep.mubr.bf16.mxu0 %v19426_v60  ;;  %v17902_v60 = vld [vmem:[#allocation2 + $0x644] ss:$24 sps:$4 sm:$0xff]   ;;  %v11095_v17 = vadd.f32 %v11094_v40, %v9593_v25 }
 0xaf7   :  { %11394 = vmatmul.mubr.bf16.vlgmr.msra.gmra.mxu1 %v19430_v50  ;;  %11406 = vmatprep.subr.bf16.mxu0 %v17887_v30  ;;  %v17900_v50 = vld [vmem:[#allocation2 + $0x640] ss:$24 sps:$4 sm:$0xff]   ;;  %v11096_v11 = vpop.f32.mrf.mxu0  ;;  %v11137_v18 = vpop.f32.mrf.mxu1 }
 0xaf8   :  { %v11097_v10 = vadd.f32 %v11096_v11, %v9597_v43  ;;  %v11138_v23 = vadd.f32 %v11137_v18, %v11095_v17 }
 0xaf9   :  { %v11098_v61 = vpop.f32.mrf.mxu0  ;;  %v11139_v63 = vpop.f32.mrf.mxu1 }
 0xafa   :  { %11407 = vmatpush1.bf16.msra.mxu0 %v17885_v55  ;;  %v11099_v21 = vadd.f32 %v11098_v61, %v9593_v25  ;;  %v11140_v30 = vadd.f32 %v11139_v63, %v11097_v10 }
 0xafb   :  { %11408 = vmatprep.subr.bf16.mxu0 %v17890_v8  ;;  %v11100_v41 = vpop.f32.mrf.mxu0  ;;  %v11141_v6 = vpop.f32.mrf.mxu1 }
 0xafc   :  { %v11101_v55 = vadd.f32 %v11100_v41, %v9597_v43 }
 0xafe   :  { %11409 = vmatpush1.bf16.msra.mxu0 %v17888_v32  ;;  %v11143_v32 = vpop.f32.mrf.mxu1 }
 0xaff   :  { %11410 = vmatprep.subr.bf16.mxu0 %v17893_v34 }
 0xb02   :  { %11411 = vmatpush1.bf16.msra.mxu0 %v17891_v42  ;;  %v11142_v42 = vadd.f32 %v11141_v6, %v11099_v21 }
 0xb03   :  { %11412 = vmatprep.subr.bf16.mxu0 %v17896_v27 }
 0xb06   :  { %11413 = vmatpush1.bf16.msra.mxu0 %v17894_v31 }
 0xb07   :  { %11414 = vmatprep.subr.bf16.mxu0 %v17899_v49 }
 0xb0a   :  { %11415 = vmatpush1.bf16.msra.mxu0 %v17897_v16  ;;  %v11144_v16 = vadd.f32 %v11143_v32, %v11101_v55 }
 0xb0b   :  { %11416 = vmatprep.subr.bf16.mxu0 %v17902_v60 }
 0xb0e   :  { %11417 = vmatpush1.bf16.msra.mxu0 %v17900_v50 }
 0xb0f   :  { %11418 = vmatprep.subr.bf16.mxu0 %v17905_v2 }
 0xb12   :  { %11419 = vmatpush1.bf16.msra.mxu0 %v17903_v13 }
 0xb13   :  { %11420 = vmatprep.subr.bf16.mxu0 %v17908_v24 }
 0xb16   :  { %11421 = vmatpush2.bf16.msra.mxu0 %v17906_v9 }
 0xb17   :  { %11422 = vmatprep.subr.bf16.mxu0 %v17911_v4 }
 0xb1a   :  { %11423 = vmatpush2.bf16.msra.mxu0 %v17909_v54 }
 0xb1b   :  { %11424 = vmatprep.subr.bf16.mxu0 %v17914_v58 }
 0xb1e   :  { %11425 = vmatpush2.bf16.msra.mxu0 %v17912_v33 }
 0xb1f   :  { %11426 = vmatprep.subr.bf16.mxu0 %v17917_v28 }
 0xb22   :  { %11427 = vmatpush2.bf16.msra.mxu0 %v17915_v53 }
 0xb23   :  { %11428 = vmatprep.subr.bf16.mxu0 %v17920_v26 }
 0xb26   :  { %11429 = vmatpush2.bf16.msra.mxu0 %v17918_v1 }
 0xb27   :  { %11430 = vmatprep.subr.bf16.mxu0 %v17923_v59 }
 0xb2a   :  { %11431 = vmatpush2.bf16.msra.mxu0 %v17921_v15 }
 0xb2b   :  { %11432 = vmatprep.subr.bf16.mxu0 %v17926_v14 }
 0xb2e   :  { %11433 = vmatpush2.bf16.msra.mxu0 %v17924_v20 }
 0xb2f   :  { %11434 = vmatprep.subr.bf16.mxu0 %v17929_v46 }
 0xb32   :  { %11435 = vmatpush2.bf16.msra.mxu0 %v17927_v7 }
 0xb35   :  { %v11180_v22 = vpop.f32.mrf.mxu0  ;;  %11437 = vmatmul.mubr.bf16.vlgmr.msra.gmra.mxu0 %v19438_v62 }
 0xb36   :  { %v11181_v8 = vadd.f32 %v11180_v22, %v11138_v23 }
 0xb37   :  { %v11182_v34 = vpop.f32.mrf.mxu0 }
 0xb38   :  { %v11447_v27 = vmul.f32 %v11181_v8, %v11181_v8  ;;  %v11183_v31 = vadd.f32 %v11182_v34, %v11140_v30  ;;  %v11223_v34 = vpop.f32.mrf.mxu1 }
 0xb39   :  { %v11184_v49 = vpop.f32.mrf.mxu0 }
 0xb3a   :  { %v11459_v60 = vmul.f32 %v11447_v27, %v11181_v8  ;;  %v11448_v50 = vmul.f32 %v11183_v31, %v11183_v31  ;;  %v11185_v2 = vadd.f32 %v11184_v49, %v11142_v42  ;;  %v11225_v42 = vpop.f32.mrf.mxu1  ;;  %v9601_v27 = vrot.slane %v19451_v56, %v18911_v29 }
 0xb3b   :  { %v11186_v13 = vpop.f32.mrf.mxu0 }
 0xb3c   :  { %v11471_v24 = vmul.f32 0.044715, %v11459_v60  ;;  %v11460_v9 = vmul.f32 %v11448_v50, %v11183_v31  ;;  %v11453_v4 = vmul.f32 %v11185_v2, %v11185_v2  ;;  %v11187_v54 = vadd.f32 %v11186_v13, %v11144_v16  ;;  %v11227_v49 = vpop.f32.mrf.mxu1 }
 0xb3d   :  { %v11224_v16 = vadd.f32 %v11223_v34, %v9601_v27 }
 0xb3e   :  { %v11483_v58 = vadd.f32 %v11471_v24, %v11181_v8  ;;  %v11472_v62 = vmul.f32 0.044715, %v11460_v9  ;;  %v11465_v33 = vmul.f32 %v11453_v4, %v11185_v2  ;;  %v11454_v28 = vmul.f32 %v11187_v54, %v11187_v54  ;;  %v11229_v60 = vpop.f32.mrf.mxu1 }
 0xb3f   :  { %v11228_v9 = vadd.f32 %v11227_v49, %v9601_v27 }
 0xb40   :  { %v11495_v53 = vmul.f32 0.7978846, %v11483_v58  ;;  %v11484_v26 = vadd.f32 %v11472_v62, %v11183_v31  ;;  %v11477_v1 = vmul.f32 0.044715, %v11465_v33  ;;  %v11466_v59 = vmul.f32 %v11454_v28, %v11187_v54 }
 0xb42   :  { %17930 = vtanh.f32 %v11495_v53  ;;  %v11496_v15 = vmul.f32 0.7978846, %v11484_v26  ;;  %v11489_v40 = vadd.f32 %v11477_v1, %v11185_v2  ;;  %v11478_v14 = vmul.f32 0.044715, %v11466_v59 }
 0xb44   :  { %17932 = vtanh.f32 %v11496_v15  ;;  %v11501_v20 = vmul.f32 0.7978846, %v11489_v40  ;;  %v11490_v11 = vadd.f32 %v11478_v14, %v11187_v54 }
 0xb46   :  { %17934 = vtanh.f32 %v11501_v20  ;;  %v11502_v18 = vmul.f32 0.7978846, %v11490_v11 }
 0xb48   :  { %17936 = vtanh.f32 %v11502_v18 }
 0xb4f   :  { %v17931_v46 = vpop.eup %17930 }
 0xb50   :  { %v11519_v25 = vadd.f32 1.0, %v17931_v46 }
 0xb51   :  { %v17933_v43 = vpop.eup %17932 }
 0xb52   :  { %v11531_v7 = vmul.f32 0.5, %v11519_v25  ;;  %v11520_v61 = vadd.f32 1.0, %v17933_v43 }
 0xb53   :  { %v17935_v63 = vpop.eup %17934 }
 0xb54   :  { %v19458_v17 = vmul.f32 %v11531_v7, %v11181_v8  ;;  %v11532_v10 = vmul.f32 0.5, %v11520_v61  ;;  %v11525_v41 = vadd.f32 1.0, %v17935_v63  ;;  %v9605_v8 = vrot.slane %v19451_v56, %v18914_v35 }
 0xb55   :  { %v17937_v6 = vpop.eup %17936 }
 0xb56   :  { %v19460_v23 = vmul.f32 %v11532_v10, %v11183_v31  ;;  %v11537_v21 = vmul.f32 0.5, %v11525_v41  ;;  %v11526_v22 = vadd.f32 1.0, %v17937_v6  ;;  %v11226_v31 = vadd.f32 %v11225_v42, %v9605_v8 }
 0xb57   :  { %v11230_v33 = vadd.f32 %v11229_v60, %v9605_v8 }
 0xb58   :  { %v19462_v30 = vmul.f32 %v11537_v21, %v11185_v2  ;;  %v11538_v55 = vmul.f32 0.5, %v11526_v22 }
 0xb5a   :  { %v19464_v32 = vmul.f32 %v11538_v55, %v11187_v54 }
 0xb75   :  { %v11266_v50 = vpop.f32.mrf.mxu0 }
 0xb76   :  { %v11267_v13 = vadd.f32 %v11266_v50, %v11224_v16 }
 0xb77   :  { %v11268_v24 = vpop.f32.mrf.mxu0  ;;  %v11309_v2 = vpop.f32.mrf.mxu1 }
 0xb78   :  { %v11269_v4 = vadd.f32 %v11268_v24, %v11226_v31  ;;  %v11310_v54 = vadd.f32 %v11309_v2, %v11267_v13 }
 0xb79   :  { %v11270_v58 = vpop.f32.mrf.mxu0  ;;  %v11311_v62 = vpop.f32.mrf.mxu1 }
 0xb7a   :  { %v11449_v28 = vmul.f32 %v11310_v54, %v11310_v54  ;;  %v11271_v53 = vadd.f32 %v11270_v58, %v11228_v9  ;;  %v11312_v26 = vadd.f32 %v11311_v62, %v11269_v4 }
 0xb7b   :  { %v11272_v1 = vpop.f32.mrf.mxu0  ;;  %v11313_v59 = vpop.f32.mrf.mxu1 }
 0xb7c   :  { %v11461_v15 = vmul.f32 %v11449_v28, %v11310_v54  ;;  %v11450_v40 = vmul.f32 %v11312_v26, %v11312_v26  ;;  %v11273_v14 = vadd.f32 %v11272_v1, %v11230_v33  ;;  %v11314_v20 = vadd.f32 %v11313_v59, %v11271_v53 }
 0xb7d   :  { %v11315_v11 = vpop.f32.mrf.mxu1 }
 0xb7e   :  { %v11473_v18 = vmul.f32 0.044715, %v11461_v15  ;;  %v11462_v46 = vmul.f32 %v11450_v40, %v11312_v26  ;;  %v11455_v25 = vmul.f32 %v11314_v20, %v11314_v20  ;;  %v11316_v43 = vadd.f32 %v11315_v11, %v11273_v14 }
 0xb7f   :  { %v9609_v11 = vrot.slane %v19451_v56, %v18942_v36 }
 0xb80   :  { %v11485_v7 = vadd.f32 %v11473_v18, %v11310_v54  ;;  %v11474_v61 = vmul.f32 0.044715, %v11462_v46  ;;  %v11467_v63 = vmul.f32 %v11455_v25, %v11314_v20  ;;  %v11456_v10 = vmul.f32 %v11316_v43, %v11316_v43 }
 0xb82   :  { %v11497_v41 = vmul.f32 0.7978846, %v11485_v7  ;;  %v11486_v6 = vadd.f32 %v11474_v61, %v11312_v26  ;;  %v11479_v21 = vmul.f32 0.044715, %v11467_v63  ;;  %v11468_v22 = vmul.f32 %v11456_v10, %v11316_v43 }
 0xb84   :  { %17938 = vtanh.f32 %v11497_v41  ;;  %v11498_v55 = vmul.f32 0.7978846, %v11486_v6  ;;  %v11491_v34 = vadd.f32 %v11479_v21, %v11314_v20  ;;  %v11480_v42 = vmul.f32 0.044715, %v11468_v22 }
 0xb86   :  { %17940 = vtanh.f32 %v11498_v55  ;;  %v11503_v27 = vmul.f32 0.7978846, %v11491_v34  ;;  %v11492_v49 = vadd.f32 %v11480_v42, %v11316_v43 }
 0xb88   :  { %17942 = vtanh.f32 %v11503_v27  ;;  %v11504_v8 = vmul.f32 0.7978846, %v11492_v49 }
 0xb8a   :  { %17944 = vtanh.f32 %v11504_v8 }
 0xb91   :  { %v17939_v16 = vpop.eup %17938 }
 0xb92   :  { %v11521_v60 = vadd.f32 1.0, %v17939_v16 }
 0xb93   :  { %v17941_v31 = vpop.eup %17940 }
 0xb94   :  { %v11533_v50 = vmul.f32 0.5, %v11521_v60  ;;  %v11522_v13 = vadd.f32 1.0, %v17941_v31 }
 0xb95   :  { %v17943_v24 = vpop.eup %17942 }
 0xb96   :  { %v19470_v2 = vmul.f32 %v11533_v50, %v11310_v54  ;;  %v11534_v9 = vmul.f32 0.5, %v11522_v13  ;;  %v11527_v4 = vadd.f32 1.0, %v17943_v24  ;;  %v9613_v54 = vrot.slane %v19451_v56, %v19109_v52 }
 0xb97   :  { %v17945_v58 = vpop.eup %17944 }
 0xb98   :  { %v19472_v62 = vmul.f32 %v11534_v9, %v11312_v26  ;;  %v11539_v33 = vmul.f32 0.5, %v11527_v4  ;;  %v11528_v28 = vadd.f32 1.0, %v17945_v58 }
 0xb9a   :  { %v19474_v53 = vmul.f32 %v11539_v33, %v11314_v20  ;;  %v11540_v1 = vmul.f32 0.5, %v11528_v28 }
 0xb9c   :  { %v19476_v59 = vmul.f32 %v11540_v1, %v11316_v43 }
 0xbb5   :  { %v11352_v15 = vpop.f32.mrf.mxu0 }
 0xbb6   :  { %v11353_v26 = vadd.f32 %v11352_v15, %v9609_v11 }
 0xbb7   :  { %v11354_v40 = vpop.f32.mrf.mxu0  ;;  %v11395_v14 = vpop.f32.mrf.mxu1 }
 0xbb8   :  { %v11355_v25 = vadd.f32 %v11354_v40, %v9613_v54  ;;  %v11396_v20 = vadd.f32 %v11395_v14, %v11353_v26 }
 0xbb9   :  { %v11356_v18 = vpop.f32.mrf.mxu0  ;;  %v11397_v46 = vpop.f32.mrf.mxu1 }
 0xbba   :  { %v11357_v63 = vadd.f32 %v11356_v18, %v9609_v11  ;;  %v11398_v43 = vadd.f32 %v11397_v46, %v11355_v25 }
 0xbbb   :  { %v11358_v7 = vpop.f32.mrf.mxu0  ;;  %v11399_v61 = vpop.f32.mrf.mxu1 }
 0xbbc   :  { %v11359_v41 = vadd.f32 %v11358_v7, %v9613_v54  ;;  %v11400_v55 = vadd.f32 %v11399_v61, %v11357_v63 }
 0xbbd   :  { %v11401_v21 = vpop.f32.mrf.mxu1 }
 0xbbe   :  { %v11402_v49 = vadd.f32 %v11401_v21, %v11359_v41 }
 0xbf5   :  { %v11438_v10 = vpop.f32.mrf.mxu0 }
 0xbf6   :  { %v11439_v6 = vadd.f32 %v11438_v10, %v11396_v20 }
 0xbf7   :  { %v11440_v22 = vpop.f32.mrf.mxu0 }
 0xbf8   :  { %v11451_v34 = vmul.f32 %v11439_v6, %v11439_v6  ;;  %v11441_v42 = vadd.f32 %v11440_v22, %v11398_v43 }
 0xbf9   :  { %v11442_v27 = vpop.f32.mrf.mxu0 }
 0xbfa   :  { %v11463_v56 = vmul.f32 %v11451_v34, %v11439_v6  ;;  %v11452_v8 = vmul.f32 %v11441_v42, %v11441_v42  ;;  %v11443_v16 = vadd.f32 %v11442_v27, %v11400_v55 }
 0xbfb   :  { %v11444_v60 = vpop.f32.mrf.mxu0 }
 0xbfc   :  { %v11475_v31 = vmul.f32 0.044715, %v11463_v56  ;;  %v11464_v50 = vmul.f32 %v11452_v8, %v11441_v42  ;;  %v11457_v13 = vmul.f32 %v11443_v16, %v11443_v16  ;;  %v11445_v24 = vadd.f32 %v11444_v60, %v11402_v49 }
 0xbfe   :  { %v11487_v9 = vadd.f32 %v11475_v31, %v11439_v6  ;;  %v11476_v4 = vmul.f32 0.044715, %v11464_v50  ;;  %v11469_v58 = vmul.f32 %v11457_v13, %v11443_v16  ;;  %v11458_v33 = vmul.f32 %v11445_v24, %v11445_v24 }
 0xc00   :  { %v11499_v28 = vmul.f32 0.7978846, %v11487_v9  ;;  %v11488_v1 = vadd.f32 %v11476_v4, %v11441_v42  ;;  %v11481_v15 = vmul.f32 0.044715, %v11469_v58  ;;  %v11470_v40 = vmul.f32 %v11458_v33, %v11445_v24 }
 0xc02   :  { %17946 = vtanh.f32 %v11499_v28  ;;  %v11500_v14 = vmul.f32 0.7978846, %v11488_v1  ;;  %v11493_v11 = vadd.f32 %v11481_v15, %v11443_v16  ;;  %v11482_v54 = vmul.f32 0.044715, %v11470_v40 }
 0xc04   :  { %17948 = vtanh.f32 %v11500_v14  ;;  %v11505_v18 = vmul.f32 0.7978846, %v11493_v11  ;;  %v11494_v46 = vadd.f32 %v11482_v54, %v11445_v24 }
 0xc06   :  { %17950 = vtanh.f32 %v11505_v18  ;;  %v11506_v26 = vmul.f32 0.7978846, %v11494_v46 }
 0xc08   :  { %17952 = vtanh.f32 %v11506_v26 }
 0xc0f   :  { %v17947_v25 = vpop.eup %17946 }
 0xc10   :  { %v11523_v7 = vadd.f32 1.0, %v17947_v25 }
 0xc11   :  { %v17949_v61 = vpop.eup %17948 }
 0xc12   :  { %v11535_v20 = vmul.f32 0.5, %v11523_v7  ;;  %v11524_v63 = vadd.f32 1.0, %v17949_v61 }
 0xc13   :  { %v17951_v10 = vpop.eup %17950 }
 0xc14   :  { %v19482_v43 = vmul.f32 %v11535_v20, %v11439_v6  ;;  %v11536_v41 = vmul.f32 0.5, %v11524_v63  ;;  %v11529_v21 = vadd.f32 1.0, %v17951_v10 }
 0xc15   :  { %v17953_v22 = vpop.eup %17952 }
 0xc16   :  { %v19484_v55 = vmul.f32 %v11536_v41, %v11441_v42  ;;  %v11541_v34 = vmul.f32 0.5, %v11529_v21  ;;  %v11530_v27 = vadd.f32 1.0, %v17953_v22 }
 0xc18   :  { %v19486_v49 = vmul.f32 %v11541_v34, %v11443_v16  ;;  %v11542_v56 = vmul.f32 0.5, %v11530_v27 }
 0xc1a   :  { %v19488_v8 = vmul.f32 %v11542_v56, %v11445_v24 }
 0xc1b   :  { %18664 = dma.done.wait [#allocation4 + $0x1], 36864 }
 0xc1c   :  { %18665 = vsyncadd [#allocation4 + $0x1], 4294930432  ;;  %v19492_v60 = vpack.c.bf16 %v19464_v32, %v19460_v23  ;;  %v19496_v6 = vpack.c.bf16 %v19476_v59, %v19472_v62  ;;  %v17954_v42 = vld [vmem:[#allocation3 + $0x154] ss:$24 sps:$4 sm:$0xff]   ;;  %v17956_v16 = vld [vmem:[#allocation3 + $0x150] ss:$24 sps:$4 sm:$0xff]  }
 0xc1d   :  { %13323 = vmatprep.subr.bf16.mxu1 %v17954_v42  ;;  %v17957_v31 = vld [vmem:[#allocation3 + $0x454] ss:$24 sps:$4 sm:$0xff]   ;;  %v17959_v50 = vld [vmem:[#allocation3 + $0x450] ss:$24 sps:$4 sm:$0xff]   ;;  %v17960_v13 = vld [vmem:[#allocation3 + $0x124] ss:$24 sps:$4 sm:$0xff]  }
 0xc1e   :  { %13355 = vmatprep.mubr.bf16.mxu1 %v19492_v60  ;;  %13398 = vmatprep.mubr.bf16.mxu0 %v19496_v6  ;;  %v17962_v24 = vld [vmem:[#allocation3 + $0x120] ss:$24 sps:$4 sm:$0xff]   ;;  %v17963_v9 = vld [vmem:[#allocation3 + $0x424] ss:$24 sps:$4 sm:$0xff]   ;;  %v17966_v32 = vld [vmem:[#allocation3 + $0xf4] ss:$24 sps:$4 sm:$0xff]  }
 0xc1f   :  { %13324 = vmatpush1.bf16.msra.mxu1 %v17956_v16  ;;  %13366 = vmatprep.subr.bf16.mxu0 %v17957_v31  ;;  %v17965_v23 = vld [vmem:[#allocation3 + $0x420] ss:$24 sps:$4 sm:$0xff]   ;;  %v17968_v62 = vld [vmem:[#allocation3 + $0xf0] ss:$24 sps:$4 sm:$0xff]   ;;  %v17969_v59 = vld [vmem:[#allocation3 + $0x3f4] ss:$24 sps:$4 sm:$0xff]  }
 0xc20   :  { %13367 = vmatpush1.bf16.msra.mxu0 %v17959_v50  ;;  %13325 = vmatprep.subr.bf16.mxu1 %v17960_v13  ;;  %v17972_v4 = vld [vmem:[#allocation3 + $0xc4] ss:$24 sps:$4 sm:$0xff]   ;;  %v17971_v58 = vld [vmem:[#allocation3 + $0x3f0] ss:$24 sps:$4 sm:$0xff]   ;;  %v17974_v28 = vld [vmem:[#allocation3 + $0xc0] ss:$24 sps:$4 sm:$0xff]  }
 0xc21   :  { %13368 = vmatprep.subr.bf16.mxu0 %v17963_v9  ;;  %v17975_v33 = vld [vmem:[#allocation3 + $0x3c4] ss:$24 sps:$4 sm:$0xff]   ;;  %v17978_v1 = vld [vmem:[#allocation3 + $0x94] ss:$24 sps:$4 sm:$0xff]   ;;  %v17977_v15 = vld [vmem:[#allocation3 + $0x3c0] ss:$24 sps:$4 sm:$0xff]  }
 0xc22   :  { %v17981_v40 = vld [vmem:[#allocation3 + $0x394] ss:$24 sps:$4 sm:$0xff]   ;;  %v17980_v14 = vld [vmem:[#allocation3 + $0x90] ss:$24 sps:$4 sm:$0xff]   ;;  %v17984_v11 = vld [vmem:[#allocation3 + $0x64] ss:$24 sps:$4 sm:$0xff]  }
 0xc23   :  { %13326 = vmatpush1.bf16.msra.mxu1 %v17962_v24  ;;  %v17983_v54 = vld [vmem:[#allocation3 + $0x390] ss:$24 sps:$4 sm:$0xff]   ;;  %v17987_v18 = vld [vmem:[#allocation3 + $0x364] ss:$24 sps:$4 sm:$0xff]   ;;  %v17986_v46 = vld [vmem:[#allocation3 + $0x60] ss:$24 sps:$4 sm:$0xff]  }
 0xc24   :  { %13327 = vmatprep.subr.bf16.mxu1 %v17966_v32  ;;  %13369 = vmatpush1.bf16.msra.mxu0 %v17965_v23  ;;  %v17990_v26 = vld [vmem:[#allocation3 + $0x34] ss:$24 sps:$4 sm:$0xff]   ;;  %v17989_v25 = vld [vmem:[#allocation3 + $0x360] ss:$24 sps:$4 sm:$0xff]   ;;  %v17992_v61 = vld [vmem:[#allocation3 + $0x30] ss:$24 sps:$4 sm:$0xff]  }
 0xc25   :  { %13370 = vmatprep.subr.bf16.mxu0 %v17969_v59  ;;  %v17993_v7 = vld [vmem:[#allocation3 + $0x334] ss:$24 sps:$4 sm:$0xff]   ;;  %v17996_v20 = vld [vmem:[#allocation3 + $0x4] ss:$24 sps:$4 sm:$0xff]   ;;  %v17995_v63 = vld [vmem:[#allocation3 + $0x330] ss:$24 sps:$4 sm:$0xff]  }
 0xc26   :  { %v17999_v10 = vld [vmem:[#allocation3 + $0x304] ss:$24 sps:$4 sm:$0xff]   ;;  %v17998_v41 = vld [vmem:[#allocation3] ss:$24 sps:$4 sm:$0xff]   ;;  %v18002_v21 = vld [vmem:[#allocation3 + $0x2d4] ss:$24 sps:$4 sm:$0xff]  }
 0xc27   :  { %13328 = vmatpush1.bf16.msra.mxu1 %v17968_v62  ;;  %v18001_v22 = vld [vmem:[#allocation3 + $0x300] ss:$24 sps:$4 sm:$0xff]   ;;  %v18005_v34 = vld [vmem:[#allocation3 + $0x5d4] ss:$24 sps:$4 sm:$0xff]   ;;  %v18004_v27 = vld [vmem:[#allocation3 + $0x2d0] ss:$24 sps:$4 sm:$0xff]  }
 0xc28   :  { %13329 = vmatprep.subr.bf16.mxu1 %v17972_v4  ;;  %13371 = vmatpush1.bf16.msra.mxu0 %v17971_v58  ;;  %v18008_v56 = vld [vmem:[#allocation3 + $0x2a4] ss:$24 sps:$4 sm:$0xff]   ;;  %v18007_v42 = vld [vmem:[#allocation3 + $0x5d0] ss:$24 sps:$4 sm:$0xff]   ;;  %v18010_v31 = vld [vmem:[#allocation3 + $0x2a0] ss:$24 sps:$4 sm:$0xff]  }
 0xc29   :  { %13372 = vmatprep.subr.bf16.mxu0 %v17975_v33  ;;  %v18011_v16 = vld [vmem:[#allocation3 + $0x5a4] ss:$24 sps:$4 sm:$0xff]   ;;  %v18014_v50 = vld [vmem:[#allocation3 + $0x274] ss:$24 sps:$4 sm:$0xff]   ;;  %v18013_v13 = vld [vmem:[#allocation3 + $0x5a0] ss:$24 sps:$4 sm:$0xff]  }
 0xc2a   :  { %v18017_v24 = vld [vmem:[#allocation3 + $0x574] ss:$24 sps:$4 sm:$0xff]   ;;  %v18016_v9 = vld [vmem:[#allocation3 + $0x270] ss:$24 sps:$4 sm:$0xff]   ;;  %v18020_v23 = vld [vmem:[#allocation3 + $0x244] ss:$24 sps:$4 sm:$0xff]  }
 0xc2b   :  { %13330 = vmatpush1.bf16.msra.mxu1 %v17974_v28  ;;  %v18019_v32 = vld [vmem:[#allocation3 + $0x570] ss:$24 sps:$4 sm:$0xff]   ;;  %v18023_v62 = vld [vmem:[#allocation3 + $0x544] ss:$24 sps:$4 sm:$0xff]   ;;  %v18022_v59 = vld [vmem:[#allocation3 + $0x240] ss:$24 sps:$4 sm:$0xff]  }
 0xc2c   :  { %13331 = vmatprep.subr.bf16.mxu1 %v17978_v1  ;;  %13373 = vmatpush1.bf16.msra.mxu0 %v17977_v15  ;;  %v18026_v4 = vld [vmem:[#allocation3 + $0x214] ss:$24 sps:$4 sm:$0xff]   ;;  %v18025_v58 = vld [vmem:[#allocation3 + $0x540] ss:$24 sps:$4 sm:$0xff]   ;;  %v18028_v28 = vld [vmem:[#allocation3 + $0x210] ss:$24 sps:$4 sm:$0xff]  }
 0xc2d   :  { %13374 = vmatprep.subr.bf16.mxu0 %v17981_v40  ;;  %v18029_v33 = vld [vmem:[#allocation3 + $0x514] ss:$24 sps:$4 sm:$0xff]   ;;  %v18032_v1 = vld [vmem:[#allocation3 + $0x1e4] ss:$24 sps:$4 sm:$0xff]   ;;  %v18031_v15 = vld [vmem:[#allocation3 + $0x510] ss:$24 sps:$4 sm:$0xff]  }
 0xc2e   :  { %v18035_v40 = vld [vmem:[#allocation3 + $0x4e4] ss:$24 sps:$4 sm:$0xff]   ;;  %vm13900_vm1 = vcmask 1040384   ;;  %vm13945_vm2 = vcmask 1041408   ;;  %vm13967_vm3 = vcmask 1024  }
 0xc2f   :  { %13332 = vmatpush1.bf16.msra.mxu1 %v17980_v14  ;;  %v18034_v14 = vld [vmem:[#allocation3 + $0x1e0] ss:$24 sps:$4 sm:$0xff]  }
 0xc30   :  { %13333 = vmatprep.subr.bf16.mxu1 %v17984_v11  ;;  %13375 = vmatpush1.bf16.msra.mxu0 %v17983_v54  ;;  %v18038_v11 = vld [vmem:[#allocation3 + $0x1b4] ss:$24 sps:$4 sm:$0xff]   ;;  %v18037_v54 = vld [vmem:[#allocation3 + $0x4e0] ss:$24 sps:$4 sm:$0xff]  }
 0xc31   :  { %13376 = vmatprep.subr.bf16.mxu0 %v17987_v18  ;;  %v18041_v18 = vld [vmem:[#allocation3 + $0x4b4] ss:$24 sps:$4 sm:$0xff]  }
 0xc33   :  { %13334 = vmatpush1.bf16.msra.mxu1 %v17986_v46  ;;  %v18040_v46 = vld [vmem:[#allocation3 + $0x1b0] ss:$24 sps:$4 sm:$0xff]  }
 0xc34   :  { %13335 = vmatprep.subr.bf16.mxu1 %v17990_v26  ;;  %13377 = vmatpush1.bf16.msra.mxu0 %v17989_v25  ;;  %v18044_v26 = vld [vmem:[#allocation3 + $0x184] ss:$24 sps:$4 sm:$0xff]   ;;  %v18043_v25 = vld [vmem:[#allocation3 + $0x4b0] ss:$24 sps:$4 sm:$0xff]  }
 0xc35   :  { %13378 = vmatprep.subr.bf16.mxu0 %v17993_v7  ;;  %v18047_v7 = vld [vmem:[#allocation3 + $0x484] ss:$24 sps:$4 sm:$0xff]  }
 0xc37   :  { %13336 = vmatpush1.bf16.msra.mxu1 %v17992_v61  ;;  %v18046_v61 = vld [vmem:[#allocation3 + $0x180] ss:$24 sps:$4 sm:$0xff]  }
 0xc38   :  { %13337 = vmatprep.subr.bf16.mxu1 %v17996_v20  ;;  %13379 = vmatpush1.bf16.msra.mxu0 %v17995_v63  ;;  %v18052_v20 = vld [vmem:[#allocation3 + $0x754] ss:$24 sps:$4 sm:$0xff]   ;;  %v18049_v63 = vld [vmem:[#allocation3 + $0x480] ss:$24 sps:$4 sm:$0xff]  }
 0xc39   :  { %13380 = vmatprep.subr.bf16.mxu0 %v17999_v10  ;;  %v19502_v10 = vpack.c.bf16 %v19462_v30, %v19458_v17  ;;  %v18061_v17 = vld [vmem:[#allocation3 + $0x12c] ss:$24 sps:$4 sm:$0xff]   ;;  %v18056_v30 = vld [vmem:[#allocation3 + $0x720] ss:$24 sps:$4 sm:$0xff]  }
 0xc3b   :  { %13338 = vmatpush1.bf16.msra.mxu1 %v17998_v41  ;;  %v18055_v41 = vld [vmem:[#allocation3 + $0x15c] ss:$24 sps:$4 sm:$0xff]  }
 0xc3c   :  { %13339 = vmatprep.subr.bf16.mxu1 %v18002_v21  ;;  %13381 = vmatpush1.bf16.msra.mxu0 %v18001_v22  ;;  %v18050_v21 = vld [vmem:[#allocation3 + $0x750] ss:$24 sps:$4 sm:$0xff]   ;;  %v19506_v22 = vpack.c.bf16 %v19488_v8, %v19484_v55  ;;  %v18064_v55 = vld [vmem:[#allocation3 + $0x6f4] ss:$24 sps:$4 sm:$0xff]  }
 0xc3d   :  { %13382 = vmatprep.subr.bf16.mxu0 %v18005_v34  ;;  %v19510_v34 = vpack.c.bf16 %v19474_v53, %v19470_v2  ;;  %v18059_v8 = vld [vmem:[#allocation3 + $0x128] ss:$24 sps:$4 sm:$0xff]   ;;  %v18067_v2 = vld [vmem:[#allocation3 + $0xfc] ss:$24 sps:$4 sm:$0xff]  }
 0xc3e   :  { %v18062_v53 = vld [vmem:[#allocation3 + $0x6f0] ss:$24 sps:$4 sm:$0xff]  }
 0xc3f   :  { %13340 = vmatpush2.bf16.msra.mxu1 %v18004_v27  ;;  %v18058_v27 = vld [vmem:[#allocation3 + $0x724] ss:$24 sps:$4 sm:$0xff]  }
 0xc40   :  { %13341 = vmatprep.subr.bf16.mxu1 %v18008_v56  ;;  %13383 = vmatpush2.bf16.msra.mxu0 %v18007_v42  ;;  %v18053_v56 = vld [vmem:[#allocation3 + $0x158] ss:$24 sps:$4 sm:$0xff]   ;;  %v18070_v42 = vld [vmem:[#allocation3 + $0x6c4] ss:$24 sps:$4 sm:$0xff]  }
 0xc41   :  { %13384 = vmatprep.subr.bf16.mxu0 %v18011_v16  ;;  %v18065_v16 = vld [vmem:[#allocation3 + $0xf8] ss:$24 sps:$4 sm:$0xff]  }
 0xc43   :  { %13342 = vmatpush2.bf16.msra.mxu1 %v18010_v31  ;;  %v18073_v31 = vld [vmem:[#allocation3 + $0xcc] ss:$24 sps:$4 sm:$0xff]  }
 0xc44   :  { %13343 = vmatprep.subr.bf16.mxu1 %v18014_v50  ;;  %13385 = vmatpush2.bf16.msra.mxu0 %v18013_v13  ;;  %v18068_v50 = vld [vmem:[#allocation3 + $0x6c0] ss:$24 sps:$4 sm:$0xff]   ;;  %v18076_v13 = vld [vmem:[#allocation3 + $0x694] ss:$24 sps:$4 sm:$0xff]  }
 0xc45   :  { %13386 = vmatprep.subr.bf16.mxu0 %v18017_v24  ;;  %v18071_v24 = vld [vmem:[#allocation3 + $0xc8] ss:$24 sps:$4 sm:$0xff]  }
 0xc47   :  { %13344 = vmatpush2.bf16.msra.mxu1 %v18016_v9  ;;  %v18079_v9 = vld [vmem:[#allocation3 + $0x9c] ss:$24 sps:$4 sm:$0xff]  }
 0xc48   :  { %13345 = vmatprep.subr.bf16.mxu1 %v18020_v23  ;;  %13387 = vmatpush2.bf16.msra.mxu0 %v18019_v32  ;;  %v18074_v23 = vld [vmem:[#allocation3 + $0x690] ss:$24 sps:$4 sm:$0xff]   ;;  %v18082_v32 = vld [vmem:[#allocation3 + $0x664] ss:$24 sps:$4 sm:$0xff]  }
 0xc49   :  { %13388 = vmatprep.subr.bf16.mxu0 %v18023_v62  ;;  %v18077_v62 = vld [vmem:[#allocation3 + $0x98] ss:$24 sps:$4 sm:$0xff]  }
 0xc4b   :  { %13346 = vmatpush2.bf16.msra.mxu1 %v18022_v59  ;;  %v18085_v59 = vld [vmem:[#allocation3 + $0x6c] ss:$24 sps:$4 sm:$0xff]  }
 0xc4c   :  { %13347 = vmatprep.subr.bf16.mxu1 %v18026_v4  ;;  %13389 = vmatpush2.bf16.msra.mxu0 %v18025_v58  ;;  %v18080_v4 = vld [vmem:[#allocation3 + $0x660] ss:$24 sps:$4 sm:$0xff]   ;;  %v18088_v58 = vld [vmem:[#allocation3 + $0x634] ss:$24 sps:$4 sm:$0xff]  }
 0xc4d   :  { %13390 = vmatprep.subr.bf16.mxu0 %v18029_v33  ;;  %v18083_v33 = vld [vmem:[#allocation3 + $0x68] ss:$24 sps:$4 sm:$0xff]  }
 0xc4f   :  { %13348 = vmatpush2.bf16.msra.mxu1 %v18028_v28  ;;  %v18091_v28 = vld [vmem:[#allocation3 + $0x3c] ss:$24 sps:$4 sm:$0xff]  }
 0xc50   :  { %13349 = vmatprep.subr.bf16.mxu1 %v18032_v1  ;;  %13391 = vmatpush2.bf16.msra.mxu0 %v18031_v15  ;;  %v18086_v1 = vld [vmem:[#allocation3 + $0x630] ss:$24 sps:$4 sm:$0xff]   ;;  %v18094_v15 = vld [vmem:[#allocation3 + $0x604] ss:$24 sps:$4 sm:$0xff]  }
 0xc51   :  { %13392 = vmatprep.subr.bf16.mxu0 %v18035_v40  ;;  %v18089_v40 = vld [vmem:[#allocation3 + $0x38] ss:$24 sps:$4 sm:$0xff]  }
 0xc53   :  { %13350 = vmatpush2.bf16.msra.mxu1 %v18034_v14  ;;  %v18097_v14 = vld [vmem:[#allocation3 + $0xc] ss:$24 sps:$4 sm:$0xff]  }
 0xc54   :  { %13351 = vmatprep.subr.bf16.mxu1 %v18038_v11  ;;  %13393 = vmatpush2.bf16.msra.mxu0 %v18037_v54  ;;  %v18092_v11 = vld [vmem:[#allocation3 + $0x600] ss:$24 sps:$4 sm:$0xff]   ;;  %v18100_v54 = vld [vmem:[#allocation3 + $0x8d4] ss:$24 sps:$4 sm:$0xff]  }
 0xc55   :  { %13394 = vmatprep.subr.bf16.mxu0 %v18041_v18  ;;  %v18095_v18 = vld [vmem:[#allocation3 + $0x8] ss:$24 sps:$4 sm:$0xff]  }
 0xc57   :  { %13352 = vmatpush2.bf16.msra.mxu1 %v18040_v46  ;;  %v18103_v46 = vld [vmem:[#allocation3 + $0x2dc] ss:$24 sps:$4 sm:$0xff]  }
 0xc58   :  { %13353 = vmatprep.subr.bf16.mxu1 %v18044_v26  ;;  %13395 = vmatpush2.bf16.msra.mxu0 %v18043_v25  ;;  %v18098_v26 = vld [vmem:[#allocation3 + $0x8d0] ss:$24 sps:$4 sm:$0xff]   ;;  %v18106_v25 = vld [vmem:[#allocation3 + $0x8a4] ss:$24 sps:$4 sm:$0xff]  }
 0xc59   :  { %13396 = vmatprep.subr.bf16.mxu0 %v18047_v7  ;;  %v18101_v7 = vld [vmem:[#allocation3 + $0x2d8] ss:$24 sps:$4 sm:$0xff]  }
 0xc5b   :  { %13354 = vmatpush2.bf16.msra.mxu1 %v18046_v61  ;;  %v18109_v61 = vld [vmem:[#allocation3 + $0x2ac] ss:$24 sps:$4 sm:$0xff]  }
 0xc5c   :  { %13409 = vmatprep.subr.bf16.mxu1 %v18052_v20  ;;  %13397 = vmatpush2.bf16.msra.mxu0 %v18049_v63  ;;  %v18104_v20 = vld [vmem:[#allocation3 + $0x8a0] ss:$24 sps:$4 sm:$0xff]   ;;  %v18112_v63 = vld [vmem:[#allocation3 + $0x874] ss:$24 sps:$4 sm:$0xff]  }
 0xc5d   :  { %13452 = vmatprep.subr.bf16.mxu0 %v18055_v41  ;;  %v18107_v41 = vld [vmem:[#allocation3 + $0x2a8] ss:$24 sps:$4 sm:$0xff]  }
 0xc5e   :  { %13356 = vmatmul.mubr.bf16.vlgmr.msra.gmra.mxu1 %v19502_v10 }
 0xc5f   :  { %13410 = vmatpush1.bf16.msra.mxu1 %v18050_v21  ;;  %13441 = vmatprep.mubr.bf16.mxu1 %v19506_v22  ;;  %v18115_v21 = vld [vmem:[#allocation3 + $0x27c] ss:$24 sps:$4 sm:$0xff]  }
 0xc60   :  { %13399 = vmatmul.mubr.bf16.vlgmr.msra.gmra.mxu0 %v19510_v34  ;;  %13411 = vmatprep.subr.bf16.mxu1 %v18058_v27  ;;  %v18110_v27 = vld [vmem:[#allocation3 + $0x870] ss:$24 sps:$4 sm:$0xff]  }
 0xc61   :  { %13453 = vmatpush1.bf16.msra.mxu0 %v18053_v56  ;;  %13484 = vmatprep.mubr.bf16.mxu0 %v19492_v60  ;;  %v18118_v56 = vld [vmem:[#allocation3 + $0x844] ss:$24 sps:$4 sm:$0xff]  }
 0xc62   :  { %13454 = vmatprep.subr.bf16.mxu0 %v18061_v17  ;;  %v18113_v17 = vld [vmem:[#allocation3 + $0x278] ss:$24 sps:$4 sm:$0xff]  }
 0xc63   :  { %13412 = vmatpush1.bf16.msra.mxu1 %v18056_v30  ;;  %v18121_v30 = vld [vmem:[#allocation3 + $0x24c] ss:$24 sps:$4 sm:$0xff]  }
 0xc64   :  { %13413 = vmatprep.subr.bf16.mxu1 %v18064_v55  ;;  %v18116_v55 = vld [vmem:[#allocation3 + $0x840] ss:$24 sps:$4 sm:$0xff]  }
 0xc65   :  { %13455 = vmatpush1.bf16.msra.mxu0 %v18059_v8  ;;  %v18124_v8 = vld [vmem:[#allocation3 + $0x814] ss:$24 sps:$4 sm:$0xff]  }
 0xc66   :  { %13456 = vmatprep.subr.bf16.mxu0 %v18067_v2  ;;  %v18119_v2 = vld [vmem:[#allocation3 + $0x248] ss:$24 sps:$4 sm:$0xff]  }
 0xc67   :  { %13414 = vmatpush1.bf16.msra.mxu1 %v18062_v53  ;;  %v18127_v53 = vld [vmem:[#allocation3 + $0x21c] ss:$24 sps:$4 sm:$0xff]  }
 0xc68   :  { %13415 = vmatprep.subr.bf16.mxu1 %v18070_v42  ;;  %v18122_v42 = vld [vmem:[#allocation3 + $0x810] ss:$24 sps:$4 sm:$0xff]  }
 0xc69   :  { %13457 = vmatpush1.bf16.msra.mxu0 %v18065_v16  ;;  %v18130_v16 = vld [vmem:[#allocation3 + $0x7e4] ss:$24 sps:$4 sm:$0xff]  }
 0xc6a   :  { %13458 = vmatprep.subr.bf16.mxu0 %v18073_v31  ;;  %v18125_v31 = vld [vmem:[#allocation3 + $0x218] ss:$24 sps:$4 sm:$0xff]  }
 0xc6b   :  { %13416 = vmatpush1.bf16.msra.mxu1 %v18068_v50  ;;  %v18133_v50 = vld [vmem:[#allocation3 + $0x1ec] ss:$24 sps:$4 sm:$0xff]  }
 0xc6c   :  { %13417 = vmatprep.subr.bf16.mxu1 %v18076_v13  ;;  %v18128_v13 = vld [vmem:[#allocation3 + $0x7e0] ss:$24 sps:$4 sm:$0xff]  }
 0xc6d   :  { %13459 = vmatpush1.bf16.msra.mxu0 %v18071_v24  ;;  %v18136_v24 = vld [vmem:[#allocation3 + $0x7b4] ss:$24 sps:$4 sm:$0xff]  }
 0xc6e   :  { %13460 = vmatprep.subr.bf16.mxu0 %v18079_v9  ;;  %v18131_v9 = vld [vmem:[#allocation3 + $0x1e8] ss:$24 sps:$4 sm:$0xff]  }
 0xc6f   :  { %13418 = vmatpush1.bf16.msra.mxu1 %v18074_v23  ;;  %v18139_v23 = vld [vmem:[#allocation3 + $0x1bc] ss:$24 sps:$4 sm:$0xff]  }
 0xc70   :  { %13419 = vmatprep.subr.bf16.mxu1 %v18082_v32  ;;  %v18134_v32 = vld [vmem:[#allocation3 + $0x7b0] ss:$24 sps:$4 sm:$0xff]  }
 0xc71   :  { %13461 = vmatpush1.bf16.msra.mxu0 %v18077_v62  ;;  %v18142_v62 = vld [vmem:[#allocation3 + $0x784] ss:$24 sps:$4 sm:$0xff]  }
 0xc72   :  { %13462 = vmatprep.subr.bf16.mxu0 %v18085_v59  ;;  %v18137_v59 = vld [vmem:[#allocation3 + $0x1b8] ss:$24 sps:$4 sm:$0xff]  }
 0xc73   :  { %13420 = vmatpush1.bf16.msra.mxu1 %v18080_v4  ;;  %v18145_v4 = vld [vmem:[#allocation3 + $0x18c] ss:$24 sps:$4 sm:$0xff]  }
 0xc74   :  { %13421 = vmatprep.subr.bf16.mxu1 %v18088_v58  ;;  %v18140_v58 = vld [vmem:[#allocation3 + $0x780] ss:$24 sps:$4 sm:$0xff]  }
 0xc75   :  { %13463 = vmatpush1.bf16.msra.mxu0 %v18083_v33  ;;  %v18148_v33 = vld [vmem:[#allocation3 + $0x45c] ss:$24 sps:$4 sm:$0xff]  }
 0xc76   :  { %13464 = vmatprep.subr.bf16.mxu0 %v18091_v28  ;;  %v18143_v28 = vld [vmem:[#allocation3 + $0x188] ss:$24 sps:$4 sm:$0xff]  }
 0xc77   :  { %13422 = vmatpush1.bf16.msra.mxu1 %v18086_v1  ;;  %v19518_v1 = vpack.c.bf16 %v19486_v49, %v19482_v43  ;;  %v18160_v43 = vld [vmem:[#allocation3 + $0x3fc] ss:$24 sps:$4 sm:$0xff]   ;;  %v18155_v49 = vld [vmem:[#allocation3 + $0x728] ss:$24 sps:$4 sm:$0xff]  }
 0xc78   :  { %13423 = vmatprep.subr.bf16.mxu1 %v18094_v15  ;;  %v18151_v15 = vld [vmem:[#allocation3 + $0x75c] ss:$24 sps:$4 sm:$0xff]  }
 0xc79   :  { %13465 = vmatpush1.bf16.msra.mxu0 %v18089_v40  ;;  %v18146_v40 = vld [vmem:[#allocation3 + $0x458] ss:$24 sps:$4 sm:$0xff]  }
 0xc7a   :  { %13466 = vmatprep.subr.bf16.mxu0 %v18097_v14  ;;  %v18154_v14 = vld [vmem:[#allocation3 + $0x42c] ss:$24 sps:$4 sm:$0xff]  }
 0xc7b   :  { %13424 = vmatpush1.bf16.msra.mxu1 %v18092_v11  ;;  %v18149_v11 = vld [vmem:[#allocation3 + $0x758] ss:$24 sps:$4 sm:$0xff]  }
 0xc7c   :  { %13425 = vmatprep.subr.bf16.mxu1 %v18100_v54  ;;  %v18157_v54 = vld [vmem:[#allocation3 + $0x72c] ss:$24 sps:$4 sm:$0xff]  }
 0xc7d   :  { %13467 = vmatpush1.bf16.msra.mxu0 %v18095_v18  ;;  %v18152_v18 = vld [vmem:[#allocation3 + $0x428] ss:$24 sps:$4 sm:$0xff]  }
 0xc7e   :  { %13468 = vmatprep.subr.bf16.mxu0 %v18103_v46  ;;  %v18163_v46 = vld [vmem:[#allocation3 + $0x6fc] ss:$24 sps:$4 sm:$0xff]  }
 0xc7f   :  { %13426 = vmatpush2.bf16.msra.mxu1 %v18098_v26  ;;  %v18158_v26 = vld [vmem:[#allocation3 + $0x3f8] ss:$24 sps:$4 sm:$0xff]  }
 0xc80   :  { %13427 = vmatprep.subr.bf16.mxu1 %v18106_v25  ;;  %v18166_v25 = vld [vmem:[#allocation3 + $0x3cc] ss:$24 sps:$4 sm:$0xff]  }
 0xc81   :  { %13469 = vmatpush2.bf16.msra.mxu0 %v18101_v7  ;;  %v18161_v7 = vld [vmem:[#allocation3 + $0x6f8] ss:$24 sps:$4 sm:$0xff]  }
 0xc82   :  { %13470 = vmatprep.subr.bf16.mxu0 %v18109_v61  ;;  %v18169_v61 = vld [vmem:[#allocation3 + $0x6cc] ss:$24 sps:$4 sm:$0xff]  }
 0xc83   :  { %13428 = vmatpush2.bf16.msra.mxu1 %v18104_v20  ;;  %v18164_v20 = vld [vmem:[#allocation3 + $0x3c8] ss:$24 sps:$4 sm:$0xff]  }
 0xc84   :  { %13429 = vmatprep.subr.bf16.mxu1 %v18112_v63  ;;  %v18172_v63 = vld [vmem:[#allocation3 + $0x39c] ss:$24 sps:$4 sm:$0xff]  }
 0xc85   :  { %13471 = vmatpush2.bf16.msra.mxu0 %v18107_v41  ;;  %v18167_v41 = vld [vmem:[#allocation3 + $0x6c8] ss:$24 sps:$4 sm:$0xff]  }
 0xc86   :  { %13472 = vmatprep.subr.bf16.mxu0 %v18115_v21  ;;  %v18175_v21 = vld [vmem:[#allocation3 + $0x69c] ss:$24 sps:$4 sm:$0xff]  }
 0xc87   :  { %13430 = vmatpush2.bf16.msra.mxu1 %v18110_v27  ;;  %v18170_v27 = vld [vmem:[#allocation3 + $0x398] ss:$24 sps:$4 sm:$0xff]  }
 0xc88   :  { %13431 = vmatprep.subr.bf16.mxu1 %v18118_v56  ;;  %v18178_v56 = vld [vmem:[#allocation3 + $0x36c] ss:$24 sps:$4 sm:$0xff]  }
 0xc89   :  { %13473 = vmatpush2.bf16.msra.mxu0 %v18113_v17  ;;  %v18173_v17 = vld [vmem:[#allocation3 + $0x698] ss:$24 sps:$4 sm:$0xff]  }
 0xc8a   :  { %13474 = vmatprep.subr.bf16.mxu0 %v18121_v30  ;;  %v18181_v30 = vld [vmem:[#allocation3 + $0x66c] ss:$24 sps:$4 sm:$0xff]  }
 0xc8b   :  { %13432 = vmatpush2.bf16.msra.mxu1 %v18116_v55  ;;  %v18176_v55 = vld [vmem:[#allocation3 + $0x368] ss:$24 sps:$4 sm:$0xff]  }
 0xc8c   :  { %13433 = vmatprep.subr.bf16.mxu1 %v18124_v8  ;;  %v18184_v8 = vld [vmem:[#allocation3 + $0x33c] ss:$24 sps:$4 sm:$0xff]  }
 0xc8d   :  { %13475 = vmatpush2.bf16.msra.mxu0 %v18119_v2  ;;  %v18179_v2 = vld [vmem:[#allocation3 + $0x668] ss:$24 sps:$4 sm:$0xff]  }
 0xc8e   :  { %13476 = vmatprep.subr.bf16.mxu0 %v18127_v53  ;;  %v18187_v53 = vld [vmem:[#allocation3 + $0x63c] ss:$24 sps:$4 sm:$0xff]  }
 0xc8f   :  { %13434 = vmatpush2.bf16.msra.mxu1 %v18122_v42  ;;  %v18182_v42 = vld [vmem:[#allocation3 + $0x338] ss:$24 sps:$4 sm:$0xff]  }
 0xc90   :  { %13435 = vmatprep.subr.bf16.mxu1 %v18130_v16  ;;  %v18190_v16 = vld [vmem:[#allocation3 + $0x30c] ss:$24 sps:$4 sm:$0xff]  }
 0xc91   :  { %13477 = vmatpush2.bf16.msra.mxu0 %v18125_v31  ;;  %v18185_v31 = vld [vmem:[#allocation3 + $0x638] ss:$24 sps:$4 sm:$0xff]  }
 0xc92   :  { %13478 = vmatprep.subr.bf16.mxu0 %v18133_v50  ;;  %v18193_v50 = vld [vmem:[#allocation3 + $0x60c] ss:$24 sps:$4 sm:$0xff]  }
 0xc93   :  { %13436 = vmatpush2.bf16.msra.mxu1 %v18128_v13  ;;  %v18188_v13 = vld [vmem:[#allocation3 + $0x308] ss:$24 sps:$4 sm:$0xff]  }
 0xc94   :  { %13437 = vmatprep.subr.bf16.mxu1 %v18136_v24  ;;  %v18196_v24 = vld [vmem:[#allocation3 + $0x5dc] ss:$24 sps:$4 sm:$0xff]  }
 0xc95   :  { %13479 = vmatpush2.bf16.msra.mxu0 %v18131_v9  ;;  %v18191_v9 = vld [vmem:[#allocation3 + $0x608] ss:$24 sps:$4 sm:$0xff]  }
 0xc96   :  { %13480 = vmatprep.subr.bf16.mxu0 %v18139_v23  ;;  %v18199_v23 = vld [vmem:[#allocation3 + $0x8dc] ss:$24 sps:$4 sm:$0xff]  }
 0xc97   :  { %13438 = vmatpush2.bf16.msra.mxu1 %v18134_v32  ;;  %v18194_v32 = vld [vmem:[#allocation3 + $0x5d8] ss:$24 sps:$4 sm:$0xff]  }
 0xc98   :  { %13439 = vmatprep.subr.bf16.mxu1 %v18142_v62  ;;  %v18202_v62 = vld [vmem:[#allocation3 + $0x5ac] ss:$24 sps:$4 sm:$0xff]  }
 0xc99   :  { %13481 = vmatpush2.bf16.msra.mxu0 %v18137_v59  ;;  %v18197_v59 = vld [vmem:[#allocation3 + $0x8d8] ss:$24 sps:$4 sm:$0xff]  }
 0xc9a   :  { %13482 = vmatprep.subr.bf16.mxu0 %v18145_v4  ;;  %v18205_v4 = vld [vmem:[#allocation3 + $0x8ac] ss:$24 sps:$4 sm:$0xff]  }
 0xc9b   :  { %13440 = vmatpush2.bf16.msra.mxu1 %v18140_v58  ;;  %v18200_v58 = vld [vmem:[#allocation3 + $0x5a8] ss:$24 sps:$4 sm:$0xff]  }
 0xc9c   :  { %13495 = vmatprep.subr.bf16.mxu1 %v18148_v33  ;;  %v18208_v33 = vld [vmem:[#allocation3 + $0x57c] ss:$24 sps:$4 sm:$0xff]  }
 0xc9d   :  { %13483 = vmatpush2.bf16.msra.mxu0 %v18143_v28  ;;  %v18203_v28 = vld [vmem:[#allocation3 + $0x8a8] ss:$24 sps:$4 sm:$0xff]  }
 0xc9e   :  { %13442 = vmatmul.mubr.bf16.vlgmr.msra.gmra.mxu1 %v19518_v1  ;;  %13538 = vmatprep.subr.bf16.mxu0 %v18151_v15  ;;  %v18211_v15 = vld [vmem:[#allocation3 + $0x87c] ss:$24 sps:$4 sm:$0xff]  }
 0xc9f   :  { %13496 = vmatpush1.bf16.msra.mxu1 %v18146_v40  ;;  %13527 = vmatprep.mubr.bf16.mxu1 %v19496_v6  ;;  %v18206_v40 = vld [vmem:[#allocation3 + $0x578] ss:$24 sps:$4 sm:$0xff]  }
 0xca0   :  { %13485 = vmatmul.mubr.bf16.vlgmr.msra.gmra.mxu0 %v19502_v10  ;;  %13497 = vmatprep.subr.bf16.mxu1 %v18154_v14  ;;  %v18214_v14 = vld [vmem:[#allocation3 + $0x54c] ss:$24 sps:$4 sm:$0xff]  }
 0xca1   :  { %13539 = vmatpush1.bf16.msra.mxu0 %v18149_v11  ;;  %13570 = vmatprep.mubr.bf16.mxu0 %v19506_v22  ;;  %v18209_v11 = vld [vmem:[#allocation3 + $0x878] ss:$24 sps:$4 sm:$0xff]  }
 0xca2   :  { %13540 = vmatprep.subr.bf16.mxu0 %v18157_v54  ;;  %v18217_v54 = vld [vmem:[#allocation3 + $0x84c] ss:$24 sps:$4 sm:$0xff]  }
 0xca3   :  { %13498 = vmatpush1.bf16.msra.mxu1 %v18152_v18  ;;  %v18212_v18 = vld [vmem:[#allocation3 + $0x548] ss:$24 sps:$4 sm:$0xff]  }
 0xca4   :  { %13499 = vmatprep.subr.bf16.mxu1 %v18160_v43  ;;  %v18220_v43 = vld [vmem:[#allocation3 + $0x51c] ss:$24 sps:$4 sm:$0xff]  }
 0xca5   :  { %13541 = vmatpush1.bf16.msra.mxu0 %v18155_v49  ;;  %v18215_v49 = vld [vmem:[#allocation3 + $0x848] ss:$24 sps:$4 sm:$0xff]  }
 0xca6   :  { %13542 = vmatprep.subr.bf16.mxu0 %v18163_v46  ;;  %v18223_v46 = vld [vmem:[#allocation3 + $0x81c] ss:$24 sps:$4 sm:$0xff]  }
 0xca7   :  { %13500 = vmatpush1.bf16.msra.mxu1 %v18158_v26  ;;  %v18218_v26 = vld [vmem:[#allocation3 + $0x518] ss:$24 sps:$4 sm:$0xff]  }
 0xca8   :  { %13501 = vmatprep.subr.bf16.mxu1 %v18166_v25  ;;  %v18226_v25 = vld [vmem:[#allocation3 + $0x4ec] ss:$24 sps:$4 sm:$0xff]  }
 0xca9   :  { %13543 = vmatpush1.bf16.msra.mxu0 %v18161_v7  ;;  %v18221_v7 = vld [vmem:[#allocation3 + $0x818] ss:$24 sps:$4 sm:$0xff]  }
 0xcaa   :  { %13544 = vmatprep.subr.bf16.mxu0 %v18169_v61  ;;  %v18229_v61 = vld [vmem:[#allocation3 + $0x7ec] ss:$24 sps:$4 sm:$0xff]  }
 0xcab   :  { %13502 = vmatpush1.bf16.msra.mxu1 %v18164_v20  ;;  %v18224_v20 = vld [vmem:[#allocation3 + $0x4e8] ss:$24 sps:$4 sm:$0xff]  }
 0xcac   :  { %13503 = vmatprep.subr.bf16.mxu1 %v18172_v63  ;;  %v18232_v63 = vld [vmem:[#allocation3 + $0x4bc] ss:$24 sps:$4 sm:$0xff]  }
 0xcad   :  { %13545 = vmatpush1.bf16.msra.mxu0 %v18167_v41  ;;  %v18227_v41 = vld [vmem:[#allocation3 + $0x7e8] ss:$24 sps:$4 sm:$0xff]  }
 0xcae   :  { %13546 = vmatprep.subr.bf16.mxu0 %v18175_v21  ;;  %v18235_v21 = vld [vmem:[#allocation3 + $0x7bc] ss:$24 sps:$4 sm:$0xff]  }
 0xcaf   :  { %13504 = vmatpush1.bf16.msra.mxu1 %v18170_v27  ;;  %v18230_v27 = vld [vmem:[#allocation3 + $0x4b8] ss:$24 sps:$4 sm:$0xff]  }
 0xcb0   :  { %13505 = vmatprep.subr.bf16.mxu1 %v18178_v56  ;;  %v18238_v56 = vld [vmem:[#allocation3 + $0x48c] ss:$24 sps:$4 sm:$0xff]  }
 0xcb1   :  { %13547 = vmatpush1.bf16.msra.mxu0 %v18173_v17  ;;  %v18233_v17 = vld [vmem:[#allocation3 + $0x7b8] ss:$24 sps:$4 sm:$0xff]  }
 0xcb2   :  { %13548 = vmatprep.subr.bf16.mxu0 %v18181_v30  ;;  %v18241_v30 = vld [vmem:[#allocation3 + $0x78c] ss:$24 sps:$4 sm:$0xff]  }
 0xcb3   :  { %13506 = vmatpush1.bf16.msra.mxu1 %v18176_v55  ;;  %v18236_v55 = vld [vmem:[#allocation3 + $0x488] ss:$24 sps:$4 sm:$0xff]  }
 0xcb4   :  { %13507 = vmatprep.subr.bf16.mxu1 %v18184_v8  ;;  %v18244_v8 = vld [vmem:[#allocation3 + $0x164] ss:$24 sps:$4 sm:$0xff]  }
 0xcb5   :  { %13549 = vmatpush1.bf16.msra.mxu0 %v18179_v2  ;;  %v18239_v2 = vld [vmem:[#allocation3 + $0x788] ss:$24 sps:$4 sm:$0xff]  }
 0xcb6   :  { %13550 = vmatprep.subr.bf16.mxu0 %v18187_v53  ;;  %v18247_v53 = vld [vmem:[#allocation3 + $0x464] ss:$24 sps:$4 sm:$0xff]  }
 0xcb7   :  { %13508 = vmatpush1.bf16.msra.mxu1 %v18182_v42  ;;  %v18242_v42 = vld [vmem:[#allocation3 + $0x160] ss:$24 sps:$4 sm:$0xff]  }
 0xcb8   :  { %13509 = vmatprep.subr.bf16.mxu1 %v18190_v16  ;;  %v18250_v16 = vld [vmem:[#allocation3 + $0x134] ss:$24 sps:$4 sm:$0xff]  }
 0xcb9   :  { %13551 = vmatpush1.bf16.msra.mxu0 %v18185_v31  ;;  %v18245_v31 = vld [vmem:[#allocation3 + $0x460] ss:$24 sps:$4 sm:$0xff]  }
 0xcba   :  { %13552 = vmatprep.subr.bf16.mxu0 %v18193_v50  ;;  %v18253_v50 = vld [vmem:[#allocation3 + $0x434] ss:$24 sps:$4 sm:$0xff]  }
 0xcbb   :  { %13510 = vmatpush1.bf16.msra.mxu1 %v18188_v13  ;;  %v18248_v13 = vld [vmem:[#allocation3 + $0x130] ss:$24 sps:$4 sm:$0xff]  }
 0xcbc   :  { %13511 = vmatprep.subr.bf16.mxu1 %v18196_v24  ;;  %v18256_v24 = vld [vmem:[#allocation3 + $0x104] ss:$24 sps:$4 sm:$0xff]  }
 0xcbd   :  { %13553 = vmatpush1.bf16.msra.mxu0 %v18191_v9  ;;  %v18251_v9 = vld [vmem:[#allocation3 + $0x430] ss:$24 sps:$4 sm:$0xff]  }
 0xcbe   :  { %13554 = vmatprep.subr.bf16.mxu0 %v18199_v23  ;;  %v18259_v23 = vld [vmem:[#allocation3 + $0x404] ss:$24 sps:$4 sm:$0xff]  }
 0xcbf   :  { %13512 = vmatpush2.bf16.msra.mxu1 %v18194_v32  ;;  %v18254_v32 = vld [vmem:[#allocation3 + $0x100] ss:$24 sps:$4 sm:$0xff]  }
 0xcc0   :  { %13513 = vmatprep.subr.bf16.mxu1 %v18202_v62  ;;  %v18262_v62 = vld [vmem:[#allocation3 + $0xd4] ss:$24 sps:$4 sm:$0xff]  }
 0xcc1   :  { %13555 = vmatpush2.bf16.msra.mxu0 %v18197_v59  ;;  %v18257_v59 = vld [vmem:[#allocation3 + $0x400] ss:$24 sps:$4 sm:$0xff]  }
 0xcc2   :  { %13556 = vmatprep.subr.bf16.mxu0 %v18205_v4  ;;  %v18265_v4 = vld [vmem:[#allocation3 + $0x3d4] ss:$24 sps:$4 sm:$0xff]  }
 0xcc3   :  { %13514 = vmatpush2.bf16.msra.mxu1 %v18200_v58  ;;  %v18268_v58 = vld [vmem:[#allocation3 + $0xa4] ss:$24 sps:$4 sm:$0xff]  }
 0xcc4   :  { %13515 = vmatprep.subr.bf16.mxu1 %v18208_v33  ;;  %v18263_v33 = vld [vmem:[#allocation3 + $0x3d0] ss:$24 sps:$4 sm:$0xff]  }
 0xcc5   :  { %13557 = vmatpush2.bf16.msra.mxu0 %v18203_v28  ;;  %v18271_v28 = vld [vmem:[#allocation3 + $0x3a4] ss:$24 sps:$4 sm:$0xff]  }
 0xcc6   :  { %13558 = vmatprep.subr.bf16.mxu0 %v18211_v15  ;;  %v18274_v15 = vld [vmem:[#allocation3 + $0x74] ss:$24 sps:$4 sm:$0xff]  }
 0xcc7   :  { %13516 = vmatpush2.bf16.msra.mxu1 %v18206_v40  ;;  %v18269_v40 = vld [vmem:[#allocation3 + $0x3a0] ss:$24 sps:$4 sm:$0xff]  }
 0xcc8   :  { %13517 = vmatprep.subr.bf16.mxu1 %v18214_v14  ;;  %v18277_v14 = vld [vmem:[#allocation3 + $0x374] ss:$24 sps:$4 sm:$0xff]  }
 0xcc9   :  { %13559 = vmatpush2.bf16.msra.mxu0 %v18209_v11  ;;  %v18272_v11 = vld [vmem:[#allocation3 + $0x70] ss:$24 sps:$4 sm:$0xff]  }
 0xcca   :  { %13560 = vmatprep.subr.bf16.mxu0 %v18217_v54  ;;  %v18280_v54 = vld [vmem:[#allocation3 + $0x44] ss:$24 sps:$4 sm:$0xff]  }
 0xccb   :  { %13518 = vmatpush2.bf16.msra.mxu1 %v18212_v18  ;;  %v18275_v18 = vld [vmem:[#allocation3 + $0x370] ss:$24 sps:$4 sm:$0xff]  }
 0xccc   :  { %13519 = vmatprep.subr.bf16.mxu1 %v18220_v43  ;;  %v18283_v43 = vld [vmem:[#allocation3 + $0x344] ss:$24 sps:$4 sm:$0xff]  }
 0xccd   :  { %13561 = vmatpush2.bf16.msra.mxu0 %v18215_v49  ;;  %v18278_v49 = vld [vmem:[#allocation3 + $0x40] ss:$24 sps:$4 sm:$0xff]  }
 0xcce   :  { %13562 = vmatprep.subr.bf16.mxu0 %v18223_v46  ;;  %v18286_v46 = vld [vmem:[#allocation3 + $0x14] ss:$24 sps:$4 sm:$0xff]  }
 0xccf   :  { %13520 = vmatpush2.bf16.msra.mxu1 %v18218_v26  ;;  %v18281_v26 = vld [vmem:[#allocation3 + $0x340] ss:$24 sps:$4 sm:$0xff]  }
 0xcd0   :  { %13521 = vmatprep.subr.bf16.mxu1 %v18226_v25  ;;  %v18289_v25 = vld [vmem:[#allocation3 + $0x314] ss:$24 sps:$4 sm:$0xff]  }
 0xcd1   :  { %13563 = vmatpush2.bf16.msra.mxu0 %v18221_v7  ;;  %v18284_v7 = vld [vmem:[#allocation3 + $0x10] ss:$24 sps:$4 sm:$0xff]  }
 0xcd2   :  { %13564 = vmatprep.subr.bf16.mxu0 %v18229_v61  ;;  %v18292_v61 = vld [vmem:[#allocation3 + $0x2e4] ss:$24 sps:$4 sm:$0xff]  }
 0xcd3   :  { %13522 = vmatpush2.bf16.msra.mxu1 %v18224_v20  ;;  %v18287_v20 = vld [vmem:[#allocation3 + $0x310] ss:$24 sps:$4 sm:$0xff]  }
 0xcd4   :  { %13523 = vmatprep.subr.bf16.mxu1 %v18232_v63  ;;  %v18295_v63 = vld [vmem:[#allocation3 + $0x5e4] ss:$24 sps:$4 sm:$0xff]  }
 0xcd5   :  { %13565 = vmatpush2.bf16.msra.mxu0 %v18227_v41  ;;  %v18290_v41 = vld [vmem:[#allocation3 + $0x2e0] ss:$24 sps:$4 sm:$0xff]  }
 0xcd6   :  { %13566 = vmatprep.subr.bf16.mxu0 %v18235_v21  ;;  %v18298_v21 = vld [vmem:[#allocation3 + $0x2b4] ss:$24 sps:$4 sm:$0xff]  }
 0xcd7   :  { %13524 = vmatpush2.bf16.msra.mxu1 %v18230_v27  ;;  %v18293_v27 = vld [vmem:[#allocation3 + $0x5e0] ss:$24 sps:$4 sm:$0xff]  }
 0xcd8   :  { %13525 = vmatprep.subr.bf16.mxu1 %v18238_v56  ;;  %v18301_v56 = vld [vmem:[#allocation3 + $0x5b4] ss:$24 sps:$4 sm:$0xff]  }
 0xcd9   :  { %13567 = vmatpush2.bf16.msra.mxu0 %v18233_v17  ;;  %v18296_v17 = vld [vmem:[#allocation3 + $0x2b0] ss:$24 sps:$4 sm:$0xff]  }
 0xcda   :  { %13568 = vmatprep.subr.bf16.mxu0 %v18241_v30  ;;  %v18304_v30 = vld [vmem:[#allocation3 + $0x284] ss:$24 sps:$4 sm:$0xff]  }
 0xcdb   :  { %13526 = vmatpush2.bf16.msra.mxu1 %v18236_v55  ;;  %v18299_v55 = vld [vmem:[#allocation3 + $0x5b0] ss:$24 sps:$4 sm:$0xff]  }
 0xcdc   :  { %13581 = vmatprep.subr.bf16.mxu1 %v18244_v8  ;;  %v18307_v8 = vld [vmem:[#allocation3 + $0x584] ss:$24 sps:$4 sm:$0xff]  }
 0xcdd   :  { %13569 = vmatpush2.bf16.msra.mxu0 %v18239_v2  ;;  %v18302_v2 = vld [vmem:[#allocation3 + $0x280] ss:$24 sps:$4 sm:$0xff]  }
 0xcde   :  { %13528 = vmatmul.mubr.bf16.vlgmr.msra.gmra.mxu1 %v19510_v34  ;;  %13624 = vmatprep.subr.bf16.mxu0 %v18247_v53  ;;  %v18310_v53 = vld [vmem:[#allocation3 + $0x254] ss:$24 sps:$4 sm:$0xff]  }
 0xcdf   :  { %13582 = vmatpush1.bf16.msra.mxu1 %v18242_v42  ;;  %13613 = vmatprep.mubr.bf16.mxu1 %v19492_v60  ;;  %v18260_v60 = vld [vmem:[#allocation3 + $0xd0] ss:$24 sps:$4 sm:$0xff]   ;;  %v18305_v42 = vld [vmem:[#allocation3 + $0x580] ss:$24 sps:$4 sm:$0xff]  }
 0xce0   :  { %13571 = vmatmul.mubr.bf16.vlgmr.msra.gmra.mxu0 %v19518_v1  ;;  %13583 = vmatprep.subr.bf16.mxu1 %v18250_v16  ;;  %v18313_v16 = vld [vmem:[#allocation3 + $0x554] ss:$24 sps:$4 sm:$0xff]  }
 0xce1   :  { %13625 = vmatpush1.bf16.msra.mxu0 %v18245_v31  ;;  %13656 = vmatprep.mubr.bf16.mxu0 %v19496_v6  ;;  %v18266_v6 = vld [vmem:[#allocation3 + $0xa0] ss:$24 sps:$4 sm:$0xff]   ;;  %v18308_v31 = vld [vmem:[#allocation3 + $0x250] ss:$24 sps:$4 sm:$0xff]  }
 0xce2   :  { %13626 = vmatprep.subr.bf16.mxu0 %v18253_v50  ;;  %v18316_v50 = vld [vmem:[#allocation3 + $0x224] ss:$24 sps:$4 sm:$0xff]  }
 0xce3   :  { %13584 = vmatpush1.bf16.msra.mxu1 %v18248_v13  ;;  %v18311_v13 = vld [vmem:[#allocation3 + $0x550] ss:$24 sps:$4 sm:$0xff]  }
 0xce4   :  { %13585 = vmatprep.subr.bf16.mxu1 %v18256_v24  ;;  %v18319_v24 = vld [vmem:[#allocation3 + $0x524] ss:$24 sps:$4 sm:$0xff]  }
 0xce5   :  { %13627 = vmatpush1.bf16.msra.mxu0 %v18251_v9  ;;  %v18314_v9 = vld [vmem:[#allocation3 + $0x220] ss:$24 sps:$4 sm:$0xff]  }
 0xce6   :  { %13628 = vmatprep.subr.bf16.mxu0 %v18259_v23  ;;  %v18322_v23 = vld [vmem:[#allocation3 + $0x1f4] ss:$24 sps:$4 sm:$0xff]  }
 0xce7   :  { %13586 = vmatpush1.bf16.msra.mxu1 %v18254_v32  ;;  %v18317_v32 = vld [vmem:[#allocation3 + $0x520] ss:$24 sps:$4 sm:$0xff]  }
 0xce8   :  { %13587 = vmatprep.subr.bf16.mxu1 %v18262_v62  ;;  %v18325_v62 = vld [vmem:[#allocation3 + $0x4f4] ss:$24 sps:$4 sm:$0xff]  }
 0xce9   :  { %13629 = vmatpush1.bf16.msra.mxu0 %v18257_v59  ;;  %v18320_v59 = vld [vmem:[#allocation3 + $0x1f0] ss:$24 sps:$4 sm:$0xff]  }
 0xcea   :  { %13630 = vmatprep.subr.bf16.mxu0 %v18265_v4  ;;  %v18328_v4 = vld [vmem:[#allocation3 + $0x1c4] ss:$24 sps:$4 sm:$0xff]  }
 0xceb   :  { %13588 = vmatpush1.bf16.msra.mxu1 %v18260_v60  ;;  %v18323_v60 = vld [vmem:[#allocation3 + $0x4f0] ss:$24 sps:$4 sm:$0xff]  }
 0xcec   :  { %13589 = vmatprep.subr.bf16.mxu1 %v18268_v58  ;;  %v18331_v58 = vld [vmem:[#allocation3 + $0x4c4] ss:$24 sps:$4 sm:$0xff]  }
 0xced   :  { %13631 = vmatpush1.bf16.msra.mxu0 %v18263_v33  ;;  %v18326_v33 = vld [vmem:[#allocation3 + $0x1c0] ss:$24 sps:$4 sm:$0xff]  }
 0xcee   :  { %13632 = vmatprep.subr.bf16.mxu0 %v18271_v28  ;;  %v18334_v28 = vld [vmem:[#allocation3 + $0x194] ss:$24 sps:$4 sm:$0xff]  }
 0xcef   :  { %13590 = vmatpush1.bf16.msra.mxu1 %v18266_v6  ;;  %v18329_v6 = vld [vmem:[#allocation3 + $0x4c0] ss:$24 sps:$4 sm:$0xff]  }
 0xcf0   :  { %13591 = vmatprep.subr.bf16.mxu1 %v18274_v15  ;;  %v18337_v15 = vld [vmem:[#allocation3 + $0x494] ss:$24 sps:$4 sm:$0xff]  }
 0xcf1   :  { %13633 = vmatpush1.bf16.msra.mxu0 %v18269_v40  ;;  %v18332_v40 = vld [vmem:[#allocation3 + $0x190] ss:$24 sps:$4 sm:$0xff]  }
 0xcf2   :  { %13634 = vmatprep.subr.bf16.mxu0 %v18277_v14  ;;  %v18340_v14 = vld [vmem:[#allocation3 + $0x764] ss:$24 sps:$4 sm:$0xff]  }
 0xcf3   :  { %13592 = vmatpush1.bf16.msra.mxu1 %v18272_v11  ;;  %v18335_v11 = vld [vmem:[#allocation3 + $0x490] ss:$24 sps:$4 sm:$0xff]  }
 0xcf4   :  { %13593 = vmatprep.subr.bf16.mxu1 %v18280_v54  ;;  %v18338_v54 = vld [vmem:[#allocation3 + $0x760] ss:$24 sps:$4 sm:$0xff]  }
 0xcf5   :  { %13635 = vmatpush1.bf16.msra.mxu0 %v18275_v18  ;;  %v18343_v18 = vld [vmem:[#allocation3 + $0x734] ss:$24 sps:$4 sm:$0xff]  }
 0xcf6   :  { %13636 = vmatprep.subr.bf16.mxu0 %v18283_v43  ;;  %v18341_v43 = vld [vmem:[#allocation3 + $0x730] ss:$24 sps:$4 sm:$0xff]  }
 0xcf7   :  { %13594 = vmatpush1.bf16.msra.mxu1 %v18278_v49  ;;  %v18346_v49 = vld [vmem:[#allocation3 + $0x704] ss:$24 sps:$4 sm:$0xff]  }
 0xcf8   :  { %13595 = vmatprep.subr.bf16.mxu1 %v18286_v46  ;;  %v18344_v46 = vld [vmem:[#allocation3 + $0x700] ss:$24 sps:$4 sm:$0xff]  }
 0xcf9   :  { %13637 = vmatpush1.bf16.msra.mxu0 %v18281_v26  ;;  %v18349_v26 = vld [vmem:[#allocation3 + $0x6d4] ss:$24 sps:$4 sm:$0xff]  }
 0xcfa   :  { %13638 = vmatprep.subr.bf16.mxu0 %v18289_v25  ;;  %v18347_v25 = vld [vmem:[#allocation3 + $0x6d0] ss:$24 sps:$4 sm:$0xff]  }
 0xcfb   :  { %13596 = vmatpush1.bf16.msra.mxu1 %v18284_v7  ;;  %v18352_v7 = vld [vmem:[#allocation3 + $0x6a4] ss:$24 sps:$4 sm:$0xff]  }
 0xcfc   :  { %13597 = vmatprep.subr.bf16.mxu1 %v18292_v61  ;;  %v18350_v61 = vld [vmem:[#allocation3 + $0x6a0] ss:$24 sps:$4 sm:$0xff]  }
 0xcfd   :  { %13639 = vmatpush1.bf16.msra.mxu0 %v18287_v20  ;;  %v18353_v20 = vld [vmem:[#allocation3 + $0x670] ss:$24 sps:$4 sm:$0xff]  }
 0xcfe   :  { %13640 = vmatprep.subr.bf16.mxu0 %v18295_v63  ;;  %v18361_v63 = vld [vmem:[#allocation3 + $0x614] ss:$24 sps:$4 sm:$0xff]  }
 0xcff   :  { %13598 = vmatpush2.bf16.msra.mxu1 %v18290_v41  ;;  %v18359_v41 = vld [vmem:[#allocation3 + $0x610] ss:$24 sps:$4 sm:$0xff]  }
 0xd00   :  { %13599 = vmatprep.subr.bf16.mxu1 %v18298_v21  ;;  %v18364_v21 = vld [vmem:[#allocation3 + $0x8e4] ss:$24 sps:$4 sm:$0xff]  }
 0xd01   :  { %13641 = vmatpush2.bf16.msra.mxu0 %v18293_v27  ;;  %v18362_v27 = vld [vmem:[#allocation3 + $0x8e0] ss:$24 sps:$4 sm:$0xff]  }
 0xd02   :  { %13642 = vmatprep.subr.bf16.mxu0 %v18301_v56  ;;  %v18367_v56 = vld [vmem:[#allocation3 + $0x8b4] ss:$24 sps:$4 sm:$0xff]  }
 0xd03   :  { %13600 = vmatpush2.bf16.msra.mxu1 %v18296_v17  ;;  %v18365_v17 = vld [vmem:[#allocation3 + $0x8b0] ss:$24 sps:$4 sm:$0xff]  }
 0xd04   :  { %13601 = vmatprep.subr.bf16.mxu1 %v18304_v30  ;;  %v18370_v30 = vld [vmem:[#allocation3 + $0x884] ss:$24 sps:$4 sm:$0xff]  }
 0xd05   :  { %13643 = vmatpush2.bf16.msra.mxu0 %v18299_v55  ;;  %v18368_v55 = vld [vmem:[#allocation3 + $0x880] ss:$24 sps:$4 sm:$0xff]  }
 0xd06   :  { %13644 = vmatprep.subr.bf16.mxu0 %v18307_v8  ;;  %v18373_v8 = vld [vmem:[#allocation3 + $0x854] ss:$24 sps:$4 sm:$0xff]  }
 0xd07   :  { %13602 = vmatpush2.bf16.msra.mxu1 %v18302_v2  ;;  %v18371_v2 = vld [vmem:[#allocation3 + $0x850] ss:$24 sps:$4 sm:$0xff]  }
 0xd08   :  { %13603 = vmatprep.subr.bf16.mxu1 %v18310_v53  ;;  %v18376_v53 = vld [vmem:[#allocation3 + $0x824] ss:$24 sps:$4 sm:$0xff]  }
 0xd09   :  { %13645 = vmatpush2.bf16.msra.mxu0 %v18305_v42  ;;  %v18374_v42 = vld [vmem:[#allocation3 + $0x820] ss:$24 sps:$4 sm:$0xff]  }
 0xd0a   :  { %13646 = vmatprep.subr.bf16.mxu0 %v18313_v16  ;;  %v18379_v16 = vld [vmem:[#allocation3 + $0x7f4] ss:$24 sps:$4 sm:$0xff]  }
 0xd0b   :  { %13604 = vmatpush2.bf16.msra.mxu1 %v18308_v31  ;;  %v18377_v31 = vld [vmem:[#allocation3 + $0x7f0] ss:$24 sps:$4 sm:$0xff]  }
 0xd0c   :  { %13605 = vmatprep.subr.bf16.mxu1 %v18316_v50  ;;  %v18382_v50 = vld [vmem:[#allocation3 + $0x7c4] ss:$24 sps:$4 sm:$0xff]  }
 0xd0d   :  { %13647 = vmatpush2.bf16.msra.mxu0 %v18311_v13  ;;  %v18380_v13 = vld [vmem:[#allocation3 + $0x7c0] ss:$24 sps:$4 sm:$0xff]  }
 0xd0e   :  { %13648 = vmatprep.subr.bf16.mxu0 %v18319_v24  ;;  %v18385_v24 = vld [vmem:[#allocation3 + $0x794] ss:$24 sps:$4 sm:$0xff]  }
 0xd0f   :  { %13606 = vmatpush2.bf16.msra.mxu1 %v18314_v9  ;;  %v18383_v9 = vld [vmem:[#allocation3 + $0x790] ss:$24 sps:$4 sm:$0xff]  }
 0xd10   :  { %13607 = vmatprep.subr.bf16.mxu1 %v18322_v23 }
 0xd11   :  { %13649 = vmatpush2.bf16.msra.mxu0 %v18317_v32 }
 0xd12   :  { %13650 = vmatprep.subr.bf16.mxu0 %v18325_v62 }
 0xd13   :  { %13608 = vmatpush2.bf16.msra.mxu1 %v18320_v59 }
 0xd14   :  { %13609 = vmatprep.subr.bf16.mxu1 %v18328_v4 }
 0xd15   :  { %13651 = vmatpush2.bf16.msra.mxu0 %v18323_v60 }
 0xd16   :  { %13652 = vmatprep.subr.bf16.mxu0 %v18331_v58 }
 0xd17   :  { %13610 = vmatpush2.bf16.msra.mxu1 %v18326_v33 }
 0xd18   :  { %13611 = vmatprep.subr.bf16.mxu1 %v18334_v28 }
 0xd19   :  { %13653 = vmatpush2.bf16.msra.mxu0 %v18329_v6 }
 0xd1a   :  { %13654 = vmatprep.subr.bf16.mxu0 %v18337_v15 }
 0xd1b   :  { %13612 = vmatpush2.bf16.msra.mxu1 %v18332_v40 }
 0xd1c   :  { %13667 = vmatprep.subr.bf16.mxu1 %v18340_v14 }
 0xd1d   :  { %13655 = vmatpush2.bf16.msra.mxu0 %v18335_v11 }
 0xd1e   :  { %13614 = vmatmul.mubr.bf16.vlgmr.msra.gmra.mxu1 %v19502_v10  ;;  %v18355_v10 = vld [vmem:[#allocation3 + $0x674] ss:$24 sps:$4 sm:$0xff]   ;;  %v13357_v23 = vpop.f32.mrf.mxu1 }
 0xd1f   :  { %13668 = vmatpush1.bf16.msra.mxu1 %v18338_v54  ;;  %13699 = vmatprep.mubr.bf16.mxu1 %v19506_v22  ;;  %v18358_v22 = vld [vmem:[#allocation3 + $0x644] ss:$24 sps:$4 sm:$0xff]  }
 0xd20   :  { %13657 = vmatmul.mubr.bf16.vlgmr.msra.gmra.mxu0 %v19510_v34  ;;  %13669 = vmatprep.subr.bf16.mxu1 %v18343_v18  ;;  %v18356_v34 = vld [vmem:[#allocation3 + $0x640] ss:$24 sps:$4 sm:$0xff]   ;;  %v13400_v32 = vpop.f32.mrf.mxu0  ;;  %v13359_v62 = vpop.f32.mrf.mxu1 }
 0xd22   :  { %v13402_v59 = vpop.f32.mrf.mxu0  ;;  %v13361_v4 = vpop.f32.mrf.mxu1 }
 0xd23   :  { %13670 = vmatpush1.bf16.msra.mxu1 %v18341_v43 }
 0xd24   :  { %13671 = vmatprep.subr.bf16.mxu1 %v18346_v49  ;;  %v13404_v60 = vpop.f32.mrf.mxu0  ;;  %v13363_v58 = vpop.f32.mrf.mxu1 }
 0xd26   :  { %v13406_v33 = vpop.f32.mrf.mxu0 }
 0xd27   :  { %13672 = vmatpush1.bf16.msra.mxu1 %v18344_v46 }
 0xd28   :  { %13673 = vmatprep.subr.bf16.mxu1 %v18349_v26 }
 0xd2b   :  { %13674 = vmatpush1.bf16.msra.mxu1 %v18347_v25 }
 0xd2c   :  { %13675 = vmatprep.subr.bf16.mxu1 %v18352_v7 }
 0xd2f   :  { %13676 = vmatpush1.bf16.msra.mxu1 %v18350_v61 }
 0xd30   :  { %13677 = vmatprep.subr.bf16.mxu1 %v18355_v10 }
 0xd33   :  { %13678 = vmatpush1.bf16.msra.mxu1 %v18353_v20 }
 0xd34   :  { %13679 = vmatprep.subr.bf16.mxu1 %v18358_v22 }
 0xd37   :  { %13680 = vmatpush1.bf16.msra.mxu1 %v18356_v34 }
 0xd38   :  { %13681 = vmatprep.subr.bf16.mxu1 %v18361_v63 }
 0xd3b   :  { %13682 = vmatpush1.bf16.msra.mxu1 %v18359_v41 }
 0xd3c   :  { %13683 = vmatprep.subr.bf16.mxu1 %v18364_v21 }
 0xd3f   :  { %13684 = vmatpush2.bf16.msra.mxu1 %v18362_v27 }
 0xd40   :  { %13685 = vmatprep.subr.bf16.mxu1 %v18367_v56 }
 0xd43   :  { %13686 = vmatpush2.bf16.msra.mxu1 %v18365_v17 }
 0xd44   :  { %13687 = vmatprep.subr.bf16.mxu1 %v18370_v30 }
 0xd47   :  { %13688 = vmatpush2.bf16.msra.mxu1 %v18368_v55 }
 0xd48   :  { %13689 = vmatprep.subr.bf16.mxu1 %v18373_v8 }
 0xd4b   :  { %13690 = vmatpush2.bf16.msra.mxu1 %v18371_v2 }
 0xd4c   :  { %13691 = vmatprep.subr.bf16.mxu1 %v18376_v53 }
 0xd4f   :  { %13692 = vmatpush2.bf16.msra.mxu1 %v18374_v42 }
 0xd50   :  { %13693 = vmatprep.subr.bf16.mxu1 %v18379_v16 }
 0xd53   :  { %13694 = vmatpush2.bf16.msra.mxu1 %v18377_v31 }
 0xd54   :  { %13695 = vmatprep.subr.bf16.mxu1 %v18382_v50 }
 0xd57   :  { %13696 = vmatpush2.bf16.msra.mxu1 %v18380_v13 }
 0xd58   :  { %13697 = vmatprep.subr.bf16.mxu1 %v18385_v24 }
 0xd5b   :  { %13698 = vmatpush2.bf16.msra.mxu1 %v18383_v9 }
 0xd5e   :  { %13700 = vmatmul.mubr.bf16.vlgmr.msra.gmra.mxu1 %v19518_v1  ;;  %v13443_v28 = vpop.f32.mrf.mxu1  ;;  %v11851_v1 = vld [vmem:[#allocation17] sm:$0x3f] }
 0xd5f   :  { %v11860_v7 = vrot.slane %v11851_v1, %v19681_v0  ;;  %v11864_v61 = vrot.slane %v11851_v1, %v18911_v29  ;;  %v11856_v22 = vrot.slane %v11851_v1, %v18870_v37  ;;  %v11868_v56 = vrot.slane %v11851_v1, %v18914_v35 }
 0xd60   :  { %v13486_v6 = vpop.f32.mrf.mxu0  ;;  %v13445_v15 = vpop.f32.mrf.mxu1 }
 0xd61   :  { %v13364_v34 = vadd.f32 %v13363_v58, %v11860_v7  ;;  %v13360_v41 = vadd.f32 %v13359_v62, %v11860_v7  ;;  %v13362_v21 = vadd.f32 %v13361_v4, %v11856_v22  ;;  %v13487_v27 = vadd.f32 %v13486_v6, %v11864_v61 }
 0xd62   :  { %v13488_v40 = vpop.f32.mrf.mxu0  ;;  %v13447_v14 = vpop.f32.mrf.mxu1  ;;  %v13358_v55 = vadd.f32 %v13357_v23, %v11856_v22  ;;  %v11872_v62 = vrot.slane %v11851_v1, %v18942_v36 }
 0xd63   :  { %v13407_v8 = vadd.f32 %v13406_v33, %v13364_v34  ;;  %v13403_v16 = vadd.f32 %v13402_v59, %v13360_v41  ;;  %v13405_v31 = vadd.f32 %v13404_v60, %v13362_v21  ;;  %v13489_v58 = vadd.f32 %v13488_v40, %v11868_v56 }
 0xd64   :  { %v13490_v11 = vpop.f32.mrf.mxu0  ;;  %v13449_v54 = vpop.f32.mrf.mxu1  ;;  %v13401_v9 = vadd.f32 %v13400_v32, %v13358_v55  ;;  %v11876_v60 = vrot.slane %v11851_v1, %v19109_v52 }
 0xd65   :  { %v13491_v17 = vadd.f32 %v13490_v11, %v11864_v61  ;;  %v13450_v50 = vadd.f32 %v13449_v54, %v13407_v8  ;;  %v13446_v4 = vadd.f32 %v13445_v15, %v13403_v16  ;;  %v13448_v6 = vadd.f32 %v13447_v14, %v13405_v31 }
 0xd66   :  { %v13492_v18 = vpop.f32.mrf.mxu0  ;;  %v13444_v23 = vadd.f32 %v13443_v28, %v13401_v9 }
 0xd67   :  { %v13493_v13 = vadd.f32 %v13492_v18, %v11868_v56  ;;  %v13717_v33 = vadd.f32 %v13450_v50, %v19400_v44  ;;  %v13711_v54 = vadd.f32 %v13446_v4, %v19382_v45  ;;  %v13716_v32 = vadd.f32 %v13448_v6, %v19398_v38 }
 0xd69   :  { %v13729_v28 = vadd.f32 %v13717_v33, %v13716_v32 }
 0xd9e   :  { %v13529_v43 = vpop.f32.mrf.mxu1 }
 0xd9f   :  { %v13530_v24 = vadd.f32 %v13529_v43, %v13487_v27 }
 0xda0   :  { %v13531_v49 = vpop.f32.mrf.mxu1  ;;  %v13572_v46 = vpop.f32.mrf.mxu0 }
 0xda1   :  { %v13532_v22 = vadd.f32 %v13531_v49, %v13489_v58 }
 0xda2   :  { %v13533_v26 = vpop.f32.mrf.mxu1  ;;  %v13574_v25 = vpop.f32.mrf.mxu0 }
 0xda3   :  { %v13534_v2 = vadd.f32 %v13533_v26, %v13491_v17  ;;  %v13573_v26 = vadd.f32 %v13572_v46, %v13530_v24  ;;  %v13575_v49 = vadd.f32 %v13574_v25, %v13532_v22 }
 0xda4   :  { %v13535_v10 = vpop.f32.mrf.mxu1  ;;  %v13576_v20 = vpop.f32.mrf.mxu0 }
 0xda5   :  { %v13536_v7 = vadd.f32 %v13535_v10, %v13493_v13  ;;  %v13577_v35 = vadd.f32 %v13576_v20, %v13534_v2  ;;  %v13710_v10 = vadd.f32 %v13444_v23, %v19380_v19  ;;  %v13712_v44 = vadd.f32 %v13573_v26, %v19384_v47 }
 0xda6   :  { %v13578_v30 = vpop.f32.mrf.mxu0  ;;  %v13713_v19 = vadd.f32 %v13575_v49, %v19386_v5 }
 0xda7   :  { %v13718_v40 = vadd.f32 %v13577_v35, %v19402_v3  ;;  %v13579_v15 = vadd.f32 %v13578_v30, %v13536_v7 }
 0xda9   :  { %v13730_v45 = vadd.f32 %v13729_v28, %v13718_v40  ;;  %v13719_v38 = vadd.f32 %v13579_v15, %v19404_v12 }
 0xdab   :  { %v13731_v55 = vadd.f32 %v13730_v45, %v13719_v38 }
 0xdde   :  { %v13615_v63 = vpop.f32.mrf.mxu1 }
 0xddf   :  { %v13616_v59 = vadd.f32 %v13615_v63, %v11872_v62  ;;  %v13722_v63 = vadd.f32 %v13711_v54, %v13710_v10 }
 0xde0   :  { %v13617_v53 = vpop.f32.mrf.mxu1  ;;  %v13658_v42 = vpop.f32.mrf.mxu0 }
 0xde1   :  { %v13618_v20 = vadd.f32 %v13617_v53, %v11876_v60  ;;  %v13659_v34 = vadd.f32 %v13658_v42, %v13616_v59  ;;  %v13723_v27 = vadd.f32 %v13722_v63, %v13712_v44 }
 0xde2   :  { %v13619_v11 = vpop.f32.mrf.mxu1  ;;  %v13660_v61 = vpop.f32.mrf.mxu0 }
 0xde3   :  { %v13620_v43 = vadd.f32 %v13619_v11, %v11872_v62  ;;  %v13661_v17 = vadd.f32 %v13660_v61, %v13618_v20  ;;  %v13724_v12 = vadd.f32 %v13723_v27, %v13713_v19 }
 0xde4   :  { %v13621_v14 = vpop.f32.mrf.mxu1  ;;  %v13662_v18 = vpop.f32.mrf.mxu0 }
 0xde5   :  { %v13622_v1 = vadd.f32 %v13621_v14, %v11876_v60  ;;  %v13663_v3 = vadd.f32 %v13662_v18, %v13620_v43 }
 0xde6   :  { %v13664_v41 = vpop.f32.mrf.mxu0 }
 0xde7   :  { %v13665_v30 = vadd.f32 %v13664_v41, %v13622_v1 }
 0xe1e   :  { %v13701_v46 = vpop.f32.mrf.mxu1 }
 0xe1f   :  { %v13702_v21 = vadd.f32 %v13701_v46, %v13659_v34 }
 0xe20   :  { %v13703_v35 = vpop.f32.mrf.mxu1 }
 0xe21   :  { %v13714_v8 = vadd.f32 %v13702_v21, %v19388_v48  ;;  %v13704_v2 = vadd.f32 %v13703_v35, %v13661_v17 }
 0xe22   :  { %v13705_v56 = vpop.f32.mrf.mxu1 }
 0xe23   :  { %v13706_v47 = vadd.f32 %v13705_v56, %v13663_v3  ;;  %v13725_v50 = vadd.f32 %v13724_v12, %v13714_v8  ;;  %v13715_v13 = vadd.f32 %v13704_v2, %v19390_v51  ;;  %v19682_v2 = vld [vmem:[#allocation40_spill] sm:$0xff] }
 0xe24   :  { %v13707_v25 = vpop.f32.mrf.mxu1 }
 0xe25   :  { %v13720_v53 = vadd.f32 %v13706_v47, %v19406_v39  ;;  %v13708_v42 = vadd.f32 %v13707_v25, %v13665_v30  ;;  %v13726_v5 = vadd.f32 %v13725_v50, %v13715_v13  ;;  %v13794_v30 = vld [vmem:[#allocation19] sm:$0x3f]  ;;  %v13838_v47 = vld [vmem:[#allocation20] sm:$0x3f] }
 0xe26   :  { %v13803_v25 = vrot.slane %v13794_v30, %v19681_v0  ;;  %v13819_v12 = vrot.slane %v13794_v30, %v19109_v52  ;;  %v13847_v50 = vrot.slane %v13838_v47, %v19681_v0 }
 0xe27   :  { %v13721_v16 = vadd.f32 %v13708_v42, %v19408_v57  ;;  %v13732_v31 = vadd.f32 %v13731_v55, %v13720_v53  ;;  %v13799_v55 = vrot.slane %v13794_v30, %v18870_v37  ;;  %v13815_v42 = vrot.slane %v13794_v30, %v18942_v36 }
 0xe29   :  { %v13733_v24 = vadd.f32 %v13732_v31, %v13721_v16 }
 0xe2b   :  { %13734 = vadd.xlane.f32.xlu0 %v13733_v24  ;;  %v13855_v24 = vrot.slane %v13838_v47, %v19682_v2 }
 0xe2f   :  { %13727 = vadd.xlane.f32.xlu0 %v13726_v5  ;;  %v13859_v5 = vrot.slane %v13838_v47, %v18942_v36 }
 0xeb4   :  { %v13735_v9 = vpop.xlane.xlu0 %13734 }
 0xeb5   :  { %v13737_v58 = vmul.f32 0.0013020834, %v13735_v9  ;;  %v19577_v9 = vld [vmem:[#allocation22] sm:$0x3f] }
 0xeb7   :  { %v13744_v62 = vsub.f32 %v13716_v32, %v13737_v58  ;;  %v13745_v4 = vsub.f32 %v13717_v33, %v13737_v58  ;;  %v13746_v48 = vsub.f32 %v13718_v40, %v13737_v58  ;;  %v13747_v7 = vsub.f32 %v13719_v38, %v13737_v58 }
 0xeb8   :  { %v13728_v6 = vpop.xlane.xlu0 %13727  ;;  %v13748_v23 = vsub.f32 %v13720_v53, %v13737_v58  ;;  %v13749_v60 = vsub.f32 %v13721_v16, %v13737_v58  ;;  %v13811_v53 = vrot.slane %v13794_v30, %v19682_v2  ;;  %v13843_v16 = vrot.slane %v13838_v47, %v18870_v37 }
 0xeb9   :  { %v13736_v39 = vmul.f32 0.0013020834, %v13728_v6  ;;  %v13756_v11 = vmul.f32 %v13744_v62, %v13744_v62  ;;  %v13757_v61 = vmul.f32 %v13745_v4, %v13745_v4  ;;  %v13758_v57 = vmul.f32 %v13746_v48, %v13746_v48 }
 0xeba   :  { %v13759_v15 = vmul.f32 %v13747_v7, %v13747_v7  ;;  %v13760_v18 = vmul.f32 %v13748_v23, %v13748_v23 }
 0xebb   :  { %v13769_v26 = vadd.f32 %v13757_v61, %v13756_v11  ;;  %v19550_v22 = vsub.f32 %v13710_v10, %v13736_v39  ;;  %v19552_v51 = vsub.f32 %v13711_v54, %v13736_v39  ;;  %v19554_v59 = vsub.f32 %v13712_v44, %v13736_v39 }
 0xebc   :  { %v19556_v32 = vsub.f32 %v13713_v19, %v13736_v39  ;;  %v13742_v28 = vsub.f32 %v13714_v8, %v13736_v39  ;;  %v13761_v44 = vmul.f32 %v13749_v60, %v13749_v60  ;;  %v13743_v49 = vsub.f32 %v13715_v13, %v13736_v39 }
 0xebd   :  { %v13770_v14 = vadd.f32 %v13769_v26, %v13758_v57  ;;  %v13750_v33 = vmul.f32 %v19550_v22, %v19550_v22  ;;  %v13751_v40 = vmul.f32 %v19552_v51, %v19552_v51  ;;  %v13752_v54 = vmul.f32 %v19554_v59, %v19554_v59 }
 0xebe   :  { %v13753_v20 = vmul.f32 %v19556_v32, %v19556_v32  ;;  %v13754_v63 = vmul.f32 %v13742_v28, %v13742_v28  ;;  %v13755_v38 = vmul.f32 %v13743_v49, %v13743_v49  ;;  %v13807_v8 = vrot.slane %v13794_v30, %v18911_v29 }
 0xebf   :  { %v13771_v43 = vadd.f32 %v13770_v14, %v13759_v15  ;;  %v13762_v10 = vadd.f32 %v13751_v40, %v13750_v33  ;;  %v13851_v13 = vrot.slane %v13838_v47, %v18911_v29  ;;  %v13863_v26 = vrot.slane %v13838_v47, %v19109_v52 }
 0xec0   :  { %v13912_v33 = vrot.slane %v19577_v9, %v18870_v37  ;;  %v13916_v40 = vrot.slane %v19577_v9, %v19681_v0  ;;  %v13924_v47 = vrot.slane %v19577_v9, %v19682_v2  ;;  %v13932_v2 = vrot.slane %v19577_v9, %v19109_v52 }
 0xec1   :  { %v13772_v46 = vadd.f32 %v13771_v43, %v13760_v18  ;;  %v13763_v34 = vadd.f32 %v13762_v10, %v13752_v54 }
 0xec3   :  { %v13773_v1 = vadd.f32 %v13772_v46, %v13761_v44  ;;  %v13764_v45 = vadd.f32 %v13763_v34, %v13753_v20 }
 0xec5   :  { %13774 = vadd.xlane.f32.xlu1 %v13773_v1  ;;  %v13765_v41 = vadd.f32 %v13764_v45, %v13754_v63 }
 0xec7   :  { %v13766_v35 = vadd.f32 %v13765_v41, %v13755_v38 }
 0xec9   :  { %13767 = vadd.xlane.f32.xlu1 %v13766_v35 }
 0xf4e   :  { %v13775_v3 = vpop.xlane.xlu1 %13774 }
 0xf4f   :  { %v13777_v21 = vmul.f32 0.0013020834, %v13775_v3 }
 0xf51   :  { %v13779_v27 = vadd.f32 1e-12, %v13777_v21 }
 0xf52   :  { %v13768_v56 = vpop.xlane.xlu1 %13767 }
 0xf53   :  { %18386 = vrsqrt.f32 %v13779_v27  ;;  %v13776_v19 = vmul.f32 0.0013020834, %v13768_v56 }
 0xf55   :  { %v13778_v17 = vadd.f32 1e-12, %v13776_v19 }
 0xf57   :  { %18388 = vrsqrt.f32 %v13778_v17 }
 0xf60   :  { %v18387_v31 = vpop.eup %18386 }
 0xf61   :  { %v13788_v58 = vmul.f32 %v18387_v31, %v13744_v62  ;;  %v13789_v6 = vmul.f32 %v18387_v31, %v13745_v4  ;;  %v13790_v39 = vmul.f32 %v18387_v31, %v13746_v48  ;;  %v13791_v11 = vmul.f32 %v18387_v31, %v13747_v7 }
 0xf62   :  { %v13792_v61 = vmul.f32 %v18387_v31, %v13748_v23  ;;  %v13793_v57 = vmul.f32 %v18387_v31, %v13749_v60 }
 0xf63   :  { %v13832_v15 = vmul.f32 %v13799_v55, %v13788_v58  ;;  %v13833_v14 = vmul.f32 %v13803_v25, %v13789_v6  ;;  %v13834_v43 = vmul.f32 %v13807_v8, %v13790_v39  ;;  %v13835_v54 = vmul.f32 %v13811_v53, %v13791_v11 }
 0xf64   :  { %v18389_v18 = vpop.eup %18388  ;;  %v13836_v62 = vmul.f32 %v13815_v42, %v13792_v61  ;;  %v13837_v4 = vmul.f32 %v13819_v12, %v13793_v57 }
 0xf65   :  { %v13782_v48 = vmul.f32 %v18389_v18, %v19550_v22  ;;  %v13783_v7 = vmul.f32 %v18389_v18, %v19552_v51  ;;  %v13784_v23 = vmul.f32 %v18389_v18, %v19554_v59  ;;  %v13785_v60 = vmul.f32 %v18389_v18, %v19556_v32 }
 0xf66   :  { %v13786_v10 = vmul.f32 %v18389_v18, %v13742_v28  ;;  %v13787_v44 = vmul.f32 %v18389_v18, %v13743_v49  ;;  %v13876_v46 = vadd.f32 %v13843_v16, %v13832_v15  ;;  %v13877_v37 = vadd.f32 %v13847_v50, %v13833_v14 }
 0xf67   :  { %v13826_v20 = vmul.f32 %v13799_v55, %v13782_v48  ;;  %v13827_v34 = vmul.f32 %v13803_v25, %v13783_v7  ;;  %v13828_v0 = vmul.f32 %v13807_v8, %v13784_v23  ;;  %v13829_v1 = vmul.f32 %v13811_v53, %v13785_v60 }
 0xf68   :  { %v13830_v63 = vmul.f32 %v13815_v42, %v13786_v10  ;;  %v13831_v45 = vmul.f32 %v13819_v12, %v13787_v44  ;;  %v13878_v38 = vadd.f32 %v13851_v13, %v13834_v43  ;;  %v13879_v41 = vadd.f32 %v13855_v24, %v13835_v54 }
 0xf69   :  { %v13870_v35 = vadd.f32 %v13843_v16, %v13826_v20  ;;  %v13871_v22 = vadd.f32 %v13847_v50, %v13827_v34  ;;  %v13872_v3 = vadd.f32 %v13851_v13, %v13828_v0  ;;  %v13873_v51 = vadd.f32 %v13855_v24, %v13829_v1 }
 0xf6a   :  { %v13874_v21 = vadd.f32 %v13859_v5, %v13830_v63  ;;  %v13880_v59 = vadd.f32 %v13859_v5, %v13836_v62  ;;  %v13881_v27 = vadd.f32 %v13863_v26, %v13837_v4  ;;  %v13920_v32 = vrot.slane %v19577_v9, %v18911_v29 }
 0xf6b   :  { %v13888_v28 = vrot.slane %v13876_v46, 7  ;;  %v13889_v49 = vrot.slane %v13877_v37, 7  ;;  %v13890_v56 = vrot.slane %v13878_v38, 7  ;;  %v13891_v19 = vrot.slane %v13879_v41, 7 }
 0xf6c   :  { %v13875_v17 = vadd.f32 %v13863_v26, %v13831_v45  ;;  %v13892_v30 = vrot.slane %v13880_v59, 7  ;;  %v13928_v29 = vrot.slane %v19577_v9, %v18942_v36  ;;  %v13893_v16 = vrot.slane %v13881_v27, 7 }
 0xf6d   :  { %v13901_v55 = vsel %vm13900_vm1, %v13870_v35, %v13888_v28  ;;  %v13902_v25 = vsel %vm13900_vm1, %v13871_v22, %v13889_v49  ;;  %v13903_v8 = vsel %vm13900_vm1, %v13872_v3, %v13890_v56  ;;  %v13904_v53 = vsel %vm13900_vm1, %v13873_v51, %v13891_v19 }
 0xf6e   :  { %v13939_v42 = vmul.f32 %v13912_v33, %v13901_v55  ;;  %v13940_v12 = vmul.f32 %v13916_v40, %v13902_v25  ;;  %v13905_v31 = vsel %vm13900_vm1, %v13874_v21, %v13892_v30  ;;  %v13941_v50 = vmul.f32 %v13920_v32, %v13903_v8  ;;  %v15723_v33 = vld [vmem:[#allocation5] ss:$0 sm:$0xff] }
 0xf6f   :  { %v13942_v13 = vmul.f32 %v13924_v47, %v13904_v53  ;;  %v13906_v58 = vsel %vm13900_vm1, %v13875_v17, %v13893_v16  ;;  %v13943_v39 = vmul.f32 %v13928_v29, %v13905_v31 }
 0xf70   :  { %v13946_v24 = vsel %vm13945_vm2, %v13939_v42, 0.0  ;;  %v13947_v5 = vsel %vm13945_vm2, %v13940_v12, 0.0  ;;  %v13949_v36 = vsel %vm13945_vm2, %v13941_v50, 0.0  ;;  %v13944_v61 = vmul.f32 %v13932_v2, %v13906_v58 }
 0xf71   :  { %v13948_v6 = vadd.f32 %v13947_v5, %v13946_v24  ;;  %v13951_v57 = vsel %vm13945_vm2, %v13942_v13, 0.0  ;;  %v13953_v15 = vsel %vm13945_vm2, %v13943_v39, 0.0 }
 0xf72   :  { %v13955_v52 = vsel %vm13945_vm2, %v13944_v61, 0.0 }
 0xf73   :  { %v13950_v11 = vadd.f32 %v13949_v36, %v13948_v6 }
 0xf75   :  { %v13952_v26 = vadd.f32 %v13951_v57, %v13950_v11 }
 0xf77   :  { %v13954_v14 = vadd.f32 %v13953_v15, %v13952_v26 }
 0xf79   :  { %v13956_v9 = vadd.f32 %v13955_v52, %v13954_v14 }
 0xf7b   :  { %13957 = vadd.xlane.f32.xlu0 %v13956_v9 }
0x1004   :  { %v13958_v40 = vpop.xlane.xlu0 %13957 }
0x1005   :  { %v13966_v18 = vadd.f32 %v15723_v33, %v13958_v40 }
0x1007   :  { %13968 = vst.msk [vmem:[%s19627_s16] sm:$0x3] %vm13967_vm3, %v13966_v18 }
0x1008   :  { %13973 = vsyncpa [#allocation7], 1 }
0x1009   :  { %13974 = vsyncpa [#allocation9], 1 }
0x100a   :  { %13975 = vsyncpa [#allocation12], 1 }
0x100b   :  { %13976 = vsyncpa [#allocation15], 1 }
0x100c   :  { %13977 = vsyncpa [#allocation18], 1 }
0x100d   :  { %13978 = vsyncpa [#allocation21], 1 }
0x100e   :  { %13979 = vsyncmov [#allocation4] }
0x1011   :  { %s13980_s24 = vpop.sfrf %13979 }
0x1012   :  { %p15724_p9 = scmp.ne.s32.totalorder %s13980_s24, 0 }
0x1014   :  { %13984 = shalt.err (%p15724_p9)  }
0x1015   :  { %13986 = vsyncmov [#allocation4 + $0x1] }
0x1018   :  { %s13987_s2 = vpop.sfrf %13986 }
0x1019   :  { %p15725_p10 = scmp.ne.s32.totalorder %s13987_s2, 0 }
0x101b   :  { %13991 = shalt.err (%p15725_p10)  }

</bundles_post_ra>
